<compile_context>
chip_gen: v6e
topology: v6e:2x2x1
jax: 0.10.0
libtpu: 0.0.40
codegen_flags: <defaults>
</compile_context>

<pallas_src>
import functools

import jax
import jax.numpy as jnp
from jax.experimental import pallas as pl
from jax.experimental.pallas import tpu as pltpu


DILATIONS = (1, 3, 5)
DMAX = max(DILATIONS)  # padding of the shared in-kernel working buffer


# --------------------------------------------------------------------------
# Fused Pallas kernel: 3 dilated 3x3 convs + concat + 1x1 fuse, one image.
# --------------------------------------------------------------------------
def _dblock2_kernel(x_ref, w1_ref, b1_ref, w2_ref, b2_ref, w3_ref, b3_ref,
                    wf_ref, bf_ref, o_ref, pad_ref, patch_ref, cat_ref,
                    *, H, W, C, Cout):
    """Shapes (per grid step = one image):
      x_ref:    (1, H, W, C)              input image (NHWC slice)
      w{1,2,3}: (9C, C) bf16              3x3 weights, row = (ky*3+kx)*C + cin
      b{1,2,3}: (1, C)  f32
      wf_ref:   (4C, Cout) bf16           1x1 fuse weight
      bf_ref:   (1, Cout) f32
      o_ref:    (1, H*W, Cout)            fused output (row p = h*W + w)
      pad_ref:  (H+2*DMAX, W+2*DMAX, C)   zero-padded working image (scratch)
      patch_ref:(H*W, 9C)                 im2col patch matrix (scratch)
      cat_ref:  (H*W, 4C)                 implicit channel concat (scratch)
    """
    HW = H * W

    # Zero the padded working buffer; only its interior is rewritten below,
    # so the zero border (width DMAX >= every dilation) stays valid.
    pad_ref[...] = jnp.zeros_like(pad_ref)

    def set_interior(img_hwc):
        pad_ref[DMAX:DMAX + H, DMAX:DMAX + W, :] = img_hwc

    def conv_stage(w_ref, b_ref, d):
        # im2col: gather the 9 dilated taps into the (HW, 9C) patch matrix.
        for ky in range(3):
            for kx in range(3):
                oy = DMAX - d + ky * d
                ox = DMAX - d + kx * d
                tap = ky * 3 + kx
                patch_ref[:, tap * C:(tap + 1) * C] = (
                    pad_ref[oy:oy + H, ox:ox + W, :].reshape(HW, C))
        # Single MXU matmul per conv stage (bf16 operands, f32 accumulate).
        y = jnp.dot(patch_ref[...].astype(jnp.bfloat16), w_ref[...],
                    preferred_element_type=jnp.float32)          # (HW, C)
        return y + b_ref[0][None, :]

    x = x_ref[0]                                                  # (H, W, C)
    set_interior(x)
    cat_ref[:, 0:C] = x.reshape(HW, C)

    d1 = conv_stage(w1_ref, b1_ref, DILATIONS[0])
    cat_ref[:, C:2 * C] = d1
    set_interior(d1.reshape(H, W, C))

    d2 = conv_stage(w2_ref, b2_ref, DILATIONS[1])
    cat_ref[:, 2 * C:3 * C] = d2
    set_interior(d2.reshape(H, W, C))

    d3 = conv_stage(w3_ref, b3_ref, DILATIONS[2])
    cat_ref[:, 3 * C:4 * C] = d3

    # 1x1 fuse over the implicit concat [x, d1, d2, d3].
    out = jnp.dot(cat_ref[...].astype(jnp.bfloat16), wf_ref[...],
                  preferred_element_type=jnp.float32)             # (HW, Cout)
    out = out + bf_ref[0][None, :]
    o_ref[...] = out[None].astype(o_ref.dtype)


# --------------------------------------------------------------------------
# Wrapper (layout glue only: NCHW<->NHWC transpose, weight reshape/cast)
# --------------------------------------------------------------------------
def dblock2_forward(x_nchw, params):
    """Dblock2 forward. Input/output NCHW to mirror PyTorch semantics."""
    N, C, H, W = x_nchw.shape
    Cout = params["bf"].shape[0]
    HW = H * W

    x_nhwc = jnp.transpose(x_nchw, (0, 2, 3, 1))  # glue

    # Kernel-layout weights (glue): HWIO (3,3,C,C) -> (9C, C), cast to bf16.
    def w_im2col(w_hwio):
        return w_hwio.reshape(9 * C, C).astype(jnp.bfloat16)

    w1 = w_im2col(params["w1"])
    w2 = w_im2col(params["w2"])
    w3 = w_im2col(params["w3"])
    wf = params["wf"].astype(jnp.bfloat16)          # (4C, Cout)
    b1 = params["b1"].reshape(1, C).astype(jnp.float32)
    b2 = params["b2"].reshape(1, C).astype(jnp.float32)
    b3 = params["b3"].reshape(1, C).astype(jnp.float32)
    bf = params["bf"].reshape(1, Cout).astype(jnp.float32)

    kernel = functools.partial(_dblock2_kernel, H=H, W=W, C=C, Cout=Cout)

    out_flat = pl.pallas_call(
        kernel,
        out_shape=jax.ShapeDtypeStruct((N, HW, Cout), x_nchw.dtype),
        grid_spec=pltpu.PrefetchScalarGridSpec(
            num_scalar_prefetch=0,
            grid=(N,),
            in_specs=[
                pl.BlockSpec((1, H, W, C), lambda n: (n, 0, 0, 0)),
                pl.BlockSpec((9 * C, C), lambda n: (0, 0)),
                pl.BlockSpec((1, C), lambda n: (0, 0)),
                pl.BlockSpec((9 * C, C), lambda n: (0, 0)),
                pl.BlockSpec((1, C), lambda n: (0, 0)),
                pl.BlockSpec((9 * C, C), lambda n: (0, 0)),
                pl.BlockSpec((1, C), lambda n: (0, 0)),
                pl.BlockSpec((4 * C, Cout), lambda n: (0, 0)),
                pl.BlockSpec((1, Cout), lambda n: (0, 0)),
            ],
            out_specs=pl.BlockSpec((1, HW, Cout), lambda n: (n, 0, 0)),
            scratch_shapes=[
                pltpu.VMEM((H + 2 * DMAX, W + 2 * DMAX, C), jnp.float32),
                pltpu.VMEM((HW, 9 * C), jnp.float32),
                pltpu.VMEM((HW, 4 * C), jnp.float32),
            ],
        ),
        compiler_params=pltpu.CompilerParams(
            dimension_semantics=("parallel",)),  # batch -> 2 TCs on v7x
    )(x_nhwc, w1, b1, w2, b2, w3, b3, wf, bf)

    # (N, H*W, Cout) -> NCHW (glue)
    return jnp.transpose(out_flat.reshape(N, H, W, Cout), (0, 3, 1, 2))


def init_params(key, channel, outchannel, dtype=jnp.float32):
    """Deterministic synthetic init; biases zeroed (as in the module's __init__)."""
    k1, k2, k3, k4 = jax.random.split(key, 4)

    def w3x3(k):
        fan_in = channel * 9
        return (jax.random.normal(k, (3, 3, channel, channel), dtype)
                * (1.0 / fan_in) ** 0.5)

    wf_fan_in = channel * 4
    return {
        "w1": w3x3(k1), "b1": jnp.zeros((channel,), dtype),
        "w2": w3x3(k2), "b2": jnp.zeros((channel,), dtype),
        "w3": w3x3(k3), "b3": jnp.zeros((channel,), dtype),
        "wf": (jax.random.normal(k4, (channel * 4, outchannel), dtype)
               * (1.0 / wf_fan_in) ** 0.5),
        "bf": jnp.zeros((outchannel,), dtype),
    }


# --------------------------------------------------------------------------
# Pure-JAX reference (f32, HIGHEST precision) for correctness check
# --------------------------------------------------------------------------
def _ref_conv(x_nhwc, w_hwio, b, dilation):
    y = jax.lax.conv_general_dilated(
        x_nhwc, w_hwio,
        window_strides=(1, 1),
        padding=[(dilation, dilation), (dilation, dilation)],
        rhs_dilation=(dilation, dilation),
        dimension_numbers=("NHWC", "HWIO", "NHWC"),
        precision=jax.lax.Precision.HIGHEST,
    )
    return y + b[None, None, None, :]


def dblock2_reference(x_nchw, params):
    x = jnp.transpose(x_nchw, (0, 2, 3, 1))
    d1 = _ref_conv(x, params["w1"], params["b1"], 1)
    d2 = _ref_conv(d1, params["w2"], params["b2"], 3)
    d3 = _ref_conv(d2, params["w3"], params["b3"], 5)
    cat = jnp.concatenate([x, d1, d2, d3], axis=-1)
    out = jnp.einsum("nhwc,cd->nhwd", cat, params["wf"],
                     precision=jax.lax.Precision.HIGHEST) + params["bf"]
    return jnp.transpose(out, (0, 3, 1, 2))


# --------------------------------------------------------------------------
# Main
# --------------------------------------------------------------------------
if __name__ == "__main__":
    N, C, H, W = 2, 4, 16, 16
    OUTC = 8

    key = jax.random.PRNGKey(0)
    kx, kp = jax.random.split(key)
    x = jax.random.normal(kx, (N, C, H, W), jnp.float32)
    params = init_params(kp, C, OUTC)

    out = dblock2_forward(x, params)
    out = jax.block_until_ready(out)

    ref = jax.block_until_ready(dblock2_reference(x, params))
    assert out.shape == (N, OUTC, H, W), out.shape
    # bf16-operand MXU matmuls (per the perf review) vs. f32 HIGHEST reference:
    # use bf16-class tolerance.
    assert jnp.allclose(out, ref, atol=5e-2, rtol=5e-2), (
        float(jnp.max(jnp.abs(out - ref))))

    print("KERNEL_OK")
</pallas_src>

<mosaic_0001>
module attributes {stable_mosaic.version = 11 : i64} {
  func.func @_dblock2_kernel(%arg0: i32, %arg1: memref<1x16x16x4xf32, #tpu.memory_space<vmem>>, %arg2: memref<36x4xbf16, #tpu.memory_space<vmem>>, %arg3: memref<1x4xf32, #tpu.memory_space<vmem>>, %arg4: memref<36x4xbf16, #tpu.memory_space<vmem>>, %arg5: memref<1x4xf32, #tpu.memory_space<vmem>>, %arg6: memref<36x4xbf16, #tpu.memory_space<vmem>>, %arg7: memref<1x4xf32, #tpu.memory_space<vmem>>, %arg8: memref<16x8xbf16, #tpu.memory_space<vmem>>, %arg9: memref<1x8xf32, #tpu.memory_space<vmem>>, %arg10: memref<1x256x8xf32, #tpu.memory_space<vmem>>, %arg11: memref<26x26x4xf32, #tpu.memory_space<vmem>>, %arg12: memref<256x36xf32, #tpu.memory_space<vmem>>, %arg13: memref<256x16xf32, #tpu.memory_space<vmem>>) attributes {dimension_semantics = [#tpu.dimension_semantics<parallel>], iteration_bounds = array<i64: 2>, scalar_prefetch = 0 : i64, scratch_operands = 3 : i64, tpu.core_type = #tpu.core_type<tc>, window_params = [{transform_indices = @transform_0, window_bounds = array<i64: 1, 16, 16, 4>}, {pipeline_mode = #tpu.pipeline_mode<synchronous>, transform_indices = @transform_1, window_bounds = array<i64: 36, 4>}, {pipeline_mode = #tpu.pipeline_mode<synchronous>, transform_indices = @transform_2, window_bounds = array<i64: 1, 4>}, {pipeline_mode = #tpu.pipeline_mode<synchronous>, transform_indices = @transform_3, window_bounds = array<i64: 36, 4>}, {pipeline_mode = #tpu.pipeline_mode<synchronous>, transform_indices = @transform_4, window_bounds = array<i64: 1, 4>}, {pipeline_mode = #tpu.pipeline_mode<synchronous>, transform_indices = @transform_5, window_bounds = array<i64: 36, 4>}, {pipeline_mode = #tpu.pipeline_mode<synchronous>, transform_indices = @transform_6, window_bounds = array<i64: 1, 4>}, {pipeline_mode = #tpu.pipeline_mode<synchronous>, transform_indices = @transform_7, window_bounds = array<i64: 16, 8>}, {pipeline_mode = #tpu.pipeline_mode<synchronous>, transform_indices = @transform_8, window_bounds = array<i64: 1, 8>}, {transform_indices = @transform_9, window_bounds = array<i64: 1, 256, 8>}]} {
    %cst = arith.constant 0.000000e+00 : f32
    %0 = vector.broadcast %cst : f32 to vector<26x26x4xf32>
    %c0 = arith.constant 0 : index
    %c0_0 = arith.constant 0 : index
    %c0_1 = arith.constant 0 : index
    %1 = vector.load %arg11[%c0, %c0_0, %c0_1] : memref<26x26x4xf32, #tpu.memory_space<vmem>>, vector<26x26x4xf32>
    tpu.vector_store %arg11[%c0, %c0_0, %c0_1], %0 {strides = array<i32>} : memref<26x26x4xf32, #tpu.memory_space<vmem>>, vector<26x26x4xf32>,
    %c0_2 = arith.constant 0 : index
    %c0_3 = arith.constant 0 : index
    %c0_4 = arith.constant 0 : index
    %c0_5 = arith.constant 0 : index
    %2 = vector.load %arg1[%c0_2, %c0_3, %c0_4, %c0_5] : memref<1x16x16x4xf32, #tpu.memory_space<vmem>>, vector<1x16x16x4xf32>
    %3 = vector.shape_cast %2 : vector<1x16x16x4xf32> to vector<16x16x4xf32>
    %c5 = arith.constant 5 : index
    %c5_6 = arith.constant 5 : index
    %c0_7 = arith.constant 0 : index
    %4 = vector.load %arg11[%c5, %c5_6, %c0_7] : memref<26x26x4xf32, #tpu.memory_space<vmem>>, vector<16x16x4xf32>
    tpu.vector_store %arg11[%c5, %c5_6, %c0_7], %3 {strides = array<i32>} : memref<26x26x4xf32, #tpu.memory_space<vmem>>, vector<16x16x4xf32>,
    %5 = vector.shape_cast %3 : vector<16x16x4xf32> to vector<256x4xf32>
    %c0_8 = arith.constant 0 : index
    %c0_9 = arith.constant 0 : index
    %6 = vector.load %arg13[%c0_8, %c0_9] : memref<256x16xf32, #tpu.memory_space<vmem>>, vector<256x4xf32>
    tpu.vector_store %arg13[%c0_8, %c0_9], %5 {strides = array<i32>} : memref<256x16xf32, #tpu.memory_space<vmem>>, vector<256x4xf32>,
    %c4 = arith.constant 4 : index
    %c4_10 = arith.constant 4 : index
    %c0_11 = arith.constant 0 : index
    %7 = vector.load %arg11[%c4, %c4_10, %c0_11] : memref<26x26x4xf32, #tpu.memory_space<vmem>>, vector<16x16x4xf32>
    %8 = vector.shape_cast %7 : vector<16x16x4xf32> to vector<256x4xf32>
    %c0_12 = arith.constant 0 : index
    %c0_13 = arith.constant 0 : index
    %9 = vector.load %arg12[%c0_12, %c0_13] : memref<256x36xf32, #tpu.memory_space<vmem>>, vector<256x4xf32>
    tpu.vector_store %arg12[%c0_12, %c0_13], %8 {strides = array<i32>} : memref<256x36xf32, #tpu.memory_space<vmem>>, vector<256x4xf32>,
    %c4_14 = arith.constant 4 : index
    %c5_15 = arith.constant 5 : index
    %c0_16 = arith.constant 0 : index
    %10 = vector.load %arg11[%c4_14, %c5_15, %c0_16] : memref<26x26x4xf32, #tpu.memory_space<vmem>>, vector<16x16x4xf32>
    %11 = vector.shape_cast %10 : vector<16x16x4xf32> to vector<256x4xf32>
    %c0_17 = arith.constant 0 : index
    %c4_18 = arith.constant 4 : index
    %12 = vector.load %arg12[%c0_17, %c4_18] : memref<256x36xf32, #tpu.memory_space<vmem>>, vector<256x4xf32>
    tpu.vector_store %arg12[%c0_17, %c4_18], %11 {strides = array<i32>} : memref<256x36xf32, #tpu.memory_space<vmem>>, vector<256x4xf32>,
    %c4_19 = arith.constant 4 : index
    %c6 = arith.constant 6 : index
    %c0_20 = arith.constant 0 : index
    %13 = vector.load %arg11[%c4_19, %c6, %c0_20] : memref<26x26x4xf32, #tpu.memory_space<vmem>>, vector<16x16x4xf32>
    %14 = vector.shape_cast %13 : vector<16x16x4xf32> to vector<256x4xf32>
    %c0_21 = arith.constant 0 : index
    %c8 = arith.constant 8 : index
    %15 = vector.load %arg12[%c0_21, %c8] : memref<256x36xf32, #tpu.memory_space<vmem>>, vector<256x4xf32>
    tpu.vector_store %arg12[%c0_21, %c8], %14 {strides = array<i32>} : memref<256x36xf32, #tpu.memory_space<vmem>>, vector<256x4xf32>,
    %c5_22 = arith.constant 5 : index
    %c4_23 = arith.constant 4 : index
    %c0_24 = arith.constant 0 : index
    %16 = vector.load %arg11[%c5_22, %c4_23, %c0_24] : memref<26x26x4xf32, #tpu.memory_space<vmem>>, vector<16x16x4xf32>
    %17 = vector.shape_cast %16 : vector<16x16x4xf32> to vector<256x4xf32>
    %c0_25 = arith.constant 0 : index
    %c12 = arith.constant 12 : index
    %18 = vector.load %arg12[%c0_25, %c12] : memref<256x36xf32, #tpu.memory_space<vmem>>, vector<256x4xf32>
    tpu.vector_store %arg12[%c0_25, %c12], %17 {strides = array<i32>} : memref<256x36xf32, #tpu.memory_space<vmem>>, vector<256x4xf32>,
    %c5_26 = arith.constant 5 : index
    %c5_27 = arith.constant 5 : index
    %c0_28 = arith.constant 0 : index
    %19 = vector.load %arg11[%c5_26, %c5_27, %c0_28] : memref<26x26x4xf32, #tpu.memory_space<vmem>>, vector<16x16x4xf32>
    %20 = vector.shape_cast %19 : vector<16x16x4xf32> to vector<256x4xf32>
    %c0_29 = arith.constant 0 : index
    %c16 = arith.constant 16 : index
    %21 = vector.load %arg12[%c0_29, %c16] : memref<256x36xf32, #tpu.memory_space<vmem>>, vector<256x4xf32>
    tpu.vector_store %arg12[%c0_29, %c16], %20 {strides = array<i32>} : memref<256x36xf32, #tpu.memory_space<vmem>>, vector<256x4xf32>,
    %c5_30 = arith.constant 5 : index
    %c6_31 = arith.constant 6 : index
    %c0_32 = arith.constant 0 : index
    %22 = vector.load %arg11[%c5_30, %c6_31, %c0_32] : memref<26x26x4xf32, #tpu.memory_space<vmem>>, vector<16x16x4xf32>
    %23 = vector.shape_cast %22 : vector<16x16x4xf32> to vector<256x4xf32>
    %c0_33 = arith.constant 0 : index
    %c20 = arith.constant 20 : index
    %24 = vector.load %arg12[%c0_33, %c20] : memref<256x36xf32, #tpu.memory_space<vmem>>, vector<256x4xf32>
    tpu.vector_store %arg12[%c0_33, %c20], %23 {strides = array<i32>} : memref<256x36xf32, #tpu.memory_space<vmem>>, vector<256x4xf32>,
    %c6_34 = arith.constant 6 : index
    %c4_35 = arith.constant 4 : index
    %c0_36 = arith.constant 0 : index
    %25 = vector.load %arg11[%c6_34, %c4_35, %c0_36] : memref<26x26x4xf32, #tpu.memory_space<vmem>>, vector<16x16x4xf32>
    %26 = vector.shape_cast %25 : vector<16x16x4xf32> to vector<256x4xf32>
    %c0_37 = arith.constant 0 : index
    %c24 = arith.constant 24 : index
    %27 = vector.load %arg12[%c0_37, %c24] : memref<256x36xf32, #tpu.memory_space<vmem>>, vector<256x4xf32>
    tpu.vector_store %arg12[%c0_37, %c24], %26 {strides = array<i32>} : memref<256x36xf32, #tpu.memory_space<vmem>>, vector<256x4xf32>,
    %c6_38 = arith.constant 6 : index
    %c5_39 = arith.constant 5 : index
    %c0_40 = arith.constant 0 : index
    %28 = vector.load %arg11[%c6_38, %c5_39, %c0_40] : memref<26x26x4xf32, #tpu.memory_space<vmem>>, vector<16x16x4xf32>
    %29 = vector.shape_cast %28 : vector<16x16x4xf32> to vector<256x4xf32>
    %c0_41 = arith.constant 0 : index
    %c28 = arith.constant 28 : index
    %30 = vector.load %arg12[%c0_41, %c28] : memref<256x36xf32, #tpu.memory_space<vmem>>, vector<256x4xf32>
    tpu.vector_store %arg12[%c0_41, %c28], %29 {strides = array<i32>} : memref<256x36xf32, #tpu.memory_space<vmem>>, vector<256x4xf32>,
    %c6_42 = arith.constant 6 : index
    %c6_43 = arith.constant 6 : index
    %c0_44 = arith.constant 0 : index
    %31 = vector.load %arg11[%c6_42, %c6_43, %c0_44] : memref<26x26x4xf32, #tpu.memory_space<vmem>>, vector<16x16x4xf32>
    %32 = vector.shape_cast %31 : vector<16x16x4xf32> to vector<256x4xf32>
    %c0_45 = arith.constant 0 : index
    %c32 = arith.constant 32 : index
    %33 = vector.load %arg12[%c0_45, %c32] : memref<256x36xf32, #tpu.memory_space<vmem>>, vector<256x4xf32>
    tpu.vector_store %arg12[%c0_45, %c32], %32 {strides = array<i32>} : memref<256x36xf32, #tpu.memory_space<vmem>>, vector<256x4xf32>,
    %c0_46 = arith.constant 0 : index
    %c0_47 = arith.constant 0 : index
    %34 = vector.load %arg12[%c0_46, %c0_47] : memref<256x36xf32, #tpu.memory_space<vmem>>, vector<256x36xf32>
    %35 = arith.truncf %34 : vector<256x36xf32> to vector<256x36xbf16>
    %c0_48 = arith.constant 0 : index
    %c0_49 = arith.constant 0 : index
    %36 = vector.load %arg2[%c0_48, %c0_49] : memref<36x4xbf16, #tpu.memory_space<vmem>>, vector<36x4xbf16>
    %cst_50 = arith.constant dense<0.000000e+00> : vector<256x4xf32>
    %37 = tpu.matmul %35, %36, %cst_50 {dimension_numbers = #tpu.dot_dimension_numbers<[1], [0], [0], [1], [0, 0, 1, 1], [], []>} : vector<256x36xbf16>, vector<36x4xbf16>, vector<256x4xf32> -> vector<256x4xf32>
    %c0_51 = arith.constant 0 : index
    %c0_52 = arith.constant 0 : index
    %38 = vector.load %arg3[%c0_51, %c0_52] : memref<1x4xf32, #tpu.memory_space<vmem>>, vector<1x4xf32>
    %39 = vector.shape_cast %38 : vector<1x4xf32> to vector<4xf32>
    %40 = vector.shape_cast %39 : vector<4xf32> to vector<1x4xf32>
    %41 = vector.broadcast %40 : vector<1x4xf32> to vector<256x4xf32>
    %42 = arith.addf %37, %41 : vector<256x4xf32>
    %c0_53 = arith.constant 0 : index
    %c4_54 = arith.constant 4 : index
    %43 = vector.load %arg13[%c0_53, %c4_54] : memref<256x16xf32, #tpu.memory_space<vmem>>, vector<256x4xf32>
    tpu.vector_store %arg13[%c0_53, %c4_54], %42 {strides = array<i32>} : memref<256x16xf32, #tpu.memory_space<vmem>>, vector<256x4xf32>,
    %44 = vector.shape_cast %42 : vector<256x4xf32> to vector<16x16x4xf32>
    %c5_55 = arith.constant 5 : index
    %c5_56 = arith.constant 5 : index
    %c0_57 = arith.constant 0 : index
    %45 = vector.load %arg11[%c5_55, %c5_56, %c0_57] : memref<26x26x4xf32, #tpu.memory_space<vmem>>, vector<16x16x4xf32>
    tpu.vector_store %arg11[%c5_55, %c5_56, %c0_57], %44 {strides = array<i32>} : memref<26x26x4xf32, #tpu.memory_space<vmem>>, vector<16x16x4xf32>,
    %c2 = arith.constant 2 : index
    %c2_58 = arith.constant 2 : index
    %c0_59 = arith.constant 0 : index
    %46 = vector.load %arg11[%c2, %c2_58, %c0_59] : memref<26x26x4xf32, #tpu.memory_space<vmem>>, vector<16x16x4xf32>
    %47 = vector.shape_cast %46 : vector<16x16x4xf32> to vector<256x4xf32>
    %c0_60 = arith.constant 0 : index
    %c0_61 = arith.constant 0 : index
    %48 = vector.load %arg12[%c0_60, %c0_61] : memref<256x36xf32, #tpu.memory_space<vmem>>, vector<256x4xf32>
    tpu.vector_store %arg12[%c0_60, %c0_61], %47 {strides = array<i32>} : memref<256x36xf32, #tpu.memory_space<vmem>>, vector<256x4xf32>,
    %c2_62 = arith.constant 2 : index
    %c5_63 = arith.constant 5 : index
    %c0_64 = arith.constant 0 : index
    %49 = vector.load %arg11[%c2_62, %c5_63, %c0_64] : memref<26x26x4xf32, #tpu.memory_space<vmem>>, vector<16x16x4xf32>
    %50 = vector.shape_cast %49 : vector<16x16x4xf32> to vector<256x4xf32>
    %c0_65 = arith.constant 0 : index
    %c4_66 = arith.constant 4 : index
    %51 = vector.load %arg12[%c0_65, %c4_66] : memref<256x36xf32, #tpu.memory_space<vmem>>, vector<256x4xf32>
    tpu.vector_store %arg12[%c0_65, %c4_66], %50 {strides = array<i32>} : memref<256x36xf32, #tpu.memory_space<vmem>>, vector<256x4xf32>,
    %c2_67 = arith.constant 2 : index
    %c8_68 = arith.constant 8 : index
    %c0_69 = arith.constant 0 : index
    %52 = vector.load %arg11[%c2_67, %c8_68, %c0_69] : memref<26x26x4xf32, #tpu.memory_space<vmem>>, vector<16x16x4xf32>
    %53 = vector.shape_cast %52 : vector<16x16x4xf32> to vector<256x4xf32>
    %c0_70 = arith.constant 0 : index
    %c8_71 = arith.constant 8 : index
    %54 = vector.load %arg12[%c0_70, %c8_71] : memref<256x36xf32, #tpu.memory_space<vmem>>, vector<256x4xf32>
    tpu.vector_store %arg12[%c0_70, %c8_71], %53 {strides = array<i32>} : memref<256x36xf32, #tpu.memory_space<vmem>>, vector<256x4xf32>,
    %c5_72 = arith.constant 5 : index
    %c2_73 = arith.constant 2 : index
    %c0_74 = arith.constant 0 : index
    %55 = vector.load %arg11[%c5_72, %c2_73, %c0_74] : memref<26x26x4xf32, #tpu.memory_space<vmem>>, vector<16x16x4xf32>
    %56 = vector.shape_cast %55 : vector<16x16x4xf32> to vector<256x4xf32>
    %c0_75 = arith.constant 0 : index
    %c12_76 = arith.constant 12 : index
    %57 = vector.load %arg12[%c0_75, %c12_76] : memref<256x36xf32, #tpu.memory_space<vmem>>, vector<256x4xf32>
    tpu.vector_store %arg12[%c0_75, %c12_76], %56 {strides = array<i32>} : memref<256x36xf32, #tpu.memory_space<vmem>>, vector<256x4xf32>,
    %c5_77 = arith.constant 5 : index
    %c5_78 = arith.constant 5 : index
    %c0_79 = arith.constant 0 : index
    %58 = vector.load %arg11[%c5_77, %c5_78, %c0_79] : memref<26x26x4xf32, #tpu.memory_space<vmem>>, vector<16x16x4xf32>
    %59 = vector.shape_cast %58 : vector<16x16x4xf32> to vector<256x4xf32>
    %c0_80 = arith.constant 0 : index
    %c16_81 = arith.constant 16 : index
    %60 = vector.load %arg12[%c0_80, %c16_81] : memref<256x36xf32, #tpu.memory_space<vmem>>, vector<256x4xf32>
    tpu.vector_store %arg12[%c0_80, %c16_81], %59 {strides = array<i32>} : memref<256x36xf32, #tpu.memory_space<vmem>>, vector<256x4xf32>,
    %c5_82 = arith.constant 5 : index
    %c8_83 = arith.constant 8 : index
    %c0_84 = arith.constant 0 : index
    %61 = vector.load %arg11[%c5_82, %c8_83, %c0_84] : memref<26x26x4xf32, #tpu.memory_space<vmem>>, vector<16x16x4xf32>
    %62 = vector.shape_cast %61 : vector<16x16x4xf32> to vector<256x4xf32>
    %c0_85 = arith.constant 0 : index
    %c20_86 = arith.constant 20 : index
    %63 = vector.load %arg12[%c0_85, %c20_86] : memref<256x36xf32, #tpu.memory_space<vmem>>, vector<256x4xf32>
    tpu.vector_store %arg12[%c0_85, %c20_86], %62 {strides = array<i32>} : memref<256x36xf32, #tpu.memory_space<vmem>>, vector<256x4xf32>,
    %c8_87 = arith.constant 8 : index
    %c2_88 = arith.constant 2 : index
    %c0_89 = arith.constant 0 : index
    %64 = vector.load %arg11[%c8_87, %c2_88, %c0_89] : memref<26x26x4xf32, #tpu.memory_space<vmem>>, vector<16x16x4xf32>
    %65 = vector.shape_cast %64 : vector<16x16x4xf32> to vector<256x4xf32>
    %c0_90 = arith.constant 0 : index
    %c24_91 = arith.constant 24 : index
    %66 = vector.load %arg12[%c0_90, %c24_91] : memref<256x36xf32, #tpu.memory_space<vmem>>, vector<256x4xf32>
    tpu.vector_store %arg12[%c0_90, %c24_91], %65 {strides = array<i32>} : memref<256x36xf32, #tpu.memory_space<vmem>>, vector<256x4xf32>,
    %c8_92 = arith.constant 8 : index
    %c5_93 = arith.constant 5 : index
    %c0_94 = arith.constant 0 : index
    %67 = vector.load %arg11[%c8_92, %c5_93, %c0_94] : memref<26x26x4xf32, #tpu.memory_space<vmem>>, vector<16x16x4xf32>
    %68 = vector.shape_cast %67 : vector<16x16x4xf32> to vector<256x4xf32>
    %c0_95 = arith.constant 0 : index
    %c28_96 = arith.constant 28 : index
    %69 = vector.load %arg12[%c0_95, %c28_96] : memref<256x36xf32, #tpu.memory_space<vmem>>, vector<256x4xf32>
    tpu.vector_store %arg12[%c0_95, %c28_96], %68 {strides = array<i32>} : memref<256x36xf32, #tpu.memory_space<vmem>>, vector<256x4xf32>,
    %c8_97 = arith.constant 8 : index
    %c8_98 = arith.constant 8 : index
    %c0_99 = arith.constant 0 : index
    %70 = vector.load %arg11[%c8_97, %c8_98, %c0_99] : memref<26x26x4xf32, #tpu.memory_space<vmem>>, vector<16x16x4xf32>
    %71 = vector.shape_cast %70 : vector<16x16x4xf32> to vector<256x4xf32>
    %c0_100 = arith.constant 0 : index
    %c32_101 = arith.constant 32 : index
    %72 = vector.load %arg12[%c0_100, %c32_101] : memref<256x36xf32, #tpu.memory_space<vmem>>, vector<256x4xf32>
    tpu.vector_store %arg12[%c0_100, %c32_101], %71 {strides = array<i32>} : memref<256x36xf32, #tpu.memory_space<vmem>>, vector<256x4xf32>,
    %c0_102 = arith.constant 0 : index
    %c0_103 = arith.constant 0 : index
    %73 = vector.load %arg12[%c0_102, %c0_103] : memref<256x36xf32, #tpu.memory_space<vmem>>, vector<256x36xf32>
    %74 = arith.truncf %73 : vector<256x36xf32> to vector<256x36xbf16>
    %c0_104 = arith.constant 0 : index
    %c0_105 = arith.constant 0 : index
    %75 = vector.load %arg4[%c0_104, %c0_105] : memref<36x4xbf16, #tpu.memory_space<vmem>>, vector<36x4xbf16>
    %cst_106 = arith.constant dense<0.000000e+00> : vector<256x4xf32>
    %76 = tpu.matmul %74, %75, %cst_106 {dimension_numbers = #tpu.dot_dimension_numbers<[1], [0], [0], [1], [0, 0, 1, 1], [], []>} : vector<256x36xbf16>, vector<36x4xbf16>, vector<256x4xf32> -> vector<256x4xf32>
    %c0_107 = arith.constant 0 : index
    %c0_108 = arith.constant 0 : index
    %77 = vector.load %arg5[%c0_107, %c0_108] : memref<1x4xf32, #tpu.memory_space<vmem>>, vector<1x4xf32>
    %78 = vector.shape_cast %77 : vector<1x4xf32> to vector<4xf32>
    %79 = vector.shape_cast %78 : vector<4xf32> to vector<1x4xf32>
    %80 = vector.broadcast %79 : vector<1x4xf32> to vector<256x4xf32>
    %81 = arith.addf %76, %80 : vector<256x4xf32>
    %c0_109 = arith.constant 0 : index
    %c8_110 = arith.constant 8 : index
    %82 = vector.load %arg13[%c0_109, %c8_110] : memref<256x16xf32, #tpu.memory_space<vmem>>, vector<256x4xf32>
    tpu.vector_store %arg13[%c0_109, %c8_110], %81 {strides = array<i32>} : memref<256x16xf32, #tpu.memory_space<vmem>>, vector<256x4xf32>,
    %83 = vector.shape_cast %81 : vector<256x4xf32> to vector<16x16x4xf32>
    %c5_111 = arith.constant 5 : index
    %c5_112 = arith.constant 5 : index
    %c0_113 = arith.constant 0 : index
    %84 = vector.load %arg11[%c5_111, %c5_112, %c0_113] : memref<26x26x4xf32, #tpu.memory_space<vmem>>, vector<16x16x4xf32>
    tpu.vector_store %arg11[%c5_111, %c5_112, %c0_113], %83 {strides = array<i32>} : memref<26x26x4xf32, #tpu.memory_space<vmem>>, vector<16x16x4xf32>,
    %c0_114 = arith.constant 0 : index
    %c0_115 = arith.constant 0 : index
    %c0_116 = arith.constant 0 : index
    %85 = vector.load %arg11[%c0_114, %c0_115, %c0_116] : memref<26x26x4xf32, #tpu.memory_space<vmem>>, vector<16x16x4xf32>
    %86 = vector.shape_cast %85 : vector<16x16x4xf32> to vector<256x4xf32>
    %c0_117 = arith.constant 0 : index
    %c0_118 = arith.constant 0 : index
    %87 = vector.load %arg12[%c0_117, %c0_118] : memref<256x36xf32, #tpu.memory_space<vmem>>, vector<256x4xf32>
    tpu.vector_store %arg12[%c0_117, %c0_118], %86 {strides = array<i32>} : memref<256x36xf32, #tpu.memory_space<vmem>>, vector<256x4xf32>,
    %c0_119 = arith.constant 0 : index
    %c5_120 = arith.constant 5 : index
    %c0_121 = arith.constant 0 : index
    %88 = vector.load %arg11[%c0_119, %c5_120, %c0_121] : memref<26x26x4xf32, #tpu.memory_space<vmem>>, vector<16x16x4xf32>
    %89 = vector.shape_cast %88 : vector<16x16x4xf32> to vector<256x4xf32>
    %c0_122 = arith.constant 0 : index
    %c4_123 = arith.constant 4 : index
    %90 = vector.load %arg12[%c0_122, %c4_123] : memref<256x36xf32, #tpu.memory_space<vmem>>, vector<256x4xf32>
    tpu.vector_store %arg12[%c0_122, %c4_123], %89 {strides = array<i32>} : memref<256x36xf32, #tpu.memory_space<vmem>>, vector<256x4xf32>,
    %c0_124 = arith.constant 0 : index
    %c10 = arith.constant 10 : index
    %c0_125 = arith.constant 0 : index
    %91 = vector.load %arg11[%c0_124, %c10, %c0_125] : memref<26x26x4xf32, #tpu.memory_space<vmem>>, vector<16x16x4xf32>
    %92 = vector.shape_cast %91 : vector<16x16x4xf32> to vector<256x4xf32>
    %c0_126 = arith.constant 0 : index
    %c8_127 = arith.constant 8 : index
    %93 = vector.load %arg12[%c0_126, %c8_127] : memref<256x36xf32, #tpu.memory_space<vmem>>, vector<256x4xf32>
    tpu.vector_store %arg12[%c0_126, %c8_127], %92 {strides = array<i32>} : memref<256x36xf32, #tpu.memory_space<vmem>>, vector<256x4xf32>,
    %c5_128 = arith.constant 5 : index
    %c0_129 = arith.constant 0 : index
    %c0_130 = arith.constant 0 : index
    %94 = vector.load %arg11[%c5_128, %c0_129, %c0_130] : memref<26x26x4xf32, #tpu.memory_space<vmem>>, vector<16x16x4xf32>
    %95 = vector.shape_cast %94 : vector<16x16x4xf32> to vector<256x4xf32>
    %c0_131 = arith.constant 0 : index
    %c12_132 = arith.constant 12 : index
    %96 = vector.load %arg12[%c0_131, %c12_132] : memref<256x36xf32, #tpu.memory_space<vmem>>, vector<256x4xf32>
    tpu.vector_store %arg12[%c0_131, %c12_132], %95 {strides = array<i32>} : memref<256x36xf32, #tpu.memory_space<vmem>>, vector<256x4xf32>,
    %c5_133 = arith.constant 5 : index
    %c5_134 = arith.constant 5 : index
    %c0_135 = arith.constant 0 : index
    %97 = vector.load %arg11[%c5_133, %c5_134, %c0_135] : memref<26x26x4xf32, #tpu.memory_space<vmem>>, vector<16x16x4xf32>
    %98 = vector.shape_cast %97 : vector<16x16x4xf32> to vector<256x4xf32>
    %c0_136 = arith.constant 0 : index
    %c16_137 = arith.constant 16 : index
    %99 = vector.load %arg12[%c0_136, %c16_137] : memref<256x36xf32, #tpu.memory_space<vmem>>, vector<256x4xf32>
    tpu.vector_store %arg12[%c0_136, %c16_137], %98 {strides = array<i32>} : memref<256x36xf32, #tpu.memory_space<vmem>>, vector<256x4xf32>,
    %c5_138 = arith.constant 5 : index
    %c10_139 = arith.constant 10 : index
    %c0_140 = arith.constant 0 : index
    %100 = vector.load %arg11[%c5_138, %c10_139, %c0_140] : memref<26x26x4xf32, #tpu.memory_space<vmem>>, vector<16x16x4xf32>
    %101 = vector.shape_cast %100 : vector<16x16x4xf32> to vector<256x4xf32>
    %c0_141 = arith.constant 0 : index
    %c20_142 = arith.constant 20 : index
    %102 = vector.load %arg12[%c0_141, %c20_142] : memref<256x36xf32, #tpu.memory_space<vmem>>, vector<256x4xf32>
    tpu.vector_store %arg12[%c0_141, %c20_142], %101 {strides = array<i32>} : memref<256x36xf32, #tpu.memory_space<vmem>>, vector<256x4xf32>,
    %c10_143 = arith.constant 10 : index
    %c0_144 = arith.constant 0 : index
    %c0_145 = arith.constant 0 : index
    %103 = vector.load %arg11[%c10_143, %c0_144, %c0_145] : memref<26x26x4xf32, #tpu.memory_space<vmem>>, vector<16x16x4xf32>
    %104 = vector.shape_cast %103 : vector<16x16x4xf32> to vector<256x4xf32>
    %c0_146 = arith.constant 0 : index
    %c24_147 = arith.constant 24 : index
    %105 = vector.load %arg12[%c0_146, %c24_147] : memref<256x36xf32, #tpu.memory_space<vmem>>, vector<256x4xf32>
    tpu.vector_store %arg12[%c0_146, %c24_147], %104 {strides = array<i32>} : memref<256x36xf32, #tpu.memory_space<vmem>>, vector<256x4xf32>,
    %c10_148 = arith.constant 10 : index
    %c5_149 = arith.constant 5 : index
    %c0_150 = arith.constant 0 : index
    %106 = vector.load %arg11[%c10_148, %c5_149, %c0_150] : memref<26x26x4xf32, #tpu.memory_space<vmem>>, vector<16x16x4xf32>
    %107 = vector.shape_cast %106 : vector<16x16x4xf32> to vector<256x4xf32>
    %c0_151 = arith.constant 0 : index
    %c28_152 = arith.constant 28 : index
    %108 = vector.load %arg12[%c0_151, %c28_152] : memref<256x36xf32, #tpu.memory_space<vmem>>, vector<256x4xf32>
    tpu.vector_store %arg12[%c0_151, %c28_152], %107 {strides = array<i32>} : memref<256x36xf32, #tpu.memory_space<vmem>>, vector<256x4xf32>,
    %c10_153 = arith.constant 10 : index
    %c10_154 = arith.constant 10 : index
    %c0_155 = arith.constant 0 : index
    %109 = vector.load %arg11[%c10_153, %c10_154, %c0_155] : memref<26x26x4xf32, #tpu.memory_space<vmem>>, vector<16x16x4xf32>
    %110 = vector.shape_cast %109 : vector<16x16x4xf32> to vector<256x4xf32>
    %c0_156 = arith.constant 0 : index
    %c32_157 = arith.constant 32 : index
    %111 = vector.load %arg12[%c0_156, %c32_157] : memref<256x36xf32, #tpu.memory_space<vmem>>, vector<256x4xf32>
    tpu.vector_store %arg12[%c0_156, %c32_157], %110 {strides = array<i32>} : memref<256x36xf32, #tpu.memory_space<vmem>>, vector<256x4xf32>,
    %c0_158 = arith.constant 0 : index
    %c0_159 = arith.constant 0 : index
    %112 = vector.load %arg12[%c0_158, %c0_159] : memref<256x36xf32, #tpu.memory_space<vmem>>, vector<256x36xf32>
    %113 = arith.truncf %112 : vector<256x36xf32> to vector<256x36xbf16>
    %c0_160 = arith.constant 0 : index
    %c0_161 = arith.constant 0 : index
    %114 = vector.load %arg6[%c0_160, %c0_161] : memref<36x4xbf16, #tpu.memory_space<vmem>>, vector<36x4xbf16>
    %cst_162 = arith.constant dense<0.000000e+00> : vector<256x4xf32>
    %115 = tpu.matmul %113, %114, %cst_162 {dimension_numbers = #tpu.dot_dimension_numbers<[1], [0], [0], [1], [0, 0, 1, 1], [], []>} : vector<256x36xbf16>, vector<36x4xbf16>, vector<256x4xf32> -> vector<256x4xf32>
    %c0_163 = arith.constant 0 : index
    %c0_164 = arith.constant 0 : index
    %116 = vector.load %arg7[%c0_163, %c0_164] : memref<1x4xf32, #tpu.memory_space<vmem>>, vector<1x4xf32>
    %117 = vector.shape_cast %116 : vector<1x4xf32> to vector<4xf32>
    %118 = vector.shape_cast %117 : vector<4xf32> to vector<1x4xf32>
    %119 = vector.broadcast %118 : vector<1x4xf32> to vector<256x4xf32>
    %120 = arith.addf %115, %119 : vector<256x4xf32>
    %c0_165 = arith.constant 0 : index
    %c12_166 = arith.constant 12 : index
    %121 = vector.load %arg13[%c0_165, %c12_166] : memref<256x16xf32, #tpu.memory_space<vmem>>, vector<256x4xf32>
    tpu.vector_store %arg13[%c0_165, %c12_166], %120 {strides = array<i32>} : memref<256x16xf32, #tpu.memory_space<vmem>>, vector<256x4xf32>,
    %c0_167 = arith.constant 0 : index
    %c0_168 = arith.constant 0 : index
    %122 = vector.load %arg13[%c0_167, %c0_168] : memref<256x16xf32, #tpu.memory_space<vmem>>, vector<256x16xf32>
    %123 = arith.truncf %122 : vector<256x16xf32> to vector<256x16xbf16>
    %c0_169 = arith.constant 0 : index
    %c0_170 = arith.constant 0 : index
    %124 = vector.load %arg8[%c0_169, %c0_170] : memref<16x8xbf16, #tpu.memory_space<vmem>>, vector<16x8xbf16>
    %cst_171 = arith.constant dense<0.000000e+00> : vector<256x8xf32>
    %125 = tpu.matmul %123, %124, %cst_171 {dimension_numbers = #tpu.dot_dimension_numbers<[1], [0], [0], [1], [0, 0, 1, 1], [], []>} : vector<256x16xbf16>, vector<16x8xbf16>, vector<256x8xf32> -> vector<256x8xf32>
    %c0_172 = arith.constant 0 : index
    %c0_173 = arith.constant 0 : index
    %126 = vector.load %arg9[%c0_172, %c0_173] : memref<1x8xf32, #tpu.memory_space<vmem>>, vector<1x8xf32>
    %127 = vector.shape_cast %126 : vector<1x8xf32> to vector<8xf32>
    %128 = vector.shape_cast %127 : vector<8xf32> to vector<1x8xf32>
    %129 = vector.broadcast %128 : vector<1x8xf32> to vector<256x8xf32>
    %130 = arith.addf %125, %129 : vector<256x8xf32>
    %131 = vector.shape_cast %130 : vector<256x8xf32> to vector<1x256x8xf32>
    %c0_174 = arith.constant 0 : index
    %c0_175 = arith.constant 0 : index
    %c0_176 = arith.constant 0 : index
    %132 = vector.load %arg10[%c0_174, %c0_175, %c0_176] : memref<1x256x8xf32, #tpu.memory_space<vmem>>, vector<1x256x8xf32>
    tpu.vector_store %arg10[%c0_174, %c0_175, %c0_176], %131 {strides = array<i32>} : memref<1x256x8xf32, #tpu.memory_space<vmem>>, vector<1x256x8xf32>,
    return
  }
  func.func @transform_0(%arg0: i32) -> (i32, i32, i32, i32) {
    %c0_i32 = arith.constant 0 : i32
    %c0_i32_0 = arith.constant 0 : i32
    %c0_i32_1 = arith.constant 0 : i32
    %c0_i32_2 = arith.constant 0 : i32
    return %arg0, %c0_i32, %c0_i32_0, %c0_i32_1 : i32, i32, i32, i32
  }
  func.func @transform_1(%arg0: i32) -> (i32, i32) {
    %c0_i32 = arith.constant 0 : i32
    %c0_i32_0 = arith.constant 0 : i32
    %c0_i32_1 = arith.constant 0 : i32
    return %c0_i32, %c0_i32_0 : i32, i32
  }
  func.func @transform_2(%arg0: i32) -> (i32, i32) {
    %c0_i32 = arith.constant 0 : i32
    %c0_i32_0 = arith.constant 0 : i32
    %c0_i32_1 = arith.constant 0 : i32
    return %c0_i32, %c0_i32_0 : i32, i32
  }
  func.func @transform_3(%arg0: i32) -> (i32, i32) {
    %c0_i32 = arith.constant 0 : i32
    %c0_i32_0 = arith.constant 0 : i32
    %c0_i32_1 = arith.constant 0 : i32
    return %c0_i32, %c0_i32_0 : i32, i32
  }
  func.func @transform_4(%arg0: i32) -> (i32, i32) {
    %c0_i32 = arith.constant 0 : i32
    %c0_i32_0 = arith.constant 0 : i32
    %c0_i32_1 = arith.constant 0 : i32
    return %c0_i32, %c0_i32_0 : i32, i32
  }
  func.func @transform_5(%arg0: i32) -> (i32, i32) {
    %c0_i32 = arith.constant 0 : i32
    %c0_i32_0 = arith.constant 0 : i32
    %c0_i32_1 = arith.constant 0 : i32
    return %c0_i32, %c0_i32_0 : i32, i32
  }
  func.func @transform_6(%arg0: i32) -> (i32, i32) {
    %c0_i32 = arith.constant 0 : i32
    %c0_i32_0 = arith.constant 0 : i32
    %c0_i32_1 = arith.constant 0 : i32
    return %c0_i32, %c0_i32_0 : i32, i32
  }
  func.func @transform_7(%arg0: i32) -> (i32, i32) {
    %c0_i32 = arith.constant 0 : i32
    %c0_i32_0 = arith.constant 0 : i32
    %c0_i32_1 = arith.constant 0 : i32
    return %c0_i32, %c0_i32_0 : i32, i32
  }
  func.func @transform_8(%arg0: i32) -> (i32, i32) {
    %c0_i32 = arith.constant 0 : i32
    %c0_i32_0 = arith.constant 0 : i32
    %c0_i32_1 = arith.constant 0 : i32
    return %c0_i32, %c0_i32_0 : i32, i32
  }
  func.func @transform_9(%arg0: i32) -> (i32, i32, i32) {
    %c0_i32 = arith.constant 0 : i32
    %c0_i32_0 = arith.constant 0 : i32
    %c0_i32_1 = arith.constant 0 : i32
    return %arg0, %c0_i32, %c0_i32_0 : i32, i32, i32
  }
}

</mosaic_0001>

<bundles_post_ra>
// kernel: tpu_custom_call.1
= control target key start
LH: loop header
LB: loop body
LE: loop exit
PB: predicated region body
PF: predicated region fallthrough
CT: control target
= control target key end

     0   :  { %s7528_s30 = smov 0   ;;  %s11253_s0 = inlined_call_operand.vmem [shape: f32[2,16,16,4], index: 0, kind: input, shape index: {}]   ;;  %s11254_s1 = inlined_call_operand.vmem [shape: bf16[36,4], index: 1, kind: input, shape index: {}]   ;;  %s11255_s2 = inlined_call_operand.vmem [shape: f32[1,4], index: 2, kind: input, shape index: {}]   ;;  %s11256_s3 = inlined_call_operand.vmem [shape: bf16[36,4], index: 3, kind: input, shape index: {}]   ;;  %s11257_s4 = inlined_call_operand.vmem [shape: f32[1,4], index: 4, kind: input, shape index: {}]   ;;  %s11258_s5 = inlined_call_operand.vmem [shape: bf16[36,4], index: 5, kind: input, shape index: {}]   ;;  %s11259_s6 = inlined_call_operand.vmem [shape: f32[1,4], index: 6, kind: input, shape index: {}]   ;;  %s11260_s7 = inlined_call_operand.vmem [shape: bf16[16,8], index: 7, kind: input, shape index: {}]   ;;  %s11261_s8 = inlined_call_operand.vmem [shape: f32[1,8], index: 8, kind: input, shape index: {}]   ;;  %s11262_s9 = inlined_call_operand.vmem [shape: f32[2,256,8], index: 9, kind: output, shape index: {}]  }
   0x1 LB: > { %s7118_s10 = sadd.s32 4294967295, %s7467_s30   ;;  %p7122_p0 = scmp.ge.s32.totalorder %s7467_s30, 1  ;;  %s7467_s30 = sphi %s7528_s30, %s19_s30  }
   0x2   : > { %p287_p1 = scmp.lt.s32.totalorder %s7467_s30, 3 }
   0x4   : > { %p288_p2 = pnand %p7122_p0, %p287_p1 }
   0x6   : > { %291 = sbr.rel (%p288_p2) target bundleno = 2800 (0xaf0), region = 56 }
   0xb   : > { %vm334_vm0 = vcmask 31744   ;;  %p7538_p3 = scmp.lt.s32.totalorder %s7118_s10, 1  ;;  %v11263_v0 = vmov 0.0   ;;  %s7470_s16 = smov 4   ;;  %vm762_vm1 = vcmask 64544   ;;  %vm955_vm2 = vcmask 97344  }
   0xc   : > { %352 = vst.msk [vmem:[#allocation2 + $0x80] sm:$0xff] %vm334_vm0, %v11263_v0  ;;  %353 = vst.msk [vmem:[#allocation2 + $0x88] sm:$0xff] %vm334_vm0, %v11263_v0  ;;  %s7471_s17 = smov 8   ;;  %s7472_s18 = smov 12   ;;  %vm1148_vm3 = vcmask 130144   ;;  %vm1341_vm4 = vcmask 162944  }
   0xd   : > { %335 = vst.msk [vmem:[#allocation2] sm:$0xff] %vm334_vm0, %v11263_v0  ;;  %336 = vst.msk [vmem:[#allocation2 + $0x8] sm:$0xff] %vm334_vm0, %v11263_v0  ;;  %s11397_s10 = smov (!%p7538_p3, %s7118_s10), 1  ;;  %s7473_s19 = smov 16   ;;  %vm1534_vm5 = vcmask 195744   ;;  %vm1728_vm6 = vcmask 228544  }
   0xe   : > { %337 = vst.msk [vmem:[#allocation2 + $0x10] sm:$0xff] %vm334_vm0, %v11263_v0  ;;  %340 = vst.msk [vmem:[#allocation2 + $0x20] sm:$0xff] %vm334_vm0, %v11263_v0  ;;  %s7207_s12 = sshll.u32 %s11397_s10, 8  ;;  %s7474_s20 = smov 20   ;;  %vm2271_vm7 = vcmask 1041408   ;;  %vm1921_vm8 = vcmask 261344  }
   0xf   : > { %341 = vst.msk [vmem:[#allocation2 + $0x28] sm:$0xff] %vm334_vm0, %v11263_v0  ;;  %342 = vst.msk [vmem:[#allocation2 + $0x30] sm:$0xff] %vm334_vm0, %v11263_v0  ;;  %s7710_s15 = scalar_lea.vmem %s11253_s0, %s7207_s12  ;;  %s7475_s21 = smov 24   ;;  %vm2114_vm9 = vcmask 294144   ;;  %vm2222_vm10 = vcmask 293888   ;;  %vm338_vm11 = vcmask 25600  }
  0x10   : > { %344 = vst.msk [vmem:[#allocation2 + $0x40] sm:$0xff] %vm334_vm0, %v11263_v0  ;;  %345 = vst.msk [vmem:[#allocation2 + $0x48] sm:$0xff] %vm334_vm0, %v11263_v0  ;;  %v440_v1 = vld [vmem:[%s7710_s15] sm:$0xff]  ;;  %v441_v2 = vld [vmem:[%s7710_s15 + $0x8] sm:$0xff]  ;;  %s7476_s22 = smov 28   ;;  %s7477_s27 = smov 32  }
  0x11   : > { %346 = vst.msk [vmem:[#allocation2 + $0x50] sm:$0xff] %vm334_vm0, %v11263_v0  ;;  %348 = vst.msk [vmem:[#allocation2 + $0x60] sm:$0xff] %vm334_vm0, %v11263_v0  ;;  %v442_v3 = vld [vmem:[%s7710_s15 + $0x10] sm:$0xff]  ;;  %v443_v4 = vld [vmem:[%s7710_s15 + $0x18] sm:$0xff]  ;;  %vm6820_vm12 = vcmask 130048   ;;  %s11129_s26 = scalar_lea.vmem %s11262_s9, %s7207_s12  ;;  %vm7030_vm13 = vcmask 64512  }
  0x12   : > { %349 = vst.msk [vmem:[#allocation2 + $0x68] sm:$0xff] %vm334_vm0, %v11263_v0  ;;  %350 = vst.msk [vmem:[#allocation2 + $0x70] sm:$0xff] %vm334_vm0, %v11263_v0  ;;  %v444_v5 = vld [vmem:[%s7710_s15 + $0x20] sm:$0xff]  ;;  %v445_v6 = vld [vmem:[%s7710_s15 + $0x28] sm:$0xff] }
  0x13   : > { %354 = vst.msk [vmem:[#allocation2 + $0x90] sm:$0xff] %vm334_vm0, %v11263_v0  ;;  %356 = vst.msk [vmem:[#allocation2 + $0xa0] sm:$0xff] %vm334_vm0, %v11263_v0  ;;  %v602_v7 = vld [vmem:[#allocation2 + $0x85] sm:$0xff]  ;;  %v446_v9 = vld [vmem:[%s7710_s15 + $0x30] sm:$0xff] }
  0x14   : > { %357 = vst.msk [vmem:[#allocation2 + $0xa8] sm:$0xff] %vm334_vm0, %v11263_v0  ;;  %358 = vst.msk [vmem:[#allocation2 + $0xb0] sm:$0xff] %vm334_vm0, %v11263_v0  ;;  %666 = vrot.lane.b32.xlu0 %v602_v7, %s7470_s16  ;;  %v447_v10 = vld [vmem:[%s7710_s15 + $0x38] sm:$0xff]  ;;  %v448_v11 = vld [vmem:[%s7710_s15 + $0x40] sm:$0xff] }
  0x15   : > { %360 = vst.msk [vmem:[#allocation2 + $0xc0] sm:$0xff] %vm334_vm0, %v11263_v0  ;;  %361 = vst.msk [vmem:[#allocation2 + $0xc8] sm:$0xff] %vm334_vm0, %v11263_v0  ;;  %v449_v12 = vld [vmem:[%s7710_s15 + $0x48] sm:$0xff]  ;;  %v450_v13 = vld [vmem:[%s7710_s15 + $0x50] sm:$0xff] }
  0x16   : > { %362 = vst.msk [vmem:[#allocation2 + $0xd0] sm:$0xff] %vm334_vm0, %v11263_v0  ;;  %364 = vst.msk [vmem:[#allocation2 + $0xe0] sm:$0xff] %vm334_vm0, %v11263_v0  ;;  %v451_v14 = vld [vmem:[%s7710_s15 + $0x58] sm:$0xff]  ;;  %v452_v15 = vld [vmem:[%s7710_s15 + $0x60] sm:$0xff] }
  0x17   : > { %365 = vst.msk [vmem:[#allocation2 + $0xe8] sm:$0xff] %vm334_vm0, %v11263_v0  ;;  %366 = vst.msk [vmem:[#allocation2 + $0xf0] sm:$0xff] %vm334_vm0, %v11263_v0  ;;  %v453_v16 = vld [vmem:[%s7710_s15 + $0x68] sm:$0xff]  ;;  %v454_v17 = vld [vmem:[%s7710_s15 + $0x70] sm:$0xff] }
  0x18   : > { %368 = vst.msk [vmem:[#allocation2 + $0x100] sm:$0xff] %vm334_vm0, %v11263_v0  ;;  %369 = vst.msk [vmem:[#allocation2 + $0x108] sm:$0xff] %vm334_vm0, %v11263_v0  ;;  %v455_v18 = vld [vmem:[%s7710_s15 + $0x78] sm:$0xff]  ;;  %v456_v19 = vld [vmem:[%s7710_s15 + $0x80] sm:$0xff] }
  0x19   : > { %370 = vst.msk [vmem:[#allocation2 + $0x110] sm:$0xff] %vm334_vm0, %v11263_v0  ;;  %372 = vst.msk [vmem:[#allocation2 + $0x120] sm:$0xff] %vm334_vm0, %v11263_v0  ;;  %v457_v20 = vld [vmem:[%s7710_s15 + $0x88] sm:$0xff]  ;;  %v458_v21 = vld [vmem:[%s7710_s15 + $0x90] sm:$0xff] }
  0x1a   : > { %373 = vst.msk [vmem:[#allocation2 + $0x128] sm:$0xff] %vm334_vm0, %v11263_v0  ;;  %374 = vst.msk [vmem:[#allocation2 + $0x130] sm:$0xff] %vm334_vm0, %v11263_v0  ;;  %v603_v8 = vld [vmem:[#allocation2 + $0x8d] sm:$0xff]  ;;  %v459_v22 = vld [vmem:[%s7710_s15 + $0x98] sm:$0xff] }
  0x1b   : > { %376 = vst.msk [vmem:[#allocation2 + $0x140] sm:$0xff] %vm334_vm0, %v11263_v0  ;;  %377 = vst.msk [vmem:[#allocation2 + $0x148] sm:$0xff] %vm334_vm0, %v11263_v0  ;;  %668 = vrot.lane.b32.xlu0 %v603_v8, %s7470_s16  ;;  %v460_v23 = vld [vmem:[%s7710_s15 + $0xa0] sm:$0xff]  ;;  %v461_v24 = vld [vmem:[%s7710_s15 + $0xa8] sm:$0xff] }
  0x1c   : > { %378 = vst.msk [vmem:[#allocation2 + $0x150] sm:$0xff] %vm334_vm0, %v11263_v0  ;;  %380 = vst.msk [vmem:[#allocation2 + $0x160] sm:$0xff] %vm334_vm0, %v11263_v0  ;;  %v462_v28 = vld [vmem:[%s7710_s15 + $0xb0] sm:$0xff]  ;;  %v463_v29 = vld [vmem:[%s7710_s15 + $0xb8] sm:$0xff] }
  0x1d   : > { %381 = vst.msk [vmem:[#allocation2 + $0x168] sm:$0xff] %vm334_vm0, %v11263_v0  ;;  %382 = vst.msk [vmem:[#allocation2 + $0x170] sm:$0xff] %vm334_vm0, %v11263_v0  ;;  %v464_v33 = vld [vmem:[%s7710_s15 + $0xc0] sm:$0xff]  ;;  %v465_v34 = vld [vmem:[%s7710_s15 + $0xc8] sm:$0xff] }
  0x1e   : > { %384 = vst.msk [vmem:[#allocation2 + $0x180] sm:$0xff] %vm334_vm0, %v11263_v0  ;;  %385 = vst.msk [vmem:[#allocation2 + $0x188] sm:$0xff] %vm334_vm0, %v11263_v0  ;;  %v466_v35 = vld [vmem:[%s7710_s15 + $0xd0] sm:$0xff]  ;;  %v467_v36 = vld [vmem:[%s7710_s15 + $0xd8] sm:$0xff] }
  0x1f   : > { %386 = vst.msk [vmem:[#allocation2 + $0x190] sm:$0xff] %vm334_vm0, %v11263_v0  ;;  %388 = vst.msk [vmem:[#allocation2 + $0x1a0] sm:$0xff] %vm334_vm0, %v11263_v0  ;;  %v468_v37 = vld [vmem:[%s7710_s15 + $0xe0] sm:$0xff]  ;;  %v469_v38 = vld [vmem:[%s7710_s15 + $0xe8] sm:$0xff] }
  0x20   : > { %389 = vst.msk [vmem:[#allocation2 + $0x1a8] sm:$0xff] %vm334_vm0, %v11263_v0  ;;  %390 = vst.msk [vmem:[#allocation2 + $0x1b0] sm:$0xff] %vm334_vm0, %v11263_v0  ;;  %v538_v45 = vld [vmem:[#allocation2 + $0x84] sm:$0xff]  ;;  %v539_v48 = vld [vmem:[#allocation2 + $0x8c] sm:$0xff] }
  0x21   : > { %392 = vst.msk [vmem:[#allocation2 + $0x1c0] sm:$0xff] %vm334_vm0, %v11263_v0  ;;  %393 = vst.msk [vmem:[#allocation2 + $0x1c8] sm:$0xff] %vm334_vm0, %v11263_v0 }
  0x22   : > { %394 = vst.msk [vmem:[#allocation2 + $0x1d0] sm:$0xff] %vm334_vm0, %v11263_v0  ;;  %396 = vst.msk [vmem:[#allocation2 + $0x1e0] sm:$0xff] %vm334_vm0, %v11263_v0 }
  0x23   : > { %397 = vst.msk [vmem:[#allocation2 + $0x1e8] sm:$0xff] %vm334_vm0, %v11263_v0  ;;  %398 = vst.msk [vmem:[#allocation2 + $0x1f0] sm:$0xff] %vm334_vm0, %v11263_v0 }
  0x24   : > { %400 = vst.msk [vmem:[#allocation2 + $0x200] sm:$0xff] %vm334_vm0, %v11263_v0  ;;  %401 = vst.msk [vmem:[#allocation2 + $0x208] sm:$0xff] %vm334_vm0, %v11263_v0 }
  0x25   : > { %402 = vst.msk [vmem:[#allocation2 + $0x210] sm:$0xff] %vm334_vm0, %v11263_v0  ;;  %404 = vst.msk [vmem:[#allocation2 + $0x220] sm:$0xff] %vm334_vm0, %v11263_v0 }
  0x26   : > { %405 = vst.msk [vmem:[#allocation2 + $0x228] sm:$0xff] %vm334_vm0, %v11263_v0  ;;  %406 = vst.msk [vmem:[#allocation2 + $0x230] sm:$0xff] %vm334_vm0, %v11263_v0 }
  0x27   : > { %408 = vst.msk [vmem:[#allocation2 + $0x240] sm:$0xff] %vm334_vm0, %v11263_v0  ;;  %409 = vst.msk [vmem:[#allocation2 + $0x248] sm:$0xff] %vm334_vm0, %v11263_v0 }
  0x28   : > { %410 = vst.msk [vmem:[#allocation2 + $0x250] sm:$0xff] %vm334_vm0, %v11263_v0  ;;  %412 = vst.msk [vmem:[#allocation2 + $0x260] sm:$0xff] %vm334_vm0, %v11263_v0 }
  0x29   : > { %413 = vst.msk [vmem:[#allocation2 + $0x268] sm:$0xff] %vm334_vm0, %v11263_v0  ;;  %414 = vst.msk [vmem:[#allocation2 + $0x270] sm:$0xff] %vm334_vm0, %v11263_v0 }
  0x2a   : > { %416 = vst.msk [vmem:[#allocation2 + $0x280] sm:$0xff] %vm334_vm0, %v11263_v0  ;;  %417 = vst.msk [vmem:[#allocation2 + $0x288] sm:$0xff] %vm334_vm0, %v11263_v0 }
  0x2b   : > { %418 = vst.msk [vmem:[#allocation2 + $0x290] sm:$0xff] %vm334_vm0, %v11263_v0  ;;  %420 = vst.msk [vmem:[#allocation2 + $0x2a0] sm:$0xff] %vm334_vm0, %v11263_v0 }
  0x2c   : > { %421 = vst.msk [vmem:[#allocation2 + $0x2a8] sm:$0xff] %vm334_vm0, %v11263_v0  ;;  %422 = vst.msk [vmem:[#allocation2 + $0x2b0] sm:$0xff] %vm334_vm0, %v11263_v0 }
  0x2d   : > { %424 = vst.msk [vmem:[#allocation2 + $0x2c0] sm:$0xff] %vm334_vm0, %v11263_v0  ;;  %425 = vst.msk [vmem:[#allocation2 + $0x2c8] sm:$0xff] %vm334_vm0, %v11263_v0 }
  0x2e   : > { %426 = vst.msk [vmem:[#allocation2 + $0x2d0] sm:$0xff] %vm334_vm0, %v11263_v0  ;;  %428 = vst.msk [vmem:[#allocation2 + $0x2e0] sm:$0xff] %vm334_vm0, %v11263_v0 }
  0x2f   : > { %429 = vst.msk [vmem:[#allocation2 + $0x2e8] sm:$0xff] %vm334_vm0, %v11263_v0  ;;  %430 = vst.msk [vmem:[#allocation2 + $0x2f0] sm:$0xff] %vm334_vm0, %v11263_v0 }
  0x30   : > { %432 = vst.msk [vmem:[#allocation2 + $0x300] sm:$0xff] %vm334_vm0, %v11263_v0  ;;  %433 = vst.msk [vmem:[#allocation2 + $0x308] sm:$0xff] %vm334_vm0, %v11263_v0 }
  0x31   : > { %434 = vst.msk [vmem:[#allocation2 + $0x310] sm:$0xff] %vm334_vm0, %v11263_v0  ;;  %436 = vst.msk [vmem:[#allocation2 + $0x320] sm:$0xff] %vm334_vm0, %v11263_v0 }
  0x32   : > { %437 = vst.msk [vmem:[#allocation2 + $0x328] sm:$0xff] %vm334_vm0, %v11263_v0  ;;  %438 = vst.msk [vmem:[#allocation2 + $0x330] sm:$0xff] %vm334_vm0, %v11263_v0 }
  0x33   : > { %473 = vst.msk [vmem:[#allocation2 + $0xa5] sm:$0xff] %vm334_vm0, %v440_v1  ;;  %505 = vst.msk [vmem:[#allocation4] sm:$0xff] %vm334_vm0, %v440_v1 }
  0x34   : > { %474 = vst.msk [vmem:[#allocation2 + $0xad] sm:$0xff] %vm334_vm0, %v441_v2  ;;  %506 = vst.msk [vmem:[#allocation4 + $0x8] sm:$0xff] %vm334_vm0, %v441_v2 }
  0x35   : > { %475 = vst.msk [vmem:[#allocation2 + $0xc5] sm:$0xff] %vm334_vm0, %v442_v3  ;;  %507 = vst.msk [vmem:[#allocation4 + $0x10] sm:$0xff] %vm334_vm0, %v442_v3 }
  0x36   : > { %476 = vst.msk [vmem:[#allocation2 + $0xcd] sm:$0xff] %vm334_vm0, %v443_v4  ;;  %508 = vst.msk [vmem:[#allocation4 + $0x18] sm:$0xff] %vm334_vm0, %v443_v4 }
  0x37   : > { %477 = vst.msk [vmem:[#allocation2 + $0xe5] sm:$0xff] %vm334_vm0, %v444_v5  ;;  %509 = vst.msk [vmem:[#allocation4 + $0x20] sm:$0xff] %vm334_vm0, %v444_v5 }
  0x38   : > { %478 = vst.msk [vmem:[#allocation2 + $0xed] sm:$0xff] %vm334_vm0, %v445_v6  ;;  %510 = vst.msk [vmem:[#allocation4 + $0x28] sm:$0xff] %vm334_vm0, %v445_v6 }
  0x39   : > { %479 = vst.msk [vmem:[#allocation2 + $0x105] sm:$0xff] %vm334_vm0, %v446_v9  ;;  %511 = vst.msk [vmem:[#allocation4 + $0x30] sm:$0xff] %vm334_vm0, %v446_v9 }
  0x3a   : > { %480 = vst.msk [vmem:[#allocation2 + $0x10d] sm:$0xff] %vm334_vm0, %v447_v10  ;;  %512 = vst.msk [vmem:[#allocation4 + $0x38] sm:$0xff] %vm334_vm0, %v447_v10  ;;  %v7774_v25 = vld [vmem:[#allocation2 + $0xa5] sm:$0xff] }
  0x3b   : > { %481 = vst.msk [vmem:[#allocation2 + $0x125] sm:$0xff] %vm334_vm0, %v448_v11  ;;  %513 = vst.msk [vmem:[#allocation4 + $0x40] sm:$0xff] %vm334_vm0, %v448_v11  ;;  %670 = vrot.lane.b32.xlu1 %v7774_v25, %s7470_s16  ;;  %v7786_v27 = vld [vmem:[#allocation2 + $0xad] sm:$0xff]  ;;  %v7850_v46 = vld [vmem:[#allocation2 + $0xa4] sm:$0xff] }
  0x3c   : > { %482 = vst.msk [vmem:[#allocation2 + $0x12d] sm:$0xff] %vm334_vm0, %v449_v12  ;;  %514 = vst.msk [vmem:[#allocation4 + $0x48] sm:$0xff] %vm334_vm0, %v449_v12  ;;  %v7776_v26 = vld [vmem:[#allocation2 + $0xc5] sm:$0xff] }
  0x3d   : > { %483 = vst.msk [vmem:[#allocation2 + $0x145] sm:$0xff] %vm334_vm0, %v450_v13  ;;  %515 = vst.msk [vmem:[#allocation4 + $0x50] sm:$0xff] %vm334_vm0, %v450_v13  ;;  %674 = vrot.lane.b32.xlu0 %v7776_v26, %s7470_s16  ;;  %v7800_v31 = vld [vmem:[#allocation2 + $0xcd] sm:$0xff]  ;;  %v7866_v51 = vld [vmem:[#allocation2 + $0xc4] sm:$0xff] }
  0x3e   : > { %484 = vst.msk [vmem:[#allocation2 + $0x14d] sm:$0xff] %vm334_vm0, %v451_v14  ;;  %516 = vst.msk [vmem:[#allocation4 + $0x58] sm:$0xff] %vm334_vm0, %v451_v14  ;;  %v7796_v30 = vld [vmem:[#allocation2 + $0xe5] sm:$0xff] }
  0x3f   : > { %485 = vst.msk [vmem:[#allocation2 + $0x165] sm:$0xff] %vm334_vm0, %v452_v15  ;;  %517 = vst.msk [vmem:[#allocation4 + $0x60] sm:$0xff] %vm334_vm0, %v452_v15  ;;  %672 = vrot.lane.b32.xlu1 %v7786_v27, %s7470_s16  ;;  %v7820_v39 = vld [vmem:[#allocation2 + $0xed] sm:$0xff]  ;;  %v7878_v54 = vld [vmem:[#allocation2 + $0xe4] sm:$0xff] }
  0x40   : > { %486 = vst.msk [vmem:[#allocation2 + $0x16d] sm:$0xff] %vm334_vm0, %v453_v16  ;;  %518 = vst.msk [vmem:[#allocation4 + $0x68] sm:$0xff] %vm334_vm0, %v453_v16  ;;  %v7804_v32 = vld [vmem:[#allocation2 + $0x105] sm:$0xff] }
  0x41   : > { %487 = vst.msk [vmem:[#allocation2 + $0x185] sm:$0xff] %vm334_vm0, %v454_v17  ;;  %519 = vst.msk [vmem:[#allocation4 + $0x70] sm:$0xff] %vm334_vm0, %v454_v17  ;;  %678 = vrot.lane.b32.xlu0 %v7796_v30, %s7470_s16  ;;  %v7834_v41 = vld [vmem:[#allocation2 + $0x10d] sm:$0xff]  ;;  %v7888_v57 = vld [vmem:[#allocation2 + $0x104] sm:$0xff] }
  0x42   : > { %488 = vst.msk [vmem:[#allocation2 + $0x18d] sm:$0xff] %vm334_vm0, %v455_v18  ;;  %520 = vst.msk [vmem:[#allocation4 + $0x78] sm:$0xff] %vm334_vm0, %v455_v18  ;;  %v7830_v40 = vld [vmem:[#allocation2 + $0x125] sm:$0xff] }
  0x43   : > { %489 = vst.msk [vmem:[#allocation2 + $0x1a5] sm:$0xff] %vm334_vm0, %v456_v19  ;;  %521 = vst.msk [vmem:[#allocation4 + $0x80] sm:$0xff] %vm334_vm0, %v456_v19  ;;  %676 = vrot.lane.b32.xlu1 %v7800_v31, %s7470_s16  ;;  %v7842_v43 = vld [vmem:[#allocation2 + $0x12d] sm:$0xff]  ;;  %v7892_v59 = vld [vmem:[#allocation2 + $0x124] sm:$0xff] }
  0x44   : > { %490 = vst.msk [vmem:[#allocation2 + $0x1ad] sm:$0xff] %vm334_vm0, %v457_v20  ;;  %522 = vst.msk [vmem:[#allocation4 + $0x88] sm:$0xff] %vm334_vm0, %v457_v20  ;;  %v7838_v42 = vld [vmem:[#allocation2 + $0x145] sm:$0xff] }
  0x45   : > { %491 = vst.msk [vmem:[#allocation2 + $0x1c5] sm:$0xff] %vm334_vm0, %v458_v21  ;;  %523 = vst.msk [vmem:[#allocation4 + $0x90] sm:$0xff] %vm334_vm0, %v458_v21  ;;  %682 = vrot.lane.b32.xlu0 %v7804_v32, %s7470_s16  ;;  %v7852_v47 = vld [vmem:[#allocation2 + $0x14d] sm:$0xff]  ;;  %v7904_v61 = vld [vmem:[#allocation2 + $0x144] sm:$0xff] }
  0x46   : > { %492 = vst.msk [vmem:[#allocation2 + $0x1cd] sm:$0xff] %vm334_vm0, %v459_v22  ;;  %524 = vst.msk [vmem:[#allocation4 + $0x98] sm:$0xff] %vm334_vm0, %v459_v22  ;;  %v7846_v44 = vld [vmem:[#allocation2 + $0x165] sm:$0xff] }
  0x47   : > { %493 = vst.msk [vmem:[#allocation2 + $0x1e5] sm:$0xff] %vm334_vm0, %v460_v23  ;;  %525 = vst.msk [vmem:[#allocation4 + $0xa0] sm:$0xff] %vm334_vm0, %v460_v23  ;;  %680 = vrot.lane.b32.xlu1 %v7820_v39, %s7470_s16  ;;  %v7860_v49 = vld [vmem:[#allocation2 + $0xac] sm:$0xff]  ;;  %v7916_v1 = vld [vmem:[#allocation2 + $0x164] sm:$0xff] }
  0x48   : > { %494 = vst.msk [vmem:[#allocation2 + $0x1ed] sm:$0xff] %vm334_vm0, %v461_v24  ;;  %526 = vst.msk [vmem:[#allocation4 + $0xa8] sm:$0xff] %vm334_vm0, %v461_v24  ;;  %v7862_v50 = vld [vmem:[#allocation2 + $0x185] sm:$0xff]  ;;  %v7872_v53 = vld [vmem:[#allocation2 + $0x16d] sm:$0xff] }
  0x49   : > { %495 = vst.msk [vmem:[#allocation2 + $0x205] sm:$0xff] %vm334_vm0, %v462_v28  ;;  %527 = vst.msk [vmem:[#allocation4 + $0xb0] sm:$0xff] %vm334_vm0, %v462_v28  ;;  %686 = vrot.lane.b32.xlu0 %v7830_v40, %s7470_s16  ;;  %v7868_v52 = vld [vmem:[#allocation2 + $0xcc] sm:$0xff]  ;;  %v7920_v3 = vld [vmem:[#allocation2 + $0x184] sm:$0xff] }
  0x4a   : > { %496 = vst.msk [vmem:[#allocation2 + $0x20d] sm:$0xff] %vm334_vm0, %v463_v29  ;;  %528 = vst.msk [vmem:[#allocation4 + $0xb8] sm:$0xff] %vm334_vm0, %v463_v29  ;;  %v7880_v55 = vld [vmem:[#allocation2 + $0xec] sm:$0xff]  ;;  %v7932_v5 = vld [vmem:[#allocation2 + $0x1a4] sm:$0xff] }
  0x4b   : > { %497 = vst.msk [vmem:[#allocation2 + $0x225] sm:$0xff] %vm334_vm0, %v464_v33  ;;  %529 = vst.msk [vmem:[#allocation4 + $0xc0] sm:$0xff] %vm334_vm0, %v464_v33  ;;  %684 = vrot.lane.b32.xlu1 %v7834_v41, %s7470_s16  ;;  %v7882_v56 = vld [vmem:[#allocation2 + $0x1a5] sm:$0xff]  ;;  %v7908_v63 = vld [vmem:[#allocation2 + $0x18d] sm:$0xff] }
  0x4c   : > { %498 = vst.msk [vmem:[#allocation2 + $0x22d] sm:$0xff] %vm334_vm0, %v465_v34  ;;  %530 = vst.msk [vmem:[#allocation4 + $0xc8] sm:$0xff] %vm334_vm0, %v465_v34  ;;  %v7890_v58 = vld [vmem:[#allocation2 + $0x10c] sm:$0xff]  ;;  %v7944_v8 = vld [vmem:[#allocation2 + $0x1c4] sm:$0xff] }
  0x4d   : > { %499 = vst.msk [vmem:[#allocation2 + $0x245] sm:$0xff] %vm334_vm0, %v466_v35  ;;  %531 = vst.msk [vmem:[#allocation4 + $0xd0] sm:$0xff] %vm334_vm0, %v466_v35  ;;  %690 = vrot.lane.b32.xlu0 %v7838_v42, %s7470_s16  ;;  %v7902_v60 = vld [vmem:[#allocation2 + $0x12c] sm:$0xff] }
  0x4e   : > { %500 = vst.msk [vmem:[#allocation2 + $0x24d] sm:$0xff] %vm334_vm0, %v467_v36  ;;  %532 = vst.msk [vmem:[#allocation4 + $0xd8] sm:$0xff] %vm334_vm0, %v467_v36  ;;  %v7906_v62 = vld [vmem:[#allocation2 + $0x14c] sm:$0xff]  ;;  %v7948_v10 = vld [vmem:[#allocation2 + $0x1e4] sm:$0xff] }
  0x4f   : > { %501 = vst.msk [vmem:[#allocation2 + $0x265] sm:$0xff] %vm334_vm0, %v468_v37  ;;  %533 = vst.msk [vmem:[#allocation4 + $0xe0] sm:$0xff] %vm334_vm0, %v468_v37  ;;  %688 = vrot.lane.b32.xlu1 %v7842_v43, %s7470_s16  ;;  %v7918_v2 = vld [vmem:[#allocation2 + $0x16c] sm:$0xff]  ;;  %v471_v37 = vld [vmem:[%s7710_s15 + $0xf8] sm:$0xff] }
  0x50   : > { %502 = vst.msk [vmem:[#allocation2 + $0x26d] sm:$0xff] %vm334_vm0, %v469_v38  ;;  %534 = vst.msk [vmem:[#allocation4 + $0xe8] sm:$0xff] %vm334_vm0, %v469_v38  ;;  %v7930_v4 = vld [vmem:[#allocation2 + $0x18c] sm:$0xff]  ;;  %v7964_v12 = vld [vmem:[#allocation2 + $0x204] sm:$0xff] }
  0x51   : > { %570 = vst.msk [vmem:[#allocation3] sm:$0xff] %vm334_vm0, %v538_v45  ;;  %572 = vst.msk [vmem:[#allocation3 + $0x10] sm:$0xff] %vm334_vm0, %v7850_v46  ;;  %694 = vrot.lane.b32.xlu0 %v7846_v44, %s7470_s16  ;;  %v7934_v6 = vld [vmem:[#allocation2 + $0x1ac] sm:$0xff] }
  0x52   : > { %571 = vst.msk [vmem:[#allocation3 + $0x8] sm:$0xff] %vm334_vm0, %v539_v48  ;;  %573 = vst.msk [vmem:[#allocation3 + $0x18] sm:$0xff] %vm334_vm0, %v7860_v49  ;;  %v7936_v7 = vld [vmem:[#allocation2 + $0x1c5] sm:$0xff]  ;;  %v7968_v14 = vld [vmem:[#allocation2 + $0x1ad] sm:$0xff] }
  0x53   : > { %692 = vrot.lane.b32.xlu1 %v7852_v47, %s7470_s16  ;;  %574 = vst.msk [vmem:[#allocation3 + $0x20] sm:$0xff] %vm334_vm0, %v7866_v51  ;;  %575 = vst.msk [vmem:[#allocation3 + $0x28] sm:$0xff] %vm334_vm0, %v7868_v52  ;;  %v7946_v9 = vld [vmem:[#allocation2 + $0x1cc] sm:$0xff]  ;;  %v7980_v16 = vld [vmem:[#allocation2 + $0x224] sm:$0xff] }
  0x54   : > { %576 = vst.msk [vmem:[#allocation3 + $0x30] sm:$0xff] %vm334_vm0, %v7878_v54  ;;  %577 = vst.msk [vmem:[#allocation3 + $0x38] sm:$0xff] %vm334_vm0, %v7880_v55  ;;  %v7958_v11 = vld [vmem:[#allocation2 + $0x1ec] sm:$0xff]  ;;  %v7996_v20 = vld [vmem:[#allocation2 + $0x244] sm:$0xff] }
  0x55   : > { %698 = vrot.lane.b32.xlu0 %v7862_v50, %s7470_s16  ;;  %578 = vst.msk [vmem:[#allocation3 + $0x40] sm:$0xff] %vm334_vm0, %v7888_v57  ;;  %579 = vst.msk [vmem:[#allocation3 + $0x48] sm:$0xff] %vm334_vm0, %v7890_v58  ;;  %v7966_v13 = vld [vmem:[#allocation2 + $0x20c] sm:$0xff] }
  0x56   : > { %580 = vst.msk [vmem:[#allocation3 + $0x50] sm:$0xff] %vm334_vm0, %v7892_v59  ;;  %581 = vst.msk [vmem:[#allocation3 + $0x58] sm:$0xff] %vm334_vm0, %v7902_v60  ;;  %v7976_v15 = vld [vmem:[#allocation2 + $0x1e5] sm:$0xff]  ;;  %v7984_v18 = vld [vmem:[#allocation2 + $0x1cd] sm:$0xff] }
  0x57   : > { %582 = vst.msk [vmem:[#allocation3 + $0x60] sm:$0xff] %vm334_vm0, %v7904_v61  ;;  %583 = vst.msk [vmem:[#allocation3 + $0x68] sm:$0xff] %vm334_vm0, %v7906_v62  ;;  %696 = vrot.lane.b32.xlu1 %v7872_v53, %s7470_s16  ;;  %v7982_v17 = vld [vmem:[#allocation2 + $0x22c] sm:$0xff]  ;;  %v8012_v24 = vld [vmem:[#allocation2 + $0x264] sm:$0xff] }
  0x58   : > { %584 = vst.msk [vmem:[#allocation3 + $0x70] sm:$0xff] %vm334_vm0, %v7916_v1  ;;  %585 = vst.msk [vmem:[#allocation3 + $0x78] sm:$0xff] %vm334_vm0, %v7918_v2  ;;  %v7992_v19 = vld [vmem:[#allocation2 + $0x205] sm:$0xff]  ;;  %v8000_v22 = vld [vmem:[#allocation2 + $0x1ed] sm:$0xff] }
  0x59   : > { %586 = vst.msk [vmem:[#allocation3 + $0x80] sm:$0xff] %vm334_vm0, %v7920_v3  ;;  %587 = vst.msk [vmem:[#allocation3 + $0x88] sm:$0xff] %vm334_vm0, %v7930_v4  ;;  %702 = vrot.lane.b32.xlu0 %v7882_v56, %s7470_s16  ;;  %v7998_v21 = vld [vmem:[#allocation2 + $0x24c] sm:$0xff] }
  0x5a   : > { %588 = vst.msk [vmem:[#allocation3 + $0x90] sm:$0xff] %vm334_vm0, %v7932_v5  ;;  %589 = vst.msk [vmem:[#allocation3 + $0x98] sm:$0xff] %vm334_vm0, %v7934_v6  ;;  %v8008_v23 = vld [vmem:[#allocation2 + $0x225] sm:$0xff]  ;;  %v8016_v29 = vld [vmem:[#allocation2 + $0x20d] sm:$0xff] }
  0x5b   : > { %590 = vst.msk [vmem:[#allocation3 + $0xa0] sm:$0xff] %vm334_vm0, %v7944_v8  ;;  %591 = vst.msk [vmem:[#allocation3 + $0xa8] sm:$0xff] %vm334_vm0, %v7946_v9  ;;  %700 = vrot.lane.b32.xlu1 %v7908_v63, %s7470_s16  ;;  %v8014_v28 = vld [vmem:[#allocation2 + $0x26c] sm:$0xff] }
  0x5c   : > { %592 = vst.msk [vmem:[#allocation3 + $0xb0] sm:$0xff] %vm334_vm0, %v7948_v10  ;;  %593 = vst.msk [vmem:[#allocation3 + $0xb8] sm:$0xff] %vm334_vm0, %v7958_v11  ;;  %v8024_v33 = vld [vmem:[#allocation2 + $0x245] sm:$0xff]  ;;  %v8028_v34 = vld [vmem:[#allocation2 + $0x22d] sm:$0xff] }
  0x5d   : > { %594 = vst.msk [vmem:[#allocation3 + $0xc0] sm:$0xff] %vm334_vm0, %v7964_v12  ;;  %595 = vst.msk [vmem:[#allocation3 + $0xc8] sm:$0xff] %vm334_vm0, %v7966_v13  ;;  %706 = vrot.lane.b32.xlu0 %v7936_v7, %s7470_s16  ;;  %v8032_v35 = vld [vmem:[#allocation2 + $0x265] sm:$0xff]  ;;  %v470_v36 = vld [vmem:[%s7710_s15 + $0xf0] sm:$0xff] }
  0x5e   : > { %596 = vst.msk [vmem:[#allocation3 + $0xd0] sm:$0xff] %vm334_vm0, %v7980_v16  ;;  %597 = vst.msk [vmem:[#allocation3 + $0xd8] sm:$0xff] %vm334_vm0, %v7982_v17  ;;  %v8042_v38 = vld [vmem:[#allocation2 + $0x24d] sm:$0xff] }
  0x5f   : > { %704 = vrot.lane.b32.xlu1 %v7968_v14, %s7470_s16  ;;  %598 = vst.msk [vmem:[#allocation3 + $0xe0] sm:$0xff] %vm334_vm0, %v7996_v20  ;;  %599 = vst.msk [vmem:[#allocation3 + $0xe8] sm:$0xff] %vm334_vm0, %v7998_v21  ;;  %v795_v45 = vld [vmem:[#allocation2 + $0x86] sm:$0xff] }
  0x60   : > { %600 = vst.msk [vmem:[#allocation3 + $0xf0] sm:$0xff] %vm334_vm0, %v8012_v24  ;;  %601 = vst.msk [vmem:[#allocation3 + $0xf8] sm:$0xff] %vm334_vm0, %v8014_v28  ;;  %v8048_v48 = vld [vmem:[#allocation2 + $0x26d] sm:$0xff] }
  0x61   : > { %710 = vrot.lane.b32.xlu0 %v7976_v15, %s7470_s16  ;;  %11313 = vst [vmem:[#allocation5_spill] sm:$0xff] %v8028_v34  ;;  %11314 = vst [vmem:[#allocation6_spill] sm:$0xff] %v8032_v35  ;;  %v8051_v0 = vld [vmem:[#allocation2 + $0xa6] sm:$0xff] }
  0x62   : > { %503 = vst.msk [vmem:[#allocation2 + $0x285] sm:$0xff] %vm334_vm0, %v470_v36  ;;  %535 = vst.msk [vmem:[#allocation4 + $0xf0] sm:$0xff] %vm334_vm0, %v470_v36  ;;  %v796_v36 = vld [vmem:[#allocation2 + $0x8e] sm:$0xff] }
  0x63   : > { %708 = vrot.lane.b32.xlu1 %v7984_v18, %s7470_s16  ;;  %504 = vst.msk [vmem:[#allocation2 + $0x28d] sm:$0xff] %vm334_vm0, %v471_v37  ;;  %536 = vst.msk [vmem:[#allocation4 + $0xf8] sm:$0xff] %vm334_vm0, %v471_v37  ;;  %v8057_v37 = vld [vmem:[#allocation2 + $0xc6] sm:$0xff] }
  0x64   : > { %11315 = vst [vmem:[#allocation7_spill] sm:$0xff] %v8042_v38  ;;  %11316 = vst [vmem:[#allocation8_spill] sm:$0xff] %v8048_v48 }
  0x65   : > { %714 = vrot.lane.b32.xlu0 %v7992_v19, %s7470_s16  ;;  %11317 = vst [vmem:[#allocation9_spill] sm:$0xff] %v8051_v0  ;;  %11318 = vst [vmem:[#allocation10_spill] sm:$0xff] %v8057_v37 }
  0x67   : > { %712 = vrot.lane.b32.xlu1 %v8000_v22, %s7470_s16 }
  0x69   : > { %718 = vrot.lane.b32.xlu0 %v8008_v23, %s7470_s16 }
  0x6b   : > { %716 = vrot.lane.b32.xlu1 %v8016_v29, %s7470_s16 }
  0x6d   : > { %722 = vrot.lane.b32.xlu0 %v8024_v33, %s7470_s16 }
  0x6f   : > { %720 = vrot.lane.b32.xlu1 %v8028_v34, %s7470_s16 }
  0x71   : > { %726 = vrot.lane.b32.xlu0 %v8032_v35, %s7470_s16  ;;  %v8060_v35 = vld [vmem:[#allocation2 + $0xae] sm:$0xff] }
  0x72   : > { %11319 = vst [vmem:[#allocation11_spill] sm:$0xff] %v8060_v35 }
  0x73   : > { %724 = vrot.lane.b32.xlu1 %v8042_v38, %s7470_s16  ;;  %v8064_v38 = vld [vmem:[#allocation2 + $0xe6] sm:$0xff] }
  0x74   : > { %11320 = vst [vmem:[#allocation12_spill] sm:$0xff] %v8064_v38 }
  0x75   : > { %859 = vrot.lane.b32.xlu0 %v795_v45, %s7471_s17  ;;  %v8068_v45 = vld [vmem:[#allocation2 + $0xce] sm:$0xff] }
  0x76   : > { %11321 = vst [vmem:[#allocation13_spill] sm:$0xff] %v8068_v45 }
  0x77   : > { %728 = vrot.lane.b32.xlu1 %v8048_v48, %s7470_s16  ;;  %v8148_v48 = vld [vmem:[#allocation2 + $0x20e] sm:$0xff] }
  0x78   : > { %11341 = vst [vmem:[#allocation33_spill] sm:$0xff] %v8148_v48 }
  0x79   : > { %863 = vrot.lane.b32.xlu0 %v8051_v0, %s7471_s17  ;;  %v8072_v0 = vld [vmem:[#allocation2 + $0x106] sm:$0xff] }
  0x7a   : > { %11322 = vst [vmem:[#allocation14_spill] sm:$0xff] %v8072_v0 }
  0x7b   : > { %861 = vrot.lane.b32.xlu1 %v796_v36, %s7471_s17  ;;  %v8076_v36 = vld [vmem:[#allocation2 + $0xee] sm:$0xff] }
  0x7c   : > { %11323 = vst [vmem:[#allocation15_spill] sm:$0xff] %v8076_v36 }
  0x7d   : > { %867 = vrot.lane.b32.xlu0 %v8057_v37, %s7471_s17  ;;  %v8080_v37 = vld [vmem:[#allocation2 + $0x126] sm:$0xff] }
  0x7e   : > { %11324 = vst [vmem:[#allocation16_spill] sm:$0xff] %v8080_v37 }
  0x7f   : > { %865 = vrot.lane.b32.xlu1 %v8060_v35, %s7471_s17  ;;  %v8084_v35 = vld [vmem:[#allocation2 + $0x10e] sm:$0xff] }
  0x80   : > { %11325 = vst [vmem:[#allocation17_spill] sm:$0xff] %v8084_v35 }
  0x81   : > { %871 = vrot.lane.b32.xlu0 %v8064_v38, %s7471_s17  ;;  %v8088_v38 = vld [vmem:[#allocation2 + $0x146] sm:$0xff] }
  0x82   : > { %11326 = vst [vmem:[#allocation18_spill] sm:$0xff] %v8088_v38 }
  0x83   : > { %869 = vrot.lane.b32.xlu1 %v8068_v45, %s7471_s17  ;;  %v8092_v45 = vld [vmem:[#allocation2 + $0x12e] sm:$0xff] }
  0x84   : > { %11327 = vst [vmem:[#allocation19_spill] sm:$0xff] %v8092_v45 }
  0x85   : > { %875 = vrot.lane.b32.xlu0 %v8072_v0, %s7471_s17  ;;  %v8096_v0 = vld [vmem:[#allocation2 + $0x166] sm:$0xff] }
  0x86   : > { %11328 = vst [vmem:[#allocation20_spill] sm:$0xff] %v8096_v0 }
  0x87   : > { %873 = vrot.lane.b32.xlu1 %v8076_v36, %s7471_s17  ;;  %v8100_v36 = vld [vmem:[#allocation2 + $0x14e] sm:$0xff] }
  0x88   : > { %11329 = vst [vmem:[#allocation21_spill] sm:$0xff] %v8100_v36 }
  0x89   : > { %879 = vrot.lane.b32.xlu0 %v8080_v37, %s7471_s17  ;;  %v8104_v37 = vld [vmem:[#allocation2 + $0x186] sm:$0xff] }
  0x8a   : > { %11330 = vst [vmem:[#allocation22_spill] sm:$0xff] %v8104_v37 }
  0x8b   : > { %877 = vrot.lane.b32.xlu1 %v8084_v35, %s7471_s17  ;;  %v8108_v35 = vld [vmem:[#allocation2 + $0x16e] sm:$0xff] }
  0x8c   : > { %11331 = vst [vmem:[#allocation23_spill] sm:$0xff] %v8108_v35 }
  0x8d   : > { %883 = vrot.lane.b32.xlu0 %v8088_v38, %s7471_s17  ;;  %v8112_v38 = vld [vmem:[#allocation2 + $0x1a6] sm:$0xff] }
  0x8e   : > { %11332 = vst [vmem:[#allocation24_spill] sm:$0xff] %v8112_v38 }
  0x8f   : > { %881 = vrot.lane.b32.xlu1 %v8092_v45, %s7471_s17  ;;  %v8116_v45 = vld [vmem:[#allocation2 + $0x18e] sm:$0xff] }
  0x90   : > { %11333 = vst [vmem:[#allocation25_spill] sm:$0xff] %v8116_v45 }
  0x91   : > { %887 = vrot.lane.b32.xlu0 %v8096_v0, %s7471_s17  ;;  %v8120_v0 = vld [vmem:[#allocation2 + $0x1c6] sm:$0xff] }
  0x92   : > { %11334 = vst [vmem:[#allocation26_spill] sm:$0xff] %v8120_v0 }
  0x93   : > { %885 = vrot.lane.b32.xlu1 %v8100_v36, %s7471_s17  ;;  %v8124_v36 = vld [vmem:[#allocation2 + $0x1ae] sm:$0xff] }
  0x94   : > { %11335 = vst [vmem:[#allocation27_spill] sm:$0xff] %v8124_v36 }
  0x95   : > { %891 = vrot.lane.b32.xlu0 %v8104_v37, %s7471_s17  ;;  %v8128_v37 = vld [vmem:[#allocation2 + $0x1e6] sm:$0xff] }
  0x96   : > { %11336 = vst [vmem:[#allocation28_spill] sm:$0xff] %v8128_v37 }
  0x97   : > { %889 = vrot.lane.b32.xlu1 %v8108_v35, %s7471_s17  ;;  %v8132_v35 = vld [vmem:[#allocation2 + $0x1ce] sm:$0xff] }
  0x98   : > { %11337 = vst [vmem:[#allocation29_spill] sm:$0xff] %v8132_v35 }
  0x99   : > { %895 = vrot.lane.b32.xlu0 %v8112_v38, %s7471_s17  ;;  %v8136_v38 = vld [vmem:[#allocation2 + $0x206] sm:$0xff] }
  0x9a   : > { %11338 = vst [vmem:[#allocation30_spill] sm:$0xff] %v8136_v38 }
  0x9b   : > { %893 = vrot.lane.b32.xlu1 %v8116_v45, %s7471_s17  ;;  %v8140_v45 = vld [vmem:[#allocation2 + $0x1ee] sm:$0xff] }
  0x9c   : > { %11339 = vst [vmem:[#allocation31_spill] sm:$0xff] %v8140_v45 }
  0x9d   : > { %899 = vrot.lane.b32.xlu0 %v8120_v0, %s7471_s17  ;;  %v8144_v0 = vld [vmem:[#allocation2 + $0x226] sm:$0xff] }
  0x9e   : > { %11340 = vst [vmem:[#allocation32_spill] sm:$0xff] %v8144_v0 }
  0x9f   : > { %897 = vrot.lane.b32.xlu1 %v8124_v36, %s7471_s17  ;;  %v667_v36 = vpop.permute.xlu0 %666 }
  0xa0   : > { %763 = vst.msk [vmem:[#allocation3] sm:$0xff] %vm762_vm1, %v667_v36  ;;  %v8163_v36 = vld [vmem:[#allocation2 + $0x266] sm:$0xff] }
  0xa1   : > { %903 = vrot.lane.b32.xlu0 %v8128_v37, %s7471_s17  ;;  %v8157_v37 = vld [vmem:[#allocation2 + $0x22e] sm:$0xff] }
  0xa2   : > { %11342 = vst [vmem:[#allocation34_spill] sm:$0xff] %v8157_v37 }
  0xa3   : > { %901 = vrot.lane.b32.xlu1 %v8132_v35, %s7471_s17  ;;  %v8153_v35 = vld [vmem:[#allocation2 + $0x246] sm:$0xff] }
  0xa5   : > { %907 = vrot.lane.b32.xlu0 %v8136_v38, %s7471_s17  ;;  %v669_v38 = vpop.permute.xlu0 %668 }
  0xa6   : > { %764 = vst.msk [vmem:[#allocation3 + $0x8] sm:$0xff] %vm762_vm1, %v669_v38  ;;  %v8175_v38 = vld [vmem:[#allocation2 + $0x26e] sm:$0xff] }
  0xa7   : > { %905 = vrot.lane.b32.xlu1 %v8140_v45, %s7471_s17  ;;  %v8167_v45 = vld [vmem:[#allocation2 + $0x24e] sm:$0xff] }
  0xa9   : > { %911 = vrot.lane.b32.xlu0 %v8144_v0, %s7471_s17 }
  0xab   : > { %909 = vrot.lane.b32.xlu1 %v8148_v48, %s7471_s17 }
  0xad   : > { %v671_v34 = vpop.permute.xlu1 %670  ;;  %915 = vrot.lane.b32.xlu0 %v8153_v35, %s7471_s17 }
  0xae   : > { %765 = vst.msk [vmem:[#allocation3 + $0x10] sm:$0xff] %vm762_vm1, %v671_v34 }
  0xaf   : > { %913 = vrot.lane.b32.xlu1 %v8157_v37, %s7471_s17  ;;  %v675_v0 = vpop.permute.xlu0 %674 }
  0xb0   : > { %767 = vst.msk [vmem:[#allocation3 + $0x20] sm:$0xff] %vm762_vm1, %v675_v0 }
  0xb1   : > { %v673_v48 = vpop.permute.xlu1 %672  ;;  %919 = vrot.lane.b32.xlu0 %v8163_v36, %s7471_s17 }
  0xb2   : > { %766 = vst.msk [vmem:[#allocation3 + $0x18] sm:$0xff] %vm762_vm1, %v673_v48 }
  0xb3   : > { %917 = vrot.lane.b32.xlu1 %v8167_v45, %s7471_s17  ;;  %v679_v34 = vpop.permute.xlu0 %678 }
  0xb4   : > { %769 = vst.msk [vmem:[#allocation3 + $0x30] sm:$0xff] %vm762_vm1, %v679_v34 }
  0xb5   : > { %v677_v37 = vpop.permute.xlu1 %676  ;;  %1052 = vrot.lane.b32.xlu0 %v7850_v46, %s7472_s18 }
  0xb6   : > { %768 = vst.msk [vmem:[#allocation3 + $0x28] sm:$0xff] %vm762_vm1, %v677_v37 }
  0xb7   : > { %921 = vrot.lane.b32.xlu1 %v8175_v38, %s7471_s17  ;;  %v683_v0 = vpop.permute.xlu0 %682 }
  0xb8   : > { %771 = vst.msk [vmem:[#allocation3 + $0x40] sm:$0xff] %vm762_vm1, %v683_v0 }
  0xb9   : > { %v681_v48 = vpop.permute.xlu1 %680  ;;  %1056 = vrot.lane.b32.xlu0 %v7866_v51, %s7472_s18 }
  0xba   : > { %770 = vst.msk [vmem:[#allocation3 + $0x38] sm:$0xff] %vm762_vm1, %v681_v48 }
  0xbb   : > { %1054 = vrot.lane.b32.xlu1 %v7860_v49, %s7472_s18  ;;  %v687_v34 = vpop.permute.xlu0 %686 }
  0xbc   : > { %773 = vst.msk [vmem:[#allocation3 + $0x50] sm:$0xff] %vm762_vm1, %v687_v34 }
  0xbd   : > { %v685_v46 = vpop.permute.xlu1 %684  ;;  %1060 = vrot.lane.b32.xlu0 %v7878_v54, %s7472_s18 }
  0xbe   : > { %772 = vst.msk [vmem:[#allocation3 + $0x48] sm:$0xff] %vm762_vm1, %v685_v46 }
  0xbf   : > { %1058 = vrot.lane.b32.xlu1 %v7868_v52, %s7472_s18  ;;  %v691_v37 = vpop.permute.xlu0 %690 }
  0xc0   : > { %775 = vst.msk [vmem:[#allocation3 + $0x60] sm:$0xff] %vm762_vm1, %v691_v37 }
  0xc1   : > { %v689_v0 = vpop.permute.xlu1 %688  ;;  %1064 = vrot.lane.b32.xlu0 %v7888_v57, %s7472_s18 }
  0xc2   : > { %774 = vst.msk [vmem:[#allocation3 + $0x58] sm:$0xff] %vm762_vm1, %v689_v0 }
  0xc3   : > { %1062 = vrot.lane.b32.xlu1 %v7880_v55, %s7472_s18  ;;  %v695_v49 = vpop.permute.xlu0 %694 }
  0xc4   : > { %777 = vst.msk [vmem:[#allocation3 + $0x70] sm:$0xff] %vm762_vm1, %v695_v49 }
  0xc5   : > { %v693_v48 = vpop.permute.xlu1 %692  ;;  %1068 = vrot.lane.b32.xlu0 %v7892_v59, %s7472_s18 }
  0xc6   : > { %776 = vst.msk [vmem:[#allocation3 + $0x68] sm:$0xff] %vm762_vm1, %v693_v48 }
  0xc7   : > { %1066 = vrot.lane.b32.xlu1 %v7890_v58, %s7472_s18  ;;  %v699_v34 = vpop.permute.xlu0 %698 }
  0xc8   : > { %779 = vst.msk [vmem:[#allocation3 + $0x80] sm:$0xff] %vm762_vm1, %v699_v34 }
  0xc9   : > { %v697_v46 = vpop.permute.xlu1 %696  ;;  %1072 = vrot.lane.b32.xlu0 %v7904_v61, %s7472_s18 }
  0xca   : > { %778 = vst.msk [vmem:[#allocation3 + $0x78] sm:$0xff] %vm762_vm1, %v697_v46 }
  0xcb   : > { %1070 = vrot.lane.b32.xlu1 %v7902_v60, %s7472_s18  ;;  %v703_v37 = vpop.permute.xlu0 %702 }
  0xcc   : > { %781 = vst.msk [vmem:[#allocation3 + $0x90] sm:$0xff] %vm762_vm1, %v703_v37 }
  0xcd   : > { %v701_v0 = vpop.permute.xlu1 %700  ;;  %1076 = vrot.lane.b32.xlu0 %v7916_v1, %s7472_s18 }
  0xce   : > { %780 = vst.msk [vmem:[#allocation3 + $0x88] sm:$0xff] %vm762_vm1, %v701_v0 }
  0xcf   : > { %1074 = vrot.lane.b32.xlu1 %v7906_v62, %s7472_s18  ;;  %v707_v49 = vpop.permute.xlu0 %706 }
  0xd0   : > { %783 = vst.msk [vmem:[#allocation3 + $0xa0] sm:$0xff] %vm762_vm1, %v707_v49 }
  0xd1   : > { %v705_v48 = vpop.permute.xlu1 %704  ;;  %1080 = vrot.lane.b32.xlu0 %v7920_v3, %s7472_s18 }
  0xd2   : > { %782 = vst.msk [vmem:[#allocation3 + $0x98] sm:$0xff] %vm762_vm1, %v705_v48 }
  0xd3   : > { %1078 = vrot.lane.b32.xlu1 %v7918_v2, %s7472_s18  ;;  %v711_v34 = vpop.permute.xlu0 %710 }
  0xd4   : > { %785 = vst.msk [vmem:[#allocation3 + $0xb0] sm:$0xff] %vm762_vm1, %v711_v34 }
  0xd5   : > { %v709_v46 = vpop.permute.xlu1 %708  ;;  %1084 = vrot.lane.b32.xlu0 %v7932_v5, %s7472_s18 }
  0xd6   : > { %784 = vst.msk [vmem:[#allocation3 + $0xa8] sm:$0xff] %vm762_vm1, %v709_v46 }
  0xd7   : > { %1082 = vrot.lane.b32.xlu1 %v7930_v4, %s7472_s18  ;;  %v715_v37 = vpop.permute.xlu0 %714 }
  0xd8   : > { %787 = vst.msk [vmem:[#allocation3 + $0xc0] sm:$0xff] %vm762_vm1, %v715_v37 }
  0xd9   : > { %v713_v0 = vpop.permute.xlu1 %712  ;;  %1088 = vrot.lane.b32.xlu0 %v7944_v8, %s7472_s18 }
  0xda   : > { %786 = vst.msk [vmem:[#allocation3 + $0xb8] sm:$0xff] %vm762_vm1, %v713_v0 }
  0xdb   : > { %1086 = vrot.lane.b32.xlu1 %v7934_v6, %s7472_s18  ;;  %v719_v49 = vpop.permute.xlu0 %718 }
  0xdc   : > { %789 = vst.msk [vmem:[#allocation3 + $0xd0] sm:$0xff] %vm762_vm1, %v719_v49 }
  0xdd   : > { %v717_v48 = vpop.permute.xlu1 %716  ;;  %1092 = vrot.lane.b32.xlu0 %v7948_v10, %s7472_s18 }
  0xde   : > { %788 = vst.msk [vmem:[#allocation3 + $0xc8] sm:$0xff] %vm762_vm1, %v717_v48 }
  0xdf   : > { %1090 = vrot.lane.b32.xlu1 %v7946_v9, %s7472_s18  ;;  %v723_v34 = vpop.permute.xlu0 %722 }
  0xe0   : > { %791 = vst.msk [vmem:[#allocation3 + $0xe0] sm:$0xff] %vm762_vm1, %v723_v34 }
  0xe1   : > { %v721_v46 = vpop.permute.xlu1 %720  ;;  %1096 = vrot.lane.b32.xlu0 %v7964_v12, %s7472_s18 }
  0xe2   : > { %790 = vst.msk [vmem:[#allocation3 + $0xd8] sm:$0xff] %vm762_vm1, %v721_v46 }
  0xe3   : > { %1094 = vrot.lane.b32.xlu1 %v7958_v11, %s7472_s18  ;;  %v727_v37 = vpop.permute.xlu0 %726 }
  0xe4   : > { %793 = vst.msk [vmem:[#allocation3 + $0xf0] sm:$0xff] %vm762_vm1, %v727_v37  ;;  %v8265_v37 = vld [vmem:[#allocation2 + $0x284] sm:$0xff] }
  0xe5   : > { %v725_v0 = vpop.permute.xlu1 %724  ;;  %1100 = vrot.lane.b32.xlu0 %v7980_v16, %s7472_s18 }
  0xe6   : > { %792 = vst.msk [vmem:[#allocation3 + $0xe8] sm:$0xff] %vm762_vm1, %v725_v0 }
  0xe7   : > { %1098 = vrot.lane.b32.xlu1 %v7966_v13, %s7472_s18  ;;  %v860_v49 = vpop.permute.xlu0 %859 }
  0xe8   : > { %956 = vst.msk [vmem:[#allocation3] sm:$0xff] %vm955_vm2, %v860_v49 }
  0xe9   : > { %v729_v48 = vpop.permute.xlu1 %728  ;;  %1104 = vrot.lane.b32.xlu0 %v7996_v20, %s7472_s18 }
  0xea   : > { %794 = vst.msk [vmem:[#allocation3 + $0xf8] sm:$0xff] %vm762_vm1, %v729_v48 }
  0xeb   : > { %1102 = vrot.lane.b32.xlu1 %v7982_v17, %s7472_s18  ;;  %v864_v34 = vpop.permute.xlu0 %863 }
  0xec   : > { %958 = vst.msk [vmem:[#allocation3 + $0x10] sm:$0xff] %vm955_vm2, %v864_v34  ;;  %v8275_v34 = vld [vmem:[#allocation2 + $0x28c] sm:$0xff] }
  0xed   : > { %v862_v46 = vpop.permute.xlu1 %861  ;;  %1108 = vrot.lane.b32.xlu0 %v8012_v24, %s7472_s18 }
  0xee   : > { %957 = vst.msk [vmem:[#allocation3 + $0x8] sm:$0xff] %vm955_vm2, %v862_v46 }
  0xef   : > { %1106 = vrot.lane.b32.xlu1 %v7998_v21, %s7472_s18  ;;  %v868_v0 = vpop.permute.xlu0 %867 }
  0xf0   : > { %960 = vst.msk [vmem:[#allocation3 + $0x20] sm:$0xff] %vm955_vm2, %v868_v0 }
  0xf1   : > { %v866_v49 = vpop.permute.xlu1 %865  ;;  %1112 = vrot.lane.b32.xlu0 %v8265_v37, %s7472_s18 }
  0xf2   : > { %959 = vst.msk [vmem:[#allocation3 + $0x18] sm:$0xff] %vm955_vm2, %v866_v49 }
  0xf3   : > { %1110 = vrot.lane.b32.xlu1 %v8014_v28, %s7472_s18  ;;  %v872_v48 = vpop.permute.xlu0 %871 }
  0xf4   : > { %962 = vst.msk [vmem:[#allocation3 + $0x30] sm:$0xff] %vm955_vm2, %v872_v48 }
  0xf5   : > { %v870_v46 = vpop.permute.xlu1 %869  ;;  %1245 = vrot.lane.b32.xlu0 %v7774_v25, %s7473_s19 }
  0xf6   : > { %961 = vst.msk [vmem:[#allocation3 + $0x28] sm:$0xff] %vm955_vm2, %v870_v46 }
  0xf7   : > { %1114 = vrot.lane.b32.xlu1 %v8275_v34, %s7472_s18  ;;  %v876_v0 = vpop.permute.xlu0 %875 }
  0xf8   : > { %964 = vst.msk [vmem:[#allocation3 + $0x40] sm:$0xff] %vm955_vm2, %v876_v0 }
  0xf9   : > { %v874_v49 = vpop.permute.xlu1 %873  ;;  %1249 = vrot.lane.b32.xlu0 %v7776_v26, %s7473_s19 }
  0xfa   : > { %963 = vst.msk [vmem:[#allocation3 + $0x38] sm:$0xff] %vm955_vm2, %v874_v49  ;;  %v11344_v49 = vld [vmem:[#allocation6_spill] sm:$0xff] }
  0xfb   : > { %1247 = vrot.lane.b32.xlu1 %v7786_v27, %s7473_s19  ;;  %v880_v48 = vpop.permute.xlu0 %879 }
  0xfc   : > { %966 = vst.msk [vmem:[#allocation3 + $0x50] sm:$0xff] %vm955_vm2, %v880_v48  ;;  %v11345_v48 = vld [vmem:[#allocation7_spill] sm:$0xff] }
  0xfd   : > { %v878_v25 = vpop.permute.xlu1 %877  ;;  %1253 = vrot.lane.b32.xlu0 %v7796_v30, %s7473_s19 }
  0xfe   : > { %965 = vst.msk [vmem:[#allocation3 + $0x48] sm:$0xff] %vm955_vm2, %v878_v25 }
  0xff   : > { %1251 = vrot.lane.b32.xlu1 %v7800_v31, %s7473_s19  ;;  %v884_v46 = vpop.permute.xlu0 %883 }
 0x100   : > { %968 = vst.msk [vmem:[#allocation3 + $0x60] sm:$0xff] %vm955_vm2, %v884_v46  ;;  %v11346_v46 = vld [vmem:[#allocation8_spill] sm:$0xff] }
 0x101   : > { %v882_v26 = vpop.permute.xlu1 %881  ;;  %1257 = vrot.lane.b32.xlu0 %v7804_v32, %s7473_s19 }
 0x102   : > { %967 = vst.msk [vmem:[#allocation3 + $0x58] sm:$0xff] %vm955_vm2, %v882_v26 }
 0x103   : > { %1255 = vrot.lane.b32.xlu1 %v7820_v39, %s7473_s19  ;;  %v888_v27 = vpop.permute.xlu0 %887 }
 0x104   : > { %970 = vst.msk [vmem:[#allocation3 + $0x70] sm:$0xff] %vm955_vm2, %v888_v27  ;;  %v8375_v27 = vld [vmem:[#allocation2 + $0x28d] sm:$0xff] }
 0x105   : > { %v886_v30 = vpop.permute.xlu1 %885  ;;  %1261 = vrot.lane.b32.xlu0 %v7830_v40, %s7473_s19 }
 0x106   : > { %969 = vst.msk [vmem:[#allocation3 + $0x68] sm:$0xff] %vm955_vm2, %v886_v30 }
 0x107   : > { %1259 = vrot.lane.b32.xlu1 %v7834_v41, %s7473_s19  ;;  %v892_v31 = vpop.permute.xlu0 %891 }
 0x108   : > { %972 = vst.msk [vmem:[#allocation3 + $0x80] sm:$0xff] %vm955_vm2, %v892_v31  ;;  %v11347_v31 = vld [vmem:[#allocation9_spill] sm:$0xff] }
 0x109   : > { %v890_v32 = vpop.permute.xlu1 %889  ;;  %1265 = vrot.lane.b32.xlu0 %v7838_v42, %s7473_s19 }
 0x10a   : > { %971 = vst.msk [vmem:[#allocation3 + $0x78] sm:$0xff] %vm955_vm2, %v890_v32 }
 0x10b   : > { %1263 = vrot.lane.b32.xlu1 %v7842_v43, %s7473_s19  ;;  %v896_v39 = vpop.permute.xlu0 %895 }
 0x10c   : > { %974 = vst.msk [vmem:[#allocation3 + $0x90] sm:$0xff] %vm955_vm2, %v896_v39 }
 0x10d   : > { %v894_v40 = vpop.permute.xlu1 %893  ;;  %1269 = vrot.lane.b32.xlu0 %v7846_v44, %s7473_s19 }
 0x10e   : > { %973 = vst.msk [vmem:[#allocation3 + $0x88] sm:$0xff] %vm955_vm2, %v894_v40  ;;  %v11348_v40 = vld [vmem:[#allocation10_spill] sm:$0xff] }
 0x10f   : > { %1267 = vrot.lane.b32.xlu1 %v7852_v47, %s7473_s19  ;;  %v900_v41 = vpop.permute.xlu0 %899 }
 0x110   : > { %976 = vst.msk [vmem:[#allocation3 + $0xa0] sm:$0xff] %vm955_vm2, %v900_v41  ;;  %v11349_v41 = vld [vmem:[#allocation11_spill] sm:$0xff] }
 0x111   : > { %v898_v42 = vpop.permute.xlu1 %897  ;;  %1273 = vrot.lane.b32.xlu0 %v7862_v50, %s7473_s19 }
 0x112   : > { %975 = vst.msk [vmem:[#allocation3 + $0x98] sm:$0xff] %vm955_vm2, %v898_v42 }
 0x113   : > { %1271 = vrot.lane.b32.xlu1 %v7872_v53, %s7473_s19  ;;  %v904_v43 = vpop.permute.xlu0 %903 }
 0x114   : > { %978 = vst.msk [vmem:[#allocation3 + $0xb0] sm:$0xff] %vm955_vm2, %v904_v43 }
 0x115   : > { %v902_v44 = vpop.permute.xlu1 %901  ;;  %1277 = vrot.lane.b32.xlu0 %v7882_v56, %s7473_s19 }
 0x116   : > { %977 = vst.msk [vmem:[#allocation3 + $0xa8] sm:$0xff] %vm955_vm2, %v902_v44  ;;  %v11350_v44 = vld [vmem:[#allocation12_spill] sm:$0xff] }
 0x117   : > { %1275 = vrot.lane.b32.xlu1 %v7908_v63, %s7473_s19  ;;  %v908_v47 = vpop.permute.xlu0 %907 }
 0x118   : > { %980 = vst.msk [vmem:[#allocation3 + $0xc0] sm:$0xff] %vm955_vm2, %v908_v47  ;;  %v11351_v47 = vld [vmem:[#allocation13_spill] sm:$0xff] }
 0x119   : > { %v906_v50 = vpop.permute.xlu1 %905  ;;  %1281 = vrot.lane.b32.xlu0 %v7936_v7, %s7473_s19 }
 0x11a   : > { %979 = vst.msk [vmem:[#allocation3 + $0xb8] sm:$0xff] %vm955_vm2, %v906_v50 }
 0x11b   : > { %1279 = vrot.lane.b32.xlu1 %v7968_v14, %s7473_s19  ;;  %v912_v53 = vpop.permute.xlu0 %911 }
 0x11c   : > { %982 = vst.msk [vmem:[#allocation3 + $0xd0] sm:$0xff] %vm955_vm2, %v912_v53 }
 0x11d   : > { %v910_v56 = vpop.permute.xlu1 %909  ;;  %1285 = vrot.lane.b32.xlu0 %v7976_v15, %s7473_s19 }
 0x11e   : > { %981 = vst.msk [vmem:[#allocation3 + $0xc8] sm:$0xff] %vm955_vm2, %v910_v56  ;;  %v11352_v56 = vld [vmem:[#allocation14_spill] sm:$0xff] }
 0x11f   : > { %1283 = vrot.lane.b32.xlu1 %v7984_v18, %s7473_s19  ;;  %v916_v63 = vpop.permute.xlu0 %915 }
 0x120   : > { %984 = vst.msk [vmem:[#allocation3 + $0xe0] sm:$0xff] %vm955_vm2, %v916_v63  ;;  %v11353_v63 = vld [vmem:[#allocation15_spill] sm:$0xff] }
 0x121   : > { %v914_v7 = vpop.permute.xlu1 %913  ;;  %1289 = vrot.lane.b32.xlu0 %v7992_v19, %s7473_s19 }
 0x122   : > { %983 = vst.msk [vmem:[#allocation3 + $0xd8] sm:$0xff] %vm955_vm2, %v914_v7 }
 0x123   : > { %1287 = vrot.lane.b32.xlu1 %v8000_v22, %s7473_s19  ;;  %v920_v14 = vpop.permute.xlu0 %919  ;;  %v11343_v22 = vld [vmem:[#allocation5_spill] sm:$0xff] }
 0x124   : > { %986 = vst.msk [vmem:[#allocation3 + $0xf0] sm:$0xff] %vm955_vm2, %v920_v14 }
 0x125   : > { %v918_v15 = vpop.permute.xlu1 %917  ;;  %1293 = vrot.lane.b32.xlu0 %v8008_v23, %s7473_s19 }
 0x126   : > { %985 = vst.msk [vmem:[#allocation3 + $0xe8] sm:$0xff] %vm955_vm2, %v918_v15  ;;  %v11354_v15 = vld [vmem:[#allocation16_spill] sm:$0xff] }
 0x127   : > { %1291 = vrot.lane.b32.xlu1 %v8016_v29, %s7473_s19  ;;  %v1053_v18 = vpop.permute.xlu0 %1052  ;;  %v8365_v29 = vld [vmem:[#allocation2 + $0x285] sm:$0xff] }
 0x128   : > { %1149 = vst.msk [vmem:[#allocation3] sm:$0xff] %vm1148_vm3, %v1053_v18  ;;  %v11355_v18 = vld [vmem:[#allocation17_spill] sm:$0xff] }
 0x129   : > { %v922_v19 = vpop.permute.xlu1 %921  ;;  %1297 = vrot.lane.b32.xlu0 %v8024_v33, %s7473_s19 }
 0x12a   : > { %987 = vst.msk [vmem:[#allocation3 + $0xf8] sm:$0xff] %vm955_vm2, %v922_v19 }
 0x12b   : > { %1295 = vrot.lane.b32.xlu1 %v11343_v22, %s7473_s19  ;;  %v1057_v0 = vpop.permute.xlu0 %1056 }
 0x12c   : > { %1151 = vst.msk [vmem:[#allocation3 + $0x10] sm:$0xff] %vm1148_vm3, %v1057_v0  ;;  %v11356_v0 = vld [vmem:[#allocation18_spill] sm:$0xff] }
 0x12d   : > { %v1055_v23 = vpop.permute.xlu1 %1054  ;;  %1301 = vrot.lane.b32.xlu0 %v11344_v49, %s7473_s19 }
 0x12e   : > { %1150 = vst.msk [vmem:[#allocation3 + $0x8] sm:$0xff] %vm1148_vm3, %v1055_v23  ;;  %v11357_v23 = vld [vmem:[#allocation19_spill] sm:$0xff] }
 0x12f   : > { %1299 = vrot.lane.b32.xlu1 %v11345_v48, %s7473_s19  ;;  %v1061_v33 = vpop.permute.xlu0 %1060 }
 0x130   : > { %1153 = vst.msk [vmem:[#allocation3 + $0x20] sm:$0xff] %vm1148_vm3, %v1061_v33  ;;  %v11358_v33 = vld [vmem:[#allocation20_spill] sm:$0xff] }
 0x131   : > { %v1059_v25 = vpop.permute.xlu1 %1058  ;;  %1305 = vrot.lane.b32.xlu0 %v8365_v29, %s7473_s19 }
 0x132   : > { %1152 = vst.msk [vmem:[#allocation3 + $0x18] sm:$0xff] %vm1148_vm3, %v1059_v25  ;;  %v11359_v25 = vld [vmem:[#allocation21_spill] sm:$0xff] }
 0x133   : > { %1303 = vrot.lane.b32.xlu1 %v11346_v46, %s7473_s19  ;;  %v1065_v26 = vpop.permute.xlu0 %1064 }
 0x134   : > { %1155 = vst.msk [vmem:[#allocation3 + $0x30] sm:$0xff] %vm1148_vm3, %v1065_v26 }
 0x135   : > { %v1063_v30 = vpop.permute.xlu1 %1062  ;;  %1438 = vrot.lane.b32.xlu0 %v11347_v31, %s7474_s20  ;;  %v11361_v31 = vld [vmem:[#allocation23_spill] sm:$0xff] }
 0x136   : > { %1154 = vst.msk [vmem:[#allocation3 + $0x28] sm:$0xff] %vm1148_vm3, %v1063_v30  ;;  %v11360_v30 = vld [vmem:[#allocation22_spill] sm:$0xff] }
 0x137   : > { %1307 = vrot.lane.b32.xlu1 %v8375_v27, %s7473_s19  ;;  %v1069_v32 = vpop.permute.xlu0 %1068 }
 0x138   : > { %1157 = vst.msk [vmem:[#allocation3 + $0x40] sm:$0xff] %vm1148_vm3, %v1069_v32 }
 0x139   : > { %v1067_v39 = vpop.permute.xlu1 %1066  ;;  %1442 = vrot.lane.b32.xlu0 %v11348_v40, %s7474_s20  ;;  %v11362_v40 = vld [vmem:[#allocation24_spill] sm:$0xff] }
 0x13a   : > { %1156 = vst.msk [vmem:[#allocation3 + $0x38] sm:$0xff] %vm1148_vm3, %v1067_v39 }
 0x13b   : > { %1440 = vrot.lane.b32.xlu1 %v11349_v41, %s7474_s20  ;;  %v1073_v42 = vpop.permute.xlu0 %1072  ;;  %v11363_v41 = vld [vmem:[#allocation25_spill] sm:$0xff] }
 0x13c   : > { %1159 = vst.msk [vmem:[#allocation3 + $0x50] sm:$0xff] %vm1148_vm3, %v1073_v42 }
 0x13d   : > { %v1071_v43 = vpop.permute.xlu1 %1070  ;;  %1446 = vrot.lane.b32.xlu0 %v11350_v44, %s7474_s20  ;;  %v11364_v44 = vld [vmem:[#allocation26_spill] sm:$0xff] }
 0x13e   : > { %1158 = vst.msk [vmem:[#allocation3 + $0x48] sm:$0xff] %vm1148_vm3, %v1071_v43 }
 0x13f   : > { %1444 = vrot.lane.b32.xlu1 %v11351_v47, %s7474_s20  ;;  %v1077_v50 = vpop.permute.xlu0 %1076  ;;  %v11365_v47 = vld [vmem:[#allocation27_spill] sm:$0xff] }
 0x140   : > { %1161 = vst.msk [vmem:[#allocation3 + $0x60] sm:$0xff] %vm1148_vm3, %v1077_v50 }
 0x141   : > { %v1075_v53 = vpop.permute.xlu1 %1074  ;;  %1450 = vrot.lane.b32.xlu0 %v11352_v56, %s7474_s20  ;;  %v11366_v56 = vld [vmem:[#allocation28_spill] sm:$0xff] }
 0x142   : > { %1160 = vst.msk [vmem:[#allocation3 + $0x58] sm:$0xff] %vm1148_vm3, %v1075_v53 }
 0x143   : > { %1448 = vrot.lane.b32.xlu1 %v11353_v63, %s7474_s20  ;;  %v1081_v7 = vpop.permute.xlu0 %1080  ;;  %v11367_v63 = vld [vmem:[#allocation29_spill] sm:$0xff] }
 0x144   : > { %1163 = vst.msk [vmem:[#allocation3 + $0x70] sm:$0xff] %vm1148_vm3, %v1081_v7 }
 0x145   : > { %v1079_v14 = vpop.permute.xlu1 %1078  ;;  %1454 = vrot.lane.b32.xlu0 %v11354_v15, %s7474_s20  ;;  %v11368_v15 = vld [vmem:[#allocation30_spill] sm:$0xff] }
 0x146   : > { %1162 = vst.msk [vmem:[#allocation3 + $0x68] sm:$0xff] %vm1148_vm3, %v1079_v14 }
 0x147   : > { %1452 = vrot.lane.b32.xlu1 %v11355_v18, %s7474_s20  ;;  %v1085_v19 = vpop.permute.xlu0 %1084  ;;  %v11369_v18 = vld [vmem:[#allocation31_spill] sm:$0xff] }
 0x148   : > { %1165 = vst.msk [vmem:[#allocation3 + $0x80] sm:$0xff] %vm1148_vm3, %v1085_v19 }
 0x149   : > { %v1083_v22 = vpop.permute.xlu1 %1082  ;;  %1458 = vrot.lane.b32.xlu0 %v11356_v0, %s7474_s20  ;;  %v11370_v0 = vld [vmem:[#allocation32_spill] sm:$0xff] }
 0x14a   : > { %1164 = vst.msk [vmem:[#allocation3 + $0x78] sm:$0xff] %vm1148_vm3, %v1083_v22 }
 0x14b   : > { %1456 = vrot.lane.b32.xlu1 %v11357_v23, %s7474_s20  ;;  %v1089_v49 = vpop.permute.xlu0 %1088  ;;  %v11371_v23 = vld [vmem:[#allocation33_spill] sm:$0xff] }
 0x14c   : > { %1167 = vst.msk [vmem:[#allocation3 + $0x90] sm:$0xff] %vm1148_vm3, %v1089_v49 }
 0x14d   : > { %v1087_v48 = vpop.permute.xlu1 %1086  ;;  %1462 = vrot.lane.b32.xlu0 %v11358_v33, %s7474_s20  ;;  %v11372_v33 = vld [vmem:[#allocation34_spill] sm:$0xff] }
 0x14e   : > { %1166 = vst.msk [vmem:[#allocation3 + $0x88] sm:$0xff] %vm1148_vm3, %v1087_v48 }
 0x14f   : > { %1460 = vrot.lane.b32.xlu1 %v11359_v25, %s7474_s20  ;;  %v1093_v46 = vpop.permute.xlu0 %1092 }
 0x150   : > { %1169 = vst.msk [vmem:[#allocation3 + $0xa0] sm:$0xff] %vm1148_vm3, %v1093_v46 }
 0x151   : > { %v1091_v26 = vpop.permute.xlu1 %1090  ;;  %1466 = vrot.lane.b32.xlu0 %v11360_v30, %s7474_s20 }
 0x152   : > { %1168 = vst.msk [vmem:[#allocation3 + $0x98] sm:$0xff] %vm1148_vm3, %v1091_v26  ;;  %v8465_v26 = vld [vmem:[#allocation2 + $0x286] sm:$0xff] }
 0x153   : > { %1464 = vrot.lane.b32.xlu1 %v11361_v31, %s7474_s20  ;;  %v1097_v32 = vpop.permute.xlu0 %1096  ;;  %v8475_v31 = vld [vmem:[#allocation2 + $0x28e] sm:$0xff] }
 0x154   : > { %1171 = vst.msk [vmem:[#allocation3 + $0xb0] sm:$0xff] %vm1148_vm3, %v1097_v32 }
 0x155   : > { %v1095_v39 = vpop.permute.xlu1 %1094  ;;  %1470 = vrot.lane.b32.xlu0 %v11362_v40, %s7474_s20 }
 0x156   : > { %1170 = vst.msk [vmem:[#allocation3 + $0xa8] sm:$0xff] %vm1148_vm3, %v1095_v39 }
 0x157   : > { %1468 = vrot.lane.b32.xlu1 %v11363_v41, %s7474_s20  ;;  %v1101_v42 = vpop.permute.xlu0 %1100 }
 0x158   : > { %1173 = vst.msk [vmem:[#allocation3 + $0xc0] sm:$0xff] %vm1148_vm3, %v1101_v42 }
 0x159   : > { %v1099_v43 = vpop.permute.xlu1 %1098  ;;  %1474 = vrot.lane.b32.xlu0 %v11364_v44, %s7474_s20 }
 0x15a   : > { %1172 = vst.msk [vmem:[#allocation3 + $0xb8] sm:$0xff] %vm1148_vm3, %v1099_v43 }
 0x15b   : > { %1472 = vrot.lane.b32.xlu1 %v11365_v47, %s7474_s20  ;;  %v1105_v50 = vpop.permute.xlu0 %1104  ;;  %v1762_v47 = vld [vmem:[#allocation2 + $0xcd] sm:$0xff] }
 0x15c   : > { %1175 = vst.msk [vmem:[#allocation3 + $0xd0] sm:$0xff] %vm1148_vm3, %v1105_v50 }
 0x15d   : > { %v1103_v53 = vpop.permute.xlu1 %1102  ;;  %1478 = vrot.lane.b32.xlu0 %v11366_v56, %s7474_s20  ;;  %v1764_v56 = vld [vmem:[#allocation2 + $0xed] sm:$0xff] }
 0x15e   : > { %1174 = vst.msk [vmem:[#allocation3 + $0xc8] sm:$0xff] %vm1148_vm3, %v1103_v53 }
 0x15f   : > { %1476 = vrot.lane.b32.xlu1 %v11367_v63, %s7474_s20  ;;  %v1109_v7 = vpop.permute.xlu0 %1108 }
 0x160   : > { %1177 = vst.msk [vmem:[#allocation3 + $0xe0] sm:$0xff] %vm1148_vm3, %v1109_v7  ;;  %v1767_v7 = vld [vmem:[#allocation2 + $0x125] sm:$0xff] }
 0x161   : > { %v1107_v14 = vpop.permute.xlu1 %1106  ;;  %1482 = vrot.lane.b32.xlu0 %v11368_v15, %s7474_s20  ;;  %v1766_v15 = vld [vmem:[#allocation2 + $0x10d] sm:$0xff] }
 0x162   : > { %1176 = vst.msk [vmem:[#allocation3 + $0xd8] sm:$0xff] %vm1148_vm3, %v1107_v14 }
 0x163   : > { %1480 = vrot.lane.b32.xlu1 %v11369_v18, %s7474_s20  ;;  %v1113_v19 = vpop.permute.xlu0 %1112 }
 0x164   : > { %1179 = vst.msk [vmem:[#allocation3 + $0xf0] sm:$0xff] %vm1148_vm3, %v1113_v19  ;;  %v1769_v19 = vld [vmem:[#allocation2 + $0x145] sm:$0xff] }
 0x165   : > { %v1111_v22 = vpop.permute.xlu1 %1110  ;;  %1486 = vrot.lane.b32.xlu0 %v11370_v0, %s7474_s20  ;;  %v1768_v0 = vld [vmem:[#allocation2 + $0x12d] sm:$0xff] }
 0x166   : > { %1178 = vst.msk [vmem:[#allocation3 + $0xe8] sm:$0xff] %vm1148_vm3, %v1111_v22 }
 0x167   : > { %1484 = vrot.lane.b32.xlu1 %v11371_v23, %s7474_s20  ;;  %v1246_v49 = vpop.permute.xlu0 %1245 }
 0x168   : > { %1342 = vst.msk [vmem:[#allocation3] sm:$0xff] %vm1341_vm4, %v1246_v49  ;;  %v1771_v49 = vld [vmem:[#allocation2 + $0x165] sm:$0xff] }
 0x169   : > { %v1115_v48 = vpop.permute.xlu1 %1114  ;;  %1490 = vrot.lane.b32.xlu0 %v8153_v35, %s7474_s20 }
 0x16a   : > { %1180 = vst.msk [vmem:[#allocation3 + $0xf8] sm:$0xff] %vm1148_vm3, %v1115_v48 }
 0x16b   : > { %1488 = vrot.lane.b32.xlu1 %v11372_v33, %s7474_s20  ;;  %v1250_v25 = vpop.permute.xlu0 %1249  ;;  %v1770_v33 = vld [vmem:[#allocation2 + $0x14d] sm:$0xff] }
 0x16c   : > { %1344 = vst.msk [vmem:[#allocation3 + $0x10] sm:$0xff] %vm1341_vm4, %v1250_v25 }
 0x16d   : > { %v1248_v46 = vpop.permute.xlu1 %1247  ;;  %1494 = vrot.lane.b32.xlu0 %v8163_v36, %s7474_s20 }
 0x16e   : > { %1343 = vst.msk [vmem:[#allocation3 + $0x8] sm:$0xff] %vm1341_vm4, %v1248_v46  ;;  %v1773_v46 = vld [vmem:[#allocation2 + $0x185] sm:$0xff] }
 0x16f   : > { %1492 = vrot.lane.b32.xlu1 %v8167_v45, %s7474_s20  ;;  %v1254_v35 = vpop.permute.xlu0 %1253 }
 0x170   : > { %1346 = vst.msk [vmem:[#allocation3 + $0x20] sm:$0xff] %vm1341_vm4, %v1254_v35 }
 0x171   : > { %v1252_v30 = vpop.permute.xlu1 %1251  ;;  %1498 = vrot.lane.b32.xlu0 %v8465_v26, %s7474_s20 }
 0x172   : > { %1345 = vst.msk [vmem:[#allocation3 + $0x18] sm:$0xff] %vm1341_vm4, %v1252_v30  ;;  %v1772_v30 = vld [vmem:[#allocation2 + $0x16d] sm:$0xff] }
 0x173   : > { %1496 = vrot.lane.b32.xlu1 %v8175_v38, %s7474_s20  ;;  %v1258_v36 = vpop.permute.xlu0 %1257 }
 0x174   : > { %1348 = vst.msk [vmem:[#allocation3 + $0x30] sm:$0xff] %vm1341_vm4, %v1258_v36 }
 0x175   : > { %v1256_v32 = vpop.permute.xlu1 %1255  ;;  %1632 = vrot.lane.b32.xlu0 %v7866_v51, %s7475_s21 }
 0x176   : > { %1347 = vst.msk [vmem:[#allocation3 + $0x28] sm:$0xff] %vm1341_vm4, %v1256_v32  ;;  %v1775_v32 = vld [vmem:[#allocation2 + $0x1a5] sm:$0xff] }
 0x177   : > { %1500 = vrot.lane.b32.xlu1 %v8475_v31, %s7474_s20  ;;  %v1262_v45 = vpop.permute.xlu0 %1261 }
 0x178   : > { %1350 = vst.msk [vmem:[#allocation3 + $0x40] sm:$0xff] %vm1341_vm4, %v1262_v45 }
 0x179   : > { %v1260_v39 = vpop.permute.xlu1 %1259  ;;  %1636 = vrot.lane.b32.xlu0 %v7878_v54, %s7475_s21 }
 0x17a   : > { %1349 = vst.msk [vmem:[#allocation3 + $0x38] sm:$0xff] %vm1341_vm4, %v1260_v39  ;;  %v1774_v39 = vld [vmem:[#allocation2 + $0x18d] sm:$0xff] }
 0x17b   : > { %1634 = vrot.lane.b32.xlu1 %v7868_v52, %s7475_s21  ;;  %v1266_v38 = vpop.permute.xlu0 %1265 }
 0x17c   : > { %1352 = vst.msk [vmem:[#allocation3 + $0x50] sm:$0xff] %vm1341_vm4, %v1266_v38 }
 0x17d   : > { %v1264_v51 = vpop.permute.xlu1 %1263  ;;  %1640 = vrot.lane.b32.xlu0 %v7888_v57, %s7475_s21 }
 0x17e   : > { %1351 = vst.msk [vmem:[#allocation3 + $0x48] sm:$0xff] %vm1341_vm4, %v1264_v51  ;;  %v1777_v51 = vld [vmem:[#allocation2 + $0x1c5] sm:$0xff] }
 0x17f   : > { %1638 = vrot.lane.b32.xlu1 %v7880_v55, %s7475_s21  ;;  %v1270_v40 = vpop.permute.xlu0 %1269 }
 0x180   : > { %1354 = vst.msk [vmem:[#allocation3 + $0x60] sm:$0xff] %vm1341_vm4, %v1270_v40 }
 0x181   : > { %v1268_v54 = vpop.permute.xlu1 %1267  ;;  %1644 = vrot.lane.b32.xlu0 %v7892_v59, %s7475_s21 }
 0x182   : > { %1353 = vst.msk [vmem:[#allocation3 + $0x58] sm:$0xff] %vm1341_vm4, %v1268_v54  ;;  %v1776_v54 = vld [vmem:[#allocation2 + $0x1ad] sm:$0xff] }
 0x183   : > { %1642 = vrot.lane.b32.xlu1 %v7890_v58, %s7475_s21  ;;  %v1274_v52 = vpop.permute.xlu0 %1273 }
 0x184   : > { %1356 = vst.msk [vmem:[#allocation3 + $0x70] sm:$0xff] %vm1341_vm4, %v1274_v52 }
 0x185   : > { %v1272_v57 = vpop.permute.xlu1 %1271  ;;  %1648 = vrot.lane.b32.xlu0 %v7904_v61, %s7475_s21 }
 0x186   : > { %1355 = vst.msk [vmem:[#allocation3 + $0x68] sm:$0xff] %vm1341_vm4, %v1272_v57  ;;  %v1779_v57 = vld [vmem:[#allocation2 + $0x1e5] sm:$0xff] }
 0x187   : > { %1646 = vrot.lane.b32.xlu1 %v7902_v60, %s7475_s21  ;;  %v1278_v55 = vpop.permute.xlu0 %1277 }
 0x188   : > { %1358 = vst.msk [vmem:[#allocation3 + $0x80] sm:$0xff] %vm1341_vm4, %v1278_v55 }
 0x189   : > { %v1276_v59 = vpop.permute.xlu1 %1275  ;;  %1652 = vrot.lane.b32.xlu0 %v7916_v1, %s7475_s21 }
 0x18a   : > { %1357 = vst.msk [vmem:[#allocation3 + $0x78] sm:$0xff] %vm1341_vm4, %v1276_v59  ;;  %v1778_v59 = vld [vmem:[#allocation2 + $0x1cd] sm:$0xff] }
 0x18b   : > { %1650 = vrot.lane.b32.xlu1 %v7906_v62, %s7475_s21  ;;  %v1282_v58 = vpop.permute.xlu0 %1281 }
 0x18c   : > { %1360 = vst.msk [vmem:[#allocation3 + $0x90] sm:$0xff] %vm1341_vm4, %v1282_v58 }
 0x18d   : > { %v1280_v61 = vpop.permute.xlu1 %1279  ;;  %1656 = vrot.lane.b32.xlu0 %v7920_v3, %s7475_s21 }
 0x18e   : > { %1359 = vst.msk [vmem:[#allocation3 + $0x88] sm:$0xff] %vm1341_vm4, %v1280_v61  ;;  %v1781_v61 = vld [vmem:[#allocation2 + $0x205] sm:$0xff] }
 0x18f   : > { %1654 = vrot.lane.b32.xlu1 %v7918_v2, %s7475_s21  ;;  %v1286_v60 = vpop.permute.xlu0 %1285 }
 0x190   : > { %1362 = vst.msk [vmem:[#allocation3 + $0xa0] sm:$0xff] %vm1341_vm4, %v1286_v60 }
 0x191   : > { %v1284_v1 = vpop.permute.xlu1 %1283  ;;  %1660 = vrot.lane.b32.xlu0 %v7932_v5, %s7475_s21 }
 0x192   : > { %1361 = vst.msk [vmem:[#allocation3 + $0x98] sm:$0xff] %vm1341_vm4, %v1284_v1  ;;  %v1780_v1 = vld [vmem:[#allocation2 + $0x1ed] sm:$0xff] }
 0x193   : > { %1658 = vrot.lane.b32.xlu1 %v7930_v4, %s7475_s21  ;;  %v1290_v62 = vpop.permute.xlu0 %1289 }
 0x194   : > { %1364 = vst.msk [vmem:[#allocation3 + $0xb0] sm:$0xff] %vm1341_vm4, %v1290_v62 }
 0x195   : > { %v1288_v3 = vpop.permute.xlu1 %1287  ;;  %1664 = vrot.lane.b32.xlu0 %v7944_v8, %s7475_s21 }
 0x196   : > { %1363 = vst.msk [vmem:[#allocation3 + $0xa8] sm:$0xff] %vm1341_vm4, %v1288_v3  ;;  %v1783_v3 = vld [vmem:[#allocation2 + $0x225] sm:$0xff] }
 0x197   : > { %1662 = vrot.lane.b32.xlu1 %v7934_v6, %s7475_s21  ;;  %v1294_v2 = vpop.permute.xlu0 %1293 }
 0x198   : > { %1366 = vst.msk [vmem:[#allocation3 + $0xc0] sm:$0xff] %vm1341_vm4, %v1294_v2 }
 0x199   : > { %v1292_v5 = vpop.permute.xlu1 %1291  ;;  %1668 = vrot.lane.b32.xlu0 %v7948_v10, %s7475_s21 }
 0x19a   : > { %1365 = vst.msk [vmem:[#allocation3 + $0xb8] sm:$0xff] %vm1341_vm4, %v1292_v5  ;;  %v1782_v5 = vld [vmem:[#allocation2 + $0x20d] sm:$0xff] }
 0x19b   : > { %1666 = vrot.lane.b32.xlu1 %v7946_v9, %s7475_s21  ;;  %v1298_v4 = vpop.permute.xlu0 %1297 }
 0x19c   : > { %1368 = vst.msk [vmem:[#allocation3 + $0xd0] sm:$0xff] %vm1341_vm4, %v1298_v4 }
 0x19d   : > { %v1296_v8 = vpop.permute.xlu1 %1295  ;;  %1672 = vrot.lane.b32.xlu0 %v7964_v12, %s7475_s21 }
 0x19e   : > { %1367 = vst.msk [vmem:[#allocation3 + $0xc8] sm:$0xff] %vm1341_vm4, %v1296_v8  ;;  %v1785_v8 = vld [vmem:[#allocation2 + $0x245] sm:$0xff] }
 0x19f   : > { %1670 = vrot.lane.b32.xlu1 %v7958_v11, %s7475_s21  ;;  %v1302_v6 = vpop.permute.xlu0 %1301 }
 0x1a0   : > { %1370 = vst.msk [vmem:[#allocation3 + $0xe0] sm:$0xff] %vm1341_vm4, %v1302_v6 }
 0x1a1   : > { %v1300_v10 = vpop.permute.xlu1 %1299  ;;  %1676 = vrot.lane.b32.xlu0 %v7980_v16, %s7475_s21 }
 0x1a2   : > { %1369 = vst.msk [vmem:[#allocation3 + $0xd8] sm:$0xff] %vm1341_vm4, %v1300_v10  ;;  %v1784_v10 = vld [vmem:[#allocation2 + $0x22d] sm:$0xff] }
 0x1a3   : > { %1674 = vrot.lane.b32.xlu1 %v7966_v13, %s7475_s21  ;;  %v1306_v9 = vpop.permute.xlu0 %1305 }
 0x1a4   : > { %1372 = vst.msk [vmem:[#allocation3 + $0xf0] sm:$0xff] %vm1341_vm4, %v1306_v9 }
 0x1a5   : > { %v1304_v12 = vpop.permute.xlu1 %1303  ;;  %1680 = vrot.lane.b32.xlu0 %v7996_v20, %s7475_s21 }
 0x1a6   : > { %1371 = vst.msk [vmem:[#allocation3 + $0xe8] sm:$0xff] %vm1341_vm4, %v1304_v12  ;;  %v1787_v12 = vld [vmem:[#allocation2 + $0x265] sm:$0xff] }
 0x1a7   : > { %1678 = vrot.lane.b32.xlu1 %v7982_v17, %s7475_s21  ;;  %v1439_v11 = vpop.permute.xlu0 %1438  ;;  %v1598_v17 = vld [vmem:[#allocation2 + $0x2a4] sm:$0xff] }
 0x1a8   : > { %1535 = vst.msk [vmem:[#allocation3] sm:$0xff] %vm1534_vm5, %v1439_v11 }
 0x1a9   : > { %v1308_v16 = vpop.permute.xlu1 %1307  ;;  %1684 = vrot.lane.b32.xlu0 %v8012_v24, %s7475_s21 }
 0x1aa   : > { %1373 = vst.msk [vmem:[#allocation3 + $0xf8] sm:$0xff] %vm1341_vm4, %v1308_v16  ;;  %v1786_v16 = vld [vmem:[#allocation2 + $0x24d] sm:$0xff] }
 0x1ab   : > { %1682 = vrot.lane.b32.xlu1 %v7998_v21, %s7475_s21  ;;  %v1443_v13 = vpop.permute.xlu0 %1442  ;;  %v1761_v21 = vld [vmem:[#allocation2 + $0xc5] sm:$0xff] }
 0x1ac   : > { %1537 = vst.msk [vmem:[#allocation3 + $0x10] sm:$0xff] %vm1534_vm5, %v1443_v13 }
 0x1ad   : > { %v1441_v20 = vpop.permute.xlu1 %1440  ;;  %1688 = vrot.lane.b32.xlu0 %v8265_v37, %s7475_s21  ;;  %v1599_v37 = vld [vmem:[#allocation2 + $0x2ac] sm:$0xff] }
 0x1ae   : > { %1536 = vst.msk [vmem:[#allocation3 + $0x8] sm:$0xff] %vm1534_vm5, %v1441_v20 }
 0x1af   : > { %1686 = vrot.lane.b32.xlu1 %v8014_v28, %s7475_s21  ;;  %v1447_v41 = vpop.permute.xlu0 %1446  ;;  %v1763_v28 = vld [vmem:[#allocation2 + $0xe5] sm:$0xff] }
 0x1b0   : > { %1539 = vst.msk [vmem:[#allocation3 + $0x20] sm:$0xff] %vm1534_vm5, %v1447_v41 }
 0x1b1   : > { %v1445_v24 = vpop.permute.xlu1 %1444  ;;  %1692 = vrot.lane.b32.xlu0 %v1598_v17, %s7475_s21  ;;  %v1788_v17 = vld [vmem:[#allocation2 + $0x26d] sm:$0xff] }
 0x1b2   : > { %1538 = vst.msk [vmem:[#allocation3 + $0x18] sm:$0xff] %vm1534_vm5, %v1445_v24  ;;  %v1791_v24 = vld [vmem:[#allocation2 + $0x2a5] sm:$0xff] }
 0x1b3   : > { %1690 = vrot.lane.b32.xlu1 %v8275_v34, %s7475_s21  ;;  %v1451_v42 = vpop.permute.xlu0 %1450  ;;  %v1765_v34 = vld [vmem:[#allocation2 + $0x105] sm:$0xff] }
 0x1b4   : > { %1541 = vst.msk [vmem:[#allocation3 + $0x30] sm:$0xff] %vm1534_vm5, %v1451_v42 }
 0x1b5   : > { %v1449_v43 = vpop.permute.xlu1 %1448  ;;  %1825 = vrot.lane.b32.xlu0 %v1761_v21, %s7476_s22  ;;  %v7451_v21 = vld [vmem:[%s11254_s1 + $0x10] ss:$0 sps:$4 sm:$0x33]  }
 0x1b6   : > { %1540 = vst.msk [vmem:[#allocation3 + $0x28] sm:$0xff] %vm1534_vm5, %v1449_v43  ;;  %7431 = vmatprep.subr.msk.bf16.mxu0 %vm2271_vm7, %v7451_v21 }
 0x1b7   : > { %1694 = vrot.lane.b32.xlu1 %v1599_v37, %s7475_s21  ;;  %v1455_v44 = vpop.permute.xlu0 %1454  ;;  %v2273_v37 = vsel %vm2271_vm7, %v7451_v21, 0 }
 0x1b8   : > { %1543 = vst.msk [vmem:[#allocation3 + $0x40] sm:$0xff] %vm1534_vm5, %v1455_v44  ;;  %7284 = vmatpush3.bf16.msra.mxu0 %v2273_v37 }
 0x1b9   : > { %v1453_v50 = vpop.permute.xlu1 %1452  ;;  %1829 = vrot.lane.b32.xlu0 %v1763_v28, %s7476_s22  ;;  %v7452_v28 = vld [vmem:[%s11254_s1 + $0x8] sm:$0xff]  }
 0x1ba   : > { %1542 = vst.msk [vmem:[#allocation3 + $0x38] sm:$0xff] %vm1534_vm5, %v1453_v50  ;;  %7285 = vmatprep.subr.bf16.mxu0 %v7452_v28 }
 0x1bb   : > { %1827 = vrot.lane.b32.xlu1 %v1762_v47, %s7476_s22  ;;  %v1459_v53 = vpop.permute.xlu0 %1458  ;;  %v1792_v47 = vld [vmem:[#allocation2 + $0x2ad] sm:$0xff] }
 0x1bc   : > { %1545 = vst.msk [vmem:[#allocation3 + $0x50] sm:$0xff] %vm1534_vm5, %v1459_v53  ;;  %7286 = vmatpush3.bf16.msra.mxu0 %v7452_v28  ;;  %v7453_v53 = vld [vmem:[%s11254_s1] sm:$0xff]  }
 0x1bd   : > { %v1457_v63 = vpop.permute.xlu1 %1456  ;;  %1833 = vrot.lane.b32.xlu0 %v1765_v34, %s7476_s22  ;;  %v1956_v34 = vld [vmem:[#allocation2 + $0xe6] sm:$0xff]  ;;  %7287 = vmatprep.subr.bf16.mxu0 %v7453_v53 }
 0x1be   : > { %1544 = vst.msk [vmem:[#allocation3 + $0x48] sm:$0xff] %vm1534_vm5, %v1457_v63 }
 0x1bf   : > { %1831 = vrot.lane.b32.xlu1 %v1764_v56, %s7476_s22  ;;  %v1463_v14 = vpop.permute.xlu0 %1462  ;;  %v1955_v56 = vld [vmem:[#allocation2 + $0xce] sm:$0xff] }
 0x1c0   : > { %1547 = vst.msk [vmem:[#allocation3 + $0x60] sm:$0xff] %vm1534_vm5, %v1463_v14  ;;  %7288 = vmatpush3.bf16.msra.mxu0 %v7453_v53 }
 0x1c1   : > { %v1461_v18 = vpop.permute.xlu1 %1460  ;;  %1837 = vrot.lane.b32.xlu0 %v1767_v7, %s7476_s22  ;;  %v1958_v7 = vld [vmem:[#allocation2 + $0x106] sm:$0xff] }
 0x1c2   : > { %1546 = vst.msk [vmem:[#allocation3 + $0x58] sm:$0xff] %vm1534_vm5, %v1461_v18 }
 0x1c3   : > { %1835 = vrot.lane.b32.xlu1 %v1766_v15, %s7476_s22  ;;  %v1467_v22 = vpop.permute.xlu0 %1466  ;;  %v1957_v15 = vld [vmem:[#allocation2 + $0xee] sm:$0xff] }
 0x1c4   : > { %1549 = vst.msk [vmem:[#allocation3 + $0x70] sm:$0xff] %vm1534_vm5, %v1467_v22 }
 0x1c5   : > { %v1465_v23 = vpop.permute.xlu1 %1464  ;;  %1841 = vrot.lane.b32.xlu0 %v1769_v19, %s7476_s22  ;;  %v1960_v19 = vld [vmem:[#allocation2 + $0x126] sm:$0xff] }
 0x1c6   : > { %1548 = vst.msk [vmem:[#allocation3 + $0x68] sm:$0xff] %vm1534_vm5, %v1465_v23 }
 0x1c7   : > { %1839 = vrot.lane.b32.xlu1 %v1768_v0, %s7476_s22  ;;  %v1471_v48 = vpop.permute.xlu0 %1470  ;;  %v1959_v0 = vld [vmem:[#allocation2 + $0x10e] sm:$0xff] }
 0x1c8   : > { %1551 = vst.msk [vmem:[#allocation3 + $0x80] sm:$0xff] %vm1534_vm5, %v1471_v48 }
 0x1c9   : > { %v1469_v25 = vpop.permute.xlu1 %1468  ;;  %1845 = vrot.lane.b32.xlu0 %v1771_v49, %s7476_s22  ;;  %v1962_v49 = vld [vmem:[#allocation2 + $0x146] sm:$0xff] }
 0x1ca   : > { %1550 = vst.msk [vmem:[#allocation3 + $0x78] sm:$0xff] %vm1534_vm5, %v1469_v25 }
 0x1cb   : > { %1843 = vrot.lane.b32.xlu1 %v1770_v33, %s7476_s22  ;;  %v1475_v35 = vpop.permute.xlu0 %1474  ;;  %v1961_v33 = vld [vmem:[#allocation2 + $0x12e] sm:$0xff] }
 0x1cc   : > { %1553 = vst.msk [vmem:[#allocation3 + $0x90] sm:$0xff] %vm1534_vm5, %v1475_v35 }
 0x1cd   : > { %v1473_v36 = vpop.permute.xlu1 %1472  ;;  %1849 = vrot.lane.b32.xlu0 %v1773_v46, %s7476_s22  ;;  %v1964_v46 = vld [vmem:[#allocation2 + $0x166] sm:$0xff] }
 0x1ce   : > { %1552 = vst.msk [vmem:[#allocation3 + $0x88] sm:$0xff] %vm1534_vm5, %v1473_v36 }
 0x1cf   : > { %1847 = vrot.lane.b32.xlu1 %v1772_v30, %s7476_s22  ;;  %v1479_v45 = vpop.permute.xlu0 %1478  ;;  %v1963_v30 = vld [vmem:[#allocation2 + $0x14e] sm:$0xff] }
 0x1d0   : > { %1555 = vst.msk [vmem:[#allocation3 + $0xa0] sm:$0xff] %vm1534_vm5, %v1479_v45 }
 0x1d1   : > { %v1477_v38 = vpop.permute.xlu1 %1476  ;;  %1853 = vrot.lane.b32.xlu0 %v1775_v32, %s7476_s22  ;;  %v1966_v32 = vld [vmem:[#allocation2 + $0x186] sm:$0xff] }
 0x1d2   : > { %1554 = vst.msk [vmem:[#allocation3 + $0x98] sm:$0xff] %vm1534_vm5, %v1477_v38 }
 0x1d3   : > { %1851 = vrot.lane.b32.xlu1 %v1774_v39, %s7476_s22  ;;  %v1483_v40 = vpop.permute.xlu0 %1482  ;;  %v1965_v39 = vld [vmem:[#allocation2 + $0x16e] sm:$0xff] }
 0x1d4   : > { %1557 = vst.msk [vmem:[#allocation3 + $0xb0] sm:$0xff] %vm1534_vm5, %v1483_v40 }
 0x1d5   : > { %v1481_v52 = vpop.permute.xlu1 %1480  ;;  %1857 = vrot.lane.b32.xlu0 %v1777_v51, %s7476_s22  ;;  %v1968_v51 = vld [vmem:[#allocation2 + $0x1a6] sm:$0xff] }
 0x1d6   : > { %1556 = vst.msk [vmem:[#allocation3 + $0xa8] sm:$0xff] %vm1534_vm5, %v1481_v52 }
 0x1d7   : > { %1855 = vrot.lane.b32.xlu1 %v1776_v54, %s7476_s22  ;;  %v1487_v55 = vpop.permute.xlu0 %1486  ;;  %v1967_v54 = vld [vmem:[#allocation2 + $0x18e] sm:$0xff] }
 0x1d8   : > { %1559 = vst.msk [vmem:[#allocation3 + $0xc0] sm:$0xff] %vm1534_vm5, %v1487_v55 }
 0x1d9   : > { %v1485_v58 = vpop.permute.xlu1 %1484  ;;  %1861 = vrot.lane.b32.xlu0 %v1779_v57, %s7476_s22  ;;  %v1970_v57 = vld [vmem:[#allocation2 + $0x1c6] sm:$0xff] }
 0x1da   : > { %1558 = vst.msk [vmem:[#allocation3 + $0xb8] sm:$0xff] %vm1534_vm5, %v1485_v58 }
 0x1db   : > { %1859 = vrot.lane.b32.xlu1 %v1778_v59, %s7476_s22  ;;  %v1491_v60 = vpop.permute.xlu0 %1490  ;;  %v1969_v59 = vld [vmem:[#allocation2 + $0x1ae] sm:$0xff] }
 0x1dc   : > { %1561 = vst.msk [vmem:[#allocation3 + $0xd0] sm:$0xff] %vm1534_vm5, %v1491_v60 }
 0x1dd   : > { %v1489_v62 = vpop.permute.xlu1 %1488  ;;  %1865 = vrot.lane.b32.xlu0 %v1781_v61, %s7476_s22  ;;  %v1972_v61 = vld [vmem:[#allocation2 + $0x1e6] sm:$0xff] }
 0x1de   : > { %1560 = vst.msk [vmem:[#allocation3 + $0xc8] sm:$0xff] %vm1534_vm5, %v1489_v62 }
 0x1df   : > { %1863 = vrot.lane.b32.xlu1 %v1780_v1, %s7476_s22  ;;  %v1495_v2 = vpop.permute.xlu0 %1494  ;;  %v1971_v1 = vld [vmem:[#allocation2 + $0x1ce] sm:$0xff] }
 0x1e0   : > { %1563 = vst.msk [vmem:[#allocation3 + $0xe0] sm:$0xff] %vm1534_vm5, %v1495_v2 }
 0x1e1   : > { %v1493_v4 = vpop.permute.xlu1 %1492  ;;  %1869 = vrot.lane.b32.xlu0 %v1783_v3, %s7476_s22  ;;  %v1974_v3 = vld [vmem:[#allocation2 + $0x206] sm:$0xff] }
 0x1e2   : > { %1562 = vst.msk [vmem:[#allocation3 + $0xd8] sm:$0xff] %vm1534_vm5, %v1493_v4 }
 0x1e3   : > { %1867 = vrot.lane.b32.xlu1 %v1782_v5, %s7476_s22  ;;  %v1499_v6 = vpop.permute.xlu0 %1498  ;;  %v1973_v5 = vld [vmem:[#allocation2 + $0x1ee] sm:$0xff] }
 0x1e4   : > { %1565 = vst.msk [vmem:[#allocation3 + $0xf0] sm:$0xff] %vm1534_vm5, %v1499_v6 }
 0x1e5   : > { %v1497_v9 = vpop.permute.xlu1 %1496  ;;  %1873 = vrot.lane.b32.xlu0 %v1785_v8, %s7476_s22  ;;  %v1976_v8 = vld [vmem:[#allocation2 + $0x226] sm:$0xff] }
 0x1e6   : > { %1564 = vst.msk [vmem:[#allocation3 + $0xe8] sm:$0xff] %vm1534_vm5, %v1497_v9 }
 0x1e7   : > { %1871 = vrot.lane.b32.xlu1 %v1784_v10, %s7476_s22  ;;  %v1633_v11 = vpop.permute.xlu0 %1632  ;;  %v1975_v10 = vld [vmem:[#allocation2 + $0x20e] sm:$0xff] }
 0x1e8   : > { %1729 = vst.msk [vmem:[#allocation3] sm:$0xff] %vm1728_vm6, %v1633_v11 }
 0x1e9   : > { %v1501_v13 = vpop.permute.xlu1 %1500  ;;  %1877 = vrot.lane.b32.xlu0 %v1787_v12, %s7476_s22  ;;  %v1978_v12 = vld [vmem:[#allocation2 + $0x246] sm:$0xff] }
 0x1ea   : > { %1566 = vst.msk [vmem:[#allocation3 + $0xf8] sm:$0xff] %vm1534_vm5, %v1501_v13 }
 0x1eb   : > { %1875 = vrot.lane.b32.xlu1 %v1786_v16, %s7476_s22  ;;  %v1637_v20 = vpop.permute.xlu0 %1636  ;;  %v1977_v16 = vld [vmem:[#allocation2 + $0x22e] sm:$0xff] }
 0x1ec   : > { %1731 = vst.msk [vmem:[#allocation3 + $0x10] sm:$0xff] %vm1728_vm6, %v1637_v20  ;;  %v1980_v20 = vld [vmem:[#allocation2 + $0x266] sm:$0xff] }
 0x1ed   : > { %v1635_v41 = vpop.permute.xlu1 %1634  ;;  %1881 = vrot.lane.b32.xlu0 %v8365_v29, %s7476_s22  ;;  %v1954_v29 = vld [vmem:[#allocation2 + $0xc6] sm:$0xff] }
 0x1ee   : > { %1730 = vst.msk [vmem:[#allocation3 + $0x8] sm:$0xff] %vm1728_vm6, %v1635_v41  ;;  %v1979_v41 = vld [vmem:[#allocation2 + $0x24e] sm:$0xff] }
 0x1ef   : > { %1879 = vrot.lane.b32.xlu1 %v1788_v17, %s7476_s22  ;;  %v1641_v42 = vpop.permute.xlu0 %1640 }
 0x1f0   : > { %1733 = vst.msk [vmem:[#allocation3 + $0x20] sm:$0xff] %vm1728_vm6, %v1641_v42  ;;  %v1981_v42 = vld [vmem:[#allocation2 + $0x26e] sm:$0xff] }
 0x1f1   : > { %v1639_v43 = vpop.permute.xlu1 %1638  ;;  %1885 = vrot.lane.b32.xlu0 %v1791_v24, %s7476_s22 }
 0x1f2   : > { %1732 = vst.msk [vmem:[#allocation3 + $0x18] sm:$0xff] %vm1728_vm6, %v1639_v43  ;;  %v1984_v43 = vld [vmem:[#allocation2 + $0x2a6] sm:$0xff] }
 0x1f3   : > { %1883 = vrot.lane.b32.xlu1 %v8375_v27, %s7476_s22  ;;  %v1645_v44 = vpop.permute.xlu0 %1644 }
 0x1f4   : > { %1735 = vst.msk [vmem:[#allocation3 + $0x30] sm:$0xff] %vm1728_vm6, %v1645_v44 }
 0x1f5   : > { %v1643_v50 = vpop.permute.xlu1 %1642  ;;  %2018 = vrot.lane.b32.xlu0 %v1954_v29, %s7477_s27 }
 0x1f6   : > { %1734 = vst.msk [vmem:[#allocation3 + $0x28] sm:$0xff] %vm1728_vm6, %v1643_v50 }
 0x1f7   : > { %1887 = vrot.lane.b32.xlu1 %v1792_v47, %s7476_s22  ;;  %v1649_v27 = vpop.permute.xlu0 %1648  ;;  %v1985_v47 = vld [vmem:[#allocation2 + $0x2ae] sm:$0xff] }
 0x1f8   : > { %1737 = vst.msk [vmem:[#allocation3 + $0x40] sm:$0xff] %vm1728_vm6, %v1649_v27 }
 0x1f9   : > { %v1647_v63 = vpop.permute.xlu1 %1646  ;;  %2022 = vrot.lane.b32.xlu0 %v1956_v34, %s7477_s27 }
 0x1fa   : > { %1736 = vst.msk [vmem:[#allocation3 + $0x38] sm:$0xff] %vm1728_vm6, %v1647_v63 }
 0x1fb   : > { %2020 = vrot.lane.b32.xlu1 %v1955_v56, %s7477_s27  ;;  %v1653_v14 = vpop.permute.xlu0 %1652 }
 0x1fc   : > { %1739 = vst.msk [vmem:[#allocation3 + $0x50] sm:$0xff] %vm1728_vm6, %v1653_v14 }
 0x1fd   : > { %v1651_v18 = vpop.permute.xlu1 %1650  ;;  %2026 = vrot.lane.b32.xlu0 %v1958_v7, %s7477_s27 }
 0x1fe   : > { %1738 = vst.msk [vmem:[#allocation3 + $0x48] sm:$0xff] %vm1728_vm6, %v1651_v18 }
 0x1ff   : > { %2024 = vrot.lane.b32.xlu1 %v1957_v15, %s7477_s27  ;;  %v1657_v22 = vpop.permute.xlu0 %1656 }
 0x200   : > { %1741 = vst.msk [vmem:[#allocation3 + $0x60] sm:$0xff] %vm1728_vm6, %v1657_v22 }
 0x201   : > { %v1655_v23 = vpop.permute.xlu1 %1654  ;;  %2030 = vrot.lane.b32.xlu0 %v1960_v19, %s7477_s27 }
 0x202   : > { %1740 = vst.msk [vmem:[#allocation3 + $0x58] sm:$0xff] %vm1728_vm6, %v1655_v23 }
 0x203   : > { %2028 = vrot.lane.b32.xlu1 %v1959_v0, %s7477_s27  ;;  %v1661_v48 = vpop.permute.xlu0 %1660 }
 0x204   : > { %1743 = vst.msk [vmem:[#allocation3 + $0x70] sm:$0xff] %vm1728_vm6, %v1661_v48 }
 0x205   : > { %v1659_v25 = vpop.permute.xlu1 %1658  ;;  %2034 = vrot.lane.b32.xlu0 %v1962_v49, %s7477_s27 }
 0x206   : > { %1742 = vst.msk [vmem:[#allocation3 + $0x68] sm:$0xff] %vm1728_vm6, %v1659_v25 }
 0x207   : > { %2032 = vrot.lane.b32.xlu1 %v1961_v33, %s7477_s27  ;;  %v1665_v35 = vpop.permute.xlu0 %1664 }
 0x208   : > { %1745 = vst.msk [vmem:[#allocation3 + $0x80] sm:$0xff] %vm1728_vm6, %v1665_v35 }
 0x209   : > { %v1663_v36 = vpop.permute.xlu1 %1662  ;;  %2038 = vrot.lane.b32.xlu0 %v1964_v46, %s7477_s27 }
 0x20a   : > { %1744 = vst.msk [vmem:[#allocation3 + $0x78] sm:$0xff] %vm1728_vm6, %v1663_v36 }
 0x20b   : > { %2036 = vrot.lane.b32.xlu1 %v1963_v30, %s7477_s27  ;;  %v1669_v45 = vpop.permute.xlu0 %1668 }
 0x20c   : > { %1747 = vst.msk [vmem:[#allocation3 + $0x90] sm:$0xff] %vm1728_vm6, %v1669_v45 }
 0x20d   : > { %v1667_v38 = vpop.permute.xlu1 %1666  ;;  %2042 = vrot.lane.b32.xlu0 %v1966_v32, %s7477_s27 }
 0x20e   : > { %1746 = vst.msk [vmem:[#allocation3 + $0x88] sm:$0xff] %vm1728_vm6, %v1667_v38 }
 0x20f   : > { %2040 = vrot.lane.b32.xlu1 %v1965_v39, %s7477_s27  ;;  %v1673_v40 = vpop.permute.xlu0 %1672 }
 0x210   : > { %1749 = vst.msk [vmem:[#allocation3 + $0xa0] sm:$0xff] %vm1728_vm6, %v1673_v40 }
 0x211   : > { %v1671_v52 = vpop.permute.xlu1 %1670  ;;  %2046 = vrot.lane.b32.xlu0 %v1968_v51, %s7477_s27 }
 0x212   : > { %1748 = vst.msk [vmem:[#allocation3 + $0x98] sm:$0xff] %vm1728_vm6, %v1671_v52 }
 0x213   : > { %2044 = vrot.lane.b32.xlu1 %v1967_v54, %s7477_s27  ;;  %v1677_v55 = vpop.permute.xlu0 %1676 }
 0x214   : > { %1751 = vst.msk [vmem:[#allocation3 + $0xb0] sm:$0xff] %vm1728_vm6, %v1677_v55 }
 0x215   : > { %v1675_v58 = vpop.permute.xlu1 %1674  ;;  %2050 = vrot.lane.b32.xlu0 %v1970_v57, %s7477_s27 }
 0x216   : > { %1750 = vst.msk [vmem:[#allocation3 + $0xa8] sm:$0xff] %vm1728_vm6, %v1675_v58 }
 0x217   : > { %2048 = vrot.lane.b32.xlu1 %v1969_v59, %s7477_s27  ;;  %v1681_v60 = vpop.permute.xlu0 %1680 }
 0x218   : > { %1753 = vst.msk [vmem:[#allocation3 + $0xc0] sm:$0xff] %vm1728_vm6, %v1681_v60 }
 0x219   : > { %v1679_v62 = vpop.permute.xlu1 %1678  ;;  %2054 = vrot.lane.b32.xlu0 %v1972_v61, %s7477_s27 }
 0x21a   : > { %1752 = vst.msk [vmem:[#allocation3 + $0xb8] sm:$0xff] %vm1728_vm6, %v1679_v62 }
 0x21b   : > { %2052 = vrot.lane.b32.xlu1 %v1971_v1, %s7477_s27  ;;  %v1685_v2 = vpop.permute.xlu0 %1684 }
 0x21c   : > { %1755 = vst.msk [vmem:[#allocation3 + $0xd0] sm:$0xff] %vm1728_vm6, %v1685_v2 }
 0x21d   : > { %v1683_v4 = vpop.permute.xlu1 %1682  ;;  %2058 = vrot.lane.b32.xlu0 %v1974_v3, %s7477_s27 }
 0x21e   : > { %1754 = vst.msk [vmem:[#allocation3 + $0xc8] sm:$0xff] %vm1728_vm6, %v1683_v4 }
 0x21f   : > { %2056 = vrot.lane.b32.xlu1 %v1973_v5, %s7477_s27  ;;  %v1689_v6 = vpop.permute.xlu0 %1688 }
 0x220   : > { %1757 = vst.msk [vmem:[#allocation3 + $0xe0] sm:$0xff] %vm1728_vm6, %v1689_v6 }
 0x221   : > { %v1687_v9 = vpop.permute.xlu1 %1686  ;;  %2062 = vrot.lane.b32.xlu0 %v1976_v8, %s7477_s27 }
 0x222   : > { %1756 = vst.msk [vmem:[#allocation3 + $0xd8] sm:$0xff] %vm1728_vm6, %v1687_v9 }
 0x223   : > { %2060 = vrot.lane.b32.xlu1 %v1975_v10, %s7477_s27  ;;  %v1693_v11 = vpop.permute.xlu0 %1692 }
 0x224   : > { %1759 = vst.msk [vmem:[#allocation3 + $0xf0] sm:$0xff] %vm1728_vm6, %v1693_v11 }
 0x225   : > { %v1691_v13 = vpop.permute.xlu1 %1690  ;;  %2066 = vrot.lane.b32.xlu0 %v1978_v12, %s7477_s27 }
 0x226   : > { %1758 = vst.msk [vmem:[#allocation3 + $0xe8] sm:$0xff] %vm1728_vm6, %v1691_v13 }
 0x227   : > { %2064 = vrot.lane.b32.xlu1 %v1977_v16, %s7477_s27  ;;  %v1826_v17 = vpop.permute.xlu0 %1825 }
 0x228   : > { %1922 = vst.msk [vmem:[#allocation3] sm:$0xff] %vm1921_vm8, %v1826_v17 }
 0x229   : > { %v1695_v24 = vpop.permute.xlu1 %1694  ;;  %2070 = vrot.lane.b32.xlu0 %v1980_v20, %s7477_s27 }
 0x22a   : > { %1760 = vst.msk [vmem:[#allocation3 + $0xf8] sm:$0xff] %vm1728_vm6, %v1695_v24 }
 0x22b   : > { %2068 = vrot.lane.b32.xlu1 %v1979_v41, %s7477_s27  ;;  %v1830_v21 = vpop.permute.xlu0 %1829 }
 0x22c   : > { %1924 = vst.msk [vmem:[#allocation3 + $0x10] sm:$0xff] %vm1921_vm8, %v1830_v21 }
 0x22d   : > { %v1828_v37 = vpop.permute.xlu1 %1827  ;;  %2074 = vrot.lane.b32.xlu0 %v8465_v26, %s7477_s27 }
 0x22e   : > { %1923 = vst.msk [vmem:[#allocation3 + $0x8] sm:$0xff] %vm1921_vm8, %v1828_v37 }
 0x22f   : > { %2072 = vrot.lane.b32.xlu1 %v1981_v42, %s7477_s27  ;;  %v1834_v29 = vpop.permute.xlu0 %1833 }
 0x230   : > { %1926 = vst.msk [vmem:[#allocation3 + $0x20] sm:$0xff] %vm1921_vm8, %v1834_v29 }
 0x231   : > { %v1832_v28 = vpop.permute.xlu1 %1831  ;;  %2078 = vrot.lane.b32.xlu0 %v1984_v43, %s7477_s27 }
 0x232   : > { %1925 = vst.msk [vmem:[#allocation3 + $0x18] sm:$0xff] %vm1921_vm8, %v1832_v28 }
 0x233   : > { %2076 = vrot.lane.b32.xlu1 %v8475_v31, %s7477_s27  ;;  %v1838_v44 = vpop.permute.xlu0 %1837 }
 0x234   : > { %1928 = vst.msk [vmem:[#allocation3 + $0x30] sm:$0xff] %vm1921_vm8, %v1838_v44 }
 0x235   : > { %v1836_v26 = vpop.permute.xlu1 %1835 }
 0x236   : > { %1927 = vst.msk [vmem:[#allocation3 + $0x28] sm:$0xff] %vm1921_vm8, %v1836_v26 }
 0x237   : > { %2080 = vrot.lane.b32.xlu1 %v1985_v47, %s7477_s27  ;;  %v1842_v50 = vpop.permute.xlu0 %1841 }
 0x238   : > { %1930 = vst.msk [vmem:[#allocation3 + $0x40] sm:$0xff] %vm1921_vm8, %v1842_v50 }
 0x239   : > { %v1840_v34 = vpop.permute.xlu1 %1839 }
 0x23a   : > { %1929 = vst.msk [vmem:[#allocation3 + $0x38] sm:$0xff] %vm1921_vm8, %v1840_v34 }
 0x23b   : > { %v1846_v53 = vpop.permute.xlu0 %1845 }
 0x23c   : > { %1932 = vst.msk [vmem:[#allocation3 + $0x50] sm:$0xff] %vm1921_vm8, %v1846_v53 }
 0x23d   : > { %v1844_v27 = vpop.permute.xlu1 %1843 }
 0x23e   : > { %1931 = vst.msk [vmem:[#allocation3 + $0x48] sm:$0xff] %vm1921_vm8, %v1844_v27 }
 0x23f   : > { %v1850_v31 = vpop.permute.xlu0 %1849 }
 0x240   : > { %1934 = vst.msk [vmem:[#allocation3 + $0x60] sm:$0xff] %vm1921_vm8, %v1850_v31 }
 0x241   : > { %v1848_v56 = vpop.permute.xlu1 %1847 }
 0x242   : > { %1933 = vst.msk [vmem:[#allocation3 + $0x58] sm:$0xff] %vm1921_vm8, %v1848_v56 }
 0x243   : > { %v1854_v63 = vpop.permute.xlu0 %1853 }
 0x244   : > { %1936 = vst.msk [vmem:[#allocation3 + $0x70] sm:$0xff] %vm1921_vm8, %v1854_v63 }
 0x245   : > { %v1852_v7 = vpop.permute.xlu1 %1851 }
 0x246   : > { %1935 = vst.msk [vmem:[#allocation3 + $0x68] sm:$0xff] %vm1921_vm8, %v1852_v7 }
 0x247   : > { %v1858_v14 = vpop.permute.xlu0 %1857 }
 0x248   : > { %1938 = vst.msk [vmem:[#allocation3 + $0x80] sm:$0xff] %vm1921_vm8, %v1858_v14 }
 0x249   : > { %v1856_v15 = vpop.permute.xlu1 %1855 }
 0x24a   : > { %1937 = vst.msk [vmem:[#allocation3 + $0x78] sm:$0xff] %vm1921_vm8, %v1856_v15 }
 0x24b   : > { %v1862_v18 = vpop.permute.xlu0 %1861 }
 0x24c   : > { %1940 = vst.msk [vmem:[#allocation3 + $0x90] sm:$0xff] %vm1921_vm8, %v1862_v18 }
 0x24d   : > { %v1860_v19 = vpop.permute.xlu1 %1859 }
 0x24e   : > { %1939 = vst.msk [vmem:[#allocation3 + $0x88] sm:$0xff] %vm1921_vm8, %v1860_v19 }
 0x24f   : > { %v1866_v22 = vpop.permute.xlu0 %1865 }
 0x250   : > { %1942 = vst.msk [vmem:[#allocation3 + $0xa0] sm:$0xff] %vm1921_vm8, %v1866_v22 }
 0x251   : > { %v1864_v0 = vpop.permute.xlu1 %1863 }
 0x252   : > { %1941 = vst.msk [vmem:[#allocation3 + $0x98] sm:$0xff] %vm1921_vm8, %v1864_v0 }
 0x253   : > { %v1870_v23 = vpop.permute.xlu0 %1869 }
 0x254   : > { %1944 = vst.msk [vmem:[#allocation3 + $0xb0] sm:$0xff] %vm1921_vm8, %v1870_v23 }
 0x255   : > { %v1868_v49 = vpop.permute.xlu1 %1867 }
 0x256   : > { %1943 = vst.msk [vmem:[#allocation3 + $0xa8] sm:$0xff] %vm1921_vm8, %v1868_v49 }
 0x257   : > { %v1874_v48 = vpop.permute.xlu0 %1873 }
 0x258   : > { %1946 = vst.msk [vmem:[#allocation3 + $0xc0] sm:$0xff] %vm1921_vm8, %v1874_v48 }
 0x259   : > { %v1872_v33 = vpop.permute.xlu1 %1871 }
 0x25a   : > { %1945 = vst.msk [vmem:[#allocation3 + $0xb8] sm:$0xff] %vm1921_vm8, %v1872_v33 }
 0x25b   : > { %v1878_v25 = vpop.permute.xlu0 %1877 }
 0x25c   : > { %1948 = vst.msk [vmem:[#allocation3 + $0xd0] sm:$0xff] %vm1921_vm8, %v1878_v25 }
 0x25d   : > { %v1876_v46 = vpop.permute.xlu1 %1875 }
 0x25e   : > { %1947 = vst.msk [vmem:[#allocation3 + $0xc8] sm:$0xff] %vm1921_vm8, %v1876_v46 }
 0x25f   : > { %v1882_v35 = vpop.permute.xlu0 %1881 }
 0x260   : > { %1950 = vst.msk [vmem:[#allocation3 + $0xe0] sm:$0xff] %vm1921_vm8, %v1882_v35 }
 0x261   : > { %v1880_v30 = vpop.permute.xlu1 %1879 }
 0x262   : > { %1949 = vst.msk [vmem:[#allocation3 + $0xd8] sm:$0xff] %vm1921_vm8, %v1880_v30 }
 0x263   : > { %v1886_v36 = vpop.permute.xlu0 %1885 }
 0x264   : > { %1952 = vst.msk [vmem:[#allocation3 + $0xf0] sm:$0xff] %vm1921_vm8, %v1886_v36 }
 0x265   : > { %v1884_v32 = vpop.permute.xlu1 %1883 }
 0x266   : > { %1951 = vst.msk [vmem:[#allocation3 + $0xe8] sm:$0xff] %vm1921_vm8, %v1884_v32 }
 0x267   : > { %v2019_v45 = vpop.permute.xlu0 %2018 }
 0x268   : > { %2115 = vst.msk [vmem:[#allocation3] sm:$0xff] %vm2114_vm9, %v2019_v45 }
 0x269   : > { %v1888_v39 = vpop.permute.xlu1 %1887 }
 0x26a   : > { %1953 = vst.msk [vmem:[#allocation3 + $0xf8] sm:$0xff] %vm1921_vm8, %v1888_v39 }
 0x26b   : > { %v2023_v38 = vpop.permute.xlu0 %2022 }
 0x26c   : > { %2117 = vst.msk [vmem:[#allocation3 + $0x10] sm:$0xff] %vm2114_vm9, %v2023_v38 }
 0x26d   : > { %v2021_v51 = vpop.permute.xlu1 %2020 }
 0x26e   : > { %2116 = vst.msk [vmem:[#allocation3 + $0x8] sm:$0xff] %vm2114_vm9, %v2021_v51 }
 0x26f   : > { %v2027_v40 = vpop.permute.xlu0 %2026  ;;  %v2147_v52 = vld [vmem:[#allocation3] sm:$0xff] }
 0x270   : > { %2119 = vst.msk [vmem:[#allocation3 + $0x20] sm:$0xff] %vm2114_vm9, %v2027_v40 }
 0x271   : > { %v2025_v54 = vpop.permute.xlu1 %2024 }
 0x272   : > { %2118 = vst.msk [vmem:[#allocation3 + $0x18] sm:$0xff] %vm2114_vm9, %v2025_v54 }
 0x273   : > { %v2031_v57 = vpop.permute.xlu0 %2030  ;;  %v2149_v61 = vld [vmem:[#allocation3 + $0x10] sm:$0xff] }
 0x274   : > { %2121 = vst.msk [vmem:[#allocation3 + $0x30] sm:$0xff] %vm2114_vm9, %v2031_v57 }
 0x275   : > { %v2029_v55 = vpop.permute.xlu1 %2028  ;;  %v2148_v59 = vld [vmem:[#allocation3 + $0x8] sm:$0xff] }
 0x276   : > { %2120 = vst.msk [vmem:[#allocation3 + $0x28] sm:$0xff] %vm2114_vm9, %v2029_v55  ;;  %v2179_v58 = vpack.c.bf16 %v2148_v59, %v2147_v52 }
 0x277   : > { %v2035_v60 = vpop.permute.xlu0 %2034  ;;  %v2151_v2 = vld [vmem:[#allocation3 + $0x20] sm:$0xff] }
 0x278   : > { %7289 = vmatprep.mubr.msk.bf16.mxu0 %vm2222_vm10, %v2179_v58  ;;  %2123 = vst.msk [vmem:[#allocation3 + $0x40] sm:$0xff] %vm2114_vm9, %v2035_v60 }
 0x279   : > { %v2033_v1 = vpop.permute.xlu1 %2032  ;;  %v2150_v62 = vld [vmem:[#allocation3 + $0x18] sm:$0xff] }
 0x27a   : > { %2122 = vst.msk [vmem:[#allocation3 + $0x38] sm:$0xff] %vm2114_vm9, %v2033_v1  ;;  %v2180_v3 = vpack.c.bf16 %v2150_v62, %v2149_v61 }
 0x27b   : > { %v2039_v5 = vpop.permute.xlu0 %2038  ;;  %v2153_v10 = vld [vmem:[#allocation3 + $0x30] sm:$0xff] }
 0x27c   : > { %7290 = vmatmul.mubr.msk.bf16.vlgmr.msra.gmra.mxu0 %vm2222_vm10, %v2180_v3  ;;  %2125 = vst.msk [vmem:[#allocation3 + $0x50] sm:$0xff] %vm2114_vm9, %v2039_v5  ;;  %v8794_v5 = vld [vmem:[%s11255_s2] ss:$0 sm:$0xff] }
 0x27d   : > { %v2037_v4 = vpop.permute.xlu1 %2036  ;;  %v2152_v8 = vld [vmem:[#allocation3 + $0x28] sm:$0xff] }
 0x27e   : > { %2124 = vst.msk [vmem:[#allocation3 + $0x48] sm:$0xff] %vm2114_vm9, %v2037_v4  ;;  %v2181_v6 = vpack.c.bf16 %v2152_v8, %v2151_v2 }
 0x27f   : > { %v2043_v9 = vpop.permute.xlu0 %2042  ;;  %v2155_v13 = vld [vmem:[#allocation3 + $0x40] sm:$0xff] }
 0x280   : > { %7293 = vmatprep.mubr.msk.bf16.mxu0 %vm2222_vm10, %v2181_v6  ;;  %2127 = vst.msk [vmem:[#allocation3 + $0x60] sm:$0xff] %vm2114_vm9, %v2043_v9 }
 0x281   : > { %v2041_v12 = vpop.permute.xlu1 %2040  ;;  %v2154_v11 = vld [vmem:[#allocation3 + $0x38] sm:$0xff] }
 0x282   : > { %2126 = vst.msk [vmem:[#allocation3 + $0x58] sm:$0xff] %vm2114_vm9, %v2041_v12  ;;  %v2182_v16 = vpack.c.bf16 %v2154_v11, %v2153_v10 }
 0x283   : > { %v2047_v20 = vpop.permute.xlu0 %2046  ;;  %v2157_v21 = vld [vmem:[#allocation3 + $0x50] sm:$0xff] }
 0x284   : > { %7294 = vmatmul.mubr.msk.bf16.gmra.mxu0 %vm2222_vm10, %v2182_v16  ;;  %2129 = vst.msk [vmem:[#allocation3 + $0x70] sm:$0xff] %vm2114_vm9, %v2047_v20 }
 0x285   : > { %v2045_v17 = vpop.permute.xlu1 %2044  ;;  %v2156_v41 = vld [vmem:[#allocation3 + $0x48] sm:$0xff] }
 0x286   : > { %2128 = vst.msk [vmem:[#allocation3 + $0x68] sm:$0xff] %vm2114_vm9, %v2045_v17  ;;  %v2183_v24 = vpack.c.bf16 %v2156_v41, %v2155_v13 }
 0x287   : > { %v2051_v42 = vpop.permute.xlu0 %2050  ;;  %v2159_v28 = vld [vmem:[#allocation3 + $0x60] sm:$0xff] }
 0x288   : > { %7297 = vmatprep.mubr.msk.bf16.mxu0 %vm2222_vm10, %v2183_v24  ;;  %2131 = vst.msk [vmem:[#allocation3 + $0x80] sm:$0xff] %vm2114_vm9, %v2051_v42 }
 0x289   : > { %v2049_v37 = vpop.permute.xlu1 %2048  ;;  %v2158_v43 = vld [vmem:[#allocation3 + $0x58] sm:$0xff] }
 0x28a   : > { %2130 = vst.msk [vmem:[#allocation3 + $0x78] sm:$0xff] %vm2114_vm9, %v2049_v37  ;;  %v2184_v29 = vpack.c.bf16 %v2158_v43, %v2157_v21 }
 0x28b   : > { %v2055_v44 = vpop.permute.xlu0 %2054  ;;  %v2161_v34 = vld [vmem:[#allocation3 + $0x70] sm:$0xff] }
 0x28c   : > { %7298 = vmatmul.mubr.msk.bf16.gmra.mxu0 %vm2222_vm10, %v2184_v29  ;;  %2133 = vst.msk [vmem:[#allocation3 + $0x90] sm:$0xff] %vm2114_vm9, %v2055_v44 }
 0x28d   : > { %v2053_v47 = vpop.permute.xlu1 %2052  ;;  %v2160_v26 = vld [vmem:[#allocation3 + $0x68] sm:$0xff] }
 0x28e   : > { %2132 = vst.msk [vmem:[#allocation3 + $0x88] sm:$0xff] %vm2114_vm9, %v2053_v47  ;;  %v2185_v50 = vpack.c.bf16 %v2160_v26, %v2159_v28 }
 0x28f   : > { %v2059_v53 = vpop.permute.xlu0 %2058  ;;  %v2163_v63 = vld [vmem:[#allocation3 + $0x80] sm:$0xff] }
 0x290   : > { %7301 = vmatprep.mubr.msk.bf16.mxu0 %vm2222_vm10, %v2185_v50  ;;  %2135 = vst.msk [vmem:[#allocation3 + $0xa0] sm:$0xff] %vm2114_vm9, %v2059_v53 }
 0x291   : > { %v2057_v27 = vpop.permute.xlu1 %2056  ;;  %v2162_v31 = vld [vmem:[#allocation3 + $0x78] sm:$0xff] }
 0x292   : > { %2134 = vst.msk [vmem:[#allocation3 + $0x98] sm:$0xff] %vm2114_vm9, %v2057_v27  ;;  %v2186_v56 = vpack.c.bf16 %v2162_v31, %v2161_v34 }
 0x293   : > { %v2063_v7 = vpop.permute.xlu0 %2062  ;;  %v2165_v19 = vld [vmem:[#allocation3 + $0x90] sm:$0xff] }
 0x294   : > { %7302 = vmatmul.mubr.msk.bf16.gmra.mxu0 %vm2222_vm10, %v2186_v56  ;;  %2137 = vst.msk [vmem:[#allocation3 + $0xb0] sm:$0xff] %vm2114_vm9, %v2063_v7 }
 0x295   : > { %v2061_v14 = vpop.permute.xlu1 %2060  ;;  %v2164_v15 = vld [vmem:[#allocation3 + $0x88] sm:$0xff] }
 0x296   : > { %2136 = vst.msk [vmem:[#allocation3 + $0xa8] sm:$0xff] %vm2114_vm9, %v2061_v14  ;;  %v2187_v18 = vpack.c.bf16 %v2164_v15, %v2163_v63 }
 0x297   : > { %v2067_v22 = vpop.permute.xlu0 %2066  ;;  %v2167_v48 = vld [vmem:[#allocation3 + $0xa0] sm:$0xff] }
 0x298   : > { %7305 = vmatprep.mubr.msk.bf16.mxu0 %vm2222_vm10, %v2187_v18  ;;  %2139 = vst.msk [vmem:[#allocation3 + $0xc0] sm:$0xff] %vm2114_vm9, %v2067_v22 }
 0x299   : > { %v2065_v0 = vpop.permute.xlu1 %2064  ;;  %v2166_v23 = vld [vmem:[#allocation3 + $0x98] sm:$0xff] }
 0x29a   : > { %2138 = vst.msk [vmem:[#allocation3 + $0xb8] sm:$0xff] %vm2114_vm9, %v2065_v0  ;;  %v2188_v49 = vpack.c.bf16 %v2166_v23, %v2165_v19 }
 0x29b   : > { %v2071_v33 = vpop.permute.xlu0 %2070  ;;  %v2169_v30 = vld [vmem:[#allocation3 + $0xb0] sm:$0xff] }
 0x29c   : > { %7306 = vmatmul.mubr.msk.bf16.gmra.mxu0 %vm2222_vm10, %v2188_v49  ;;  %2141 = vst.msk [vmem:[#allocation3 + $0xd0] sm:$0xff] %vm2114_vm9, %v2071_v33 }
 0x29d   : > { %v2069_v25 = vpop.permute.xlu1 %2068  ;;  %v2168_v46 = vld [vmem:[#allocation3 + $0xa8] sm:$0xff] }
 0x29e   : > { %2140 = vst.msk [vmem:[#allocation3 + $0xc8] sm:$0xff] %vm2114_vm9, %v2069_v25  ;;  %v2189_v35 = vpack.c.bf16 %v2168_v46, %v2167_v48 }
 0x29f   : > { %v2075_v36 = vpop.permute.xlu0 %2074  ;;  %v2171_v38 = vld [vmem:[#allocation3 + $0xc0] sm:$0xff] }
 0x2a0   : > { %7309 = vmatprep.mubr.msk.bf16.mxu0 %vm2222_vm10, %v2189_v35  ;;  %2143 = vst.msk [vmem:[#allocation3 + $0xe0] sm:$0xff] %vm2114_vm9, %v2075_v36 }
 0x2a1   : > { %v2073_v32 = vpop.permute.xlu1 %2072  ;;  %v2170_v45 = vld [vmem:[#allocation3 + $0xb8] sm:$0xff] }
 0x2a2   : > { %2142 = vst.msk [vmem:[#allocation3 + $0xd8] sm:$0xff] %vm2114_vm9, %v2073_v32  ;;  %v2190_v39 = vpack.c.bf16 %v2170_v45, %v2169_v30 }
 0x2a3   : > { %v2079_v51 = vpop.permute.xlu0 %2078  ;;  %v2173_v57 = vld [vmem:[#allocation3 + $0xd0] sm:$0xff] }
 0x2a4   : > { %7310 = vmatmul.mubr.msk.bf16.gmra.mxu0 %vm2222_vm10, %v2190_v39  ;;  %2145 = vst.msk [vmem:[#allocation3 + $0xf0] sm:$0xff] %vm2114_vm9, %v2079_v51 }
 0x2a5   : > { %v2077_v40 = vpop.permute.xlu1 %2076  ;;  %v2172_v54 = vld [vmem:[#allocation3 + $0xc8] sm:$0xff] }
 0x2a6   : > { %2144 = vst.msk [vmem:[#allocation3 + $0xe8] sm:$0xff] %vm2114_vm9, %v2077_v40  ;;  %v2191_v52 = vpack.c.bf16 %v2172_v54, %v2171_v38 }
 0x2a7   : > { %v2175_v61 = vld [vmem:[#allocation3 + $0xe0] sm:$0xff] }
 0x2a8   : > { %7313 = vmatprep.mubr.msk.bf16.mxu0 %vm2222_vm10, %v2191_v52 }
 0x2a9   : > { %v2081_v55 = vpop.permute.xlu1 %2080  ;;  %v2174_v59 = vld [vmem:[#allocation3 + $0xd8] sm:$0xff] }
 0x2aa   : > { %2146 = vst.msk [vmem:[#allocation3 + $0xf8] sm:$0xff] %vm2114_vm9, %v2081_v55  ;;  %v2192_v58 = vpack.c.bf16 %v2174_v59, %v2173_v57 }
 0x2ab   : > { %v2177_v62 = vld [vmem:[#allocation3 + $0xf0] sm:$0xff] }
 0x2ac   : > { %7314 = vmatmul.mubr.msk.bf16.gmra.mxu0 %vm2222_vm10, %v2192_v58 }
 0x2ad   : > { %v2176_v60 = vld [vmem:[#allocation3 + $0xe8] sm:$0xff] }
 0x2ae   : > { %v2193_v1 = vpack.c.bf16 %v2176_v60, %v2175_v61 }
 0x2b0   : > { %7317 = vmatprep.mubr.msk.bf16.mxu0 %vm2222_vm10, %v2193_v1 }
 0x2b1   : > { %v2178_v3 = vld [vmem:[#allocation3 + $0xf8] sm:$0xff] }
 0x2b2   : > { %v2194_v2 = vpack.c.bf16 %v2178_v3, %v2177_v62 }
 0x2b4   : > { %7318 = vmatmul.mubr.msk.bf16.gmra.mxu0 %vm2222_vm10, %v2194_v2 }
 0x33c   : > { %v7291_v4 = vpop.f32.mrf.mxu0 }
 0x33d   : > { %v2318_v8 = vadd.f32 %v7291_v4, %v8794_v5 }
 0x33e   : > { %v2309_v6 = vpop.f32.mrf.mxu0 }
 0x33f   : > { %2598 = vst.msk [vmem:[#allocation2 + $0xc5] sm:$0xff] %vm334_vm0, %v2318_v8  ;;  %v2310_v10 = vadd.f32 %v8794_v5, %v2309_v6 }
 0x340   : > { %v7292_v9 = vpop.f32.mrf.mxu0 }
 0x341   : > { %2596 = vst.msk [vmem:[#allocation2 + $0xa5] sm:$0xff] %vm334_vm0, %v2310_v10  ;;  %v2321_v12 = vadd.f32 %v7292_v9, %v8794_v5  ;;  %2468 = vrot.lane.b32.xlu0 %v2310_v10, %s7470_s16 }
 0x342   : > { %v2312_v11 = vpop.f32.mrf.mxu0 }
 0x343   : > { %2599 = vst.msk [vmem:[#allocation2 + $0xcd] sm:$0xff] %vm334_vm0, %v2321_v12  ;;  %v2313_v16 = vadd.f32 %v8794_v5, %v2312_v11 }
 0x344   : > { %v7295_v13 = vpop.f32.mrf.mxu0 }
 0x345   : > { %2597 = vst.msk [vmem:[#allocation2 + $0xad] sm:$0xff] %vm334_vm0, %v2313_v16  ;;  %v2334_v20 = vadd.f32 %v7295_v13, %v8794_v5  ;;  %2470 = vrot.lane.b32.xlu1 %v2313_v16, %s7470_s16  ;;  %2472 = vrot.lane.b32.xlu0 %v2318_v8, %s7470_s16 }
 0x346   : > { %v2325_v17 = vpop.f32.mrf.mxu0  ;;  %v8808_v41 = vld [vmem:[#allocation2 + $0xc2] sm:$0xff] }
 0x347   : > { %2602 = vst.msk [vmem:[#allocation2 + $0x105] sm:$0xff] %vm334_vm0, %v2334_v20  ;;  %v2326_v24 = vadd.f32 %v8794_v5, %v2325_v17  ;;  %2669 = vst.msk [vmem:[#allocation3 + $0x40] sm:$0xff] %vm334_vm0, %v8808_v41 }
 0x348   : > { %v7296_v21 = vpop.f32.mrf.mxu0  ;;  %v8818_v37 = vld [vmem:[#allocation2 + $0xa2] sm:$0xff] }
 0x349   : > { %2600 = vst.msk [vmem:[#allocation2 + $0xe5] sm:$0xff] %vm334_vm0, %v2326_v24  ;;  %v2337_v42 = vadd.f32 %v7296_v21, %v8794_v5  ;;  %2474 = vrot.lane.b32.xlu1 %v2321_v12, %s7470_s16  ;;  %2476 = vrot.lane.b32.xlu0 %v2326_v24, %s7470_s16  ;;  %2667 = vst.msk [vmem:[#allocation3 + $0x30] sm:$0xff] %vm334_vm0, %v8818_v37 }
 0x34a   : > { %v2328_v43 = vpop.f32.mrf.mxu0  ;;  %v8824_v28 = vld [vmem:[#allocation2 + $0xca] sm:$0xff] }
 0x34b   : > { %2603 = vst.msk [vmem:[#allocation2 + $0x10d] sm:$0xff] %vm334_vm0, %v2337_v42  ;;  %v2329_v29 = vadd.f32 %v8794_v5, %v2328_v43  ;;  %2670 = vst.msk [vmem:[#allocation3 + $0x48] sm:$0xff] %vm334_vm0, %v8824_v28 }
 0x34c   : > { %v7299_v44 = vpop.f32.mrf.mxu0  ;;  %v8832_v26 = vld [vmem:[#allocation2 + $0xaa] sm:$0xff] }
 0x34d   : > { %2601 = vst.msk [vmem:[#allocation2 + $0xed] sm:$0xff] %vm334_vm0, %v2329_v29  ;;  %v2350_v47 = vadd.f32 %v7299_v44, %v8794_v5  ;;  %2478 = vrot.lane.b32.xlu1 %v2329_v29, %s7470_s16  ;;  %2480 = vrot.lane.b32.xlu0 %v2334_v20, %s7470_s16  ;;  %2668 = vst.msk [vmem:[#allocation3 + $0x38] sm:$0xff] %vm334_vm0, %v8832_v26  ;;  %v2629_v29 = vld [vmem:[#allocation2 + $0x42] sm:$0xff] }
 0x34e   : > { %v2341_v50 = vpop.f32.mrf.mxu0  ;;  %v8836_v34 = vld [vmem:[#allocation2 + $0x102] sm:$0xff]  ;;  %2661 = vst.msk [vmem:[#allocation3] sm:$0xff] %vm334_vm0, %v2629_v29 }
 0x34f   : > { %2606 = vst.msk [vmem:[#allocation2 + $0x145] sm:$0xff] %vm334_vm0, %v2350_v47  ;;  %v2342_v53 = vadd.f32 %v8794_v5, %v2341_v50  ;;  %2673 = vst.msk [vmem:[#allocation3 + $0x60] sm:$0xff] %vm334_vm0, %v8836_v34 }
 0x350   : > { %v7300_v27 = vpop.f32.mrf.mxu0  ;;  %v8842_v31 = vld [vmem:[#allocation2 + $0xe2] sm:$0xff] }
 0x351   : > { %2604 = vst.msk [vmem:[#allocation2 + $0x125] sm:$0xff] %vm334_vm0, %v2342_v53  ;;  %v2353_v56 = vadd.f32 %v7300_v27, %v8794_v5  ;;  %2482 = vrot.lane.b32.xlu1 %v2337_v42, %s7470_s16  ;;  %2484 = vrot.lane.b32.xlu0 %v2342_v53, %s7470_s16  ;;  %2671 = vst.msk [vmem:[#allocation3 + $0x50] sm:$0xff] %vm334_vm0, %v8842_v31  ;;  %v2630_v53 = vld [vmem:[#allocation2 + $0x4a] sm:$0xff] }
 0x352   : > { %v2344_v63 = vpop.f32.mrf.mxu0  ;;  %v8852_v14 = vld [vmem:[#allocation2 + $0x10a] sm:$0xff]  ;;  %2662 = vst.msk [vmem:[#allocation3 + $0x8] sm:$0xff] %vm334_vm0, %v2630_v53 }
 0x353   : > { %2607 = vst.msk [vmem:[#allocation2 + $0x14d] sm:$0xff] %vm334_vm0, %v2353_v56  ;;  %v2345_v7 = vadd.f32 %v8794_v5, %v2344_v63  ;;  %2674 = vst.msk [vmem:[#allocation3 + $0x68] sm:$0xff] %vm334_vm0, %v8852_v14 }
 0x354   : > { %v7303_v15 = vpop.f32.mrf.mxu0  ;;  %v8860_v19 = vld [vmem:[#allocation2 + $0xea] sm:$0xff] }
 0x355   : > { %2605 = vst.msk [vmem:[#allocation2 + $0x12d] sm:$0xff] %vm334_vm0, %v2345_v7  ;;  %v2366_v18 = vadd.f32 %v7303_v15, %v8794_v5  ;;  %2486 = vrot.lane.b32.xlu1 %v2345_v7, %s7470_s16  ;;  %2488 = vrot.lane.b32.xlu0 %v2350_v47, %s7470_s16  ;;  %2672 = vst.msk [vmem:[#allocation3 + $0x58] sm:$0xff] %vm334_vm0, %v8860_v19  ;;  %v2631_v7 = vld [vmem:[#allocation2 + $0x62] sm:$0xff] }
 0x356   : > { %v2357_v22 = vpop.f32.mrf.mxu0  ;;  %v8864_v0 = vld [vmem:[#allocation2 + $0x142] sm:$0xff]  ;;  %2663 = vst.msk [vmem:[#allocation3 + $0x10] sm:$0xff] %vm334_vm0, %v2631_v7 }
 0x357   : > { %2610 = vst.msk [vmem:[#allocation2 + $0x185] sm:$0xff] %vm334_vm0, %v2366_v18  ;;  %v2358_v23 = vadd.f32 %v8794_v5, %v2357_v22  ;;  %2677 = vst.msk [vmem:[#allocation3 + $0x80] sm:$0xff] %vm334_vm0, %v8864_v0 }
 0x358   : > { %v7304_v49 = vpop.f32.mrf.mxu0  ;;  %v8870_v48 = vld [vmem:[#allocation2 + $0x122] sm:$0xff] }
 0x359   : > { %2608 = vst.msk [vmem:[#allocation2 + $0x165] sm:$0xff] %vm334_vm0, %v2358_v23  ;;  %v2369_v33 = vadd.f32 %v7304_v49, %v8794_v5  ;;  %2490 = vrot.lane.b32.xlu1 %v2353_v56, %s7470_s16  ;;  %2492 = vrot.lane.b32.xlu0 %v2358_v23, %s7470_s16  ;;  %2675 = vst.msk [vmem:[#allocation3 + $0x70] sm:$0xff] %vm334_vm0, %v8870_v48  ;;  %v2632_v23 = vld [vmem:[#allocation2 + $0x6a] sm:$0xff] }
 0x35a   : > { %v2360_v25 = vpop.f32.mrf.mxu0  ;;  %v8880_v35 = vld [vmem:[#allocation2 + $0x14a] sm:$0xff]  ;;  %2664 = vst.msk [vmem:[#allocation3 + $0x18] sm:$0xff] %vm334_vm0, %v2632_v23 }
 0x35b   : > { %2611 = vst.msk [vmem:[#allocation2 + $0x18d] sm:$0xff] %vm334_vm0, %v2369_v33  ;;  %v2361_v46 = vadd.f32 %v8794_v5, %v2360_v25  ;;  %2678 = vst.msk [vmem:[#allocation3 + $0x88] sm:$0xff] %vm334_vm0, %v8880_v35  ;;  %v2633_v25 = vld [vmem:[#allocation2 + $0x82] sm:$0xff] }
 0x35c   : > { %v7307_v30 = vpop.f32.mrf.mxu0  ;;  %v8888_v32 = vld [vmem:[#allocation2 + $0x12a] sm:$0xff]  ;;  %2665 = vst.msk [vmem:[#allocation3 + $0x20] sm:$0xff] %vm334_vm0, %v2633_v25 }
 0x35d   : > { %2609 = vst.msk [vmem:[#allocation2 + $0x16d] sm:$0xff] %vm334_vm0, %v2361_v46  ;;  %v2382_v36 = vadd.f32 %v7307_v30, %v8794_v5  ;;  %2494 = vrot.lane.b32.xlu1 %v2361_v46, %s7470_s16  ;;  %2496 = vrot.lane.b32.xlu0 %v2366_v18, %s7470_s16  ;;  %2676 = vst.msk [vmem:[#allocation3 + $0x78] sm:$0xff] %vm334_vm0, %v8888_v32  ;;  %v2634_v46 = vld [vmem:[#allocation2 + $0x8a] sm:$0xff] }
 0x35e   : > { %v2373_v45 = vpop.f32.mrf.mxu0  ;;  %v8892_v39 = vld [vmem:[#allocation2 + $0x182] sm:$0xff]  ;;  %2666 = vst.msk [vmem:[#allocation3 + $0x28] sm:$0xff] %vm334_vm0, %v2634_v46 }
 0x35f   : > { %2614 = vst.msk [vmem:[#allocation2 + $0x1c5] sm:$0xff] %vm334_vm0, %v2382_v36  ;;  %v2374_v38 = vadd.f32 %v8794_v5, %v2373_v45  ;;  %2681 = vst.msk [vmem:[#allocation3 + $0xa0] sm:$0xff] %vm334_vm0, %v8892_v39  ;;  %v2695_v45 = vld [vmem:[#allocation2 + $0x65] sm:$0xff] }
 0x360   : > { %v7308_v51 = vpop.f32.mrf.mxu0  ;;  %v8898_v40 = vld [vmem:[#allocation2 + $0x162] sm:$0xff] }
 0x361   : > { %2612 = vst.msk [vmem:[#allocation2 + $0x1a5] sm:$0xff] %vm334_vm0, %v2374_v38  ;;  %v2385_v54 = vadd.f32 %v7308_v51, %v8794_v5  ;;  %2498 = vrot.lane.b32.xlu1 %v2369_v33, %s7470_s16  ;;  %2500 = vrot.lane.b32.xlu0 %v2374_v38, %s7470_s16  ;;  %2679 = vst.msk [vmem:[#allocation3 + $0x90] sm:$0xff] %vm334_vm0, %v8898_v40  ;;  %v2696_v38 = vld [vmem:[#allocation2 + $0x6d] sm:$0xff]  ;;  %v2697_v51 = vld [vmem:[#allocation2 + $0x85] sm:$0xff] }
 0x362   : > { %v2376_v52 = vpop.f32.mrf.mxu0  ;;  %v8908_v55 = vld [vmem:[#allocation2 + $0x18a] sm:$0xff] }
 0x363   : > { %2615 = vst.msk [vmem:[#allocation2 + $0x1cd] sm:$0xff] %vm334_vm0, %v2385_v54  ;;  %v2377_v57 = vadd.f32 %v8794_v5, %v2376_v52  ;;  %2682 = vst.msk [vmem:[#allocation3 + $0xa8] sm:$0xff] %vm334_vm0, %v8908_v55  ;;  %v9007_v52 = vld [vmem:[#allocation2 + $0xa5] sm:$0xff] }
 0x364   : > { %v7311_v59 = vpop.f32.mrf.mxu0  ;;  %v8916_v61 = vld [vmem:[#allocation2 + $0x16a] sm:$0xff] }
 0x365   : > { %2613 = vst.msk [vmem:[#allocation2 + $0x1ad] sm:$0xff] %vm334_vm0, %v2377_v57  ;;  %v2398_v58 = vadd.f32 %v7311_v59, %v8794_v5  ;;  %2502 = vrot.lane.b32.xlu1 %v2377_v57, %s7470_s16  ;;  %2504 = vrot.lane.b32.xlu0 %v2382_v36, %s7470_s16  ;;  %2680 = vst.msk [vmem:[#allocation3 + $0x98] sm:$0xff] %vm334_vm0, %v8916_v61  ;;  %v2693_v36 = vld [vmem:[#allocation2 + $0x45] sm:$0xff]  ;;  %v9012_v57 = vld [vmem:[#allocation2 + $0xad] sm:$0xff] }
 0x366   : > { %v2389_v60 = vpop.f32.mrf.mxu0  ;;  %v8920_v1 = vld [vmem:[#allocation2 + $0x1c2] sm:$0xff] }
 0x367   : > { %2618 = vst.msk [vmem:[#allocation2 + $0x205] sm:$0xff] %vm334_vm0, %v2398_v58  ;;  %v2390_v62 = vadd.f32 %v8794_v5, %v2389_v60  ;;  %2685 = vst.msk [vmem:[#allocation3 + $0xc0] sm:$0xff] %vm334_vm0, %v8920_v1  ;;  %v9014_v59 = vld [vmem:[#allocation2 + $0xc5] sm:$0xff] }
 0x368   : > { %v7312_v3 = vpop.f32.mrf.mxu0  ;;  %v8926_v2 = vld [vmem:[#allocation2 + $0x1a2] sm:$0xff] }
 0x369   : > { %2616 = vst.msk [vmem:[#allocation2 + $0x1e5] sm:$0xff] %vm334_vm0, %v2390_v62  ;;  %v2401_v4 = vadd.f32 %v7312_v3, %v8794_v5  ;;  %2506 = vrot.lane.b32.xlu1 %v2385_v54, %s7470_s16  ;;  %2508 = vrot.lane.b32.xlu0 %v2390_v62, %s7470_s16  ;;  %2683 = vst.msk [vmem:[#allocation3 + $0xb0] sm:$0xff] %vm334_vm0, %v8926_v2  ;;  %v2698_v54 = vld [vmem:[#allocation2 + $0x8d] sm:$0xff]  ;;  %v9022_v60 = vld [vmem:[#allocation2 + $0xe5] sm:$0xff] }
 0x36a   : > { %v2392_v8 = vpop.f32.mrf.mxu0  ;;  %v8936_v10 = vld [vmem:[#allocation2 + $0x1ca] sm:$0xff] }
 0x36b   : > { %2619 = vst.msk [vmem:[#allocation2 + $0x20d] sm:$0xff] %vm334_vm0, %v2401_v4  ;;  %v2393_v6 = vadd.f32 %v8794_v5, %v2392_v8  ;;  %2686 = vst.msk [vmem:[#allocation3 + $0xc8] sm:$0xff] %vm334_vm0, %v8936_v10  ;;  %v9028_v62 = vld [vmem:[#allocation2 + $0xed] sm:$0xff]  ;;  %v9030_v3 = vld [vmem:[#allocation2 + $0x105] sm:$0xff] }
 0x36c   : > { %v7315_v9 = vpop.f32.mrf.mxu0  ;;  %v8944_v11 = vld [vmem:[#allocation2 + $0x1aa] sm:$0xff] }
 0x36d   : > { %2617 = vst.msk [vmem:[#allocation2 + $0x1ed] sm:$0xff] %vm334_vm0, %v2393_v6  ;;  %v2414_v12 = vadd.f32 %v7315_v9, %v8794_v5  ;;  %2510 = vrot.lane.b32.xlu1 %v2393_v6, %s7470_s16  ;;  %2512 = vrot.lane.b32.xlu0 %v2398_v58, %s7470_s16  ;;  %2684 = vst.msk [vmem:[#allocation3 + $0xb8] sm:$0xff] %vm334_vm0, %v8944_v11  ;;  %v9020_v58 = vld [vmem:[#allocation2 + $0xcd] sm:$0xff]  ;;  %v9038_v8 = vld [vmem:[#allocation2 + $0x125] sm:$0xff] }
 0x36e   : > { %v2405_v16 = vpop.f32.mrf.mxu0  ;;  %v8948_v13 = vld [vmem:[#allocation2 + $0x202] sm:$0xff]  ;;  %v9044_v6 = vld [vmem:[#allocation2 + $0x12d] sm:$0xff] }
 0x36f   : > { %2622 = vst.msk [vmem:[#allocation2 + $0x245] sm:$0xff] %vm334_vm0, %v2414_v12  ;;  %v2406_v20 = vadd.f32 %v8794_v5, %v2405_v16  ;;  %2689 = vst.msk [vmem:[#allocation3 + $0xe0] sm:$0xff] %vm334_vm0, %v8948_v13  ;;  %v9046_v9 = vld [vmem:[#allocation2 + $0x145] sm:$0xff] }
 0x370   : > { %v7316_v17 = vpop.f32.mrf.mxu0  ;;  %v8954_v24 = vld [vmem:[#allocation2 + $0x1e2] sm:$0xff] }
 0x371   : > { %2620 = vst.msk [vmem:[#allocation2 + $0x225] sm:$0xff] %vm334_vm0, %v2406_v20  ;;  %v2417_v21 = vadd.f32 %v7316_v17, %v8794_v5  ;;  %2514 = vrot.lane.b32.xlu1 %v2401_v4, %s7470_s16  ;;  %2516 = vrot.lane.b32.xlu0 %v2406_v20, %s7470_s16  ;;  %2687 = vst.msk [vmem:[#allocation3 + $0xd0] sm:$0xff] %vm334_vm0, %v8954_v24  ;;  %v9036_v4 = vld [vmem:[#allocation2 + $0x10d] sm:$0xff]  ;;  %v9054_v16 = vld [vmem:[#allocation2 + $0x165] sm:$0xff] }
 0x372   : > { %v2408_v42 = vpop.f32.mrf.mxu0  ;;  %v8964_v44 = vld [vmem:[#allocation2 + $0x20a] sm:$0xff] }
 0x373   : > { %2623 = vst.msk [vmem:[#allocation2 + $0x24d] sm:$0xff] %vm334_vm0, %v2417_v21  ;;  %v2409_v43 = vadd.f32 %v8794_v5, %v2408_v42  ;;  %2690 = vst.msk [vmem:[#allocation3 + $0xe8] sm:$0xff] %vm334_vm0, %v8964_v44  ;;  %v9060_v20 = vld [vmem:[#allocation2 + $0x16d] sm:$0xff]  ;;  %v9062_v17 = vld [vmem:[#allocation2 + $0x185] sm:$0xff] }
 0x374   : > { %v7319_v47 = vpop.f32.mrf.mxu0  ;;  %v8973_v27 = vld [vmem:[#allocation2 + $0x1ea] sm:$0xff] }
 0x375   : > { %2621 = vst.msk [vmem:[#allocation2 + $0x22d] sm:$0xff] %vm334_vm0, %v2409_v43  ;;  %v2430_v50 = vadd.f32 %v7319_v47, %v8794_v5  ;;  %2518 = vrot.lane.b32.xlu1 %v2409_v43, %s7470_s16  ;;  %2520 = vrot.lane.b32.xlu0 %v2414_v12, %s7470_s16  ;;  %2688 = vst.msk [vmem:[#allocation3 + $0xd8] sm:$0xff] %vm334_vm0, %v8973_v27  ;;  %v9052_v12 = vld [vmem:[#allocation2 + $0x14d] sm:$0xff]  ;;  %v9070_v42 = vld [vmem:[#allocation2 + $0x1a5] sm:$0xff] }
 0x376   : > { %v2421_v56 = vpop.f32.mrf.mxu0  ;;  %v9076_v43 = vld [vmem:[#allocation2 + $0x1ad] sm:$0xff]  ;;  %v9078_v29 = vld [vmem:[#allocation2 + $0x1c5] sm:$0xff] }
 0x377   : > { %2626 = vst.msk [vmem:[#allocation2 + $0x285] sm:$0xff] %vm334_vm0, %v2430_v50  ;;  %v2422_v63 = vadd.f32 %v8794_v5, %v2421_v56  ;;  %v9087_v53 = vld [vmem:[#allocation2 + $0x1e5] sm:$0xff]  ;;  %v9095_v7 = vld [vmem:[#allocation2 + $0x1ed] sm:$0xff] }
 0x378   : > { %v7320_v15 = vpop.f32.mrf.mxu0  ;;  %v8981_v18 = vld [vmem:[#allocation2 + $0x222] sm:$0xff] }
 0x379   : > { %2624 = vst.msk [vmem:[#allocation2 + $0x265] sm:$0xff] %vm334_vm0, %v2422_v63  ;;  %v2433_v22 = vadd.f32 %v7320_v15, %v8794_v5  ;;  %2522 = vrot.lane.b32.xlu1 %v2417_v21, %s7470_s16  ;;  %2524 = vrot.lane.b32.xlu0 %v2422_v63, %s7470_s16  ;;  %2691 = vst.msk [vmem:[#allocation3 + $0xf0] sm:$0xff] %vm334_vm0, %v8981_v18  ;;  %v9068_v21 = vld [vmem:[#allocation2 + $0x18d] sm:$0xff]  ;;  %v9097_v15 = vld [vmem:[#allocation2 + $0x205] sm:$0xff] }
 0x37a   : > { %v2424_v49 = vpop.f32.mrf.mxu0  ;;  %v2885_v25 = vld [vmem:[#allocation2 + $0x48] sm:$0xff] }
 0x37b   : > { %2627 = vst.msk [vmem:[#allocation2 + $0x28d] sm:$0xff] %vm334_vm0, %v2433_v22  ;;  %v2425_v33 = vadd.f32 %v8794_v5, %v2424_v49  ;;  %v2694_v5 = vld [vmem:[#allocation2 + $0x4d] sm:$0xff] }
 0x37c   : > { %v8996_v30 = vld [vmem:[#allocation2 + $0x22a] sm:$0xff] }
 0x37d   : > { %2625 = vst.msk [vmem:[#allocation2 + $0x26d] sm:$0xff] %vm334_vm0, %v2425_v33  ;;  %2526 = vrot.lane.b32.xlu1 %v2425_v33, %s7470_s16  ;;  %2528 = vrot.lane.b32.xlu0 %v2430_v50, %s7470_s16  ;;  %2692 = vst.msk [vmem:[#allocation3 + $0xf8] sm:$0xff] %vm334_vm0, %v8996_v30  ;;  %v9085_v50 = vld [vmem:[#allocation2 + $0x1cd] sm:$0xff]  ;;  %v9107_v33 = vld [vmem:[#allocation2 + $0x225] sm:$0xff] }
 0x37e   : > { %v9105_v49 = vld [vmem:[#allocation2 + $0x20d] sm:$0xff] }
 0x381   : > { %2530 = vrot.lane.b32.xlu1 %v2433_v22, %s7470_s16  ;;  %2757 = vrot.lane.b32.xlu0 %v2693_v36, %s7470_s16 }
 0x385   : > { %2759 = vrot.lane.b32.xlu1 %v2694_v5, %s7470_s16  ;;  %2761 = vrot.lane.b32.xlu0 %v2695_v45, %s7470_s16  ;;  %v9115_v5 = vld [vmem:[#allocation2 + $0x22d] sm:$0xff] }
 0x386   : > { %v2886_v45 = vld [vmem:[#allocation2 + $0x50] sm:$0xff] }
 0x389   : > { %2763 = vrot.lane.b32.xlu1 %v2696_v38, %s7470_s16  ;;  %2765 = vrot.lane.b32.xlu0 %v2697_v51, %s7470_s16  ;;  %v2887_v38 = vld [vmem:[#allocation2 + $0x68] sm:$0xff] }
 0x38d   : > { %2767 = vrot.lane.b32.xlu1 %v2698_v54, %s7470_s16  ;;  %2769 = vrot.lane.b32.xlu0 %v9007_v52, %s7470_s16 }
 0x391   : > { %2771 = vrot.lane.b32.xlu1 %v9012_v57, %s7470_s16  ;;  %2773 = vrot.lane.b32.xlu0 %v9014_v59, %s7470_s16 }
 0x395   : > { %2775 = vrot.lane.b32.xlu1 %v9020_v58, %s7470_s16  ;;  %2777 = vrot.lane.b32.xlu0 %v9022_v60, %s7470_s16 }
 0x399   : > { %2779 = vrot.lane.b32.xlu1 %v9028_v62, %s7470_s16  ;;  %2781 = vrot.lane.b32.xlu0 %v9030_v3, %s7470_s16 }
 0x39d   : > { %2783 = vrot.lane.b32.xlu1 %v9036_v4, %s7470_s16  ;;  %2785 = vrot.lane.b32.xlu0 %v9038_v8, %s7470_s16 }
 0x3a1   : > { %2787 = vrot.lane.b32.xlu1 %v9044_v6, %s7470_s16  ;;  %2789 = vrot.lane.b32.xlu0 %v9046_v9, %s7470_s16 }
 0x3a5   : > { %2791 = vrot.lane.b32.xlu1 %v9052_v12, %s7470_s16  ;;  %2793 = vrot.lane.b32.xlu0 %v9054_v16, %s7470_s16 }
 0x3a9   : > { %2795 = vrot.lane.b32.xlu1 %v9060_v20, %s7470_s16  ;;  %2797 = vrot.lane.b32.xlu0 %v9062_v17, %s7470_s16 }
 0x3ad   : > { %2799 = vrot.lane.b32.xlu1 %v9068_v21, %s7470_s16  ;;  %2801 = vrot.lane.b32.xlu0 %v9070_v42, %s7470_s16 }
 0x3b1   : > { %2803 = vrot.lane.b32.xlu1 %v9076_v43, %s7470_s16  ;;  %2805 = vrot.lane.b32.xlu0 %v9078_v29, %s7470_s16 }
 0x3b3   : > { %v2469_v47 = vpop.permute.xlu0 %2468 }
 0x3b4   : > { %2564 = vst.msk [vmem:[#allocation4] sm:$0xff] %vm762_vm1, %v2469_v47  ;;  %v2888_v47 = vld [vmem:[#allocation2 + $0x70] sm:$0xff] }
 0x3b5   : > { %2807 = vrot.lane.b32.xlu1 %v9085_v50, %s7470_s16  ;;  %2809 = vrot.lane.b32.xlu0 %v9087_v53, %s7470_s16 }
 0x3b7   : > { %v2471_v56 = vpop.permute.xlu1 %2470  ;;  %v2473_v63 = vpop.permute.xlu0 %2472 }
 0x3b8   : > { %2565 = vst.msk [vmem:[#allocation4 + $0x8] sm:$0xff] %vm762_vm1, %v2471_v56  ;;  %2566 = vst.msk [vmem:[#allocation4 + $0x10] sm:$0xff] %vm762_vm1, %v2473_v63  ;;  %v2889_v56 = vld [vmem:[#allocation2 + $0x88] sm:$0xff] }
 0x3b9   : > { %2811 = vrot.lane.b32.xlu1 %v9095_v7, %s7470_s16  ;;  %2813 = vrot.lane.b32.xlu0 %v9097_v15, %s7470_s16 }
 0x3bb   : > { %v2475_v22 = vpop.permute.xlu1 %2474  ;;  %v2477_v23 = vpop.permute.xlu0 %2476 }
 0x3bc   : > { %2567 = vst.msk [vmem:[#allocation4 + $0x18] sm:$0xff] %vm762_vm1, %v2475_v22  ;;  %2568 = vst.msk [vmem:[#allocation4 + $0x20] sm:$0xff] %vm762_vm1, %v2477_v23  ;;  %v2890_v23 = vld [vmem:[#allocation2 + $0x90] sm:$0xff] }
 0x3bd   : > { %2815 = vrot.lane.b32.xlu1 %v9105_v49, %s7470_s16  ;;  %2817 = vrot.lane.b32.xlu0 %v9107_v33, %s7470_s16 }
 0x3bf   : > { %v2479_v46 = vpop.permute.xlu1 %2478  ;;  %v2481_v36 = vpop.permute.xlu0 %2480 }
 0x3c0   : > { %2569 = vst.msk [vmem:[#allocation4 + $0x28] sm:$0xff] %vm762_vm1, %v2479_v46  ;;  %2570 = vst.msk [vmem:[#allocation4 + $0x30] sm:$0xff] %vm762_vm1, %v2481_v36  ;;  %v9130_v36 = vld [vmem:[#allocation2 + $0xa8] sm:$0xff] }
 0x3c1   : > { %2819 = vrot.lane.b32.xlu1 %v9115_v5, %s7470_s16  ;;  %2949 = vrot.lane.b32.xlu0 %v2885_v25, %s7471_s17 }
 0x3c3   : > { %v2483_v51 = vpop.permute.xlu1 %2482  ;;  %v2485_v54 = vpop.permute.xlu0 %2484 }
 0x3c4   : > { %2571 = vst.msk [vmem:[#allocation4 + $0x38] sm:$0xff] %vm762_vm1, %v2483_v51  ;;  %2572 = vst.msk [vmem:[#allocation4 + $0x40] sm:$0xff] %vm762_vm1, %v2485_v54  ;;  %v9137_v51 = vld [vmem:[#allocation2 + $0xb0] sm:$0xff]  ;;  %v9139_v54 = vld [vmem:[#allocation2 + $0xc8] sm:$0xff] }
 0x3c5   : > { %2951 = vrot.lane.b32.xlu1 %v2886_v45, %s7471_s17  ;;  %2953 = vrot.lane.b32.xlu0 %v2887_v38, %s7471_s17 }
 0x3c7   : > { %v2487_v63 = vpop.permute.xlu1 %2486  ;;  %v2489_v22 = vpop.permute.xlu0 %2488 }
 0x3c8   : > { %2573 = vst.msk [vmem:[#allocation4 + $0x48] sm:$0xff] %vm762_vm1, %v2487_v63  ;;  %2574 = vst.msk [vmem:[#allocation4 + $0x50] sm:$0xff] %vm762_vm1, %v2489_v22  ;;  %v9147_v63 = vld [vmem:[#allocation2 + $0xd0] sm:$0xff]  ;;  %v9149_v22 = vld [vmem:[#allocation2 + $0xe8] sm:$0xff] }
 0x3c9   : > { %2955 = vrot.lane.b32.xlu1 %v2888_v47, %s7471_s17  ;;  %2957 = vrot.lane.b32.xlu0 %v2889_v56, %s7471_s17  ;;  %11373 = vst [vmem:[#allocation5_spill] sm:$0xff] %v9149_v22 }
 0x3cb   : > { %v2491_v25 = vpop.permute.xlu1 %2490  ;;  %v2493_v46 = vpop.permute.xlu0 %2492 }
 0x3cc   : > { %2575 = vst.msk [vmem:[#allocation4 + $0x58] sm:$0xff] %vm762_vm1, %v2491_v25  ;;  %2576 = vst.msk [vmem:[#allocation4 + $0x60] sm:$0xff] %vm762_vm1, %v2493_v46  ;;  %v9157_v46 = vld [vmem:[#allocation2 + $0xf0] sm:$0xff] }
 0x3cd   : > { %2959 = vrot.lane.b32.xlu1 %v2890_v23, %s7471_s17  ;;  %2961 = vrot.lane.b32.xlu0 %v9130_v36, %s7471_s17  ;;  %11374 = vst [vmem:[#allocation6_spill] sm:$0xff] %v9157_v46 }
 0x3cf   : > { %v2495_v45 = vpop.permute.xlu1 %2494  ;;  %v2497_v38 = vpop.permute.xlu0 %2496 }
 0x3d0   : > { %2577 = vst.msk [vmem:[#allocation4 + $0x68] sm:$0xff] %vm762_vm1, %v2495_v45  ;;  %2578 = vst.msk [vmem:[#allocation4 + $0x70] sm:$0xff] %vm762_vm1, %v2497_v38  ;;  %v9159_v45 = vld [vmem:[#allocation2 + $0x108] sm:$0xff] }
 0x3d1   : > { %2963 = vrot.lane.b32.xlu1 %v9137_v51, %s7471_s17  ;;  %2965 = vrot.lane.b32.xlu0 %v9139_v54, %s7471_s17  ;;  %11375 = vst [vmem:[#allocation7_spill] sm:$0xff] %v9159_v45 }
 0x3d3   : > { %v2499_v47 = vpop.permute.xlu1 %2498  ;;  %v2501_v56 = vpop.permute.xlu0 %2500 }
 0x3d4   : > { %2579 = vst.msk [vmem:[#allocation4 + $0x78] sm:$0xff] %vm762_vm1, %v2499_v47  ;;  %2580 = vst.msk [vmem:[#allocation4 + $0x80] sm:$0xff] %vm762_vm1, %v2501_v56  ;;  %v9167_v56 = vld [vmem:[#allocation2 + $0x110] sm:$0xff] }
 0x3d5   : > { %2967 = vrot.lane.b32.xlu1 %v9147_v63, %s7471_s17  ;;  %2969 = vrot.lane.b32.xlu0 %v9149_v22, %s7471_s17  ;;  %11376 = vst [vmem:[#allocation8_spill] sm:$0xff] %v9167_v56  ;;  %v9177_v22 = vld [vmem:[#allocation2 + $0x130] sm:$0xff] }
 0x3d6   : > { %11378 = vst [vmem:[#allocation10_spill] sm:$0xff] %v9177_v22 }
 0x3d7   : > { %v2503_v23 = vpop.permute.xlu1 %2502  ;;  %v2505_v25 = vpop.permute.xlu0 %2504 }
 0x3d8   : > { %2581 = vst.msk [vmem:[#allocation4 + $0x88] sm:$0xff] %vm762_vm1, %v2503_v23  ;;  %2582 = vst.msk [vmem:[#allocation4 + $0x90] sm:$0xff] %vm762_vm1, %v2505_v25  ;;  %v9169_v23 = vld [vmem:[#allocation2 + $0x128] sm:$0xff] }
 0x3d9   : > { %2971 = vrot.lane.b32.xlu1 %v9157_v46, %s7471_s17  ;;  %2973 = vrot.lane.b32.xlu0 %v9159_v45, %s7471_s17  ;;  %11377 = vst [vmem:[#allocation9_spill] sm:$0xff] %v9169_v23 }
 0x3db   : > { %v2507_v38 = vpop.permute.xlu1 %2506  ;;  %v2509_v47 = vpop.permute.xlu0 %2508 }
 0x3dc   : > { %2583 = vst.msk [vmem:[#allocation4 + $0x98] sm:$0xff] %vm762_vm1, %v2507_v38  ;;  %2584 = vst.msk [vmem:[#allocation4 + $0xa0] sm:$0xff] %vm762_vm1, %v2509_v47  ;;  %v9179_v38 = vld [vmem:[#allocation2 + $0x148] sm:$0xff] }
 0x3dd   : > { %2975 = vrot.lane.b32.xlu1 %v9167_v56, %s7471_s17  ;;  %2977 = vrot.lane.b32.xlu0 %v9169_v23, %s7471_s17  ;;  %11379 = vst [vmem:[#allocation11_spill] sm:$0xff] %v9179_v38  ;;  %v9187_v23 = vld [vmem:[#allocation2 + $0x150] sm:$0xff] }
 0x3de   : > { %11380 = vst [vmem:[#allocation12_spill] sm:$0xff] %v9187_v23 }
 0x3df   : > { %v2511_v25 = vpop.permute.xlu1 %2510  ;;  %v2513_v46 = vpop.permute.xlu0 %2512 }
 0x3e0   : > { %2585 = vst.msk [vmem:[#allocation4 + $0xa8] sm:$0xff] %vm762_vm1, %v2511_v25  ;;  %2586 = vst.msk [vmem:[#allocation4 + $0xb0] sm:$0xff] %vm762_vm1, %v2513_v46  ;;  %v9189_v25 = vld [vmem:[#allocation2 + $0x168] sm:$0xff] }
 0x3e1   : > { %2979 = vrot.lane.b32.xlu1 %v9177_v22, %s7471_s17  ;;  %2981 = vrot.lane.b32.xlu0 %v9179_v38, %s7471_s17  ;;  %11381 = vst [vmem:[#allocation13_spill] sm:$0xff] %v9189_v25  ;;  %v9197_v38 = vld [vmem:[#allocation2 + $0x170] sm:$0xff] }
 0x3e2   : > { %11382 = vst [vmem:[#allocation14_spill] sm:$0xff] %v9197_v38 }
 0x3e3   : > { %v2515_v47 = vpop.permute.xlu1 %2514  ;;  %v2517_v56 = vpop.permute.xlu0 %2516 }
 0x3e4   : > { %2587 = vst.msk [vmem:[#allocation4 + $0xb8] sm:$0xff] %vm762_vm1, %v2515_v47  ;;  %2588 = vst.msk [vmem:[#allocation4 + $0xc0] sm:$0xff] %vm762_vm1, %v2517_v56  ;;  %v2905_v47 = vld [vmem:[#allocation2 + $0x188] sm:$0xff] }
 0x3e5   : > { %2983 = vrot.lane.b32.xlu1 %v9187_v23, %s7471_s17  ;;  %2985 = vrot.lane.b32.xlu0 %v9189_v25, %s7471_s17  ;;  %v2906_v25 = vld [vmem:[#allocation2 + $0x190] sm:$0xff]  ;;  %v2907_v23 = vld [vmem:[#allocation2 + $0x1a8] sm:$0xff] }
 0x3e7   : > { %v2519_v46 = vpop.permute.xlu1 %2518  ;;  %v2521_v22 = vpop.permute.xlu0 %2520 }
 0x3e8   : > { %2589 = vst.msk [vmem:[#allocation4 + $0xc8] sm:$0xff] %vm762_vm1, %v2519_v46  ;;  %2590 = vst.msk [vmem:[#allocation4 + $0xd0] sm:$0xff] %vm762_vm1, %v2521_v22 }
 0x3e9   : > { %2987 = vrot.lane.b32.xlu1 %v9197_v38, %s7471_s17  ;;  %2989 = vrot.lane.b32.xlu0 %v2905_v47, %s7471_s17  ;;  %v2908_v38 = vld [vmem:[#allocation2 + $0x1b0] sm:$0xff]  ;;  %v2909_v47 = vld [vmem:[#allocation2 + $0x1c8] sm:$0xff] }
 0x3eb   : > { %v2523_v56 = vpop.permute.xlu1 %2522  ;;  %v2525_v45 = vpop.permute.xlu0 %2524 }
 0x3ec   : > { %2591 = vst.msk [vmem:[#allocation4 + $0xd8] sm:$0xff] %vm762_vm1, %v2523_v56  ;;  %2592 = vst.msk [vmem:[#allocation4 + $0xe0] sm:$0xff] %vm762_vm1, %v2525_v45 }
 0x3ed   : > { %2991 = vrot.lane.b32.xlu1 %v2906_v25, %s7471_s17  ;;  %2993 = vrot.lane.b32.xlu0 %v2907_v23, %s7471_s17  ;;  %v2910_v25 = vld [vmem:[#allocation2 + $0x1d0] sm:$0xff]  ;;  %v2911_v23 = vld [vmem:[#allocation2 + $0x1e8] sm:$0xff] }
 0x3ef   : > { %v2527_v22 = vpop.permute.xlu1 %2526  ;;  %v2529_v46 = vpop.permute.xlu0 %2528 }
 0x3f0   : > { %2593 = vst.msk [vmem:[#allocation4 + $0xe8] sm:$0xff] %vm762_vm1, %v2527_v22  ;;  %2594 = vst.msk [vmem:[#allocation4 + $0xf0] sm:$0xff] %vm762_vm1, %v2529_v46 }
 0x3f1   : > { %2995 = vrot.lane.b32.xlu1 %v2908_v38, %s7471_s17  ;;  %2997 = vrot.lane.b32.xlu0 %v2909_v47, %s7471_s17  ;;  %v2912_v38 = vld [vmem:[#allocation2 + $0x1f0] sm:$0xff]  ;;  %v2913_v47 = vld [vmem:[#allocation2 + $0x208] sm:$0xff] }
 0x3f3   : > { %v2531_v56 = vpop.permute.xlu1 %2530  ;;  %v2758_v45 = vpop.permute.xlu0 %2757 }
 0x3f4   : > { %2595 = vst.msk [vmem:[#allocation4 + $0xf8] sm:$0xff] %vm762_vm1, %v2531_v56  ;;  %2853 = vst.msk [vmem:[#allocation3] sm:$0xff] %vm762_vm1, %v2758_v45 }
 0x3f5   : > { %2999 = vrot.lane.b32.xlu1 %v2910_v25, %s7471_s17  ;;  %3001 = vrot.lane.b32.xlu0 %v2911_v23, %s7471_s17  ;;  %v2914_v25 = vld [vmem:[#allocation2 + $0x210] sm:$0xff]  ;;  %v2915_v23 = vld [vmem:[#allocation2 + $0x228] sm:$0xff] }
 0x3f7   : > { %v2760_v22 = vpop.permute.xlu1 %2759  ;;  %v2762_v46 = vpop.permute.xlu0 %2761 }
 0x3f8   : > { %2854 = vst.msk [vmem:[#allocation3 + $0x8] sm:$0xff] %vm762_vm1, %v2760_v22  ;;  %2855 = vst.msk [vmem:[#allocation3 + $0x10] sm:$0xff] %vm762_vm1, %v2762_v46 }
 0x3f9   : > { %3003 = vrot.lane.b32.xlu1 %v2912_v38, %s7471_s17  ;;  %3005 = vrot.lane.b32.xlu0 %v2913_v47, %s7471_s17  ;;  %v2916_v38 = vld [vmem:[#allocation2 + $0x230] sm:$0xff] }
 0x3fb   : > { %v2764_v56 = vpop.permute.xlu1 %2763  ;;  %v2766_v45 = vpop.permute.xlu0 %2765 }
 0x3fc   : > { %2856 = vst.msk [vmem:[#allocation3 + $0x18] sm:$0xff] %vm762_vm1, %v2764_v56  ;;  %2857 = vst.msk [vmem:[#allocation3 + $0x20] sm:$0xff] %vm762_vm1, %v2766_v45 }
 0x3fd   : > { %3007 = vrot.lane.b32.xlu1 %v2914_v25, %s7471_s17  ;;  %3009 = vrot.lane.b32.xlu0 %v2915_v23, %s7471_s17 }
 0x3ff   : > { %v2768_v22 = vpop.permute.xlu1 %2767  ;;  %v2770_v46 = vpop.permute.xlu0 %2769 }
 0x400   : > { %2858 = vst.msk [vmem:[#allocation3 + $0x28] sm:$0xff] %vm762_vm1, %v2768_v22  ;;  %2859 = vst.msk [vmem:[#allocation3 + $0x30] sm:$0xff] %vm762_vm1, %v2770_v46 }
 0x401   : > { %3011 = vrot.lane.b32.xlu1 %v2916_v38, %s7471_s17  ;;  %3141 = vrot.lane.b32.xlu0 %v8818_v37, %s7472_s18 }
 0x403   : > { %v2772_v47 = vpop.permute.xlu1 %2771  ;;  %v2774_v56 = vpop.permute.xlu0 %2773 }
 0x404   : > { %2860 = vst.msk [vmem:[#allocation3 + $0x38] sm:$0xff] %vm762_vm1, %v2772_v47  ;;  %2861 = vst.msk [vmem:[#allocation3 + $0x40] sm:$0xff] %vm762_vm1, %v2774_v56 }
 0x405   : > { %3143 = vrot.lane.b32.xlu1 %v8832_v26, %s7472_s18  ;;  %3145 = vrot.lane.b32.xlu0 %v8808_v41, %s7472_s18 }
 0x407   : > { %v2776_v45 = vpop.permute.xlu1 %2775  ;;  %v2778_v25 = vpop.permute.xlu0 %2777 }
 0x408   : > { %2862 = vst.msk [vmem:[#allocation3 + $0x48] sm:$0xff] %vm762_vm1, %v2776_v45  ;;  %2863 = vst.msk [vmem:[#allocation3 + $0x50] sm:$0xff] %vm762_vm1, %v2778_v25 }
 0x409   : > { %3147 = vrot.lane.b32.xlu1 %v8824_v28, %s7472_s18  ;;  %3149 = vrot.lane.b32.xlu0 %v8842_v31, %s7472_s18 }
 0x40b   : > { %v2780_v37 = vpop.permute.xlu1 %2779  ;;  %v2782_v23 = vpop.permute.xlu0 %2781 }
 0x40c   : > { %2864 = vst.msk [vmem:[#allocation3 + $0x58] sm:$0xff] %vm762_vm1, %v2780_v37  ;;  %2865 = vst.msk [vmem:[#allocation3 + $0x60] sm:$0xff] %vm762_vm1, %v2782_v23 }
 0x40d   : > { %3151 = vrot.lane.b32.xlu1 %v8860_v19, %s7472_s18  ;;  %3153 = vrot.lane.b32.xlu0 %v8836_v34, %s7472_s18 }
 0x40f   : > { %v2784_v41 = vpop.permute.xlu1 %2783  ;;  %v2786_v26 = vpop.permute.xlu0 %2785 }
 0x410   : > { %2866 = vst.msk [vmem:[#allocation3 + $0x68] sm:$0xff] %vm762_vm1, %v2784_v41  ;;  %2867 = vst.msk [vmem:[#allocation3 + $0x70] sm:$0xff] %vm762_vm1, %v2786_v26 }
 0x411   : > { %3155 = vrot.lane.b32.xlu1 %v8852_v14, %s7472_s18  ;;  %3157 = vrot.lane.b32.xlu0 %v8870_v48, %s7472_s18 }
 0x413   : > { %v2788_v28 = vpop.permute.xlu1 %2787  ;;  %v2790_v31 = vpop.permute.xlu0 %2789 }
 0x414   : > { %2868 = vst.msk [vmem:[#allocation3 + $0x78] sm:$0xff] %vm762_vm1, %v2788_v28  ;;  %2869 = vst.msk [vmem:[#allocation3 + $0x80] sm:$0xff] %vm762_vm1, %v2790_v31 }
 0x415   : > { %3159 = vrot.lane.b32.xlu1 %v8888_v32, %s7472_s18  ;;  %3161 = vrot.lane.b32.xlu0 %v8864_v0, %s7472_s18 }
 0x417   : > { %v2792_v19 = vpop.permute.xlu1 %2791  ;;  %v2794_v22 = vpop.permute.xlu0 %2793 }
 0x418   : > { %2870 = vst.msk [vmem:[#allocation3 + $0x88] sm:$0xff] %vm762_vm1, %v2792_v19  ;;  %2871 = vst.msk [vmem:[#allocation3 + $0x90] sm:$0xff] %vm762_vm1, %v2794_v22 }
 0x419   : > { %3163 = vrot.lane.b32.xlu1 %v8880_v35, %s7472_s18  ;;  %3165 = vrot.lane.b32.xlu0 %v8898_v40, %s7472_s18 }
 0x41b   : > { %v2796_v46 = vpop.permute.xlu1 %2795  ;;  %v2798_v38 = vpop.permute.xlu0 %2797 }
 0x41c   : > { %2872 = vst.msk [vmem:[#allocation3 + $0x98] sm:$0xff] %vm762_vm1, %v2796_v46  ;;  %2873 = vst.msk [vmem:[#allocation3 + $0xa0] sm:$0xff] %vm762_vm1, %v2798_v38  ;;  %v9301_v46 = vld [vmem:[#allocation2 + $0x242] sm:$0xff] }
 0x41d   : > { %3167 = vrot.lane.b32.xlu1 %v8916_v61, %s7472_s18  ;;  %3169 = vrot.lane.b32.xlu0 %v8892_v39, %s7472_s18 }
 0x41f   : > { %v2800_v47 = vpop.permute.xlu1 %2799  ;;  %v2802_v56 = vpop.permute.xlu0 %2801 }
 0x420   : > { %2874 = vst.msk [vmem:[#allocation3 + $0xa8] sm:$0xff] %vm762_vm1, %v2800_v47  ;;  %2875 = vst.msk [vmem:[#allocation3 + $0xb0] sm:$0xff] %vm762_vm1, %v2802_v56  ;;  %v9309_v56 = vld [vmem:[#allocation2 + $0x24a] sm:$0xff] }
 0x421   : > { %3171 = vrot.lane.b32.xlu1 %v8908_v55, %s7472_s18  ;;  %3173 = vrot.lane.b32.xlu0 %v8926_v2, %s7472_s18 }
 0x423   : > { %v2804_v45 = vpop.permute.xlu1 %2803  ;;  %v2806_v25 = vpop.permute.xlu0 %2805 }
 0x424   : > { %2876 = vst.msk [vmem:[#allocation3 + $0xb8] sm:$0xff] %vm762_vm1, %v2804_v45  ;;  %2877 = vst.msk [vmem:[#allocation3 + $0xc0] sm:$0xff] %vm762_vm1, %v2806_v25  ;;  %v9311_v45 = vld [vmem:[#allocation2 + $0x262] sm:$0xff] }
 0x425   : > { %3175 = vrot.lane.b32.xlu1 %v8944_v11, %s7472_s18  ;;  %3177 = vrot.lane.b32.xlu0 %v8920_v1, %s7472_s18 }
 0x427   : > { %v2808_v37 = vpop.permute.xlu1 %2807  ;;  %v2810_v23 = vpop.permute.xlu0 %2809 }
 0x428   : > { %2878 = vst.msk [vmem:[#allocation3 + $0xc8] sm:$0xff] %vm762_vm1, %v2808_v37  ;;  %2879 = vst.msk [vmem:[#allocation3 + $0xd0] sm:$0xff] %vm762_vm1, %v2810_v23  ;;  %v9319_v23 = vld [vmem:[#allocation2 + $0x26a] sm:$0xff] }
 0x429   : > { %3179 = vrot.lane.b32.xlu1 %v8936_v10, %s7472_s18  ;;  %3181 = vrot.lane.b32.xlu0 %v8954_v24, %s7472_s18 }
 0x42b   : > { %v2812_v41 = vpop.permute.xlu1 %2811  ;;  %v2814_v26 = vpop.permute.xlu0 %2813 }
 0x42c   : > { %2880 = vst.msk [vmem:[#allocation3 + $0xd8] sm:$0xff] %vm762_vm1, %v2812_v41  ;;  %2881 = vst.msk [vmem:[#allocation3 + $0xe0] sm:$0xff] %vm762_vm1, %v2814_v26  ;;  %v3107_v41 = vld [vmem:[#allocation2 + $0x282] sm:$0xff] }
 0x42d   : > { %3183 = vrot.lane.b32.xlu1 %v8973_v27, %s7472_s18  ;;  %3185 = vrot.lane.b32.xlu0 %v8948_v13, %s7472_s18 }
 0x42f   : > { %v2816_v28 = vpop.permute.xlu1 %2815  ;;  %v2818_v31 = vpop.permute.xlu0 %2817 }
 0x430   : > { %2882 = vst.msk [vmem:[#allocation3 + $0xe8] sm:$0xff] %vm762_vm1, %v2816_v28  ;;  %2883 = vst.msk [vmem:[#allocation3 + $0xf0] sm:$0xff] %vm762_vm1, %v2818_v31  ;;  %v3108_v31 = vld [vmem:[#allocation2 + $0x28a] sm:$0xff] }
 0x431   : > { %3187 = vrot.lane.b32.xlu1 %v8964_v44, %s7472_s18  ;;  %3189 = vrot.lane.b32.xlu0 %v8981_v18, %s7472_s18 }
 0x433   : > { %v2820_v19 = vpop.permute.xlu1 %2819  ;;  %v2950_v22 = vpop.permute.xlu0 %2949 }
 0x434   : > { %2884 = vst.msk [vmem:[#allocation3 + $0xf8] sm:$0xff] %vm762_vm1, %v2820_v19 }
 0x435   : > { %3045 = vst.msk [vmem:[#allocation3] sm:$0xff] %vm955_vm2, %v2950_v22  ;;  %3191 = vrot.lane.b32.xlu1 %v8996_v30, %s7472_s18  ;;  %3193 = vrot.lane.b32.xlu0 %v9301_v46, %s7472_s18 }
 0x437   : > { %v2952_v38 = vpop.permute.xlu1 %2951  ;;  %v2954_v47 = vpop.permute.xlu0 %2953 }
 0x438   : > { %3046 = vst.msk [vmem:[#allocation3 + $0x8] sm:$0xff] %vm955_vm2, %v2952_v38  ;;  %3047 = vst.msk [vmem:[#allocation3 + $0x10] sm:$0xff] %vm955_vm2, %v2954_v47 }
 0x439   : > { %3195 = vrot.lane.b32.xlu1 %v9309_v56, %s7472_s18  ;;  %3197 = vrot.lane.b32.xlu0 %v9311_v45, %s7472_s18 }
 0x43b   : > { %v2956_v25 = vpop.permute.xlu1 %2955  ;;  %v2958_v37 = vpop.permute.xlu0 %2957 }
 0x43c   : > { %3048 = vst.msk [vmem:[#allocation3 + $0x18] sm:$0xff] %vm955_vm2, %v2956_v25  ;;  %3049 = vst.msk [vmem:[#allocation3 + $0x20] sm:$0xff] %vm955_vm2, %v2958_v37 }
 0x43d   : > { %3199 = vrot.lane.b32.xlu1 %v9319_v23, %s7472_s18  ;;  %3201 = vrot.lane.b32.xlu0 %v3107_v41, %s7472_s18 }
 0x43f   : > { %v2960_v26 = vpop.permute.xlu1 %2959  ;;  %v2962_v28 = vpop.permute.xlu0 %2961 }
 0x440   : > { %3050 = vst.msk [vmem:[#allocation3 + $0x28] sm:$0xff] %vm955_vm2, %v2960_v26  ;;  %3051 = vst.msk [vmem:[#allocation3 + $0x30] sm:$0xff] %vm955_vm2, %v2962_v28 }
 0x441   : > { %3203 = vrot.lane.b32.xlu1 %v3108_v31, %s7472_s18  ;;  %3333 = vrot.lane.b32.xlu0 %v9007_v52, %s7473_s19 }
 0x443   : > { %v2964_v19 = vpop.permute.xlu1 %2963  ;;  %v2966_v22 = vpop.permute.xlu0 %2965 }
 0x444   : > { %3052 = vst.msk [vmem:[#allocation3 + $0x38] sm:$0xff] %vm955_vm2, %v2964_v19  ;;  %3053 = vst.msk [vmem:[#allocation3 + $0x40] sm:$0xff] %vm955_vm2, %v2966_v22  ;;  %v3846_v22 = vld [vmem:[#allocation2 + $0x105] sm:$0xff] }
 0x445   : > { %3335 = vrot.lane.b32.xlu1 %v9012_v57, %s7473_s19  ;;  %3337 = vrot.lane.b32.xlu0 %v9014_v59, %s7473_s19 }
 0x447   : > { %v2968_v38 = vpop.permute.xlu1 %2967  ;;  %v2970_v47 = vpop.permute.xlu0 %2969 }
 0x448   : > { %3054 = vst.msk [vmem:[#allocation3 + $0x48] sm:$0xff] %vm955_vm2, %v2968_v38  ;;  %3055 = vst.msk [vmem:[#allocation3 + $0x50] sm:$0xff] %vm955_vm2, %v2970_v47  ;;  %v3847_v38 = vld [vmem:[#allocation2 + $0x10d] sm:$0xff] }
 0x449   : > { %3339 = vrot.lane.b32.xlu1 %v9020_v58, %s7473_s19  ;;  %3341 = vrot.lane.b32.xlu0 %v9022_v60, %s7473_s19 }
 0x44b   : > { %v2972_v52 = vpop.permute.xlu1 %2971  ;;  %v2974_v25 = vpop.permute.xlu0 %2973 }
 0x44c   : > { %3056 = vst.msk [vmem:[#allocation3 + $0x58] sm:$0xff] %vm955_vm2, %v2972_v52  ;;  %3057 = vst.msk [vmem:[#allocation3 + $0x60] sm:$0xff] %vm955_vm2, %v2974_v25  ;;  %v3848_v52 = vld [vmem:[#allocation2 + $0x125] sm:$0xff]  ;;  %v3849_v25 = vld [vmem:[#allocation2 + $0x12d] sm:$0xff] }
 0x44d   : > { %3343 = vrot.lane.b32.xlu1 %v9028_v62, %s7473_s19  ;;  %3345 = vrot.lane.b32.xlu0 %v9030_v3, %s7473_s19 }
 0x44f   : > { %v2976_v57 = vpop.permute.xlu1 %2975  ;;  %v2978_v59 = vpop.permute.xlu0 %2977 }
 0x450   : > { %3058 = vst.msk [vmem:[#allocation3 + $0x68] sm:$0xff] %vm955_vm2, %v2976_v57  ;;  %3059 = vst.msk [vmem:[#allocation3 + $0x70] sm:$0xff] %vm955_vm2, %v2978_v59  ;;  %v7456_v57 = vld [vmem:[%s11256_s3] sm:$0xff]  }
 0x451   : > { %3347 = vrot.lane.b32.xlu1 %v9036_v4, %s7473_s19  ;;  %3349 = vrot.lane.b32.xlu0 %v9038_v8, %s7473_s19 }
 0x453   : > { %v2980_v58 = vpop.permute.xlu1 %2979  ;;  %v2982_v60 = vpop.permute.xlu0 %2981 }
 0x454   : > { %3060 = vst.msk [vmem:[#allocation3 + $0x78] sm:$0xff] %vm955_vm2, %v2980_v58  ;;  %3061 = vst.msk [vmem:[#allocation3 + $0x80] sm:$0xff] %vm955_vm2, %v2982_v60  ;;  %v11383_v60 = vld [vmem:[#allocation7_spill] sm:$0xff] }
 0x455   : > { %3351 = vrot.lane.b32.xlu1 %v9044_v6, %s7473_s19  ;;  %3353 = vrot.lane.b32.xlu0 %v9046_v9, %s7473_s19 }
 0x457   : > { %v2984_v62 = vpop.permute.xlu1 %2983  ;;  %v2986_v3 = vpop.permute.xlu0 %2985 }
 0x458   : > { %3062 = vst.msk [vmem:[#allocation3 + $0x88] sm:$0xff] %vm955_vm2, %v2984_v62  ;;  %3063 = vst.msk [vmem:[#allocation3 + $0x90] sm:$0xff] %vm955_vm2, %v2986_v3  ;;  %v11384_v62 = vld [vmem:[#allocation8_spill] sm:$0xff] }
 0x459   : > { %3355 = vrot.lane.b32.xlu1 %v9052_v12, %s7473_s19  ;;  %3357 = vrot.lane.b32.xlu0 %v9054_v16, %s7473_s19 }
 0x45b   : > { %v2988_v4 = vpop.permute.xlu1 %2987  ;;  %v2990_v8 = vpop.permute.xlu0 %2989 }
 0x45c   : > { %3064 = vst.msk [vmem:[#allocation3 + $0x98] sm:$0xff] %vm955_vm2, %v2988_v4  ;;  %3065 = vst.msk [vmem:[#allocation3 + $0xa0] sm:$0xff] %vm955_vm2, %v2990_v8  ;;  %v11385_v8 = vld [vmem:[#allocation9_spill] sm:$0xff] }
 0x45d   : > { %3359 = vrot.lane.b32.xlu1 %v9060_v20, %s7473_s19  ;;  %3361 = vrot.lane.b32.xlu0 %v9062_v17, %s7473_s19 }
 0x45f   : > { %v2992_v6 = vpop.permute.xlu1 %2991  ;;  %v2994_v9 = vpop.permute.xlu0 %2993 }
 0x460   : > { %3066 = vst.msk [vmem:[#allocation3 + $0xa8] sm:$0xff] %vm955_vm2, %v2992_v6  ;;  %3067 = vst.msk [vmem:[#allocation3 + $0xb0] sm:$0xff] %vm955_vm2, %v2994_v9  ;;  %v11386_v6 = vld [vmem:[#allocation10_spill] sm:$0xff] }
 0x461   : > { %3363 = vrot.lane.b32.xlu1 %v9068_v21, %s7473_s19  ;;  %3365 = vrot.lane.b32.xlu0 %v9070_v42, %s7473_s19 }
 0x463   : > { %v2996_v12 = vpop.permute.xlu1 %2995  ;;  %v2998_v16 = vpop.permute.xlu0 %2997 }
 0x464   : > { %3068 = vst.msk [vmem:[#allocation3 + $0xb8] sm:$0xff] %vm955_vm2, %v2996_v12  ;;  %3069 = vst.msk [vmem:[#allocation3 + $0xc0] sm:$0xff] %vm955_vm2, %v2998_v16  ;;  %v11387_v16 = vld [vmem:[#allocation5_spill] sm:$0xff] }
 0x465   : > { %3367 = vrot.lane.b32.xlu1 %v9076_v43, %s7473_s19  ;;  %3369 = vrot.lane.b32.xlu0 %v9078_v29, %s7473_s19 }
 0x467   : > { %v3000_v20 = vpop.permute.xlu1 %2999  ;;  %v3002_v17 = vpop.permute.xlu0 %3001 }
 0x468   : > { %3070 = vst.msk [vmem:[#allocation3 + $0xc8] sm:$0xff] %vm955_vm2, %v3000_v20  ;;  %3071 = vst.msk [vmem:[#allocation3 + $0xd0] sm:$0xff] %vm955_vm2, %v3002_v17  ;;  %v11388_v20 = vld [vmem:[#allocation6_spill] sm:$0xff] }
 0x469   : > { %3371 = vrot.lane.b32.xlu1 %v9085_v50, %s7473_s19  ;;  %3373 = vrot.lane.b32.xlu0 %v9087_v53, %s7473_s19 }
 0x46b   : > { %v3004_v21 = vpop.permute.xlu1 %3003  ;;  %v3006_v42 = vpop.permute.xlu0 %3005 }
 0x46c   : > { %3072 = vst.msk [vmem:[#allocation3 + $0xd8] sm:$0xff] %vm955_vm2, %v3004_v21  ;;  %3073 = vst.msk [vmem:[#allocation3 + $0xe0] sm:$0xff] %vm955_vm2, %v3006_v42 }
 0x46d   : > { %3375 = vrot.lane.b32.xlu1 %v9095_v7, %s7473_s19  ;;  %3377 = vrot.lane.b32.xlu0 %v9097_v15, %s7473_s19  ;;  %v9403_v7 = vld [vmem:[#allocation2 + $0x245] sm:$0xff] }
 0x46f   : > { %v3008_v43 = vpop.permute.xlu1 %3007  ;;  %v3010_v29 = vpop.permute.xlu0 %3009 }
 0x470   : > { %3074 = vst.msk [vmem:[#allocation3 + $0xe8] sm:$0xff] %vm955_vm2, %v3008_v43  ;;  %3075 = vst.msk [vmem:[#allocation3 + $0xf0] sm:$0xff] %vm955_vm2, %v3010_v29 }
 0x471   : > { %3379 = vrot.lane.b32.xlu1 %v9105_v49, %s7473_s19  ;;  %3381 = vrot.lane.b32.xlu0 %v9107_v33, %s7473_s19  ;;  %v9411_v49 = vld [vmem:[#allocation2 + $0x24d] sm:$0xff]  ;;  %v9413_v33 = vld [vmem:[#allocation2 + $0x265] sm:$0xff] }
 0x473   : > { %v3012_v50 = vpop.permute.xlu1 %3011  ;;  %v3142_v53 = vpop.permute.xlu0 %3141 }
 0x474   : > { %3076 = vst.msk [vmem:[#allocation3 + $0xf8] sm:$0xff] %vm955_vm2, %v3012_v50 }
 0x475   : > { %3237 = vst.msk [vmem:[#allocation3] sm:$0xff] %vm1148_vm3, %v3142_v53  ;;  %3383 = vrot.lane.b32.xlu1 %v9115_v5, %s7473_s19  ;;  %3385 = vrot.lane.b32.xlu0 %v9403_v7, %s7473_s19 }
 0x477   : > { %v3144_v15 = vpop.permute.xlu1 %3143  ;;  %v3146_v37 = vpop.permute.xlu0 %3145 }
 0x478   : > { %3238 = vst.msk [vmem:[#allocation3 + $0x8] sm:$0xff] %vm1148_vm3, %v3144_v15  ;;  %3239 = vst.msk [vmem:[#allocation3 + $0x10] sm:$0xff] %vm1148_vm3, %v3146_v37 }
 0x479   : > { %3387 = vrot.lane.b32.xlu1 %v9411_v49, %s7473_s19  ;;  %3389 = vrot.lane.b32.xlu0 %v9413_v33, %s7473_s19 }
 0x47b   : > { %v3148_v5 = vpop.permute.xlu1 %3147  ;;  %v3150_v41 = vpop.permute.xlu0 %3149 }
 0x47c   : > { %3240 = vst.msk [vmem:[#allocation3 + $0x18] sm:$0xff] %vm1148_vm3, %v3148_v5  ;;  %3241 = vst.msk [vmem:[#allocation3 + $0x20] sm:$0xff] %vm1148_vm3, %v3150_v41 }
 0x47d   : > { %3525 = vrot.lane.b32.xlu1 %v9130_v36, %s7474_s20  ;;  %3527 = vrot.lane.b32.xlu0 %v9137_v51, %s7474_s20 }
 0x47f   : > { %v3152_v26 = vpop.permute.xlu1 %3151  ;;  %v3154_v28 = vpop.permute.xlu0 %3153 }
 0x480   : > { %3242 = vst.msk [vmem:[#allocation3 + $0x28] sm:$0xff] %vm1148_vm3, %v3152_v26  ;;  %3243 = vst.msk [vmem:[#allocation3 + $0x30] sm:$0xff] %vm1148_vm3, %v3154_v28  ;;  %v11389_v28 = vld [vmem:[#allocation11_spill] sm:$0xff] }
 0x481   : > { %3529 = vrot.lane.b32.xlu1 %v9139_v54, %s7474_s20  ;;  %3531 = vrot.lane.b32.xlu0 %v9147_v63, %s7474_s20  ;;  %v7454_v54 = vld [vmem:[%s11256_s3 + $0x10] ss:$0 sps:$4 sm:$0x33]  }
 0x482   : > { %7432 = vmatprep.subr.msk.bf16.mxu1 %vm2271_vm7, %v7454_v54 }
 0x483   : > { %v3156_v31 = vpop.permute.xlu1 %3155  ;;  %v3158_v19 = vpop.permute.xlu0 %3157 }
 0x484   : > { %3244 = vst.msk [vmem:[#allocation3 + $0x38] sm:$0xff] %vm1148_vm3, %v3156_v31  ;;  %3245 = vst.msk [vmem:[#allocation3 + $0x40] sm:$0xff] %vm1148_vm3, %v3158_v19  ;;  %v11390_v31 = vld [vmem:[#allocation12_spill] sm:$0xff] }
 0x485   : > { %3718 = vrot.lane.b32.xlu1 %v8836_v34, %s7475_s21  ;;  %3720 = vrot.lane.b32.xlu0 %v8852_v14, %s7475_s21  ;;  %v4354_v14 = vsel %vm2271_vm7, %v7454_v54, 0  ;;  %v11392_v54 = vld [vmem:[#allocation14_spill] sm:$0xff] }
 0x486   : > { %7322 = vmatpush3.bf16.msra.mxu1 %v4354_v14 }
 0x487   : > { %v3160_v36 = vpop.permute.xlu1 %3159  ;;  %v3162_v51 = vpop.permute.xlu0 %3161 }
 0x488   : > { %3246 = vst.msk [vmem:[#allocation3 + $0x48] sm:$0xff] %vm1148_vm3, %v3160_v36  ;;  %3247 = vst.msk [vmem:[#allocation3 + $0x50] sm:$0xff] %vm1148_vm3, %v3162_v51  ;;  %v11391_v51 = vld [vmem:[#allocation13_spill] sm:$0xff] }
 0x489   : > { %3722 = vrot.lane.b32.xlu1 %v8870_v48, %s7475_s21  ;;  %3724 = vrot.lane.b32.xlu0 %v8888_v32, %s7475_s21  ;;  %v7455_v48 = vld [vmem:[%s11256_s3 + $0x8] sm:$0xff]  }
 0x48a   : > { %7323 = vmatprep.subr.bf16.mxu1 %v7455_v48 }
 0x48b   : > { %v3164_v34 = vpop.permute.xlu1 %3163  ;;  %v3166_v63 = vpop.permute.xlu0 %3165  ;;  %7324 = vmatpush3.bf16.msra.mxu1 %v7455_v48 }
 0x48c   : > { %3248 = vst.msk [vmem:[#allocation3 + $0x58] sm:$0xff] %vm1148_vm3, %v3164_v34  ;;  %3249 = vst.msk [vmem:[#allocation3 + $0x60] sm:$0xff] %vm1148_vm3, %v3166_v63  ;;  %7325 = vmatprep.subr.bf16.mxu1 %v7456_v57 }
 0x48d   : > { %3910 = vrot.lane.b32.xlu1 %v3846_v22, %s7476_s22  ;;  %3912 = vrot.lane.b32.xlu0 %v3847_v38, %s7476_s22 }
 0x48f   : > { %v3168_v32 = vpop.permute.xlu1 %3167  ;;  %v3170_v47 = vpop.permute.xlu0 %3169  ;;  %7326 = vmatpush3.bf16.msra.mxu1 %v7456_v57 }
 0x490   : > { %3250 = vst.msk [vmem:[#allocation3 + $0x68] sm:$0xff] %vm1148_vm3, %v3168_v32  ;;  %3251 = vst.msk [vmem:[#allocation3 + $0x70] sm:$0xff] %vm1148_vm3, %v3170_v47 }
 0x491   : > { %3914 = vrot.lane.b32.xlu1 %v3848_v52, %s7476_s22  ;;  %3916 = vrot.lane.b32.xlu0 %v3849_v25, %s7476_s22 }
 0x493   : > { %v3172_v59 = vpop.permute.xlu1 %3171  ;;  %v3174_v58 = vpop.permute.xlu0 %3173 }
 0x494   : > { %3252 = vst.msk [vmem:[#allocation3 + $0x78] sm:$0xff] %vm1148_vm3, %v3172_v59  ;;  %3253 = vst.msk [vmem:[#allocation3 + $0x80] sm:$0xff] %vm1148_vm3, %v3174_v58 }
 0x495   : > { %4102 = vrot.lane.b32.xlu1 %v11383_v60, %s7477_s27  ;;  %4104 = vrot.lane.b32.xlu0 %v11384_v62, %s7477_s27 }
 0x497   : > { %v3176_v3 = vpop.permute.xlu1 %3175  ;;  %v3178_v4 = vpop.permute.xlu0 %3177 }
 0x498   : > { %3254 = vst.msk [vmem:[#allocation3 + $0x88] sm:$0xff] %vm1148_vm3, %v3176_v3  ;;  %3255 = vst.msk [vmem:[#allocation3 + $0x90] sm:$0xff] %vm1148_vm3, %v3178_v4  ;;  %v4047_v3 = vld [vmem:[#allocation2 + $0x190] sm:$0xff] }
 0x499   : > { %4106 = vrot.lane.b32.xlu1 %v11385_v8, %s7477_s27  ;;  %4108 = vrot.lane.b32.xlu0 %v11386_v6, %s7477_s27 }
 0x49b   : > { %v3180_v9 = vpop.permute.xlu1 %3179  ;;  %v3182_v12 = vpop.permute.xlu0 %3181 }
 0x49c   : > { %3256 = vst.msk [vmem:[#allocation3 + $0x98] sm:$0xff] %vm1148_vm3, %v3180_v9  ;;  %3257 = vst.msk [vmem:[#allocation3 + $0xa0] sm:$0xff] %vm1148_vm3, %v3182_v12  ;;  %v9558_v9 = vld [vmem:[#allocation2 + $0x1b0] sm:$0xff] }
 0x49d   : > { %3533 = vrot.lane.b32.xlu1 %v11387_v16, %s7474_s20  ;;  %3535 = vrot.lane.b32.xlu0 %v11388_v20, %s7474_s20  ;;  %v3473_v20 = vld [vmem:[#allocation2 + $0x168] sm:$0xff] }
 0x49f   : > { %v3184_v17 = vpop.permute.xlu1 %3183  ;;  %v3186_v21 = vpop.permute.xlu0 %3185 }
 0x4a0   : > { %3258 = vst.msk [vmem:[#allocation3 + $0xa8] sm:$0xff] %vm1148_vm3, %v3184_v17  ;;  %3259 = vst.msk [vmem:[#allocation3 + $0xb0] sm:$0xff] %vm1148_vm3, %v3186_v21  ;;  %v3474_v17 = vld [vmem:[#allocation2 + $0x170] sm:$0xff] }
 0x4a1   : > { %3537 = vrot.lane.b32.xlu1 %v11383_v60, %s7474_s20  ;;  %3539 = vrot.lane.b32.xlu0 %v11384_v62, %s7474_s20  ;;  %v4046_v62 = vld [vmem:[#allocation2 + $0x188] sm:$0xff] }
 0x4a3   : > { %v3188_v42 = vpop.permute.xlu1 %3187  ;;  %v3190_v43 = vpop.permute.xlu0 %3189 }
 0x4a4   : > { %3260 = vst.msk [vmem:[#allocation3 + $0xb8] sm:$0xff] %vm1148_vm3, %v3188_v42  ;;  %3261 = vst.msk [vmem:[#allocation3 + $0xc0] sm:$0xff] %vm1148_vm3, %v3190_v43 }
 0x4a5   : > { %3726 = vrot.lane.b32.xlu1 %v8864_v0, %s7475_s21  ;;  %3728 = vrot.lane.b32.xlu0 %v8880_v35, %s7475_s21  ;;  %v3850_v0 = vld [vmem:[#allocation2 + $0x145] sm:$0xff]  ;;  %v3851_v35 = vld [vmem:[#allocation2 + $0x14d] sm:$0xff] }
 0x4a7   : > { %v3192_v29 = vpop.permute.xlu1 %3191  ;;  %v3194_v50 = vpop.permute.xlu0 %3193 }
 0x4a8   : > { %3262 = vst.msk [vmem:[#allocation3 + $0xc8] sm:$0xff] %vm1148_vm3, %v3192_v29  ;;  %3263 = vst.msk [vmem:[#allocation3 + $0xd0] sm:$0xff] %vm1148_vm3, %v3194_v50 }
 0x4a9   : > { %3730 = vrot.lane.b32.xlu1 %v8898_v40, %s7475_s21  ;;  %3732 = vrot.lane.b32.xlu0 %v8916_v61, %s7475_s21  ;;  %v3852_v40 = vld [vmem:[#allocation2 + $0x165] sm:$0xff]  ;;  %v3853_v61 = vld [vmem:[#allocation2 + $0x16d] sm:$0xff] }
 0x4ab   : > { %v3196_v53 = vpop.permute.xlu1 %3195  ;;  %v3198_v15 = vpop.permute.xlu0 %3197 }
 0x4ac   : > { %3264 = vst.msk [vmem:[#allocation3 + $0xd8] sm:$0xff] %vm1148_vm3, %v3196_v53  ;;  %3265 = vst.msk [vmem:[#allocation3 + $0xe0] sm:$0xff] %vm1148_vm3, %v3198_v15 }
 0x4ad   : > { %3918 = vrot.lane.b32.xlu1 %v3850_v0, %s7476_s22  ;;  %3920 = vrot.lane.b32.xlu0 %v3851_v35, %s7476_s22 }
 0x4af   : > { %v3200_v37 = vpop.permute.xlu1 %3199  ;;  %v3202_v5 = vpop.permute.xlu0 %3201 }
 0x4b0   : > { %3266 = vst.msk [vmem:[#allocation3 + $0xe8] sm:$0xff] %vm1148_vm3, %v3200_v37  ;;  %3267 = vst.msk [vmem:[#allocation3 + $0xf0] sm:$0xff] %vm1148_vm3, %v3202_v5 }
 0x4b1   : > { %3922 = vrot.lane.b32.xlu1 %v3852_v40, %s7476_s22  ;;  %3924 = vrot.lane.b32.xlu0 %v3853_v61, %s7476_s22  ;;  %v4050_v61 = vld [vmem:[#allocation2 + $0x1c8] sm:$0xff] }
 0x4b3   : > { %v3204_v41 = vpop.permute.xlu1 %3203  ;;  %v3334_v26 = vpop.permute.xlu0 %3333 }
 0x4b4   : > { %3268 = vst.msk [vmem:[#allocation3 + $0xf8] sm:$0xff] %vm1148_vm3, %v3204_v41  ;;  %v4051_v41 = vld [vmem:[#allocation2 + $0x1d0] sm:$0xff] }
 0x4b5   : > { %3429 = vst.msk [vmem:[#allocation3] sm:$0xff] %vm1341_vm4, %v3334_v26  ;;  %4110 = vrot.lane.b32.xlu1 %v11389_v28, %s7477_s27  ;;  %4112 = vrot.lane.b32.xlu0 %v11390_v31, %s7477_s27 }
 0x4b7   : > { %v3336_v19 = vpop.permute.xlu1 %3335  ;;  %v3338_v36 = vpop.permute.xlu0 %3337 }
 0x4b8   : > { %3430 = vst.msk [vmem:[#allocation3 + $0x8] sm:$0xff] %vm1341_vm4, %v3336_v19  ;;  %3431 = vst.msk [vmem:[#allocation3 + $0x10] sm:$0xff] %vm1341_vm4, %v3338_v36  ;;  %v9600_v19 = vld [vmem:[#allocation2 + $0x1f0] sm:$0xff] }
 0x4b9   : > { %4114 = vrot.lane.b32.xlu1 %v11391_v51, %s7477_s27  ;;  %4116 = vrot.lane.b32.xlu0 %v11392_v54, %s7477_s27 }
 0x4bb   : > { %v3340_v34 = vpop.permute.xlu1 %3339  ;;  %v3342_v63 = vpop.permute.xlu0 %3341 }
 0x4bc   : > { %3432 = vst.msk [vmem:[#allocation3 + $0x18] sm:$0xff] %vm1341_vm4, %v3340_v34  ;;  %3433 = vst.msk [vmem:[#allocation3 + $0x20] sm:$0xff] %vm1341_vm4, %v3342_v63 }
 0x4bd   : > { %3541 = vrot.lane.b32.xlu1 %v11385_v8, %s7474_s20  ;;  %3543 = vrot.lane.b32.xlu0 %v11386_v6, %s7474_s20  ;;  %v9556_v6 = vld [vmem:[#allocation2 + $0x1a8] sm:$0xff] }
 0x4bf   : > { %v3344_v14 = vpop.permute.xlu1 %3343  ;;  %v3346_v22 = vpop.permute.xlu0 %3345 }
 0x4c0   : > { %3434 = vst.msk [vmem:[#allocation3 + $0x28] sm:$0xff] %vm1341_vm4, %v3344_v14  ;;  %3435 = vst.msk [vmem:[#allocation3 + $0x30] sm:$0xff] %vm1341_vm4, %v3346_v22 }
 0x4c1   : > { %3545 = vrot.lane.b32.xlu1 %v11389_v28, %s7474_s20  ;;  %3547 = vrot.lane.b32.xlu0 %v11390_v31, %s7474_s20  ;;  %v9598_v31 = vld [vmem:[#allocation2 + $0x1e8] sm:$0xff] }
 0x4c3   : > { %v3348_v38 = vpop.permute.xlu1 %3347  ;;  %v3350_v48 = vpop.permute.xlu0 %3349 }
 0x4c4   : > { %3436 = vst.msk [vmem:[#allocation3 + $0x38] sm:$0xff] %vm1341_vm4, %v3348_v38  ;;  %3437 = vst.msk [vmem:[#allocation3 + $0x40] sm:$0xff] %vm1341_vm4, %v3350_v48 }
 0x4c5   : > { %3734 = vrot.lane.b32.xlu1 %v8892_v39, %s7475_s21  ;;  %3736 = vrot.lane.b32.xlu0 %v8908_v55, %s7475_s21  ;;  %v3854_v39 = vld [vmem:[#allocation2 + $0x185] sm:$0xff]  ;;  %v3855_v55 = vld [vmem:[#allocation2 + $0x18d] sm:$0xff] }
 0x4c7   : > { %v3352_v32 = vpop.permute.xlu1 %3351  ;;  %v3354_v47 = vpop.permute.xlu0 %3353 }
 0x4c8   : > { %3438 = vst.msk [vmem:[#allocation3 + $0x48] sm:$0xff] %vm1341_vm4, %v3352_v32  ;;  %3439 = vst.msk [vmem:[#allocation3 + $0x50] sm:$0xff] %vm1341_vm4, %v3354_v47 }
 0x4c9   : > { %3738 = vrot.lane.b32.xlu1 %v8926_v2, %s7475_s21  ;;  %3740 = vrot.lane.b32.xlu0 %v8944_v11, %s7475_s21  ;;  %v3856_v2 = vld [vmem:[#allocation2 + $0x1a5] sm:$0xff]  ;;  %v3857_v11 = vld [vmem:[#allocation2 + $0x1ad] sm:$0xff] }
 0x4cb   : > { %v3356_v52 = vpop.permute.xlu1 %3355  ;;  %v3358_v25 = vpop.permute.xlu0 %3357 }
 0x4cc   : > { %3440 = vst.msk [vmem:[#allocation3 + $0x58] sm:$0xff] %vm1341_vm4, %v3356_v52  ;;  %3441 = vst.msk [vmem:[#allocation3 + $0x60] sm:$0xff] %vm1341_vm4, %v3358_v25 }
 0x4cd   : > { %3926 = vrot.lane.b32.xlu1 %v3854_v39, %s7476_s22  ;;  %3928 = vrot.lane.b32.xlu0 %v3855_v55, %s7476_s22 }
 0x4cf   : > { %v3360_v57 = vpop.permute.xlu1 %3359  ;;  %v3362_v59 = vpop.permute.xlu0 %3361 }
 0x4d0   : > { %3442 = vst.msk [vmem:[#allocation3 + $0x68] sm:$0xff] %vm1341_vm4, %v3360_v57  ;;  %3443 = vst.msk [vmem:[#allocation3 + $0x70] sm:$0xff] %vm1341_vm4, %v3362_v59 }
 0x4d1   : > { %3930 = vrot.lane.b32.xlu1 %v3856_v2, %s7476_s22  ;;  %3932 = vrot.lane.b32.xlu0 %v3857_v11, %s7476_s22 }
 0x4d3   : > { %v3364_v58 = vpop.permute.xlu1 %3363  ;;  %v3366_v60 = vpop.permute.xlu0 %3365 }
 0x4d4   : > { %3444 = vst.msk [vmem:[#allocation3 + $0x78] sm:$0xff] %vm1341_vm4, %v3364_v58  ;;  %3445 = vst.msk [vmem:[#allocation3 + $0x80] sm:$0xff] %vm1341_vm4, %v3366_v60  ;;  %v4054_v58 = vld [vmem:[#allocation2 + $0x208] sm:$0xff]  ;;  %v4055_v60 = vld [vmem:[#allocation2 + $0x210] sm:$0xff] }
 0x4d5   : > { %4118 = vrot.lane.b32.xlu1 %v4046_v62, %s7477_s27  ;;  %4120 = vrot.lane.b32.xlu0 %v4047_v3, %s7477_s27 }
 0x4d7   : > { %v3368_v4 = vpop.permute.xlu1 %3367  ;;  %v3370_v8 = vpop.permute.xlu0 %3369 }
 0x4d8   : > { %3446 = vst.msk [vmem:[#allocation3 + $0x88] sm:$0xff] %vm1341_vm4, %v3368_v4  ;;  %3447 = vst.msk [vmem:[#allocation3 + $0x90] sm:$0xff] %vm1341_vm4, %v3370_v8  ;;  %v9644_v8 = vld [vmem:[#allocation2 + $0x228] sm:$0xff] }
 0x4d9   : > { %4122 = vrot.lane.b32.xlu1 %v9556_v6, %s7477_s27  ;;  %4124 = vrot.lane.b32.xlu0 %v9558_v9, %s7477_s27 }
 0x4db   : > { %v3372_v12 = vpop.permute.xlu1 %3371  ;;  %v3374_v16 = vpop.permute.xlu0 %3373 }
 0x4dc   : > { %3448 = vst.msk [vmem:[#allocation3 + $0x98] sm:$0xff] %vm1341_vm4, %v3372_v12  ;;  %3449 = vst.msk [vmem:[#allocation3 + $0xa0] sm:$0xff] %vm1341_vm4, %v3374_v16 }
 0x4dd   : > { %3549 = vrot.lane.b32.xlu1 %v3473_v20, %s7474_s20  ;;  %3551 = vrot.lane.b32.xlu0 %v3474_v17, %s7474_s20 }
 0x4df   : > { %v3376_v21 = vpop.permute.xlu1 %3375  ;;  %v3378_v42 = vpop.permute.xlu0 %3377 }
 0x4e0   : > { %3450 = vst.msk [vmem:[#allocation3 + $0xa8] sm:$0xff] %vm1341_vm4, %v3376_v21  ;;  %3451 = vst.msk [vmem:[#allocation3 + $0xb0] sm:$0xff] %vm1341_vm4, %v3378_v42 }
 0x4e1   : > { %3553 = vrot.lane.b32.xlu1 %v4046_v62, %s7474_s20  ;;  %3555 = vrot.lane.b32.xlu0 %v4047_v3, %s7474_s20 }
 0x4e3   : > { %v3380_v43 = vpop.permute.xlu1 %3379  ;;  %v3382_v29 = vpop.permute.xlu0 %3381 }
 0x4e4   : > { %3452 = vst.msk [vmem:[#allocation3 + $0xb8] sm:$0xff] %vm1341_vm4, %v3380_v43  ;;  %3453 = vst.msk [vmem:[#allocation3 + $0xc0] sm:$0xff] %vm1341_vm4, %v3382_v29 }
 0x4e5   : > { %3742 = vrot.lane.b32.xlu1 %v8920_v1, %s7475_s21  ;;  %3744 = vrot.lane.b32.xlu0 %v8936_v10, %s7475_s21  ;;  %v3858_v1 = vld [vmem:[#allocation2 + $0x1c5] sm:$0xff]  ;;  %v3859_v10 = vld [vmem:[#allocation2 + $0x1cd] sm:$0xff] }
 0x4e7   : > { %v3384_v50 = vpop.permute.xlu1 %3383  ;;  %v3386_v53 = vpop.permute.xlu0 %3385 }
 0x4e8   : > { %3454 = vst.msk [vmem:[#allocation3 + $0xc8] sm:$0xff] %vm1341_vm4, %v3384_v50  ;;  %3455 = vst.msk [vmem:[#allocation3 + $0xd0] sm:$0xff] %vm1341_vm4, %v3386_v53 }
 0x4e9   : > { %3746 = vrot.lane.b32.xlu1 %v8954_v24, %s7475_s21  ;;  %3748 = vrot.lane.b32.xlu0 %v8973_v27, %s7475_s21  ;;  %v3860_v24 = vld [vmem:[#allocation2 + $0x1e5] sm:$0xff]  ;;  %v3861_v27 = vld [vmem:[#allocation2 + $0x1ed] sm:$0xff] }
 0x4eb   : > { %v3388_v15 = vpop.permute.xlu1 %3387  ;;  %v3390_v0 = vpop.permute.xlu0 %3389 }
 0x4ec   : > { %3456 = vst.msk [vmem:[#allocation3 + $0xd8] sm:$0xff] %vm1341_vm4, %v3388_v15  ;;  %3457 = vst.msk [vmem:[#allocation3 + $0xe0] sm:$0xff] %vm1341_vm4, %v3390_v0 }
 0x4ed   : > { %3934 = vrot.lane.b32.xlu1 %v3858_v1, %s7476_s22  ;;  %3936 = vrot.lane.b32.xlu0 %v3859_v10, %s7476_s22  ;;  %v4058_v10 = vld [vmem:[#allocation2 + $0x248] sm:$0xff] }
 0x4ef   : > { %v3526_v35 = vpop.permute.xlu1 %3525  ;;  %v3528_v37 = vpop.permute.xlu0 %3527 }
 0x4f0   : > { %3621 = vst.msk [vmem:[#allocation3] sm:$0xff] %vm1534_vm5, %v3526_v35  ;;  %3622 = vst.msk [vmem:[#allocation3 + $0x8] sm:$0xff] %vm1534_vm5, %v3528_v37  ;;  %v4059_v35 = vld [vmem:[#allocation2 + $0x250] sm:$0xff] }
 0x4f1   : > { %3938 = vrot.lane.b32.xlu1 %v3860_v24, %s7476_s22  ;;  %3940 = vrot.lane.b32.xlu0 %v3861_v27, %s7476_s22  ;;  %v9696_v27 = vld [vmem:[#allocation2 + $0x268] sm:$0xff] }
 0x4f3   : > { %v3530_v5 = vpop.permute.xlu1 %3529  ;;  %v3532_v40 = vpop.permute.xlu0 %3531 }
 0x4f4   : > { %3623 = vst.msk [vmem:[#allocation3 + $0x10] sm:$0xff] %vm1534_vm5, %v3530_v5  ;;  %3624 = vst.msk [vmem:[#allocation3 + $0x18] sm:$0xff] %vm1534_vm5, %v3532_v40  ;;  %v9698_v5 = vld [vmem:[#allocation2 + $0x270] sm:$0xff] }
 0x4f5   : > { %4126 = vrot.lane.b32.xlu1 %v4050_v61, %s7477_s27  ;;  %4128 = vrot.lane.b32.xlu0 %v4051_v41, %s7477_s27 }
 0x4f7   : > { %v3719_v26 = vpop.permute.xlu1 %3718  ;;  %v3721_v28 = vpop.permute.xlu0 %3720 }
 0x4f8   : > { %3814 = vst.msk [vmem:[#allocation3] sm:$0xff] %vm1728_vm6, %v3719_v26  ;;  %3815 = vst.msk [vmem:[#allocation3 + $0x8] sm:$0xff] %vm1728_vm6, %v3721_v28 }
 0x4f9   : > { %4130 = vrot.lane.b32.xlu1 %v9598_v31, %s7477_s27  ;;  %4132 = vrot.lane.b32.xlu0 %v9600_v19, %s7477_s27 }
 0x4fb   : > { %v3723_v36 = vpop.permute.xlu1 %3722  ;;  %v3725_v51 = vpop.permute.xlu0 %3724 }
 0x4fc   : > { %3816 = vst.msk [vmem:[#allocation3 + $0x10] sm:$0xff] %vm1728_vm6, %v3723_v36  ;;  %3817 = vst.msk [vmem:[#allocation3 + $0x18] sm:$0xff] %vm1728_vm6, %v3725_v51  ;;  %v3679_v36 = vld [vmem:[#allocation2 + $0x28a] sm:$0xff]  ;;  %v3680_v51 = vld [vmem:[#allocation2 + $0x2a2] sm:$0xff] }
 0x4fd   : > { %3557 = vrot.lane.b32.xlu1 %v9556_v6, %s7474_s20  ;;  %3559 = vrot.lane.b32.xlu0 %v9558_v9, %s7474_s20  ;;  %v9646_v6 = vld [vmem:[#allocation2 + $0x230] sm:$0xff] }
 0x4ff   : > { %v3911_v54 = vpop.permute.xlu1 %3910  ;;  %v3913_v34 = vpop.permute.xlu0 %3912 }
 0x500   : > { %4006 = vst.msk [vmem:[#allocation3] sm:$0xff] %vm1921_vm8, %v3911_v54  ;;  %4007 = vst.msk [vmem:[#allocation3 + $0x8] sm:$0xff] %vm1921_vm8, %v3913_v34  ;;  %v3681_v54 = vld [vmem:[#allocation2 + $0x2aa] sm:$0xff] }
 0x501   : > { %3561 = vrot.lane.b32.xlu1 %v4050_v61, %s7474_s20  ;;  %3563 = vrot.lane.b32.xlu0 %v4051_v41, %s7474_s20 }
 0x503   : > { %v3915_v63 = vpop.permute.xlu1 %3914  ;;  %v3917_v14 = vpop.permute.xlu0 %3916 }
 0x504   : > { %4008 = vst.msk [vmem:[#allocation3 + $0x10] sm:$0xff] %vm1921_vm8, %v3915_v63  ;;  %4009 = vst.msk [vmem:[#allocation3 + $0x18] sm:$0xff] %vm1921_vm8, %v3917_v14 }
 0x505   : > { %3750 = vrot.lane.b32.xlu1 %v8948_v13, %s7475_s21  ;;  %3752 = vrot.lane.b32.xlu0 %v8964_v44, %s7475_s21  ;;  %v3862_v13 = vld [vmem:[#allocation2 + $0x205] sm:$0xff]  ;;  %v3863_v44 = vld [vmem:[#allocation2 + $0x20d] sm:$0xff] }
 0x507   : > { %v4103_v22 = vpop.permute.xlu1 %4102  ;;  %v4105_v38 = vpop.permute.xlu0 %4104 }
 0x508   : > { %4198 = vst.msk [vmem:[#allocation3] sm:$0xff] %vm2114_vm9, %v4103_v22  ;;  %4199 = vst.msk [vmem:[#allocation3 + $0x8] sm:$0xff] %vm2114_vm9, %v4105_v38  ;;  %v3870_v38 = vld [vmem:[#allocation2 + $0x285] sm:$0xff] }
 0x509   : > { %3754 = vrot.lane.b32.xlu1 %v8981_v18, %s7475_s21  ;;  %3756 = vrot.lane.b32.xlu0 %v8996_v30, %s7475_s21  ;;  %v3864_v18 = vld [vmem:[#allocation2 + $0x225] sm:$0xff]  ;;  %v3865_v30 = vld [vmem:[#allocation2 + $0x22d] sm:$0xff] }
 0x50b   : > { %v4107_v48 = vpop.permute.xlu1 %4106  ;;  %v4109_v32 = vpop.permute.xlu0 %4108 }
 0x50c   : > { %4200 = vst.msk [vmem:[#allocation3 + $0x10] sm:$0xff] %vm2114_vm9, %v4107_v48  ;;  %4201 = vst.msk [vmem:[#allocation3 + $0x18] sm:$0xff] %vm2114_vm9, %v4109_v32  ;;  %v3871_v48 = vld [vmem:[#allocation2 + $0x28d] sm:$0xff]  ;;  %v3872_v32 = vld [vmem:[#allocation2 + $0x2a5] sm:$0xff] }
 0x50d   : > { %3942 = vrot.lane.b32.xlu1 %v3862_v13, %s7476_s22  ;;  %3944 = vrot.lane.b32.xlu0 %v3863_v44, %s7476_s22  ;;  %v3873_v13 = vld [vmem:[#allocation2 + $0x2ad] sm:$0xff] }
 0x50f   : > { %v3534_v47 = vpop.permute.xlu1 %3533  ;;  %v3536_v52 = vpop.permute.xlu0 %3535  ;;  %v4230_v25 = vld [vmem:[#allocation3] sm:$0xff]  ;;  %v4231_v39 = vld [vmem:[#allocation3 + $0x8] sm:$0xff] }
 0x510   : > { %3625 = vst.msk [vmem:[#allocation3 + $0x20] sm:$0xff] %vm1534_vm5, %v3534_v47  ;;  %3626 = vst.msk [vmem:[#allocation3 + $0x28] sm:$0xff] %vm1534_vm5, %v3536_v52  ;;  %v4262_v55 = vpack.c.bf16 %v4231_v39, %v4230_v25 }
 0x511   : > { %3946 = vrot.lane.b32.xlu1 %v3864_v18, %s7476_s22  ;;  %3948 = vrot.lane.b32.xlu0 %v3865_v30, %s7476_s22 }
 0x512   : > { %7327 = vmatprep.mubr.msk.bf16.mxu1 %vm2222_vm10, %v4262_v55 }
 0x513   : > { %v3538_v57 = vpop.permute.xlu1 %3537  ;;  %v3540_v59 = vpop.permute.xlu0 %3539  ;;  %v4232_v2 = vld [vmem:[#allocation3 + $0x10] sm:$0xff]  ;;  %v4233_v11 = vld [vmem:[#allocation3 + $0x18] sm:$0xff] }
 0x514   : > { %3627 = vst.msk [vmem:[#allocation3 + $0x30] sm:$0xff] %vm1534_vm5, %v3538_v57  ;;  %3628 = vst.msk [vmem:[#allocation3 + $0x38] sm:$0xff] %vm1534_vm5, %v3540_v59  ;;  %v4263_v62 = vpack.c.bf16 %v4233_v11, %v4232_v2  ;;  %v4062_v59 = vld [vmem:[#allocation2 + $0x288] sm:$0xff]  ;;  %v9733_v2 = vld [vmem:[#allocation2 + $0x290] sm:$0xff] }
 0x515   : > { %4134 = vrot.lane.b32.xlu1 %v4054_v58, %s7477_s27  ;;  %4136 = vrot.lane.b32.xlu0 %v4055_v60, %s7477_s27 }
 0x516   : > { %7328 = vmatmul.mubr.msk.bf16.vlgmr.msra.gmra.mxu1 %vm2222_vm10, %v4263_v62 }
 0x517   : > { %v3727_v3 = vpop.permute.xlu1 %3726  ;;  %v3729_v4 = vpop.permute.xlu0 %3728 }
 0x518   : > { %3818 = vst.msk [vmem:[#allocation3 + $0x20] sm:$0xff] %vm1728_vm6, %v3727_v3  ;;  %3819 = vst.msk [vmem:[#allocation3 + $0x28] sm:$0xff] %vm1728_vm6, %v3729_v4 }
 0x519   : > { %4138 = vrot.lane.b32.xlu1 %v9644_v8, %s7477_s27  ;;  %4140 = vrot.lane.b32.xlu0 %v9646_v6, %s7477_s27 }
 0x51b   : > { %v3731_v9 = vpop.permute.xlu1 %3730  ;;  %v3733_v12 = vpop.permute.xlu0 %3732 }
 0x51c   : > { %3820 = vst.msk [vmem:[#allocation3 + $0x30] sm:$0xff] %vm1728_vm6, %v3731_v9  ;;  %3821 = vst.msk [vmem:[#allocation3 + $0x38] sm:$0xff] %vm1728_vm6, %v3733_v12 }
 0x51d   : > { %3565 = vrot.lane.b32.xlu1 %v9598_v31, %s7474_s20  ;;  %3567 = vrot.lane.b32.xlu0 %v9600_v19, %s7474_s20  ;;  %v3678_v19 = vld [vmem:[#allocation2 + $0x282] sm:$0xff] }
 0x51f   : > { %v3919_v16 = vpop.permute.xlu1 %3918  ;;  %v3921_v20 = vpop.permute.xlu0 %3920 }
 0x520   : > { %4010 = vst.msk [vmem:[#allocation3 + $0x20] sm:$0xff] %vm1921_vm8, %v3919_v16  ;;  %4011 = vst.msk [vmem:[#allocation3 + $0x28] sm:$0xff] %vm1921_vm8, %v3921_v20  ;;  %v11393_v20 = vmov 0.0  }
 0x521   : > { %3569 = vrot.lane.b32.xlu1 %v4054_v58, %s7474_s20  ;;  %3571 = vrot.lane.b32.xlu0 %v4055_v60, %s7474_s20  ;;  %v4064_v58 = vld [vmem:[#allocation2 + $0x2a8] sm:$0xff]  ;;  %v4065_v60 = vld [vmem:[#allocation2 + $0x2b0] sm:$0xff]  ;;  %339 = vst.msk [vmem:[#allocation2 + $0x18] sm:$0x3] %vm338_vm11, %v11393_v20  ;;  %343 = vst.msk [vmem:[#allocation2 + $0x38] sm:$0x3] %vm338_vm11, %v11393_v20 }
 0x522   : > { %347 = vst.msk [vmem:[#allocation2 + $0x58] sm:$0x3] %vm338_vm11, %v11393_v20  ;;  %351 = vst.msk [vmem:[#allocation2 + $0x78] sm:$0x3] %vm338_vm11, %v11393_v20 }
 0x523   : > { %v3923_v17 = vpop.permute.xlu1 %3922  ;;  %v3925_v21 = vpop.permute.xlu0 %3924  ;;  %355 = vst.msk [vmem:[#allocation2 + $0x98] sm:$0x3] %vm338_vm11, %v11393_v20  ;;  %359 = vst.msk [vmem:[#allocation2 + $0xb8] sm:$0x3] %vm338_vm11, %v11393_v20 }
 0x524   : > { %4012 = vst.msk [vmem:[#allocation3 + $0x30] sm:$0xff] %vm1921_vm8, %v3923_v17  ;;  %4013 = vst.msk [vmem:[#allocation3 + $0x38] sm:$0xff] %vm1921_vm8, %v3925_v21  ;;  %v3682_v17 = vld [vmem:[#allocation2 + $0x2c2] sm:$0xff] }
 0x525   : > { %3758 = vrot.lane.b32.xlu1 %v9301_v46, %s7475_s21  ;;  %3760 = vrot.lane.b32.xlu0 %v9309_v56, %s7475_s21  ;;  %363 = vst.msk [vmem:[#allocation2 + $0xd8] sm:$0x3] %vm338_vm11, %v11393_v20  ;;  %367 = vst.msk [vmem:[#allocation2 + $0xf8] sm:$0x3] %vm338_vm11, %v11393_v20 }
 0x526   : > { %371 = vst.msk [vmem:[#allocation2 + $0x118] sm:$0x3] %vm338_vm11, %v11393_v20  ;;  %375 = vst.msk [vmem:[#allocation2 + $0x138] sm:$0x3] %vm338_vm11, %v11393_v20 }
 0x527   : > { %v4111_v42 = vpop.permute.xlu1 %4110  ;;  %v4113_v43 = vpop.permute.xlu0 %4112  ;;  %379 = vst.msk [vmem:[#allocation2 + $0x158] sm:$0x3] %vm338_vm11, %v11393_v20  ;;  %383 = vst.msk [vmem:[#allocation2 + $0x178] sm:$0x3] %vm338_vm11, %v11393_v20 }
 0x528   : > { %4202 = vst.msk [vmem:[#allocation3 + $0x20] sm:$0xff] %vm2114_vm9, %v4111_v42  ;;  %4203 = vst.msk [vmem:[#allocation3 + $0x28] sm:$0xff] %vm2114_vm9, %v4113_v43  ;;  %v3683_v43 = vld [vmem:[#allocation2 + $0x2ca] sm:$0xff] }
 0x529   : > { %3762 = vrot.lane.b32.xlu1 %v9311_v45, %s7475_s21  ;;  %3764 = vrot.lane.b32.xlu0 %v9319_v23, %s7475_s21  ;;  %v9682_v45 = vld [vmem:[#allocation2 + $0x26d] sm:$0xff]  ;;  %387 = vst.msk [vmem:[#allocation2 + $0x198] sm:$0x3] %vm338_vm11, %v11393_v20  ;;  %391 = vst.msk [vmem:[#allocation2 + $0x1b8] sm:$0x3] %vm338_vm11, %v11393_v20 }
 0x52a   : > { %395 = vst.msk [vmem:[#allocation2 + $0x1d8] sm:$0x3] %vm338_vm11, %v11393_v20  ;;  %399 = vst.msk [vmem:[#allocation2 + $0x1f8] sm:$0x3] %vm338_vm11, %v11393_v20 }
 0x52b   : > { %v4115_v29 = vpop.permute.xlu1 %4114  ;;  %v4117_v50 = vpop.permute.xlu0 %4116  ;;  %403 = vst.msk [vmem:[#allocation2 + $0x218] sm:$0x3] %vm338_vm11, %v11393_v20  ;;  %407 = vst.msk [vmem:[#allocation2 + $0x238] sm:$0x3] %vm338_vm11, %v11393_v20 }
 0x52c   : > { %4204 = vst.msk [vmem:[#allocation3 + $0x30] sm:$0xff] %vm2114_vm9, %v4115_v29  ;;  %4205 = vst.msk [vmem:[#allocation3 + $0x38] sm:$0xff] %vm2114_vm9, %v4117_v50  ;;  %v3684_v29 = vld [vmem:[#allocation2 + $0x2e2] sm:$0xff] }
 0x52d   : > { %3950 = vrot.lane.b32.xlu1 %v9403_v7, %s7476_s22  ;;  %3952 = vrot.lane.b32.xlu0 %v9411_v49, %s7476_s22  ;;  %411 = vst.msk [vmem:[#allocation2 + $0x258] sm:$0x3] %vm338_vm11, %v11393_v20  ;;  %415 = vst.msk [vmem:[#allocation2 + $0x278] sm:$0x3] %vm338_vm11, %v11393_v20 }
 0x52e   : > { %419 = vst.msk [vmem:[#allocation2 + $0x298] sm:$0x3] %vm338_vm11, %v11393_v20  ;;  %423 = vst.msk [vmem:[#allocation2 + $0x2b8] sm:$0x3] %vm338_vm11, %v11393_v20 }
 0x52f   : > { %v3542_v46 = vpop.permute.xlu1 %3541  ;;  %v3544_v56 = vpop.permute.xlu0 %3543  ;;  %v4234_v53 = vld [vmem:[#allocation3 + $0x20] sm:$0xff]  ;;  %v4235_v15 = vld [vmem:[#allocation3 + $0x28] sm:$0xff]  ;;  %427 = vst.msk [vmem:[#allocation2 + $0x2d8] sm:$0x3] %vm338_vm11, %v11393_v20  ;;  %431 = vst.msk [vmem:[#allocation2 + $0x2f8] sm:$0x3] %vm338_vm11, %v11393_v20 }
 0x530   : > { %3629 = vst.msk [vmem:[#allocation3 + $0x40] sm:$0xff] %vm1534_vm5, %v3542_v46  ;;  %3630 = vst.msk [vmem:[#allocation3 + $0x48] sm:$0xff] %vm1534_vm5, %v3544_v56  ;;  %v4264_v23 = vpack.c.bf16 %v4235_v15, %v4234_v53  ;;  %v3685_v56 = vld [vmem:[#allocation2 + $0x2ea] sm:$0xff] }
 0x531   : > { %3954 = vrot.lane.b32.xlu1 %v9413_v33, %s7476_s22  ;;  %3956 = vrot.lane.b32.xlu0 %v9682_v45, %s7476_s22  ;;  %435 = vst.msk [vmem:[#allocation2 + $0x318] sm:$0x3] %vm338_vm11, %v11393_v20  ;;  %439 = vst.msk [vmem:[#allocation2 + $0x338] sm:$0x3] %vm338_vm11, %v11393_v20  ;;  %v3874_v53 = vld [vmem:[#allocation2 + $0x2c5] sm:$0xff] }
 0x532   : > { %7331 = vmatprep.mubr.msk.bf16.mxu1 %vm2222_vm10, %v4264_v23 }
 0x533   : > { %v3546_v7 = vpop.permute.xlu1 %3545  ;;  %v3548_v49 = vpop.permute.xlu0 %3547  ;;  %v4236_v0 = vld [vmem:[#allocation3 + $0x30] sm:$0xff]  ;;  %v4237_v1 = vld [vmem:[#allocation3 + $0x38] sm:$0xff] }
 0x534   : > { %3631 = vst.msk [vmem:[#allocation3 + $0x50] sm:$0xff] %vm1534_vm5, %v3546_v7  ;;  %3632 = vst.msk [vmem:[#allocation3 + $0x58] sm:$0xff] %vm1534_vm5, %v3548_v49  ;;  %v4265_v37 = vpack.c.bf16 %v4237_v1, %v4236_v0  ;;  %v3875_v0 = vld [vmem:[#allocation2 + $0x2cd] sm:$0xff]  ;;  %v3876_v1 = vld [vmem:[#allocation2 + $0x2e5] sm:$0xff] }
 0x535   : > { %4142 = vrot.lane.b32.xlu1 %v4058_v10, %s7477_s27  ;;  %4144 = vrot.lane.b32.xlu0 %v4059_v35, %s7477_s27 }
 0x536   : > { %7332 = vmatmul.mubr.msk.bf16.gmra.mxu1 %vm2222_vm10, %v4265_v37 }
 0x537   : > { %v3735_v33 = vpop.permute.xlu1 %3734  ;;  %v3737_v24 = vpop.permute.xlu0 %3736 }
 0x538   : > { %3822 = vst.msk [vmem:[#allocation3 + $0x40] sm:$0xff] %vm1728_vm6, %v3735_v33  ;;  %3823 = vst.msk [vmem:[#allocation3 + $0x48] sm:$0xff] %vm1728_vm6, %v3737_v24 }
 0x539   : > { %4146 = vrot.lane.b32.xlu1 %v9696_v27, %s7477_s27  ;;  %4148 = vrot.lane.b32.xlu0 %v9698_v5, %s7477_s27 }
 0x53b   : > { %v3739_v40 = vpop.permute.xlu1 %3738  ;;  %v3741_v61 = vpop.permute.xlu0 %3740 }
 0x53c   : > { %3824 = vst.msk [vmem:[#allocation3 + $0x50] sm:$0xff] %vm1728_vm6, %v3739_v40  ;;  %3825 = vst.msk [vmem:[#allocation3 + $0x58] sm:$0xff] %vm1728_vm6, %v3741_v61 }
 0x53d   : > { %3573 = vrot.lane.b32.xlu1 %v9644_v8, %s7474_s20  ;;  %3575 = vrot.lane.b32.xlu0 %v9646_v6, %s7474_s20 }
 0x53f   : > { %v3927_v41 = vpop.permute.xlu1 %3926  ;;  %v3929_v26 = vpop.permute.xlu0 %3928 }
 0x540   : > { %4014 = vst.msk [vmem:[#allocation3 + $0x40] sm:$0xff] %vm1921_vm8, %v3927_v41  ;;  %4015 = vst.msk [vmem:[#allocation3 + $0x48] sm:$0xff] %vm1921_vm8, %v3929_v26  ;;  %v4067_v41 = vld [vmem:[#allocation2 + $0x2d0] sm:$0xff]  ;;  %v4068_v26 = vld [vmem:[#allocation2 + $0x2e8] sm:$0xff] }
 0x541   : > { %3577 = vrot.lane.b32.xlu1 %v4058_v10, %s7474_s20  ;;  %3579 = vrot.lane.b32.xlu0 %v4059_v35, %s7474_s20 }
 0x543   : > { %v3931_v28 = vpop.permute.xlu1 %3930  ;;  %v3933_v31 = vpop.permute.xlu0 %3932 }
 0x544   : > { %4016 = vst.msk [vmem:[#allocation3 + $0x50] sm:$0xff] %vm1921_vm8, %v3931_v28  ;;  %4017 = vst.msk [vmem:[#allocation3 + $0x58] sm:$0xff] %vm1921_vm8, %v3933_v31 }
 0x545   : > { %3766 = vrot.lane.b32.xlu1 %v3678_v19, %s7475_s21  ;;  %3768 = vrot.lane.b32.xlu0 %v3679_v36, %s7475_s21  ;;  %v4069_v19 = vld [vmem:[#allocation2 + $0x2f0] sm:$0xff] }
 0x547   : > { %v4119_v34 = vpop.permute.xlu1 %4118  ;;  %v4121_v63 = vpop.permute.xlu0 %4120 }
 0x548   : > { %4206 = vst.msk [vmem:[#allocation3 + $0x40] sm:$0xff] %vm2114_vm9, %v4119_v34  ;;  %4207 = vst.msk [vmem:[#allocation3 + $0x48] sm:$0xff] %vm2114_vm9, %v4121_v63 }
 0x549   : > { %3770 = vrot.lane.b32.xlu1 %v3680_v51, %s7475_s21  ;;  %3772 = vrot.lane.b32.xlu0 %v3681_v54, %s7475_s21 }
 0x54b   : > { %v4123_v14 = vpop.permute.xlu1 %4122  ;;  %v4125_v22 = vpop.permute.xlu0 %4124 }
 0x54c   : > { %4208 = vst.msk [vmem:[#allocation3 + $0x50] sm:$0xff] %vm2114_vm9, %v4123_v14  ;;  %4209 = vst.msk [vmem:[#allocation3 + $0x58] sm:$0xff] %vm2114_vm9, %v4125_v22 }
 0x54d   : > { %3958 = vrot.lane.b32.xlu1 %v3870_v38, %s7476_s22  ;;  %3960 = vrot.lane.b32.xlu0 %v3871_v48, %s7476_s22 }
 0x54f   : > { %v3550_v44 = vpop.permute.xlu1 %3549  ;;  %v3552_v47 = vpop.permute.xlu0 %3551  ;;  %v4238_v52 = vld [vmem:[#allocation3 + $0x40] sm:$0xff]  ;;  %v4239_v25 = vld [vmem:[#allocation3 + $0x48] sm:$0xff] }
 0x550   : > { %3633 = vst.msk [vmem:[#allocation3 + $0x60] sm:$0xff] %vm1534_vm5, %v3550_v44  ;;  %3634 = vst.msk [vmem:[#allocation3 + $0x68] sm:$0xff] %vm1534_vm5, %v3552_v47  ;;  %v4266_v39 = vpack.c.bf16 %v4239_v25, %v4238_v52 }
 0x551   : > { %3962 = vrot.lane.b32.xlu1 %v3872_v32, %s7476_s22  ;;  %3964 = vrot.lane.b32.xlu0 %v3873_v13, %s7476_s22 }
 0x552   : > { %7335 = vmatprep.mubr.msk.bf16.mxu1 %vm2222_vm10, %v4266_v39 }
 0x553   : > { %v3554_v18 = vpop.permute.xlu1 %3553  ;;  %v3556_v30 = vpop.permute.xlu0 %3555  ;;  %v4240_v55 = vld [vmem:[#allocation3 + $0x50] sm:$0xff]  ;;  %v4241_v57 = vld [vmem:[#allocation3 + $0x58] sm:$0xff] }
 0x554   : > { %3635 = vst.msk [vmem:[#allocation3 + $0x70] sm:$0xff] %vm1534_vm5, %v3554_v18  ;;  %3636 = vst.msk [vmem:[#allocation3 + $0x78] sm:$0xff] %vm1534_vm5, %v3556_v30  ;;  %v4267_v11 = vpack.c.bf16 %v4241_v57, %v4240_v55 }
 0x555   : > { %4150 = vrot.lane.b32.xlu1 %v4062_v59, %s7477_s27  ;;  %4152 = vrot.lane.b32.xlu0 %v9733_v2, %s7477_s27 }
 0x556   : > { %7336 = vmatmul.mubr.msk.bf16.gmra.mxu1 %vm2222_vm10, %v4267_v11 }
 0x557   : > { %v3743_v62 = vpop.permute.xlu1 %3742  ;;  %v3745_v3 = vpop.permute.xlu0 %3744 }
 0x558   : > { %3826 = vst.msk [vmem:[#allocation3 + $0x60] sm:$0xff] %vm1728_vm6, %v3743_v62  ;;  %3827 = vst.msk [vmem:[#allocation3 + $0x68] sm:$0xff] %vm1728_vm6, %v3745_v3 }
 0x559   : > { %4154 = vrot.lane.b32.xlu1 %v4064_v58, %s7477_s27  ;;  %4156 = vrot.lane.b32.xlu0 %v4065_v60, %s7477_s27 }
 0x55b   : > { %v3747_v4 = vpop.permute.xlu1 %3746  ;;  %v3749_v8 = vpop.permute.xlu0 %3748 }
 0x55c   : > { %3828 = vst.msk [vmem:[#allocation3 + $0x70] sm:$0xff] %vm1728_vm6, %v3747_v4  ;;  %3829 = vst.msk [vmem:[#allocation3 + $0x78] sm:$0xff] %vm1728_vm6, %v3749_v8 }
 0x55d   : > { %3391 = vrot.lane.b32.xlu1 %v9682_v45, %s7473_s19  ;;  %3393 = vrot.lane.b32.xlu0 %v3870_v38, %s7473_s19 }
 0x55f   : > { %v3935_v6 = vpop.permute.xlu1 %3934  ;;  %v3937_v9 = vpop.permute.xlu0 %3936 }
 0x560   : > { %4018 = vst.msk [vmem:[#allocation3 + $0x60] sm:$0xff] %vm1921_vm8, %v3935_v6  ;;  %4019 = vst.msk [vmem:[#allocation3 + $0x68] sm:$0xff] %vm1921_vm8, %v3937_v9 }
 0x561   : > { %3395 = vrot.lane.b32.xlu1 %v3871_v48, %s7473_s19  ;;  %3581 = vrot.lane.b32.xlu0 %v9696_v27, %s7474_s20  ;;  %v3877_v27 = vld [vmem:[#allocation2 + $0x2ed] sm:$0xff] }
 0x563   : > { %v3939_v12 = vpop.permute.xlu1 %3938  ;;  %v3941_v16 = vpop.permute.xlu0 %3940 }
 0x564   : > { %4020 = vst.msk [vmem:[#allocation3 + $0x70] sm:$0xff] %vm1921_vm8, %v3939_v12  ;;  %4021 = vst.msk [vmem:[#allocation3 + $0x78] sm:$0xff] %vm1921_vm8, %v3941_v16 }
 0x565   : > { %3583 = vrot.lane.b32.xlu1 %v9698_v5, %s7474_s20  ;;  %3585 = vrot.lane.b32.xlu0 %v4062_v59, %s7474_s20  ;;  %v4066_v5 = vld [vmem:[#allocation2 + $0x2c8] sm:$0xff] }
 0x567   : > { %v4127_v21 = vpop.permute.xlu1 %4126  ;;  %v4129_v42 = vpop.permute.xlu0 %4128 }
 0x568   : > { %4210 = vst.msk [vmem:[#allocation3 + $0x60] sm:$0xff] %vm2114_vm9, %v4127_v21  ;;  %4211 = vst.msk [vmem:[#allocation3 + $0x68] sm:$0xff] %vm2114_vm9, %v4129_v42 }
 0x569   : > { %3587 = vrot.lane.b32.xlu1 %v9733_v2, %s7474_s20  ;;  %3774 = vrot.lane.b32.xlu0 %v3682_v17, %s7475_s21 }
 0x56b   : > { %v4131_v50 = vpop.permute.xlu1 %4130  ;;  %v4133_v46 = vpop.permute.xlu0 %4132 }
 0x56c   : > { %4212 = vst.msk [vmem:[#allocation3 + $0x70] sm:$0xff] %vm2114_vm9, %v4131_v50  ;;  %4213 = vst.msk [vmem:[#allocation3 + $0x78] sm:$0xff] %vm2114_vm9, %v4133_v46 }
 0x56d   : > { %3776 = vrot.lane.b32.xlu1 %v3683_v43, %s7475_s21  ;;  %3778 = vrot.lane.b32.xlu0 %v3684_v29, %s7475_s21 }
 0x56f   : > { %v3558_v15 = vpop.permute.xlu1 %3557  ;;  %v3560_v45 = vpop.permute.xlu0 %3559  ;;  %v4242_v23 = vld [vmem:[#allocation3 + $0x60] sm:$0xff]  ;;  %v4243_v7 = vld [vmem:[#allocation3 + $0x68] sm:$0xff] }
 0x570   : > { %3637 = vst.msk [vmem:[#allocation3 + $0x80] sm:$0xff] %vm1534_vm5, %v3558_v15  ;;  %3638 = vst.msk [vmem:[#allocation3 + $0x88] sm:$0xff] %vm1534_vm5, %v3560_v45  ;;  %v4268_v49 = vpack.c.bf16 %v4243_v7, %v4242_v23 }
 0x571   : > { %3780 = vrot.lane.b32.xlu1 %v3685_v56, %s7475_s21  ;;  %3966 = vrot.lane.b32.xlu0 %v3874_v53, %s7476_s22 }
 0x572   : > { %7339 = vmatprep.mubr.msk.bf16.mxu1 %vm2222_vm10, %v4268_v49 }
 0x573   : > { %v3562_v10 = vpop.permute.xlu1 %3561  ;;  %v3564_v35 = vpop.permute.xlu0 %3563  ;;  %v4244_v37 = vld [vmem:[#allocation3 + $0x70] sm:$0xff]  ;;  %v4245_v33 = vld [vmem:[#allocation3 + $0x78] sm:$0xff] }
 0x574   : > { %3639 = vst.msk [vmem:[#allocation3 + $0x90] sm:$0xff] %vm1534_vm5, %v3562_v10  ;;  %3640 = vst.msk [vmem:[#allocation3 + $0x98] sm:$0xff] %vm1534_vm5, %v3564_v35  ;;  %v4269_v24 = vpack.c.bf16 %v4245_v33, %v4244_v37 }
 0x575   : > { %3968 = vrot.lane.b32.xlu1 %v3875_v0, %s7476_s22  ;;  %3970 = vrot.lane.b32.xlu0 %v3876_v1, %s7476_s22 }
 0x576   : > { %7340 = vmatmul.mubr.msk.bf16.gmra.mxu1 %vm2222_vm10, %v4269_v24 }
 0x577   : > { %v3751_v40 = vpop.permute.xlu1 %3750  ;;  %v3753_v61 = vpop.permute.xlu0 %3752 }
 0x578   : > { %3830 = vst.msk [vmem:[#allocation3 + $0x80] sm:$0xff] %vm1728_vm6, %v3751_v40  ;;  %3831 = vst.msk [vmem:[#allocation3 + $0x88] sm:$0xff] %vm1728_vm6, %v3753_v61 }
 0x579   : > { %3972 = vrot.lane.b32.xlu1 %v3877_v27, %s7476_s22  ;;  %4158 = vrot.lane.b32.xlu0 %v4066_v5, %s7477_s27 }
 0x57b   : > { %v3755_v28 = vpop.permute.xlu1 %3754  ;;  %v3757_v31 = vpop.permute.xlu0 %3756 }
 0x57c   : > { %3832 = vst.msk [vmem:[#allocation3 + $0x90] sm:$0xff] %vm1728_vm6, %v3755_v28  ;;  %3833 = vst.msk [vmem:[#allocation3 + $0x98] sm:$0xff] %vm1728_vm6, %v3757_v31 }
 0x57d   : > { %4160 = vrot.lane.b32.xlu1 %v4067_v41, %s7477_s27  ;;  %4162 = vrot.lane.b32.xlu0 %v4068_v26, %s7477_s27  ;;  %v9890_v41 = vld [vmem:[%s11257_s4] ss:$0 sm:$0xff] }
 0x57f   : > { %v3943_v36 = vpop.permute.xlu1 %3942  ;;  %v3945_v51 = vpop.permute.xlu0 %3944 }
 0x580   : > { %4022 = vst.msk [vmem:[#allocation3 + $0x80] sm:$0xff] %vm1921_vm8, %v3943_v36  ;;  %4023 = vst.msk [vmem:[#allocation3 + $0x88] sm:$0xff] %vm1921_vm8, %v3945_v51 }
 0x581   : > { %4164 = vrot.lane.b32.xlu1 %v4069_v19, %s7477_s27 }
 0x583   : > { %v3947_v54 = vpop.permute.xlu1 %3946  ;;  %v3949_v34 = vpop.permute.xlu0 %3948 }
 0x584   : > { %4024 = vst.msk [vmem:[#allocation3 + $0x90] sm:$0xff] %vm1921_vm8, %v3947_v54  ;;  %4025 = vst.msk [vmem:[#allocation3 + $0x98] sm:$0xff] %vm1921_vm8, %v3949_v34 }
 0x587   : > { %v4135_v63 = vpop.permute.xlu1 %4134  ;;  %v4137_v14 = vpop.permute.xlu0 %4136 }
 0x588   : > { %4214 = vst.msk [vmem:[#allocation3 + $0x80] sm:$0xff] %vm2114_vm9, %v4135_v63  ;;  %4215 = vst.msk [vmem:[#allocation3 + $0x88] sm:$0xff] %vm2114_vm9, %v4137_v14 }
 0x58b   : > { %v4139_v22 = vpop.permute.xlu1 %4138  ;;  %v4141_v38 = vpop.permute.xlu0 %4140 }
 0x58c   : > { %4216 = vst.msk [vmem:[#allocation3 + $0x90] sm:$0xff] %vm2114_vm9, %v4139_v22  ;;  %4217 = vst.msk [vmem:[#allocation3 + $0x98] sm:$0xff] %vm2114_vm9, %v4141_v38 }
 0x58f   : > { %v3566_v48 = vpop.permute.xlu1 %3565  ;;  %v3568_v32 = vpop.permute.xlu0 %3567  ;;  %v4246_v13 = vld [vmem:[#allocation3 + $0x80] sm:$0xff]  ;;  %v4247_v44 = vld [vmem:[#allocation3 + $0x88] sm:$0xff] }
 0x590   : > { %3641 = vst.msk [vmem:[#allocation3 + $0xa0] sm:$0xff] %vm1534_vm5, %v3566_v48  ;;  %3642 = vst.msk [vmem:[#allocation3 + $0xa8] sm:$0xff] %vm1534_vm5, %v3568_v32  ;;  %v4270_v47 = vpack.c.bf16 %v4247_v44, %v4246_v13 }
 0x592   : > { %7343 = vmatprep.mubr.msk.bf16.mxu1 %vm2222_vm10, %v4270_v47 }
 0x593   : > { %v3570_v52 = vpop.permute.xlu1 %3569  ;;  %v3572_v25 = vpop.permute.xlu0 %3571  ;;  %v4248_v39 = vld [vmem:[#allocation3 + $0x90] sm:$0xff]  ;;  %v4249_v18 = vld [vmem:[#allocation3 + $0x98] sm:$0xff] }
 0x594   : > { %3643 = vst.msk [vmem:[#allocation3 + $0xb0] sm:$0xff] %vm1534_vm5, %v3570_v52  ;;  %3644 = vst.msk [vmem:[#allocation3 + $0xb8] sm:$0xff] %vm1534_vm5, %v3572_v25  ;;  %v4271_v30 = vpack.c.bf16 %v4249_v18, %v4248_v39 }
 0x596   : > { %7344 = vmatmul.mubr.msk.bf16.gmra.mxu1 %vm2222_vm10, %v4271_v30 }
 0x597   : > { %v3759_v55 = vpop.permute.xlu1 %3758  ;;  %v3761_v57 = vpop.permute.xlu0 %3760 }
 0x598   : > { %3834 = vst.msk [vmem:[#allocation3 + $0xa0] sm:$0xff] %vm1728_vm6, %v3759_v55  ;;  %3835 = vst.msk [vmem:[#allocation3 + $0xa8] sm:$0xff] %vm1728_vm6, %v3761_v57 }
 0x59b   : > { %v3763_v59 = vpop.permute.xlu1 %3762  ;;  %v3765_v2 = vpop.permute.xlu0 %3764 }
 0x59c   : > { %3836 = vst.msk [vmem:[#allocation3 + $0xb0] sm:$0xff] %vm1728_vm6, %v3763_v59  ;;  %3837 = vst.msk [vmem:[#allocation3 + $0xb8] sm:$0xff] %vm1728_vm6, %v3765_v2 }
 0x59f   : > { %v3951_v11 = vpop.permute.xlu1 %3950  ;;  %v3953_v58 = vpop.permute.xlu0 %3952 }
 0x5a0   : > { %4026 = vst.msk [vmem:[#allocation3 + $0xa0] sm:$0xff] %vm1921_vm8, %v3951_v11  ;;  %4027 = vst.msk [vmem:[#allocation3 + $0xa8] sm:$0xff] %vm1921_vm8, %v3953_v58 }
 0x5a3   : > { %v3955_v60 = vpop.permute.xlu1 %3954  ;;  %v3957_v62 = vpop.permute.xlu0 %3956 }
 0x5a4   : > { %4028 = vst.msk [vmem:[#allocation3 + $0xb0] sm:$0xff] %vm1921_vm8, %v3955_v60  ;;  %4029 = vst.msk [vmem:[#allocation3 + $0xb8] sm:$0xff] %vm1921_vm8, %v3957_v62 }
 0x5a7   : > { %v4143_v3 = vpop.permute.xlu1 %4142  ;;  %v4145_v4 = vpop.permute.xlu0 %4144 }
 0x5a8   : > { %4218 = vst.msk [vmem:[#allocation3 + $0xa0] sm:$0xff] %vm2114_vm9, %v4143_v3  ;;  %4219 = vst.msk [vmem:[#allocation3 + $0xa8] sm:$0xff] %vm2114_vm9, %v4145_v4 }
 0x5ab   : > { %v4147_v8 = vpop.permute.xlu1 %4146  ;;  %v4149_v6 = vpop.permute.xlu0 %4148 }
 0x5ac   : > { %4220 = vst.msk [vmem:[#allocation3 + $0xb0] sm:$0xff] %vm2114_vm9, %v4147_v8  ;;  %4221 = vst.msk [vmem:[#allocation3 + $0xb8] sm:$0xff] %vm2114_vm9, %v4149_v6 }
 0x5af   : > { %v3574_v9 = vpop.permute.xlu1 %3573  ;;  %v3576_v12 = vpop.permute.xlu0 %3575  ;;  %v4250_v16 = vld [vmem:[#allocation3 + $0xa0] sm:$0xff]  ;;  %v4251_v20 = vld [vmem:[#allocation3 + $0xa8] sm:$0xff] }
 0x5b0   : > { %3645 = vst.msk [vmem:[#allocation3 + $0xc0] sm:$0xff] %vm1534_vm5, %v3574_v9  ;;  %3646 = vst.msk [vmem:[#allocation3 + $0xc8] sm:$0xff] %vm1534_vm5, %v3576_v12  ;;  %v4272_v17 = vpack.c.bf16 %v4251_v20, %v4250_v16 }
 0x5b2   : > { %7347 = vmatprep.mubr.msk.bf16.mxu1 %vm2222_vm10, %v4272_v17 }
 0x5b3   : > { %v3578_v21 = vpop.permute.xlu1 %3577  ;;  %v3580_v42 = vpop.permute.xlu0 %3579  ;;  %v4252_v43 = vld [vmem:[#allocation3 + $0xb0] sm:$0xff]  ;;  %v4253_v29 = vld [vmem:[#allocation3 + $0xb8] sm:$0xff] }
 0x5b4   : > { %3647 = vst.msk [vmem:[#allocation3 + $0xd0] sm:$0xff] %vm1534_vm5, %v3578_v21  ;;  %3648 = vst.msk [vmem:[#allocation3 + $0xd8] sm:$0xff] %vm1534_vm5, %v3580_v42  ;;  %v4273_v50 = vpack.c.bf16 %v4253_v29, %v4252_v43 }
 0x5b6   : > { %7348 = vmatmul.mubr.msk.bf16.gmra.mxu1 %vm2222_vm10, %v4273_v50 }
 0x5b7   : > { %v3767_v46 = vpop.permute.xlu1 %3766  ;;  %v3769_v56 = vpop.permute.xlu0 %3768 }
 0x5b8   : > { %3838 = vst.msk [vmem:[#allocation3 + $0xc0] sm:$0xff] %vm1728_vm6, %v3767_v46  ;;  %3839 = vst.msk [vmem:[#allocation3 + $0xc8] sm:$0xff] %vm1728_vm6, %v3769_v56 }
 0x5bb   : > { %v3771_v53 = vpop.permute.xlu1 %3770  ;;  %v3773_v15 = vpop.permute.xlu0 %3772 }
 0x5bc   : > { %3840 = vst.msk [vmem:[#allocation3 + $0xd0] sm:$0xff] %vm1728_vm6, %v3771_v53  ;;  %3841 = vst.msk [vmem:[#allocation3 + $0xd8] sm:$0xff] %vm1728_vm6, %v3773_v15 }
 0x5bf   : > { %v3959_v45 = vpop.permute.xlu1 %3958  ;;  %v3961_v23 = vpop.permute.xlu0 %3960 }
 0x5c0   : > { %4030 = vst.msk [vmem:[#allocation3 + $0xc0] sm:$0xff] %vm1921_vm8, %v3959_v45  ;;  %4031 = vst.msk [vmem:[#allocation3 + $0xc8] sm:$0xff] %vm1921_vm8, %v3961_v23 }
 0x5c3   : > { %v3963_v7 = vpop.permute.xlu1 %3962  ;;  %v3965_v49 = vpop.permute.xlu0 %3964 }
 0x5c4   : > { %4032 = vst.msk [vmem:[#allocation3 + $0xd0] sm:$0xff] %vm1921_vm8, %v3963_v7  ;;  %4033 = vst.msk [vmem:[#allocation3 + $0xd8] sm:$0xff] %vm1921_vm8, %v3965_v49 }
 0x5c7   : > { %v4151_v0 = vpop.permute.xlu1 %4150  ;;  %v4153_v1 = vpop.permute.xlu0 %4152 }
 0x5c8   : > { %4222 = vst.msk [vmem:[#allocation3 + $0xc0] sm:$0xff] %vm2114_vm9, %v4151_v0  ;;  %4223 = vst.msk [vmem:[#allocation3 + $0xc8] sm:$0xff] %vm2114_vm9, %v4153_v1 }
 0x5cb   : > { %v4155_v10 = vpop.permute.xlu1 %4154  ;;  %v4157_v35 = vpop.permute.xlu0 %4156 }
 0x5cc   : > { %4224 = vst.msk [vmem:[#allocation3 + $0xd0] sm:$0xff] %vm2114_vm9, %v4155_v10  ;;  %4225 = vst.msk [vmem:[#allocation3 + $0xd8] sm:$0xff] %vm2114_vm9, %v4157_v35 }
 0x5cf   : > { %v3392_v37 = vpop.permute.xlu1 %3391  ;;  %v3394_v33 = vpop.permute.xlu0 %3393  ;;  %v4254_v24 = vld [vmem:[#allocation3 + $0xc0] sm:$0xff]  ;;  %v4255_v27 = vld [vmem:[#allocation3 + $0xc8] sm:$0xff] }
 0x5d0   : > { %3458 = vst.msk [vmem:[#allocation3 + $0xe8] sm:$0xff] %vm1341_vm4, %v3392_v37  ;;  %3459 = vst.msk [vmem:[#allocation3 + $0xf0] sm:$0xff] %vm1341_vm4, %v3394_v33  ;;  %v4274_v5 = vpack.c.bf16 %v4255_v27, %v4254_v24 }
 0x5d2   : > { %7351 = vmatprep.mubr.msk.bf16.mxu1 %vm2222_vm10, %v4274_v5 }
 0x5d3   : > { %v3396_v40 = vpop.permute.xlu1 %3395  ;;  %v3582_v61 = vpop.permute.xlu0 %3581  ;;  %v4256_v8 = vld [vmem:[#allocation3 + $0xd0] sm:$0xff]  ;;  %v4257_v6 = vld [vmem:[#allocation3 + $0xd8] sm:$0xff] }
 0x5d4   : > { %3460 = vst.msk [vmem:[#allocation3 + $0xf8] sm:$0xff] %vm1341_vm4, %v3396_v40  ;;  %v4275_v12 = vpack.c.bf16 %v4257_v6, %v4256_v8  ;;  %v4776_v8 = vld [vmem:[#allocation2 + $0x2d] sm:$0xff] }
 0x5d5   : > { %3649 = vst.msk [vmem:[#allocation3 + $0xe0] sm:$0xff] %vm1534_vm5, %v3582_v61  ;;  %v4965_v6 = vld [vmem:[#allocation2 + $0xa] sm:$0xff] }
 0x5d6   : > { %v7329_v26 = vpop.f32.mrf.mxu1  ;;  %7352 = vmatmul.mubr.msk.bf16.gmra.mxu1 %vm2222_vm10, %v4275_v12 }
 0x5d7   : > { %v4399_v28 = vadd.f32 %v7329_v26, %v9890_v41  ;;  %v3584_v31 = vpop.permute.xlu1 %3583  ;;  %v3586_v19 = vpop.permute.xlu0 %3585 }
 0x5d8   : > { %3650 = vst.msk [vmem:[#allocation3 + $0xe8] sm:$0xff] %vm1534_vm5, %v3584_v31  ;;  %3651 = vst.msk [vmem:[#allocation3 + $0xf0] sm:$0xff] %vm1534_vm5, %v3586_v19  ;;  %v4390_v36 = vpop.f32.mrf.mxu1 }
 0x5d9   : > { %4679 = vst.msk [vmem:[#allocation2 + $0xc5] sm:$0xff] %vm334_vm0, %v4399_v28  ;;  %v4391_v51 = vadd.f32 %v9890_v41, %v4390_v36 }
 0x5da   : > { %v7330_v54 = vpop.f32.mrf.mxu1 }
 0x5db   : > { %4677 = vst.msk [vmem:[#allocation2 + $0xa5] sm:$0xff] %vm334_vm0, %v4391_v51  ;;  %v4402_v34 = vadd.f32 %v7330_v54, %v9890_v41  ;;  %v3588_v63 = vpop.permute.xlu1 %3587  ;;  %4549 = vrot.lane.b32.xlu0 %v4391_v51, %s7471_s17  ;;  %v3775_v14 = vpop.permute.xlu0 %3774 }
 0x5dc   : > { %3652 = vst.msk [vmem:[#allocation3 + $0xf8] sm:$0xff] %vm1534_vm5, %v3588_v63  ;;  %v4393_v22 = vpop.f32.mrf.mxu1 }
 0x5dd   : > { %3842 = vst.msk [vmem:[#allocation3 + $0xe0] sm:$0xff] %vm1728_vm6, %v3775_v14  ;;  %v4394_v38 = vadd.f32 %v9890_v41, %v4393_v22 }
 0x5de   : > { %4680 = vst.msk [vmem:[#allocation2 + $0xcd] sm:$0xff] %vm334_vm0, %v4402_v34 }
 0x5df   : > { %4678 = vst.msk [vmem:[#allocation2 + $0xad] sm:$0xff] %vm334_vm0, %v4394_v38  ;;  %4551 = vrot.lane.b32.xlu1 %v4394_v38, %s7471_s17  ;;  %4553 = vrot.lane.b32.xlu0 %v4399_v28, %s7471_s17  ;;  %v3777_v48 = vpop.permute.xlu1 %3776  ;;  %v3779_v32 = vpop.permute.xlu0 %3778 }
 0x5e0   : > { %3843 = vst.msk [vmem:[#allocation3 + $0xe8] sm:$0xff] %vm1728_vm6, %v3777_v48  ;;  %3844 = vst.msk [vmem:[#allocation3 + $0xf0] sm:$0xff] %vm1728_vm6, %v3779_v32  ;;  %v4721_v13 = vld [vmem:[#allocation2 + $0xc0] sm:$0xff] }
 0x5e1   : > { %4753 = vst.msk [vmem:[#allocation3 + $0x60] sm:$0xff] %vm334_vm0, %v4721_v13  ;;  %v4709_v48 = vld [vmem:[#allocation2] sm:$0xff] }
 0x5e2   : > { %v9910_v44 = vld [vmem:[#allocation2 + $0xa0] sm:$0xff]  ;;  %4741 = vst.msk [vmem:[#allocation3] sm:$0xff] %vm334_vm0, %v4709_v48 }
 0x5e3   : > { %4555 = vrot.lane.b32.xlu1 %v4402_v34, %s7471_s17  ;;  %v3781_v47 = vpop.permute.xlu1 %3780  ;;  %v3967_v52 = vpop.permute.xlu0 %3966  ;;  %4751 = vst.msk [vmem:[#allocation3 + $0x50] sm:$0xff] %vm334_vm0, %v9910_v44 }
 0x5e4   : > { %3845 = vst.msk [vmem:[#allocation3 + $0xf8] sm:$0xff] %vm1728_vm6, %v3781_v47  ;;  %v4710_v47 = vld [vmem:[#allocation2 + $0x8] sm:$0xff] }
 0x5e5   : > { %4034 = vst.msk [vmem:[#allocation3 + $0xe0] sm:$0xff] %vm1921_vm8, %v3967_v52  ;;  %v4722_v25 = vld [vmem:[#allocation2 + $0xc8] sm:$0xff] }
 0x5e6   : > { %v9917_v39 = vld [vmem:[#allocation2 + $0xa8] sm:$0xff]  ;;  %4754 = vst.msk [vmem:[#allocation3 + $0x68] sm:$0xff] %vm334_vm0, %v4722_v25  ;;  %4742 = vst.msk [vmem:[#allocation3 + $0x8] sm:$0xff] %vm334_vm0, %v4710_v47  ;;  %v4711_v25 = vld [vmem:[#allocation2 + $0x20] sm:$0xff] }
 0x5e7   : > { %v3969_v18 = vpop.permute.xlu1 %3968  ;;  %v3971_v30 = vpop.permute.xlu0 %3970  ;;  %4752 = vst.msk [vmem:[#allocation3 + $0x58] sm:$0xff] %vm334_vm0, %v9917_v39  ;;  %4743 = vst.msk [vmem:[#allocation3 + $0x10] sm:$0xff] %vm334_vm0, %v4711_v25  ;;  %v4715_v47 = vld [vmem:[#allocation2 + $0x60] sm:$0xff] }
 0x5e8   : > { %4035 = vst.msk [vmem:[#allocation3 + $0xe8] sm:$0xff] %vm1921_vm8, %v3969_v18  ;;  %4036 = vst.msk [vmem:[#allocation3 + $0xf0] sm:$0xff] %vm1921_vm8, %v3971_v30 }
 0x5e9   : > { %4747 = vst.msk [vmem:[#allocation3 + $0x30] sm:$0xff] %vm334_vm0, %v4715_v47 }
 0x5eb   : > { %v3973_v55 = vpop.permute.xlu1 %3972  ;;  %v4159_v57 = vpop.permute.xlu0 %4158 }
 0x5ec   : > { %4037 = vst.msk [vmem:[#allocation3 + $0xf8] sm:$0xff] %vm1921_vm8, %v3973_v55 }
 0x5ed   : > { %4226 = vst.msk [vmem:[#allocation3 + $0xe0] sm:$0xff] %vm2114_vm9, %v4159_v57  ;;  %v4712_v57 = vld [vmem:[#allocation2 + $0x28] sm:$0xff] }
 0x5ee   : > { %4744 = vst.msk [vmem:[#allocation3 + $0x18] sm:$0xff] %vm334_vm0, %v4712_v57  ;;  %v4778_v57 = vld [vmem:[#allocation2 + $0x4d] sm:$0xff] }
 0x5ef   : > { %v4161_v59 = vpop.permute.xlu1 %4160  ;;  %v4163_v2 = vpop.permute.xlu0 %4162 }
 0x5f0   : > { %4227 = vst.msk [vmem:[#allocation3 + $0xe8] sm:$0xff] %vm2114_vm9, %v4161_v59  ;;  %4228 = vst.msk [vmem:[#allocation3 + $0xf0] sm:$0xff] %vm2114_vm9, %v4163_v2 }
 0x5f3   : > { %v4165_v11 = vpop.permute.xlu1 %4164 }
 0x5f4   : > { %4229 = vst.msk [vmem:[#allocation3 + $0xf8] sm:$0xff] %vm2114_vm9, %v4165_v11  ;;  %v4258_v10 = vld [vmem:[#allocation3 + $0xe0] sm:$0xff] }
 0x5f6   : > { %v7333_v58 = vpop.f32.mrf.mxu1 }
 0x5f7   : > { %v4415_v60 = vadd.f32 %v7333_v58, %v9890_v41  ;;  %v4259_v35 = vld [vmem:[#allocation3 + $0xe8] sm:$0xff]  ;;  %v4260_v33 = vld [vmem:[#allocation3 + $0xf0] sm:$0xff] }
 0x5f8   : > { %v4406_v62 = vpop.f32.mrf.mxu1  ;;  %v4276_v37 = vpack.c.bf16 %v4259_v35, %v4258_v10  ;;  %v4773_v58 = vld [vmem:[#allocation2 + $0x5] sm:$0xff]  ;;  %v10052_v10 = vld [vmem:[#allocation2 + $0xcd] sm:$0xff] }
 0x5f9   : > { %4683 = vst.msk [vmem:[#allocation2 + $0x105] sm:$0xff] %vm334_vm0, %v4415_v60  ;;  %v4407_v3 = vadd.f32 %v9890_v41, %v4406_v62  ;;  %v10060_v35 = vld [vmem:[#allocation2 + $0xaa] sm:$0xff] }
 0x5fa   : > { %v7334_v4 = vpop.f32.mrf.mxu1  ;;  %7355 = vmatprep.mubr.msk.bf16.mxu1 %vm2222_vm10, %v4276_v37  ;;  %v10062_v37 = vld [vmem:[#allocation2 + $0xb2] sm:$0xff] }
 0x5fb   : > { %4681 = vst.msk [vmem:[#allocation2 + $0xe5] sm:$0xff] %vm334_vm0, %v4407_v3  ;;  %v4418_v9 = vadd.f32 %v7334_v4, %v9890_v41  ;;  %4557 = vrot.lane.b32.xlu0 %v4407_v3, %s7471_s17  ;;  %v4261_v24 = vld [vmem:[#allocation3 + $0xf8] sm:$0xff]  ;;  %v4775_v4 = vld [vmem:[#allocation2 + $0x25] sm:$0xff] }
 0x5fc   : > { %v4409_v16 = vpop.f32.mrf.mxu1  ;;  %v4277_v27 = vpack.c.bf16 %v4261_v24, %v4260_v33  ;;  %v10069_v24 = vld [vmem:[#allocation2 + $0xca] sm:$0xff] }
 0x5fd   : > { %4684 = vst.msk [vmem:[#allocation2 + $0x10d] sm:$0xff] %vm334_vm0, %v4418_v9  ;;  %v4410_v20 = vadd.f32 %v9890_v41, %v4409_v16 }
 0x5fe   : > { %7356 = vmatmul.mubr.msk.bf16.gmra.mxu1 %vm2222_vm10, %v4277_v27  ;;  %v10071_v27 = vld [vmem:[#allocation2 + $0xd2] sm:$0xff] }
 0x5ff   : > { %4682 = vst.msk [vmem:[#allocation2 + $0xed] sm:$0xff] %vm334_vm0, %v4410_v20  ;;  %4559 = vrot.lane.b32.xlu1 %v4410_v20, %s7471_s17  ;;  %4561 = vrot.lane.b32.xlu0 %v4415_v60, %s7471_s17  ;;  %v4774_v60 = vld [vmem:[#allocation2 + $0xd] sm:$0xff] }
 0x600   : > { %v4725_v17 = vld [vmem:[#allocation2 + $0x100] sm:$0xff]  ;;  %v4967_v20 = vld [vmem:[#allocation2 + $0x2a] sm:$0xff] }
 0x601   : > { %4757 = vst.msk [vmem:[#allocation3 + $0x80] sm:$0xff] %vm334_vm0, %v4725_v17  ;;  %v4968_v17 = vld [vmem:[#allocation2 + $0x32] sm:$0xff] }
 0x602   : > { %v4723_v21 = vld [vmem:[#allocation2 + $0xe0] sm:$0xff] }
 0x603   : > { %4563 = vrot.lane.b32.xlu1 %v4418_v9, %s7471_s17  ;;  %4755 = vst.msk [vmem:[#allocation3 + $0x70] sm:$0xff] %vm334_vm0, %v4723_v21  ;;  %v4966_v9 = vld [vmem:[#allocation2 + $0x12] sm:$0xff] }
 0x604   : > { %v4726_v42 = vld [vmem:[#allocation2 + $0x108] sm:$0xff] }
 0x605   : > { %4758 = vst.msk [vmem:[#allocation3 + $0x88] sm:$0xff] %vm334_vm0, %v4726_v42 }
 0x606   : > { %v4724_v43 = vld [vmem:[#allocation2 + $0xe8] sm:$0xff] }
 0x607   : > { %4756 = vst.msk [vmem:[#allocation3 + $0x78] sm:$0xff] %vm334_vm0, %v4724_v43 }
 0x616   : > { %v7337_v29 = vpop.f32.mrf.mxu1 }
 0x617   : > { %v4431_v50 = vadd.f32 %v7337_v29, %v9890_v41 }
 0x618   : > { %v4422_v46 = vpop.f32.mrf.mxu1 }
 0x619   : > { %4687 = vst.msk [vmem:[#allocation2 + $0x145] sm:$0xff] %vm334_vm0, %v4431_v50  ;;  %v4423_v56 = vadd.f32 %v9890_v41, %v4422_v46  ;;  %v5159_v46 = vld [vmem:[#allocation2 + $0xc0] sm:$0xff] }
 0x61a   : > { %v7338_v53 = vpop.f32.mrf.mxu1 }
 0x61b   : > { %4685 = vst.msk [vmem:[#allocation2 + $0x125] sm:$0xff] %vm334_vm0, %v4423_v56  ;;  %v4434_v15 = vadd.f32 %v7338_v53, %v9890_v41  ;;  %4565 = vrot.lane.b32.xlu0 %v4423_v56, %s7471_s17  ;;  %v5160_v56 = vld [vmem:[#allocation2 + $0xc8] sm:$0xff] }
 0x61c   : > { %v4425_v45 = vpop.f32.mrf.mxu1 }
 0x61d   : > { %4688 = vst.msk [vmem:[#allocation2 + $0x14d] sm:$0xff] %vm334_vm0, %v4434_v15  ;;  %v4426_v23 = vadd.f32 %v9890_v41, %v4425_v45  ;;  %v10032_v45 = vld [vmem:[#allocation2 + $0xa5] sm:$0xff] }
 0x61f   : > { %4686 = vst.msk [vmem:[#allocation2 + $0x12d] sm:$0xff] %vm334_vm0, %v4426_v23  ;;  %4567 = vrot.lane.b32.xlu1 %v4426_v23, %s7471_s17  ;;  %4569 = vrot.lane.b32.xlu0 %v4431_v50, %s7471_s17  ;;  %v10034_v23 = vld [vmem:[#allocation2 + $0xad] sm:$0xff] }
 0x620   : > { %v4729_v7 = vld [vmem:[#allocation2 + $0x140] sm:$0xff] }
 0x621   : > { %4761 = vst.msk [vmem:[#allocation3 + $0xa0] sm:$0xff] %vm334_vm0, %v4729_v7 }
 0x622   : > { %v4727_v49 = vld [vmem:[#allocation2 + $0x120] sm:$0xff] }
 0x623   : > { %4571 = vrot.lane.b32.xlu1 %v4434_v15, %s7471_s17  ;;  %4759 = vst.msk [vmem:[#allocation3 + $0x90] sm:$0xff] %vm334_vm0, %v4727_v49 }
 0x624   : > { %v4730_v1 = vld [vmem:[#allocation2 + $0x148] sm:$0xff]  ;;  %v10127_v25 = vld [vmem:[#allocation2 + $0x152] sm:$0xff] }
 0x625   : > { %4762 = vst.msk [vmem:[#allocation3 + $0xa8] sm:$0xff] %vm334_vm0, %v4730_v1  ;;  %v10050_v1 = vld [vmem:[#allocation2 + $0xc5] sm:$0xff] }
 0x626   : > { %v4728_v0 = vld [vmem:[#allocation2 + $0x128] sm:$0xff] }
 0x627   : > { %4760 = vst.msk [vmem:[#allocation3 + $0x98] sm:$0xff] %vm334_vm0, %v4728_v0 }
 0x636   : > { %v7341_v5 = vpop.f32.mrf.mxu1 }
 0x637   : > { %v4447_v40 = vadd.f32 %v7341_v5, %v9890_v41 }
 0x638   : > { %v4438_v61 = vpop.f32.mrf.mxu1 }
 0x639   : > { %4691 = vst.msk [vmem:[#allocation2 + $0x185] sm:$0xff] %vm334_vm0, %v4447_v40  ;;  %v4439_v26 = vadd.f32 %v9890_v41, %v4438_v61  ;;  %v10080_v61 = vld [vmem:[#allocation2 + $0x148] sm:$0xff] }
 0x63a   : > { %v7342_v28 = vpop.f32.mrf.mxu1 }
 0x63b   : > { %4689 = vst.msk [vmem:[#allocation2 + $0x165] sm:$0xff] %vm334_vm0, %v4439_v26  ;;  %v4450_v31 = vadd.f32 %v7342_v28, %v9890_v41  ;;  %4573 = vrot.lane.b32.xlu0 %v4439_v26, %s7471_s17 }
 0x63c   : > { %v4441_v19 = vpop.f32.mrf.mxu1 }
 0x63d   : > { %4692 = vst.msk [vmem:[#allocation2 + $0x18d] sm:$0xff] %vm334_vm0, %v4450_v31  ;;  %v4442_v36 = vadd.f32 %v9890_v41, %v4441_v19  ;;  %v4713_v19 = vld [vmem:[#allocation2 + $0x40] sm:$0xff] }
 0x63e   : > { %4745 = vst.msk [vmem:[#allocation3 + $0x20] sm:$0xff] %vm334_vm0, %v4713_v19 }
 0x63f   : > { %4690 = vst.msk [vmem:[#allocation2 + $0x16d] sm:$0xff] %vm334_vm0, %v4442_v36  ;;  %4575 = vrot.lane.b32.xlu1 %v4442_v36, %s7471_s17  ;;  %4577 = vrot.lane.b32.xlu0 %v4447_v40, %s7471_s17  ;;  %v10078_v40 = vld [vmem:[#allocation2 + $0x140] sm:$0xff] }
 0x640   : > { %v4733_v51 = vld [vmem:[#allocation2 + $0x180] sm:$0xff] }
 0x641   : > { %4765 = vst.msk [vmem:[#allocation3 + $0xc0] sm:$0xff] %vm334_vm0, %v4733_v51 }
 0x642   : > { %v4731_v54 = vld [vmem:[#allocation2 + $0x160] sm:$0xff] }
 0x643   : > { %4579 = vrot.lane.b32.xlu1 %v4450_v31, %s7471_s17  ;;  %4763 = vst.msk [vmem:[#allocation3 + $0xb0] sm:$0xff] %vm334_vm0, %v4731_v54  ;;  %v10087_v28 = vld [vmem:[#allocation2 + $0x160] sm:$0xff] }
 0x644   : > { %v4734_v63 = vld [vmem:[#allocation2 + $0x188] sm:$0xff] }
 0x645   : > { %4766 = vst.msk [vmem:[#allocation3 + $0xc8] sm:$0xff] %vm334_vm0, %v4734_v63  ;;  %v10098_v54 = vld [vmem:[#allocation2 + $0x145] sm:$0xff] }
 0x646   : > { %v4732_v34 = vld [vmem:[#allocation2 + $0x168] sm:$0xff] }
 0x647   : > { %4764 = vst.msk [vmem:[#allocation3 + $0xb8] sm:$0xff] %vm334_vm0, %v4732_v34  ;;  %v10089_v31 = vld [vmem:[#allocation2 + $0x168] sm:$0xff] }
 0x648   : > { %v10100_v34 = vld [vmem:[#allocation2 + $0x14d] sm:$0xff]  ;;  %v10113_v48 = vld [vmem:[#allocation2 + $0x165] sm:$0xff] }
 0x649   : > { %v4714_v63 = vld [vmem:[#allocation2 + $0x48] sm:$0xff] }
 0x64a   : > { %4746 = vst.msk [vmem:[#allocation3 + $0x28] sm:$0xff] %vm334_vm0, %v4714_v63  ;;  %v10203_v63 = vld [vmem:[#allocation2 + $0x112] sm:$0xff] }
 0x64d   : > { %v4550_v14 = vpop.permute.xlu0 %4549 }
 0x64e   : > { %4645 = vst.msk [vmem:[#allocation4] sm:$0xff] %vm955_vm2, %v4550_v14  ;;  %v7457_v14 = vld [vmem:[%s11258_s5 + $0x10] ss:$0 sps:$4 sm:$0x33]  }
 0x64f   : > { %7433 = vmatprep.subr.msk.bf16.mxu0 %vm2271_vm7, %v7457_v14 }
 0x651   : > { %v4552_v22 = vpop.permute.xlu1 %4551  ;;  %v4554_v38 = vpop.permute.xlu0 %4553 }
 0x652   : > { %4646 = vst.msk [vmem:[#allocation4 + $0x8] sm:$0xff] %vm955_vm2, %v4552_v22  ;;  %4647 = vst.msk [vmem:[#allocation4 + $0x10] sm:$0xff] %vm955_vm2, %v4554_v38  ;;  %v6434_v38 = vsel %vm2271_vm7, %v7457_v14, 0  ;;  %v10205_v14 = vld [vmem:[#allocation2 + $0x10a] sm:$0xff] }
 0x653   : > { %7360 = vmatpush3.bf16.msra.mxu0 %v6434_v38  ;;  %v10215_v38 = vld [vmem:[#allocation2 + $0x180] sm:$0xff] }
 0x655   : > { %v4556_v32 = vpop.permute.xlu1 %4555 }
 0x656   : > { %4648 = vst.msk [vmem:[#allocation4 + $0x18] sm:$0xff] %vm955_vm2, %v4556_v32  ;;  %v7345_v13 = vpop.f32.mrf.mxu1  ;;  %v10115_v32 = vld [vmem:[#allocation2 + $0x16d] sm:$0xff] }
 0x657   : > { %v4463_v52 = vadd.f32 %v7345_v13, %v9890_v41  ;;  %v7458_v13 = vld [vmem:[%s11258_s5 + $0x8] sm:$0xff]  }
 0x658   : > { %v4454_v18 = vpop.f32.mrf.mxu1  ;;  %7361 = vmatprep.subr.bf16.mxu0 %v7458_v13 }
 0x659   : > { %4695 = vst.msk [vmem:[#allocation2 + $0x1c5] sm:$0xff] %vm334_vm0, %v4463_v52  ;;  %v4455_v30 = vadd.f32 %v9890_v41, %v4454_v18  ;;  %7362 = vmatpush3.bf16.msra.mxu0 %v7458_v13  ;;  %v4716_v18 = vld [vmem:[#allocation2 + $0x68] sm:$0xff] }
 0x65a   : > { %v7346_v55 = vpop.f32.mrf.mxu1  ;;  %4748 = vst.msk [vmem:[#allocation3 + $0x38] sm:$0xff] %vm334_vm0, %v4716_v18 }
 0x65b   : > { %4693 = vst.msk [vmem:[#allocation2 + $0x1a5] sm:$0xff] %vm334_vm0, %v4455_v30  ;;  %v9992_v59 = vadd.f32 %v7346_v55, %v9890_v41  ;;  %4581 = vrot.lane.b32.xlu0 %v4455_v30, %s7471_s17  ;;  %v7459_v30 = vld [vmem:[%s11258_s5] sm:$0xff]  }
 0x65c   : > { %v4457_v2 = vpop.f32.mrf.mxu1  ;;  %v4777_v55 = vld [vmem:[#allocation2 + $0x45] sm:$0xff]  ;;  %7363 = vmatprep.subr.bf16.mxu0 %v7459_v30 }
 0x65d   : > { %4696 = vst.msk [vmem:[#allocation2 + $0x1cd] sm:$0xff] %vm334_vm0, %v9992_v59  ;;  %v4458_v11 = vadd.f32 %v9890_v41, %v4457_v2  ;;  %7364 = vmatpush3.bf16.msra.mxu0 %v7459_v30  ;;  %v10139_v2 = vld [vmem:[#allocation2 + $0x16a] sm:$0xff] }
 0x65e   : > { %v4718_v30 = vld [vmem:[#allocation2 + $0x88] sm:$0xff] }
 0x65f   : > { %4694 = vst.msk [vmem:[#allocation2 + $0x1ad] sm:$0xff] %vm334_vm0, %v4458_v11  ;;  %4583 = vrot.lane.b32.xlu1 %v4458_v11, %s7471_s17  ;;  %4585 = vrot.lane.b32.xlu0 %v4463_v52, %s7471_s17  ;;  %v10125_v52 = vld [vmem:[#allocation2 + $0x14a] sm:$0xff]  ;;  %v10141_v11 = vld [vmem:[#allocation2 + $0x172] sm:$0xff]  ;;  %4750 = vst.msk [vmem:[#allocation3 + $0x48] sm:$0xff] %vm334_vm0, %v4718_v30 }
 0x660   : > { %v4737_v62 = vld [vmem:[#allocation2 + $0x1c0] sm:$0xff] }
 0x661   : > { %4769 = vst.msk [vmem:[#allocation3 + $0xe0] sm:$0xff] %vm334_vm0, %v4737_v62  ;;  %v4969_v62 = vld [vmem:[#allocation2 + $0x4a] sm:$0xff] }
 0x662   : > { %v4735_v3 = vld [vmem:[#allocation2 + $0x1a0] sm:$0xff] }
 0x663   : > { %4837 = vrot.lane.b32.xlu1 %v4773_v58, %s7470_s16  ;;  %4839 = vrot.lane.b32.xlu0 %v4774_v60, %s7470_s16  ;;  %4767 = vst.msk [vmem:[#allocation3 + $0xd0] sm:$0xff] %vm334_vm0, %v4735_v3  ;;  %v4779_v58 = vld [vmem:[#allocation2 + $0x65] sm:$0xff]  ;;  %v4780_v60 = vld [vmem:[#allocation2 + $0x6d] sm:$0xff] }
 0x664   : > { %v4738_v16 = vld [vmem:[#allocation2 + $0x1c8] sm:$0xff]  ;;  %v4970_v3 = vld [vmem:[#allocation2 + $0x52] sm:$0xff]  ;;  %v10224_v18 = vld [vmem:[#allocation2 + $0x1a0] sm:$0xff] }
 0x665   : > { %4770 = vst.msk [vmem:[#allocation3 + $0xe8] sm:$0xff] %vm334_vm0, %v4738_v16  ;;  %v5162_v16 = vld [vmem:[#allocation2 + $0xe8] sm:$0xff] }
 0x666   : > { %v4736_v12 = vld [vmem:[#allocation2 + $0x1a8] sm:$0xff] }
 0x667   : > { %4841 = vrot.lane.b32.xlu1 %v4775_v4, %s7470_s16  ;;  %4843 = vrot.lane.b32.xlu0 %v4776_v8, %s7470_s16  ;;  %4768 = vst.msk [vmem:[#allocation3 + $0xd8] sm:$0xff] %vm334_vm0, %v4736_v12  ;;  %v4971_v4 = vld [vmem:[#allocation2 + $0x6a] sm:$0xff]  ;;  %v4972_v8 = vld [vmem:[#allocation2 + $0x72] sm:$0xff] }
 0x668   : > { %v10222_v47 = vld [vmem:[#allocation2 + $0x1a8] sm:$0xff] }
 0x66b   : > { %5029 = vrot.lane.b32.xlu1 %v4965_v6, %s7471_s17  ;;  %5031 = vrot.lane.b32.xlu0 %v4966_v9, %s7471_s17 }
 0x66d   : > { %v4558_v21 = vpop.permute.xlu0 %4557 }
 0x66e   : > { %4649 = vst.msk [vmem:[#allocation4 + $0x20] sm:$0xff] %vm955_vm2, %v4558_v21  ;;  %v5164_v21 = vld [vmem:[#allocation2 + $0x108] sm:$0xff] }
 0x66f   : > { %5033 = vrot.lane.b32.xlu1 %v4967_v20, %s7471_s17  ;;  %5035 = vrot.lane.b32.xlu0 %v4968_v17, %s7471_s17  ;;  %v5161_v20 = vld [vmem:[#allocation2 + $0xe0] sm:$0xff] }
 0x671   : > { %v4560_v42 = vpop.permute.xlu1 %4559  ;;  %v4562_v43 = vpop.permute.xlu0 %4561 }
 0x672   : > { %4650 = vst.msk [vmem:[#allocation4 + $0x28] sm:$0xff] %vm955_vm2, %v4560_v42  ;;  %4651 = vst.msk [vmem:[#allocation4 + $0x30] sm:$0xff] %vm955_vm2, %v4562_v43  ;;  %v5163_v42 = vld [vmem:[#allocation2 + $0x100] sm:$0xff]  ;;  %v10161_v43 = vld [vmem:[#allocation2 + $0xed] sm:$0xff] }
 0x673   : > { %5221 = vrot.lane.b32.xlu1 %v9910_v44, %s7472_s18  ;;  %5223 = vrot.lane.b32.xlu0 %v9917_v39, %s7472_s18 }
 0x675   : > { %v4564_v29 = vpop.permute.xlu1 %4563 }
 0x676   : > { %4652 = vst.msk [vmem:[#allocation4 + $0x38] sm:$0xff] %vm955_vm2, %v4564_v29  ;;  %v7349_v50 = vpop.f32.mrf.mxu1  ;;  %v10163_v29 = vld [vmem:[#allocation2 + $0xe5] sm:$0xff] }
 0x677   : > { %v10023_v53 = vadd.f32 %v7349_v50, %v9890_v41  ;;  %5225 = vrot.lane.b32.xlu1 %v5159_v46, %s7472_s18  ;;  %5227 = vrot.lane.b32.xlu0 %v5160_v56, %s7472_s18  ;;  %v10169_v46 = vld [vmem:[#allocation2 + $0x10d] sm:$0xff]  ;;  %v10171_v56 = vld [vmem:[#allocation2 + $0x105] sm:$0xff] }
 0x678   : > { %v4470_v15 = vpop.f32.mrf.mxu1 }
 0x679   : > { %4699 = vst.msk [vmem:[#allocation2 + $0x205] sm:$0xff] %vm334_vm0, %v10023_v53  ;;  %v10030_v44 = vadd.f32 %v9890_v41, %v4470_v15 }
 0x67a   : > { %v7350_v39 = vpop.f32.mrf.mxu1 }
 0x67b   : > { %4697 = vst.msk [vmem:[#allocation2 + $0x1e5] sm:$0xff] %vm334_vm0, %v10030_v44  ;;  %v10039_v7 = vadd.f32 %v7350_v39, %v9890_v41  ;;  %5413 = vrot.lane.b32.xlu1 %v10032_v45, %s7473_s19  ;;  %5415 = vrot.lane.b32.xlu0 %v10034_v23, %s7473_s19 }
 0x67c   : > { %v4473_v49 = vpop.f32.mrf.mxu1 }
 0x67d   : > { %4700 = vst.msk [vmem:[#allocation2 + $0x20d] sm:$0xff] %vm334_vm0, %v10039_v7  ;;  %v10048_v0 = vadd.f32 %v9890_v41, %v4473_v49 }
 0x67f   : > { %4698 = vst.msk [vmem:[#allocation2 + $0x1ed] sm:$0xff] %vm334_vm0, %v10048_v0  ;;  %5417 = vrot.lane.b32.xlu1 %v10050_v1, %s7473_s19  ;;  %5419 = vrot.lane.b32.xlu0 %v10052_v10, %s7473_s19 }
 0x682   : > { %v4739_v33 = vld [vmem:[#allocation2 + $0x1e0] sm:$0xff] }
 0x683   : > { %5605 = vrot.lane.b32.xlu1 %v10060_v35, %s7474_s20  ;;  %5607 = vrot.lane.b32.xlu0 %v10062_v37, %s7474_s20  ;;  %4771 = vst.msk [vmem:[#allocation3 + $0xf0] sm:$0xff] %vm334_vm0, %v4739_v33 }
 0x686   : > { %v4740_v5 = vld [vmem:[#allocation2 + $0x1e8] sm:$0xff] }
 0x687   : > { %5609 = vrot.lane.b32.xlu1 %v10069_v24, %s7474_s20  ;;  %5611 = vrot.lane.b32.xlu0 %v10071_v27, %s7474_s20  ;;  %4772 = vst.msk [vmem:[#allocation3 + $0xf8] sm:$0xff] %vm334_vm0, %v4740_v5  ;;  %v10185_v5 = vld [vmem:[#allocation2 + $0xf2] sm:$0xff] }
 0x68b   : > { %5798 = vrot.lane.b32.xlu1 %v10078_v40, %s7475_s21  ;;  %5800 = vrot.lane.b32.xlu0 %v10080_v61, %s7475_s21 }
 0x68d   : > { %v4566_v26 = vpop.permute.xlu0 %4565 }
 0x68e   : > { %4653 = vst.msk [vmem:[#allocation4 + $0x40] sm:$0xff] %vm955_vm2, %v4566_v26  ;;  %v10187_v26 = vld [vmem:[#allocation2 + $0xea] sm:$0xff] }
 0x68f   : > { %5802 = vrot.lane.b32.xlu1 %v10087_v28, %s7475_s21  ;;  %5804 = vrot.lane.b32.xlu0 %v10089_v31, %s7475_s21 }
 0x691   : > { %v4568_v36 = vpop.permute.xlu1 %4567  ;;  %v4570_v51 = vpop.permute.xlu0 %4569 }
 0x692   : > { %4654 = vst.msk [vmem:[#allocation4 + $0x48] sm:$0xff] %vm955_vm2, %v4568_v36  ;;  %4655 = vst.msk [vmem:[#allocation4 + $0x50] sm:$0xff] %vm955_vm2, %v4570_v51 }
 0x693   : > { %5990 = vrot.lane.b32.xlu1 %v10098_v54, %s7476_s22  ;;  %5992 = vrot.lane.b32.xlu0 %v10100_v34, %s7476_s22 }
 0x695   : > { %v4572_v22 = vpop.permute.xlu1 %4571 }
 0x696   : > { %4656 = vst.msk [vmem:[#allocation4 + $0x58] sm:$0xff] %vm955_vm2, %v4572_v22  ;;  %v7353_v50 = vpop.f32.mrf.mxu1  ;;  %v10213_v22 = vld [vmem:[#allocation2 + $0x188] sm:$0xff] }
 0x697   : > { %5994 = vrot.lane.b32.xlu1 %v10113_v48, %s7476_s22  ;;  %5996 = vrot.lane.b32.xlu0 %v10115_v32, %s7476_s22  ;;  %v10174_v15 = vadd.f32 %v7353_v50, %v9890_v41 }
 0x698   : > { %v4486_v39 = vpop.f32.mrf.mxu1 }
 0x699   : > { %4703 = vst.msk [vmem:[#allocation2 + $0x245] sm:$0xff] %vm334_vm0, %v10174_v15  ;;  %v10183_v49 = vadd.f32 %v9890_v41, %v4486_v39 }
 0x69a   : > { %v7354_v33 = vpop.f32.mrf.mxu1 }
 0x69b   : > { %6182 = vrot.lane.b32.xlu1 %v10125_v52, %s7477_s27  ;;  %6184 = vrot.lane.b32.xlu0 %v10127_v25, %s7477_s27  ;;  %4701 = vst.msk [vmem:[#allocation2 + $0x225] sm:$0xff] %vm334_vm0, %v10183_v49  ;;  %v10192_v19 = vadd.f32 %v7354_v33, %v9890_v41 }
 0x69c   : > { %v4489_v36 = vpop.f32.mrf.mxu1 }
 0x69d   : > { %4704 = vst.msk [vmem:[#allocation2 + $0x24d] sm:$0xff] %vm334_vm0, %v10192_v19  ;;  %v10201_v51 = vadd.f32 %v9890_v41, %v4489_v36  ;;  %v10268_v36 = vld [vmem:[#allocation2 + $0x1b2] sm:$0xff] }
 0x69f   : > { %4845 = vrot.lane.b32.xlu1 %v4777_v55, %s7470_s16  ;;  %4847 = vrot.lane.b32.xlu0 %v4778_v57, %s7470_s16  ;;  %4702 = vst.msk [vmem:[#allocation2 + $0x22d] sm:$0xff] %vm334_vm0, %v10201_v51 }
 0x6a3   : > { %6186 = vrot.lane.b32.xlu1 %v10139_v2, %s7477_s27  ;;  %6188 = vrot.lane.b32.xlu0 %v10141_v11, %s7477_s27 }
 0x6a7   : > { %4849 = vrot.lane.b32.xlu1 %v4779_v58, %s7470_s16  ;;  %4851 = vrot.lane.b32.xlu0 %v4780_v60, %s7470_s16  ;;  %v10233_v58 = vld [vmem:[#allocation2 + $0x18d] sm:$0xff]  ;;  %v10235_v60 = vld [vmem:[#allocation2 + $0x185] sm:$0xff] }
 0x6ab   : > { %5037 = vrot.lane.b32.xlu1 %v4969_v62, %s7471_s17  ;;  %5039 = vrot.lane.b32.xlu0 %v4970_v3, %s7471_s17  ;;  %v4717_v62 = vld [vmem:[#allocation2 + $0x80] sm:$0xff] }
 0x6ac   : > { %4749 = vst.msk [vmem:[#allocation3 + $0x40] sm:$0xff] %vm334_vm0, %v4717_v62  ;;  %v4973_v62 = vld [vmem:[#allocation2 + $0x8a] sm:$0xff] }
 0x6ad   : > { %v4574_v6 = vpop.permute.xlu0 %4573 }
 0x6ae   : > { %4657 = vst.msk [vmem:[#allocation4 + $0x60] sm:$0xff] %vm955_vm2, %v4574_v6  ;;  %v10246_v6 = vld [vmem:[#allocation2 + $0x1a5] sm:$0xff] }
 0x6af   : > { %5041 = vrot.lane.b32.xlu1 %v4971_v4, %s7471_s17  ;;  %5043 = vrot.lane.b32.xlu0 %v4972_v8, %s7471_s17  ;;  %v10244_v8 = vld [vmem:[#allocation2 + $0x1ad] sm:$0xff] }
 0x6b1   : > { %v4576_v9 = vpop.permute.xlu1 %4575  ;;  %v4578_v12 = vpop.permute.xlu0 %4577 }
 0x6b2   : > { %4658 = vst.msk [vmem:[#allocation4 + $0x68] sm:$0xff] %vm955_vm2, %v4576_v9  ;;  %4659 = vst.msk [vmem:[#allocation4 + $0x70] sm:$0xff] %vm955_vm2, %v4578_v12 }
 0x6b3   : > { %5231 = vrot.lane.b32.xlu0 %v5162_v16, %s7472_s18  ;;  %5229 = vrot.lane.b32.xlu1 %v5161_v20, %s7472_s18  ;;  %v10254_v16 = vld [vmem:[#allocation2 + $0x192] sm:$0xff]  ;;  %v10256_v20 = vld [vmem:[#allocation2 + $0x18a] sm:$0xff] }
 0x6b5   : > { %v4580_v17 = vpop.permute.xlu1 %4579 }
 0x6b6   : > { %4660 = vst.msk [vmem:[#allocation4 + $0x78] sm:$0xff] %vm955_vm2, %v4580_v17  ;;  %v4782_v17 = vld [vmem:[#allocation2 + $0x8d] sm:$0xff] }
 0x6b7   : > { %5235 = vrot.lane.b32.xlu0 %v5164_v21, %s7472_s18  ;;  %5233 = vrot.lane.b32.xlu1 %v5163_v42, %s7472_s18  ;;  %v4781_v21 = vld [vmem:[#allocation2 + $0x85] sm:$0xff] }
 0x6bb   : > { %5423 = vrot.lane.b32.xlu0 %v10161_v43, %s7473_s19  ;;  %5421 = vrot.lane.b32.xlu1 %v10163_v29, %s7473_s19 }
 0x6bf   : > { %5427 = vrot.lane.b32.xlu0 %v10169_v46, %s7473_s19  ;;  %5425 = vrot.lane.b32.xlu1 %v10171_v56, %s7473_s19 }
 0x6c3   : > { %5615 = vrot.lane.b32.xlu0 %v10185_v5, %s7474_s20  ;;  %5613 = vrot.lane.b32.xlu1 %v10187_v26, %s7474_s20 }
 0x6c7   : > { %5619 = vrot.lane.b32.xlu0 %v10203_v63, %s7474_s20  ;;  %5617 = vrot.lane.b32.xlu1 %v10205_v14, %s7474_s20 }
 0x6cb   : > { %5808 = vrot.lane.b32.xlu0 %v10213_v22, %s7475_s21  ;;  %5806 = vrot.lane.b32.xlu1 %v10215_v38, %s7475_s21 }
 0x6cd   : > { %v4582_v13 = vpop.permute.xlu0 %4581 }
 0x6ce   : > { %4661 = vst.msk [vmem:[#allocation4 + $0x80] sm:$0xff] %vm955_vm2, %v4582_v13  ;;  %v10270_v13 = vld [vmem:[#allocation2 + $0x1aa] sm:$0xff] }
 0x6cf   : > { %5812 = vrot.lane.b32.xlu0 %v10222_v47, %s7475_s21  ;;  %5810 = vrot.lane.b32.xlu1 %v10224_v18, %s7475_s21 }
 0x6d1   : > { %v4584_v55 = vpop.permute.xlu1 %4583  ;;  %v4586_v57 = vpop.permute.xlu0 %4585 }
 0x6d2   : > { %4662 = vst.msk [vmem:[#allocation4 + $0x88] sm:$0xff] %vm955_vm2, %v4584_v55  ;;  %4663 = vst.msk [vmem:[#allocation4 + $0x90] sm:$0xff] %vm955_vm2, %v4586_v57  ;;  %v4974_v57 = vld [vmem:[#allocation2 + $0x92] sm:$0xff] }
 0x6d3   : > { %6000 = vrot.lane.b32.xlu0 %v10233_v58, %s7476_s22  ;;  %5998 = vrot.lane.b32.xlu1 %v10235_v60, %s7476_s22 }
 0x6d5   : > { %v4838_v3 = vpop.permute.xlu1 %4837  ;;  %v4840_v4 = vpop.permute.xlu0 %4839 }
 0x6d6   : > { %4933 = vst.msk [vmem:[#allocation3] sm:$0xff] %vm762_vm1, %v4838_v3  ;;  %4934 = vst.msk [vmem:[#allocation3 + $0x8] sm:$0xff] %vm762_vm1, %v4840_v4 }
 0x6d7   : > { %6004 = vrot.lane.b32.xlu0 %v10244_v8, %s7476_s22  ;;  %6002 = vrot.lane.b32.xlu1 %v10246_v6, %s7476_s22 }
 0x6d9   : > { %v4842_v9 = vpop.permute.xlu1 %4841  ;;  %v4844_v12 = vpop.permute.xlu0 %4843 }
 0x6da   : > { %4935 = vst.msk [vmem:[#allocation3 + $0x10] sm:$0xff] %vm762_vm1, %v4842_v9  ;;  %4936 = vst.msk [vmem:[#allocation3 + $0x18] sm:$0xff] %vm762_vm1, %v4844_v12 }
 0x6db   : > { %6192 = vrot.lane.b32.xlu0 %v10254_v16, %s7477_s27  ;;  %6190 = vrot.lane.b32.xlu1 %v10256_v20, %s7477_s27 }
 0x6dd   : > { %v5030_v42 = vpop.permute.xlu1 %5029  ;;  %v5032_v50 = vpop.permute.xlu0 %5031 }
 0x6de   : > { %5125 = vst.msk [vmem:[#allocation3] sm:$0xff] %vm955_vm2, %v5030_v42  ;;  %5126 = vst.msk [vmem:[#allocation3 + $0x8] sm:$0xff] %vm955_vm2, %v5032_v50  ;;  %v5166_v42 = vld [vmem:[#allocation2 + $0x128] sm:$0xff]  ;;  %v5165_v50 = vld [vmem:[#allocation2 + $0x120] sm:$0xff] }
 0x6df   : > { %4855 = vrot.lane.b32.xlu0 %v4782_v17, %s7470_s16  ;;  %4853 = vrot.lane.b32.xlu1 %v4781_v21, %s7470_s16 }
 0x6e1   : > { %v5034_v39 = vpop.permute.xlu1 %5033  ;;  %v5036_v33 = vpop.permute.xlu0 %5035 }
 0x6e2   : > { %5127 = vst.msk [vmem:[#allocation3 + $0x10] sm:$0xff] %vm955_vm2, %v5034_v39  ;;  %5128 = vst.msk [vmem:[#allocation3 + $0x18] sm:$0xff] %vm955_vm2, %v5036_v33 }
 0x6e3   : > { %6196 = vrot.lane.b32.xlu0 %v10268_v36, %s7477_s27  ;;  %6194 = vrot.lane.b32.xlu1 %v10270_v13, %s7477_s27 }
 0x6e5   : > { %v5222_v30 = vpop.permute.xlu1 %5221  ;;  %v5224_v55 = vpop.permute.xlu0 %5223 }
 0x6e6   : > { %5317 = vst.msk [vmem:[#allocation3] sm:$0xff] %vm1148_vm3, %v5222_v30  ;;  %5318 = vst.msk [vmem:[#allocation3 + $0x8] sm:$0xff] %vm1148_vm3, %v5224_v55 }
 0x6e7   : > { %4859 = vrot.lane.b32.xlu0 %v10034_v23, %s7470_s16  ;;  %4857 = vrot.lane.b32.xlu1 %v10032_v45, %s7470_s16  ;;  %v7357_v45 = vpop.f32.mrf.mxu1 }
 0x6e8   : > { %v10293_v21 = vadd.f32 %v7357_v45, %v9890_v41 }
 0x6e9   : > { %v5226_v3 = vpop.permute.xlu1 %5225  ;;  %v5228_v4 = vpop.permute.xlu0 %5227 }
 0x6ea   : > { %5319 = vst.msk [vmem:[#allocation3 + $0x10] sm:$0xff] %vm1148_vm3, %v5226_v3  ;;  %5320 = vst.msk [vmem:[#allocation3 + $0x18] sm:$0xff] %vm1148_vm3, %v5228_v4  ;;  %v4502_v39 = vpop.f32.mrf.mxu1 }
 0x6eb   : > { %5047 = vrot.lane.b32.xlu0 %v4974_v57, %s7471_s17  ;;  %5045 = vrot.lane.b32.xlu1 %v4973_v62, %s7471_s17  ;;  %4707 = vst.msk [vmem:[#allocation2 + $0x285] sm:$0xff] %vm334_vm0, %v10293_v21 }
 0x6ed   : > { %v5414_v9 = vpop.permute.xlu1 %5413  ;;  %v5416_v12 = vpop.permute.xlu0 %5415 }
 0x6ee   : > { %5509 = vst.msk [vmem:[#allocation3] sm:$0xff] %vm1341_vm4, %v5414_v9  ;;  %5510 = vst.msk [vmem:[#allocation3 + $0x8] sm:$0xff] %vm1341_vm4, %v5416_v12  ;;  %v10324_v9 = vld [vmem:[#allocation2 + $0x12d] sm:$0xff] }
 0x6ef   : > { %5051 = vrot.lane.b32.xlu0 %v10062_v37, %s7471_s17  ;;  %5049 = vrot.lane.b32.xlu1 %v10060_v35, %s7471_s17  ;;  %v10302_v35 = vadd.f32 %v9890_v41, %v4502_v39  ;;  %v7358_v37 = vpop.f32.mrf.mxu1  ;;  %v10356_v39 = vld [vmem:[#allocation2 + $0x1c8] sm:$0xff] }
 0x6f0   : > { %v10307_v55 = vadd.f32 %v7358_v37, %v9890_v41  ;;  %v10358_v37 = vld [vmem:[#allocation2 + $0x1c0] sm:$0xff] }
 0x6f1   : > { %v5418_v23 = vpop.permute.xlu1 %5417  ;;  %v5420_v17 = vpop.permute.xlu0 %5419  ;;  %4705 = vst.msk [vmem:[#allocation2 + $0x265] sm:$0xff] %vm334_vm0, %v10302_v35 }
 0x6f2   : > { %5511 = vst.msk [vmem:[#allocation3 + $0x10] sm:$0xff] %vm1341_vm4, %v5418_v23  ;;  %5512 = vst.msk [vmem:[#allocation3 + $0x18] sm:$0xff] %vm1341_vm4, %v5420_v17  ;;  %v4505_v57 = vpop.f32.mrf.mxu1  ;;  %v10340_v23 = vld [vmem:[#allocation2 + $0x132] sm:$0xff]  ;;  %v10342_v17 = vld [vmem:[#allocation2 + $0x12a] sm:$0xff] }
 0x6f3   : > { %5239 = vrot.lane.b32.xlu0 %v5166_v42, %s7472_s18  ;;  %5237 = vrot.lane.b32.xlu1 %v5165_v50, %s7472_s18  ;;  %11394 = vst [vmem:[#allocation15_spill] sm:$0xff] %v10307_v55  ;;  %4708 = vst.msk [vmem:[#allocation2 + $0x28d] sm:$0xff] %vm334_vm0, %v10307_v55  ;;  %v10318_v62 = vadd.f32 %v9890_v41, %v4505_v57  ;;  %v10414_v55 = vld [vmem:[#allocation2 + $0x1f2] sm:$0xff] }
 0x6f5   : > { %v5606_v33 = vpop.permute.xlu1 %5605  ;;  %v5608_v30 = vpop.permute.xlu0 %5607  ;;  %4706 = vst.msk [vmem:[#allocation2 + $0x26d] sm:$0xff] %vm334_vm0, %v10318_v62 }
 0x6f6   : > { %5701 = vst.msk [vmem:[#allocation3] sm:$0xff] %vm1534_vm5, %v5606_v33  ;;  %5702 = vst.msk [vmem:[#allocation3 + $0x8] sm:$0xff] %vm1534_vm5, %v5608_v30  ;;  %v10368_v30 = vld [vmem:[#allocation2 + $0x1e0] sm:$0xff] }
 0x6f7   : > { %5243 = vrot.lane.b32.xlu0 %v10080_v61, %s7472_s18  ;;  %5241 = vrot.lane.b32.xlu1 %v10078_v40, %s7472_s18  ;;  %v10326_v61 = vld [vmem:[#allocation2 + $0x125] sm:$0xff] }
 0x6f9   : > { %v5610_v3 = vpop.permute.xlu1 %5609  ;;  %v5612_v4 = vpop.permute.xlu0 %5611 }
 0x6fa   : > { %5703 = vst.msk [vmem:[#allocation3 + $0x10] sm:$0xff] %vm1534_vm5, %v5610_v3  ;;  %5704 = vst.msk [vmem:[#allocation3 + $0x18] sm:$0xff] %vm1534_vm5, %v5612_v4  ;;  %v10376_v4 = vld [vmem:[#allocation2 + $0x1cd] sm:$0xff] }
 0x6fb   : > { %5431 = vrot.lane.b32.xlu0 %v10324_v9, %s7473_s19  ;;  %5429 = vrot.lane.b32.xlu1 %v10326_v61, %s7473_s19 }
 0x6fd   : > { %v5799_v41 = vpop.permute.xlu1 %5798  ;;  %v5801_v40 = vpop.permute.xlu0 %5800 }
 0x6fe   : > { %5894 = vst.msk [vmem:[#allocation3] sm:$0xff] %vm1728_vm6, %v5799_v41  ;;  %5895 = vst.msk [vmem:[#allocation3 + $0x8] sm:$0xff] %vm1728_vm6, %v5801_v40  ;;  %v10378_v41 = vld [vmem:[#allocation2 + $0x1c5] sm:$0xff] }
 0x6ff   : > { %5435 = vrot.lane.b32.xlu0 %v10100_v34, %s7473_s19  ;;  %5433 = vrot.lane.b32.xlu1 %v10098_v54, %s7473_s19 }
 0x701   : > { %v5803_v12 = vpop.permute.xlu1 %5802  ;;  %v5805_v45 = vpop.permute.xlu0 %5804 }
 0x702   : > { %5896 = vst.msk [vmem:[#allocation3 + $0x10] sm:$0xff] %vm1728_vm6, %v5803_v12  ;;  %5897 = vst.msk [vmem:[#allocation3 + $0x18] sm:$0xff] %vm1728_vm6, %v5805_v45 }
 0x703   : > { %5623 = vrot.lane.b32.xlu0 %v10340_v23, %s7474_s20  ;;  %5621 = vrot.lane.b32.xlu1 %v10342_v17, %s7474_s20 }
 0x705   : > { %v5991_v34 = vpop.permute.xlu1 %5990  ;;  %v5993_v42 = vpop.permute.xlu0 %5992 }
 0x706   : > { %6086 = vst.msk [vmem:[#allocation3] sm:$0xff] %vm1921_vm8, %v5991_v34  ;;  %6087 = vst.msk [vmem:[#allocation3 + $0x8] sm:$0xff] %vm1921_vm8, %v5993_v42  ;;  %v10386_v42 = vld [vmem:[#allocation2 + $0x1ed] sm:$0xff] }
 0x707   : > { %5627 = vrot.lane.b32.xlu0 %v10127_v25, %s7474_s20  ;;  %5625 = vrot.lane.b32.xlu1 %v10125_v52, %s7474_s20  ;;  %v10366_v52 = vld [vmem:[#allocation2 + $0x1e8] sm:$0xff] }
 0x709   : > { %v5995_v54 = vpop.permute.xlu1 %5994  ;;  %v5997_v50 = vpop.permute.xlu0 %5996 }
 0x70a   : > { %6088 = vst.msk [vmem:[#allocation3 + $0x10] sm:$0xff] %vm1921_vm8, %v5995_v54  ;;  %6089 = vst.msk [vmem:[#allocation3 + $0x18] sm:$0xff] %vm1921_vm8, %v5997_v50  ;;  %v10388_v54 = vld [vmem:[#allocation2 + $0x1e5] sm:$0xff] }
 0x70b   : > { %5816 = vrot.lane.b32.xlu0 %v10356_v39, %s7475_s21  ;;  %5814 = vrot.lane.b32.xlu1 %v10358_v37, %s7475_s21 }
 0x70d   : > { %v6183_v25 = vpop.permute.xlu1 %6182  ;;  %v6185_v33 = vpop.permute.xlu0 %6184 }
 0x70e   : > { %6278 = vst.msk [vmem:[#allocation3] sm:$0xff] %vm2114_vm9, %v6183_v25  ;;  %6279 = vst.msk [vmem:[#allocation3 + $0x8] sm:$0xff] %vm2114_vm9, %v6185_v33 }
 0x70f   : > { %5820 = vrot.lane.b32.xlu0 %v10366_v52, %s7475_s21  ;;  %5818 = vrot.lane.b32.xlu1 %v10368_v30, %s7475_s21 }
 0x711   : > { %v4846_v57 = vpop.permute.xlu1 %4845  ;;  %v4848_v3 = vpop.permute.xlu0 %4847 }
 0x712   : > { %4937 = vst.msk [vmem:[#allocation3 + $0x20] sm:$0xff] %vm762_vm1, %v4846_v57  ;;  %4938 = vst.msk [vmem:[#allocation3 + $0x28] sm:$0xff] %vm762_vm1, %v4848_v3  ;;  %v10397_v57 = vld [vmem:[#allocation2 + $0x1d2] sm:$0xff]  ;;  %v10399_v3 = vld [vmem:[#allocation2 + $0x1ca] sm:$0xff] }
 0x713   : > { %6008 = vrot.lane.b32.xlu0 %v10376_v4, %s7476_s22  ;;  %6006 = vrot.lane.b32.xlu1 %v10378_v41, %s7476_s22 }
 0x715   : > { %v6187_v40 = vpop.permute.xlu1 %6186  ;;  %v6189_v12 = vpop.permute.xlu0 %6188  ;;  %v6310_v45 = vld [vmem:[#allocation3] sm:$0xff]  ;;  %v6311_v34 = vld [vmem:[#allocation3 + $0x8] sm:$0xff] }
 0x716   : > { %6280 = vst.msk [vmem:[#allocation3 + $0x10] sm:$0xff] %vm2114_vm9, %v6187_v40  ;;  %6281 = vst.msk [vmem:[#allocation3 + $0x18] sm:$0xff] %vm2114_vm9, %v6189_v12  ;;  %v6342_v50 = vpack.c.bf16 %v6311_v34, %v6310_v45 }
 0x717   : > { %6012 = vrot.lane.b32.xlu0 %v10386_v42, %s7476_s22  ;;  %6010 = vrot.lane.b32.xlu1 %v10388_v54, %s7476_s22 }
 0x718   : > { %7365 = vmatprep.mubr.msk.bf16.mxu0 %vm2222_vm10, %v6342_v50 }
 0x719   : > { %v4850_v25 = vpop.permute.xlu1 %4849  ;;  %v4852_v33 = vpop.permute.xlu0 %4851 }
 0x71a   : > { %4939 = vst.msk [vmem:[#allocation3 + $0x30] sm:$0xff] %vm762_vm1, %v4850_v25  ;;  %4940 = vst.msk [vmem:[#allocation3 + $0x38] sm:$0xff] %vm762_vm1, %v4852_v33 }
 0x71b   : > { %6200 = vrot.lane.b32.xlu0 %v10397_v57, %s7477_s27  ;;  %6198 = vrot.lane.b32.xlu1 %v10399_v3, %s7477_s27 }
 0x71d   : > { %v5038_v40 = vpop.permute.xlu1 %5037  ;;  %v5040_v12 = vpop.permute.xlu0 %5039  ;;  %v6312_v45 = vld [vmem:[#allocation3 + $0x10] sm:$0xff]  ;;  %v6313_v34 = vld [vmem:[#allocation3 + $0x18] sm:$0xff] }
 0x71e   : > { %5129 = vst.msk [vmem:[#allocation3 + $0x20] sm:$0xff] %vm955_vm2, %v5038_v40  ;;  %5130 = vst.msk [vmem:[#allocation3 + $0x28] sm:$0xff] %vm955_vm2, %v5040_v12  ;;  %v6343_v50 = vpack.c.bf16 %v6313_v34, %v6312_v45  ;;  %v10416_v40 = vld [vmem:[#allocation2 + $0x1ea] sm:$0xff] }
 0x71f   : > { %4863 = vrot.lane.b32.xlu0 %v10052_v10, %s7470_s16  ;;  %4861 = vrot.lane.b32.xlu1 %v10050_v1, %s7470_s16 }
 0x720   : > { %7366 = vmatmul.mubr.msk.bf16.vlgmr.msra.gmra.mxu0 %vm2222_vm10, %v6343_v50 }
 0x721   : > { %v5042_v25 = vpop.permute.xlu1 %5041  ;;  %v5044_v33 = vpop.permute.xlu0 %5043 }
 0x722   : > { %5131 = vst.msk [vmem:[#allocation3 + $0x30] sm:$0xff] %vm955_vm2, %v5042_v25  ;;  %5132 = vst.msk [vmem:[#allocation3 + $0x38] sm:$0xff] %vm955_vm2, %v5044_v33  ;;  %v10490_v33 = vld [vmem:[#allocation2 + $0x220] sm:$0xff] }
 0x723   : > { %6204 = vrot.lane.b32.xlu0 %v10414_v55, %s7477_s27  ;;  %6202 = vrot.lane.b32.xlu1 %v10416_v40, %s7477_s27 }
 0x725   : > { %v5232_v10 = vpop.permute.xlu0 %5231  ;;  %v5230_v1 = vpop.permute.xlu1 %5229 }
 0x726   : > { %5322 = vst.msk [vmem:[#allocation3 + $0x28] sm:$0xff] %vm1148_vm3, %v5232_v10  ;;  %5321 = vst.msk [vmem:[#allocation3 + $0x20] sm:$0xff] %vm1148_vm3, %v5230_v1 }
 0x727   : > { %4867 = vrot.lane.b32.xlu0 %v10161_v43, %s7470_s16  ;;  %4865 = vrot.lane.b32.xlu1 %v10163_v29, %s7470_s16 }
 0x729   : > { %v5236_v12 = vpop.permute.xlu0 %5235  ;;  %v5234_v45 = vpop.permute.xlu1 %5233 }
 0x72a   : > { %5324 = vst.msk [vmem:[#allocation3 + $0x38] sm:$0xff] %vm1148_vm3, %v5236_v12  ;;  %5323 = vst.msk [vmem:[#allocation3 + $0x30] sm:$0xff] %vm1148_vm3, %v5234_v45  ;;  %v10498_v12 = vld [vmem:[#allocation2 + $0x20d] sm:$0xff]  ;;  %v10500_v45 = vld [vmem:[#allocation2 + $0x205] sm:$0xff] }
 0x72b   : > { %5055 = vrot.lane.b32.xlu0 %v10071_v27, %s7471_s17  ;;  %5053 = vrot.lane.b32.xlu1 %v10069_v24, %s7471_s17 }
 0x72d   : > { %v5424_v34 = vpop.permute.xlu0 %5423  ;;  %v5422_v50 = vpop.permute.xlu1 %5421 }
 0x72e   : > { %5514 = vst.msk [vmem:[#allocation3 + $0x28] sm:$0xff] %vm1341_vm4, %v5424_v34  ;;  %5513 = vst.msk [vmem:[#allocation3 + $0x20] sm:$0xff] %vm1341_vm4, %v5422_v50 }
 0x72f   : > { %5059 = vrot.lane.b32.xlu0 %v10185_v5, %s7471_s17  ;;  %5057 = vrot.lane.b32.xlu1 %v10187_v26, %s7471_s17 }
 0x731   : > { %v5428_v43 = vpop.permute.xlu0 %5427  ;;  %v5426_v29 = vpop.permute.xlu1 %5425 }
 0x732   : > { %5516 = vst.msk [vmem:[#allocation3 + $0x38] sm:$0xff] %vm1341_vm4, %v5428_v43  ;;  %5515 = vst.msk [vmem:[#allocation3 + $0x30] sm:$0xff] %vm1341_vm4, %v5426_v29 }
 0x733   : > { %5247 = vrot.lane.b32.xlu0 %v10089_v31, %s7472_s18  ;;  %5245 = vrot.lane.b32.xlu1 %v10087_v28, %s7472_s18 }
 0x735   : > { %v5616_v24 = vpop.permute.xlu0 %5615  ;;  %v5614_v27 = vpop.permute.xlu1 %5613 }
 0x736   : > { %5706 = vst.msk [vmem:[#allocation3 + $0x28] sm:$0xff] %vm1534_vm5, %v5616_v24  ;;  %5705 = vst.msk [vmem:[#allocation3 + $0x20] sm:$0xff] %vm1534_vm5, %v5614_v27  ;;  %v10508_v24 = vld [vmem:[#allocation2 + $0x22d] sm:$0xff]  ;;  %v10510_v27 = vld [vmem:[#allocation2 + $0x225] sm:$0xff] }
 0x737   : > { %5251 = vrot.lane.b32.xlu0 %v10213_v22, %s7472_s18  ;;  %5249 = vrot.lane.b32.xlu1 %v10215_v38, %s7472_s18 }
 0x739   : > { %v5620_v5 = vpop.permute.xlu0 %5619  ;;  %v5618_v26 = vpop.permute.xlu1 %5617 }
 0x73a   : > { %5708 = vst.msk [vmem:[#allocation3 + $0x38] sm:$0xff] %vm1534_vm5, %v5620_v5  ;;  %5707 = vst.msk [vmem:[#allocation3 + $0x30] sm:$0xff] %vm1534_vm5, %v5618_v26 }
 0x73b   : > { %5439 = vrot.lane.b32.xlu0 %v10115_v32, %s7473_s19  ;;  %5437 = vrot.lane.b32.xlu1 %v10113_v48, %s7473_s19 }
 0x73d   : > { %v5809_v28 = vpop.permute.xlu0 %5808  ;;  %v5807_v31 = vpop.permute.xlu1 %5806 }
 0x73e   : > { %5899 = vst.msk [vmem:[#allocation3 + $0x28] sm:$0xff] %vm1728_vm6, %v5809_v28  ;;  %5898 = vst.msk [vmem:[#allocation3 + $0x20] sm:$0xff] %vm1728_vm6, %v5807_v31  ;;  %v10519_v31 = vld [vmem:[#allocation2 + $0x212] sm:$0xff] }
 0x73f   : > { %5443 = vrot.lane.b32.xlu0 %v10233_v58, %s7473_s19  ;;  %5441 = vrot.lane.b32.xlu1 %v10235_v60, %s7473_s19 }
 0x741   : > { %v5813_v22 = vpop.permute.xlu0 %5812  ;;  %v5811_v38 = vpop.permute.xlu1 %5810 }
 0x742   : > { %5901 = vst.msk [vmem:[#allocation3 + $0x38] sm:$0xff] %vm1728_vm6, %v5813_v22  ;;  %5900 = vst.msk [vmem:[#allocation3 + $0x30] sm:$0xff] %vm1728_vm6, %v5811_v38  ;;  %v10521_v22 = vld [vmem:[#allocation2 + $0x20a] sm:$0xff] }
 0x743   : > { %5631 = vrot.lane.b32.xlu0 %v10141_v11, %s7474_s20  ;;  %5629 = vrot.lane.b32.xlu1 %v10139_v2, %s7474_s20  ;;  %v10478_v11 = vld [vmem:[#allocation2 + $0x208] sm:$0xff]  ;;  %v10480_v2 = vld [vmem:[#allocation2 + $0x200] sm:$0xff] }
 0x745   : > { %v6001_v48 = vpop.permute.xlu0 %6000  ;;  %v5999_v32 = vpop.permute.xlu1 %5998 }
 0x746   : > { %6091 = vst.msk [vmem:[#allocation3 + $0x28] sm:$0xff] %vm1921_vm8, %v6001_v48  ;;  %6090 = vst.msk [vmem:[#allocation3 + $0x20] sm:$0xff] %vm1921_vm8, %v5999_v32 }
 0x747   : > { %5635 = vrot.lane.b32.xlu0 %v10254_v16, %s7474_s20  ;;  %5633 = vrot.lane.b32.xlu1 %v10256_v20, %s7474_s20  ;;  %v10488_v20 = vld [vmem:[#allocation2 + $0x228] sm:$0xff] }
 0x749   : > { %v6005_v58 = vpop.permute.xlu0 %6004  ;;  %v6003_v60 = vpop.permute.xlu1 %6002 }
 0x74a   : > { %6093 = vst.msk [vmem:[#allocation3 + $0x38] sm:$0xff] %vm1921_vm8, %v6005_v58  ;;  %6092 = vst.msk [vmem:[#allocation3 + $0x30] sm:$0xff] %vm1921_vm8, %v6003_v60 }
 0x74b   : > { %5824 = vrot.lane.b32.xlu0 %v10478_v11, %s7475_s21  ;;  %5822 = vrot.lane.b32.xlu1 %v10480_v2, %s7475_s21 }
 0x74d   : > { %v6193_v16 = vpop.permute.xlu0 %6192  ;;  %v6191_v25 = vpop.permute.xlu1 %6190 }
 0x74e   : > { %6283 = vst.msk [vmem:[#allocation3 + $0x28] sm:$0xff] %vm2114_vm9, %v6193_v16  ;;  %6282 = vst.msk [vmem:[#allocation3 + $0x20] sm:$0xff] %vm2114_vm9, %v6191_v25 }
 0x74f   : > { %5828 = vrot.lane.b32.xlu0 %v10488_v20, %s7475_s21  ;;  %5826 = vrot.lane.b32.xlu1 %v10490_v33, %s7475_s21 }
 0x751   : > { %v4856_v10 = vpop.permute.xlu0 %4855  ;;  %v4854_v1 = vpop.permute.xlu1 %4853 }
 0x752   : > { %4942 = vst.msk [vmem:[#allocation3 + $0x48] sm:$0xff] %vm762_vm1, %v4856_v10  ;;  %4941 = vst.msk [vmem:[#allocation3 + $0x40] sm:$0xff] %vm762_vm1, %v4854_v1  ;;  %v10536_v10 = vld [vmem:[#allocation2 + $0x232] sm:$0xff]  ;;  %v10538_v1 = vld [vmem:[#allocation2 + $0x22a] sm:$0xff] }
 0x753   : > { %6016 = vrot.lane.b32.xlu0 %v10498_v12, %s7476_s22  ;;  %6014 = vrot.lane.b32.xlu1 %v10500_v45, %s7476_s22 }
 0x755   : > { %v6197_v34 = vpop.permute.xlu0 %6196  ;;  %v6195_v50 = vpop.permute.xlu1 %6194  ;;  %v6314_v43 = vld [vmem:[#allocation3 + $0x20] sm:$0xff]  ;;  %v6315_v29 = vld [vmem:[#allocation3 + $0x28] sm:$0xff] }
 0x756   : > { %6285 = vst.msk [vmem:[#allocation3 + $0x38] sm:$0xff] %vm2114_vm9, %v6197_v34  ;;  %6284 = vst.msk [vmem:[#allocation3 + $0x30] sm:$0xff] %vm2114_vm9, %v6195_v50  ;;  %v6344_v5 = vpack.c.bf16 %v6315_v29, %v6314_v43 }
 0x757   : > { %6020 = vrot.lane.b32.xlu0 %v10508_v24, %s7476_s22  ;;  %6018 = vrot.lane.b32.xlu1 %v10510_v27, %s7476_s22 }
 0x758   : > { %7369 = vmatprep.mubr.msk.bf16.mxu0 %vm2222_vm10, %v6344_v5 }
 0x759   : > { %v4860_v26 = vpop.permute.xlu0 %4859  ;;  %v4858_v28 = vpop.permute.xlu1 %4857 }
 0x75a   : > { %4944 = vst.msk [vmem:[#allocation3 + $0x58] sm:$0xff] %vm762_vm1, %v4860_v26  ;;  %4943 = vst.msk [vmem:[#allocation3 + $0x50] sm:$0xff] %vm762_vm1, %v4858_v28  ;;  %v10612_v26 = vld [vmem:[#allocation2 + $0x260] sm:$0xff] }
 0x75b   : > { %6208 = vrot.lane.b32.xlu0 %v10519_v31, %s7477_s27  ;;  %6206 = vrot.lane.b32.xlu1 %v10521_v22, %s7477_s27 }
 0x75d   : > { %v5048_v38 = vpop.permute.xlu0 %5047  ;;  %v5046_v48 = vpop.permute.xlu1 %5045  ;;  %v6316_v32 = vld [vmem:[#allocation3 + $0x30] sm:$0xff]  ;;  %v6317_v58 = vld [vmem:[#allocation3 + $0x38] sm:$0xff] }
 0x75e   : > { %5134 = vst.msk [vmem:[#allocation3 + $0x48] sm:$0xff] %vm955_vm2, %v5048_v38  ;;  %5133 = vst.msk [vmem:[#allocation3 + $0x40] sm:$0xff] %vm955_vm2, %v5046_v48  ;;  %v6345_v60 = vpack.c.bf16 %v6317_v58, %v6316_v32  ;;  %v10620_v48 = vld [vmem:[#allocation2 + $0x24d] sm:$0xff]  ;;  %v10622_v32 = vld [vmem:[#allocation2 + $0x245] sm:$0xff] }
 0x75f   : > { %4871 = vrot.lane.b32.xlu0 %v10169_v46, %s7470_s16  ;;  %4869 = vrot.lane.b32.xlu1 %v10171_v56, %s7470_s16 }
 0x760   : > { %7370 = vmatmul.mubr.msk.bf16.gmra.mxu0 %vm2222_vm10, %v6345_v60 }
 0x761   : > { %v5052_v16 = vpop.permute.xlu0 %5051  ;;  %v5050_v25 = vpop.permute.xlu1 %5049 }
 0x762   : > { %5136 = vst.msk [vmem:[#allocation3 + $0x58] sm:$0xff] %vm955_vm2, %v5052_v16  ;;  %5135 = vst.msk [vmem:[#allocation3 + $0x50] sm:$0xff] %vm955_vm2, %v5050_v25 }
 0x763   : > { %6212 = vrot.lane.b32.xlu0 %v10536_v10, %s7477_s27  ;;  %6210 = vrot.lane.b32.xlu1 %v10538_v1, %s7477_s27 }
 0x765   : > { %v5240_v46 = vpop.permute.xlu0 %5239  ;;  %v5238_v56 = vpop.permute.xlu1 %5237 }
 0x766   : > { %5326 = vst.msk [vmem:[#allocation3 + $0x48] sm:$0xff] %vm1148_vm3, %v5240_v46  ;;  %5325 = vst.msk [vmem:[#allocation3 + $0x40] sm:$0xff] %vm1148_vm3, %v5238_v56  ;;  %v10630_v46 = vld [vmem:[#allocation2 + $0x26d] sm:$0xff]  ;;  %v10632_v56 = vld [vmem:[#allocation2 + $0x265] sm:$0xff] }
 0x767   : > { %4875 = vrot.lane.b32.xlu0 %v10324_v9, %s7470_s16  ;;  %4873 = vrot.lane.b32.xlu1 %v10326_v61, %s7470_s16 }
 0x769   : > { %v5244_v34 = vpop.permute.xlu0 %5243  ;;  %v5242_v50 = vpop.permute.xlu1 %5241 }
 0x76a   : > { %5328 = vst.msk [vmem:[#allocation3 + $0x58] sm:$0xff] %vm1148_vm3, %v5244_v34  ;;  %5327 = vst.msk [vmem:[#allocation3 + $0x50] sm:$0xff] %vm1148_vm3, %v5242_v50 }
 0x76b   : > { %5063 = vrot.lane.b32.xlu0 %v10203_v63, %s7471_s17  ;;  %5061 = vrot.lane.b32.xlu1 %v10205_v14, %s7471_s17 }
 0x76d   : > { %v5432_v43 = vpop.permute.xlu0 %5431  ;;  %v5430_v29 = vpop.permute.xlu1 %5429 }
 0x76e   : > { %5518 = vst.msk [vmem:[#allocation3 + $0x48] sm:$0xff] %vm1341_vm4, %v5432_v43  ;;  %5517 = vst.msk [vmem:[#allocation3 + $0x40] sm:$0xff] %vm1341_vm4, %v5430_v29  ;;  %v10641_v29 = vld [vmem:[#allocation2 + $0x252] sm:$0xff] }
 0x76f   : > { %5067 = vrot.lane.b32.xlu0 %v10340_v23, %s7471_s17  ;;  %5065 = vrot.lane.b32.xlu1 %v10342_v17, %s7471_s17 }
 0x771   : > { %v5436_v9 = vpop.permute.xlu0 %5435  ;;  %v5434_v61 = vpop.permute.xlu1 %5433 }
 0x772   : > { %5520 = vst.msk [vmem:[#allocation3 + $0x58] sm:$0xff] %vm1341_vm4, %v5436_v9  ;;  %5519 = vst.msk [vmem:[#allocation3 + $0x50] sm:$0xff] %vm1341_vm4, %v5434_v61  ;;  %v10643_v9 = vld [vmem:[#allocation2 + $0x24a] sm:$0xff] }
 0x773   : > { %5255 = vrot.lane.b32.xlu0 %v10222_v47, %s7472_s18  ;;  %5253 = vrot.lane.b32.xlu1 %v10224_v18, %s7472_s18 }
 0x775   : > { %v5624_v63 = vpop.permute.xlu0 %5623  ;;  %v5622_v14 = vpop.permute.xlu1 %5621 }
 0x776   : > { %5710 = vst.msk [vmem:[#allocation3 + $0x48] sm:$0xff] %vm1534_vm5, %v5624_v63  ;;  %5709 = vst.msk [vmem:[#allocation3 + $0x40] sm:$0xff] %vm1534_vm5, %v5622_v14 }
 0x777   : > { %5259 = vrot.lane.b32.xlu0 %v10356_v39, %s7472_s18  ;;  %5257 = vrot.lane.b32.xlu1 %v10358_v37, %s7472_s18 }
 0x779   : > { %v5628_v23 = vpop.permute.xlu0 %5627  ;;  %v5626_v17 = vpop.permute.xlu1 %5625 }
 0x77a   : > { %5712 = vst.msk [vmem:[#allocation3 + $0x58] sm:$0xff] %vm1534_vm5, %v5628_v23  ;;  %5711 = vst.msk [vmem:[#allocation3 + $0x50] sm:$0xff] %vm1534_vm5, %v5626_v17  ;;  %v4794_v17 = vld [vmem:[#allocation2 + $0x14d] sm:$0xff] }
 0x77b   : > { %5447 = vrot.lane.b32.xlu0 %v10244_v8, %s7473_s19  ;;  %5445 = vrot.lane.b32.xlu1 %v10246_v6, %s7473_s19 }
 0x77d   : > { %v5817_v47 = vpop.permute.xlu0 %5816  ;;  %v5815_v18 = vpop.permute.xlu1 %5814 }
 0x77e   : > { %5903 = vst.msk [vmem:[#allocation3 + $0x48] sm:$0xff] %vm1728_vm6, %v5817_v47  ;;  %5902 = vst.msk [vmem:[#allocation3 + $0x40] sm:$0xff] %vm1728_vm6, %v5815_v18  ;;  %v4793_v47 = vld [vmem:[#allocation2 + $0x145] sm:$0xff] }
 0x77f   : > { %5451 = vrot.lane.b32.xlu0 %v10376_v4, %s7473_s19  ;;  %5449 = vrot.lane.b32.xlu1 %v10378_v41, %s7473_s19 }
 0x781   : > { %v5821_v39 = vpop.permute.xlu0 %5820  ;;  %v5819_v37 = vpop.permute.xlu1 %5818 }
 0x782   : > { %5905 = vst.msk [vmem:[#allocation3 + $0x58] sm:$0xff] %vm1728_vm6, %v5821_v39  ;;  %5904 = vst.msk [vmem:[#allocation3 + $0x50] sm:$0xff] %vm1728_vm6, %v5819_v37 }
 0x783   : > { %5639 = vrot.lane.b32.xlu0 %v10268_v36, %s7474_s20  ;;  %5637 = vrot.lane.b32.xlu1 %v10270_v13, %s7474_s20  ;;  %v10600_v36 = vld [vmem:[#allocation2 + $0x248] sm:$0xff]  ;;  %v10602_v13 = vld [vmem:[#allocation2 + $0x240] sm:$0xff] }
 0x785   : > { %v6009_v8 = vpop.permute.xlu0 %6008  ;;  %v6007_v6 = vpop.permute.xlu1 %6006 }
 0x786   : > { %6095 = vst.msk [vmem:[#allocation3 + $0x48] sm:$0xff] %vm1921_vm8, %v6009_v8  ;;  %6094 = vst.msk [vmem:[#allocation3 + $0x40] sm:$0xff] %vm1921_vm8, %v6007_v6  ;;  %v10656_v8 = vld [vmem:[#allocation2 + $0x272] sm:$0xff]  ;;  %v10658_v6 = vld [vmem:[#allocation2 + $0x26a] sm:$0xff] }
 0x787   : > { %5643 = vrot.lane.b32.xlu0 %v10397_v57, %s7474_s20  ;;  %5641 = vrot.lane.b32.xlu1 %v10399_v3, %s7474_s20  ;;  %v10610_v3 = vld [vmem:[#allocation2 + $0x268] sm:$0xff] }
 0x789   : > { %v6013_v4 = vpop.permute.xlu0 %6012  ;;  %v6011_v41 = vpop.permute.xlu1 %6010 }
 0x78a   : > { %6097 = vst.msk [vmem:[#allocation3 + $0x58] sm:$0xff] %vm1921_vm8, %v6013_v4  ;;  %6096 = vst.msk [vmem:[#allocation3 + $0x50] sm:$0xff] %vm1921_vm8, %v6011_v41 }
 0x78b   : > { %5832 = vrot.lane.b32.xlu0 %v10600_v36, %s7475_s21  ;;  %5830 = vrot.lane.b32.xlu1 %v10602_v13, %s7475_s21 }
 0x78d   : > { %v6201_v57 = vpop.permute.xlu0 %6200  ;;  %v6199_v5 = vpop.permute.xlu1 %6198 }
 0x78e   : > { %6287 = vst.msk [vmem:[#allocation3 + $0x48] sm:$0xff] %vm2114_vm9, %v6201_v57  ;;  %6286 = vst.msk [vmem:[#allocation3 + $0x40] sm:$0xff] %vm2114_vm9, %v6199_v5  ;;  %v4796_v57 = vld [vmem:[#allocation2 + $0x16d] sm:$0xff]  ;;  %v4795_v5 = vld [vmem:[#allocation2 + $0x165] sm:$0xff] }
 0x78f   : > { %5836 = vrot.lane.b32.xlu0 %v10610_v3, %s7475_s21  ;;  %5834 = vrot.lane.b32.xlu1 %v10612_v26, %s7475_s21 }
 0x791   : > { %v4864_v28 = vpop.permute.xlu0 %4863  ;;  %v4862_v38 = vpop.permute.xlu1 %4861 }
 0x792   : > { %4946 = vst.msk [vmem:[#allocation3 + $0x68] sm:$0xff] %vm762_vm1, %v4864_v28  ;;  %4945 = vst.msk [vmem:[#allocation3 + $0x60] sm:$0xff] %vm762_vm1, %v4862_v38 }
 0x793   : > { %6024 = vrot.lane.b32.xlu0 %v10620_v48, %s7476_s22  ;;  %6022 = vrot.lane.b32.xlu1 %v10622_v32, %s7476_s22 }
 0x795   : > { %v6205_v58 = vpop.permute.xlu0 %6204  ;;  %v6203_v60 = vpop.permute.xlu1 %6202  ;;  %v6318_v16 = vld [vmem:[#allocation3 + $0x40] sm:$0xff]  ;;  %v6319_v25 = vld [vmem:[#allocation3 + $0x48] sm:$0xff] }
 0x796   : > { %6289 = vst.msk [vmem:[#allocation3 + $0x58] sm:$0xff] %vm2114_vm9, %v6205_v58  ;;  %6288 = vst.msk [vmem:[#allocation3 + $0x50] sm:$0xff] %vm2114_vm9, %v6203_v60  ;;  %v6346_v34 = vpack.c.bf16 %v6319_v25, %v6318_v16  ;;  %v4986_v58 = vld [vmem:[#allocation2 + $0x152] sm:$0xff]  ;;  %v4985_v60 = vld [vmem:[#allocation2 + $0x14a] sm:$0xff] }
 0x797   : > { %6028 = vrot.lane.b32.xlu0 %v10630_v46, %s7476_s22  ;;  %6026 = vrot.lane.b32.xlu1 %v10632_v56, %s7476_s22 }
 0x798   : > { %7373 = vmatprep.mubr.msk.bf16.mxu0 %vm2222_vm10, %v6346_v34  ;;  %v4988_v34 = vld [vmem:[#allocation2 + $0x172] sm:$0xff] }
 0x799   : > { %v4868_v50 = vpop.permute.xlu0 %4867  ;;  %v4866_v43 = vpop.permute.xlu1 %4865 }
 0x79a   : > { %4948 = vst.msk [vmem:[#allocation3 + $0x78] sm:$0xff] %vm762_vm1, %v4868_v50  ;;  %4947 = vst.msk [vmem:[#allocation3 + $0x70] sm:$0xff] %vm762_vm1, %v4866_v43  ;;  %v4987_v50 = vld [vmem:[#allocation2 + $0x16a] sm:$0xff] }
 0x79b   : > { %6216 = vrot.lane.b32.xlu0 %v10641_v29, %s7477_s27  ;;  %6214 = vrot.lane.b32.xlu1 %v10643_v9, %s7477_s27 }
 0x79d   : > { %v5056_v61 = vpop.permute.xlu0 %5055  ;;  %v5054_v63 = vpop.permute.xlu1 %5053  ;;  %v6320_v14 = vld [vmem:[#allocation3 + $0x50] sm:$0xff]  ;;  %v6321_v23 = vld [vmem:[#allocation3 + $0x58] sm:$0xff] }
 0x79e   : > { %5138 = vst.msk [vmem:[#allocation3 + $0x68] sm:$0xff] %vm955_vm2, %v5056_v61  ;;  %5137 = vst.msk [vmem:[#allocation3 + $0x60] sm:$0xff] %vm955_vm2, %v5054_v63  ;;  %v6347_v18 = vpack.c.bf16 %v6321_v23, %v6320_v14 }
 0x79f   : > { %4879 = vrot.lane.b32.xlu0 %v4794_v17, %s7470_s16  ;;  %4877 = vrot.lane.b32.xlu1 %v4793_v47, %s7470_s16  ;;  %v5756_v47 = vld [vmem:[#allocation2 + $0x2a0] sm:$0xff] }
 0x7a0   : > { %7374 = vmatmul.mubr.msk.bf16.gmra.mxu0 %vm2222_vm10, %v6347_v18 }
 0x7a1   : > { %v5060_v39 = vpop.permute.xlu0 %5059  ;;  %v5058_v37 = vpop.permute.xlu1 %5057 }
 0x7a2   : > { %5140 = vst.msk [vmem:[#allocation3 + $0x78] sm:$0xff] %vm955_vm2, %v5060_v39  ;;  %5139 = vst.msk [vmem:[#allocation3 + $0x70] sm:$0xff] %vm955_vm2, %v5058_v37 }
 0x7a3   : > { %6220 = vrot.lane.b32.xlu0 %v10656_v8, %s7477_s27  ;;  %6218 = vrot.lane.b32.xlu1 %v10658_v6, %s7477_s27 }
 0x7a5   : > { %v5248_v4 = vpop.permute.xlu0 %5247  ;;  %v5246_v41 = vpop.permute.xlu1 %5245 }
 0x7a6   : > { %5330 = vst.msk [vmem:[#allocation3 + $0x68] sm:$0xff] %vm1148_vm3, %v5248_v4  ;;  %5329 = vst.msk [vmem:[#allocation3 + $0x60] sm:$0xff] %vm1148_vm3, %v5246_v41  ;;  %v10728_v4 = vld [vmem:[#allocation2 + $0x28d] sm:$0xff]  ;;  %v10730_v41 = vld [vmem:[#allocation2 + $0x285] sm:$0xff] }
 0x7a7   : > { %4883 = vrot.lane.b32.xlu0 %v4796_v57, %s7470_s16  ;;  %4881 = vrot.lane.b32.xlu1 %v4795_v5, %s7470_s16  ;;  %v5949_v57 = vld [vmem:[#allocation2 + $0x2ad] sm:$0xff]  ;;  %v5948_v5 = vld [vmem:[#allocation2 + $0x2a5] sm:$0xff] }
 0x7a9   : > { %v5252_v28 = vpop.permute.xlu0 %5251  ;;  %v5250_v38 = vpop.permute.xlu1 %5249 }
 0x7aa   : > { %5332 = vst.msk [vmem:[#allocation3 + $0x78] sm:$0xff] %vm1148_vm3, %v5252_v28  ;;  %5331 = vst.msk [vmem:[#allocation3 + $0x70] sm:$0xff] %vm1148_vm3, %v5250_v38 }
 0x7ab   : > { %5071 = vrot.lane.b32.xlu0 %v4986_v58, %s7471_s17  ;;  %5069 = vrot.lane.b32.xlu1 %v4985_v60, %s7471_s17 }
 0x7ad   : > { %v5440_v16 = vpop.permute.xlu0 %5439  ;;  %v5438_v25 = vpop.permute.xlu1 %5437 }
 0x7ae   : > { %5522 = vst.msk [vmem:[#allocation3 + $0x68] sm:$0xff] %vm1341_vm4, %v5440_v16  ;;  %5521 = vst.msk [vmem:[#allocation3 + $0x60] sm:$0xff] %vm1341_vm4, %v5438_v25 }
 0x7af   : > { %5075 = vrot.lane.b32.xlu0 %v4988_v34, %s7471_s17  ;;  %5073 = vrot.lane.b32.xlu1 %v4987_v50, %s7471_s17  ;;  %v10743_v50 = vld [vmem:[#allocation2 + $0x292] sm:$0xff] }
 0x7b1   : > { %v5444_v43 = vpop.permute.xlu0 %5443  ;;  %v5442_v61 = vpop.permute.xlu1 %5441 }
 0x7b2   : > { %5524 = vst.msk [vmem:[#allocation3 + $0x78] sm:$0xff] %vm1341_vm4, %v5444_v43  ;;  %5523 = vst.msk [vmem:[#allocation3 + $0x70] sm:$0xff] %vm1341_vm4, %v5442_v61  ;;  %v10745_v43 = vld [vmem:[#allocation2 + $0x28a] sm:$0xff] }
 0x7b3   : > { %5263 = vrot.lane.b32.xlu0 %v10366_v52, %s7472_s18  ;;  %5261 = vrot.lane.b32.xlu1 %v10368_v30, %s7472_s18 }
 0x7b5   : > { %v5632_v63 = vpop.permute.xlu0 %5631  ;;  %v5630_v14 = vpop.permute.xlu1 %5629 }
 0x7b6   : > { %5714 = vst.msk [vmem:[#allocation3 + $0x68] sm:$0xff] %vm1534_vm5, %v5632_v63  ;;  %5713 = vst.msk [vmem:[#allocation3 + $0x60] sm:$0xff] %vm1534_vm5, %v5630_v14 }
 0x7b7   : > { %5267 = vrot.lane.b32.xlu0 %v10478_v11, %s7472_s18  ;;  %5265 = vrot.lane.b32.xlu1 %v10480_v2, %s7472_s18 }
 0x7b9   : > { %v5636_v23 = vpop.permute.xlu0 %5635  ;;  %v5634_v17 = vpop.permute.xlu1 %5633 }
 0x7ba   : > { %5716 = vst.msk [vmem:[#allocation3 + $0x78] sm:$0xff] %vm1534_vm5, %v5636_v23  ;;  %5715 = vst.msk [vmem:[#allocation3 + $0x70] sm:$0xff] %vm1534_vm5, %v5634_v17  ;;  %v4798_v17 = vld [vmem:[#allocation2 + $0x18d] sm:$0xff] }
 0x7bb   : > { %5455 = vrot.lane.b32.xlu0 %v10386_v42, %s7473_s19  ;;  %5453 = vrot.lane.b32.xlu1 %v10388_v54, %s7473_s19 }
 0x7bd   : > { %v5825_v52 = vpop.permute.xlu0 %5824  ;;  %v5823_v30 = vpop.permute.xlu1 %5822 }
 0x7be   : > { %5907 = vst.msk [vmem:[#allocation3 + $0x68] sm:$0xff] %vm1728_vm6, %v5825_v52  ;;  %5906 = vst.msk [vmem:[#allocation3 + $0x60] sm:$0xff] %vm1728_vm6, %v5823_v30  ;;  %v4797_v52 = vld [vmem:[#allocation2 + $0x185] sm:$0xff] }
 0x7bf   : > { %5459 = vrot.lane.b32.xlu0 %v10498_v12, %s7473_s19  ;;  %5457 = vrot.lane.b32.xlu1 %v10500_v45, %s7473_s19 }
 0x7c1   : > { %v5829_v11 = vpop.permute.xlu0 %5828  ;;  %v5827_v2 = vpop.permute.xlu1 %5826 }
 0x7c2   : > { %5909 = vst.msk [vmem:[#allocation3 + $0x78] sm:$0xff] %vm1728_vm6, %v5829_v11  ;;  %5908 = vst.msk [vmem:[#allocation3 + $0x70] sm:$0xff] %vm1728_vm6, %v5827_v2  ;;  %v6141_v11 = vld [vmem:[#allocation2 + $0x2b2] sm:$0xff]  ;;  %v6140_v2 = vld [vmem:[#allocation2 + $0x2aa] sm:$0xff] }
 0x7c3   : > { %5647 = vrot.lane.b32.xlu0 %v10414_v55, %s7474_s20  ;;  %5645 = vrot.lane.b32.xlu1 %v10416_v40, %s7474_s20  ;;  %v10714_v55 = vld [vmem:[#allocation2 + $0x288] sm:$0xff]  ;;  %v10716_v40 = vld [vmem:[#allocation2 + $0x280] sm:$0xff] }
 0x7c5   : > { %v6017_v42 = vpop.permute.xlu0 %6016  ;;  %v6015_v54 = vpop.permute.xlu1 %6014 }
 0x7c6   : > { %6099 = vst.msk [vmem:[#allocation3 + $0x68] sm:$0xff] %vm1921_vm8, %v6017_v42  ;;  %6098 = vst.msk [vmem:[#allocation3 + $0x60] sm:$0xff] %vm1921_vm8, %v6015_v54 }
 0x7c7   : > { %5651 = vrot.lane.b32.xlu0 %v10519_v31, %s7474_s20  ;;  %5649 = vrot.lane.b32.xlu1 %v10521_v22, %s7474_s20  ;;  %v5757_v31 = vld [vmem:[#allocation2 + $0x2a8] sm:$0xff] }
 0x7c9   : > { %v6021_v12 = vpop.permute.xlu0 %6020  ;;  %v6019_v45 = vpop.permute.xlu1 %6018 }
 0x7ca   : > { %6101 = vst.msk [vmem:[#allocation3 + $0x78] sm:$0xff] %vm1921_vm8, %v6021_v12  ;;  %6100 = vst.msk [vmem:[#allocation3 + $0x70] sm:$0xff] %vm1921_vm8, %v6019_v45 }
 0x7cb   : > { %5840 = vrot.lane.b32.xlu0 %v10714_v55, %s7475_s21  ;;  %5838 = vrot.lane.b32.xlu1 %v10716_v40, %s7475_s21 }
 0x7cd   : > { %v6209_v18 = vpop.permute.xlu0 %6208  ;;  %v6207_v22 = vpop.permute.xlu1 %6206 }
 0x7ce   : > { %6291 = vst.msk [vmem:[#allocation3 + $0x68] sm:$0xff] %vm2114_vm9, %v6209_v18  ;;  %6290 = vst.msk [vmem:[#allocation3 + $0x60] sm:$0xff] %vm2114_vm9, %v6207_v22 }
 0x7cf   : > { %5844 = vrot.lane.b32.xlu0 %v5757_v31, %s7475_s21  ;;  %5842 = vrot.lane.b32.xlu1 %v5756_v47, %s7475_s21  ;;  %v4800_v31 = vld [vmem:[#allocation2 + $0x1ad] sm:$0xff]  ;;  %v4799_v47 = vld [vmem:[#allocation2 + $0x1a5] sm:$0xff] }
 0x7d1   : > { %v4872_v39 = vpop.permute.xlu0 %4871  ;;  %v4870_v37 = vpop.permute.xlu1 %4869 }
 0x7d2   : > { %4950 = vst.msk [vmem:[#allocation3 + $0x88] sm:$0xff] %vm762_vm1, %v4872_v39  ;;  %4949 = vst.msk [vmem:[#allocation3 + $0x80] sm:$0xff] %vm762_vm1, %v4870_v37  ;;  %v4990_v39 = vld [vmem:[#allocation2 + $0x192] sm:$0xff]  ;;  %v4989_v37 = vld [vmem:[#allocation2 + $0x18a] sm:$0xff] }
 0x7d3   : > { %6032 = vrot.lane.b32.xlu0 %v10728_v4, %s7476_s22  ;;  %6030 = vrot.lane.b32.xlu1 %v10730_v41, %s7476_s22 }
 0x7d5   : > { %v6213_v28 = vpop.permute.xlu0 %6212  ;;  %v6211_v38 = vpop.permute.xlu1 %6210  ;;  %v6322_v58 = vld [vmem:[#allocation3 + $0x60] sm:$0xff]  ;;  %v6323_v60 = vld [vmem:[#allocation3 + $0x68] sm:$0xff] }
 0x7d6   : > { %6293 = vst.msk [vmem:[#allocation3 + $0x78] sm:$0xff] %vm2114_vm9, %v6213_v28  ;;  %6292 = vst.msk [vmem:[#allocation3 + $0x70] sm:$0xff] %vm2114_vm9, %v6211_v38  ;;  %v6348_v16 = vpack.c.bf16 %v6323_v60, %v6322_v58  ;;  %v4992_v28 = vld [vmem:[#allocation2 + $0x1b2] sm:$0xff]  ;;  %v4991_v38 = vld [vmem:[#allocation2 + $0x1aa] sm:$0xff] }
 0x7d7   : > { %6036 = vrot.lane.b32.xlu0 %v5949_v57, %s7476_s22  ;;  %6034 = vrot.lane.b32.xlu1 %v5948_v5, %s7476_s22 }
 0x7d8   : > { %7377 = vmatprep.mubr.msk.bf16.mxu0 %vm2222_vm10, %v6348_v16 }
 0x7d9   : > { %v4876_v25 = vpop.permute.xlu0 %4875  ;;  %v4874_v34 = vpop.permute.xlu1 %4873 }
 0x7da   : > { %4952 = vst.msk [vmem:[#allocation3 + $0x98] sm:$0xff] %vm762_vm1, %v4876_v25  ;;  %4951 = vst.msk [vmem:[#allocation3 + $0x90] sm:$0xff] %vm762_vm1, %v4874_v34 }
 0x7db   : > { %6224 = vrot.lane.b32.xlu0 %v10743_v50, %s7477_s27  ;;  %6222 = vrot.lane.b32.xlu1 %v10745_v43, %s7477_s27 }
 0x7dd   : > { %v5064_v61 = vpop.permute.xlu0 %5063  ;;  %v5062_v63 = vpop.permute.xlu1 %5061  ;;  %v6324_v14 = vld [vmem:[#allocation3 + $0x70] sm:$0xff]  ;;  %v6325_v23 = vld [vmem:[#allocation3 + $0x78] sm:$0xff] }
 0x7de   : > { %5142 = vst.msk [vmem:[#allocation3 + $0x88] sm:$0xff] %vm955_vm2, %v5064_v61  ;;  %5141 = vst.msk [vmem:[#allocation3 + $0x80] sm:$0xff] %vm955_vm2, %v5062_v63  ;;  %v6349_v30 = vpack.c.bf16 %v6325_v23, %v6324_v14 }
 0x7df   : > { %4887 = vrot.lane.b32.xlu0 %v4798_v17, %s7470_s16  ;;  %4885 = vrot.lane.b32.xlu1 %v4797_v52, %s7470_s16 }
 0x7e0   : > { %7378 = vmatmul.mubr.msk.bf16.gmra.mxu0 %vm2222_vm10, %v6349_v30 }
 0x7e1   : > { %v5068_v42 = vpop.permute.xlu0 %5067  ;;  %v5066_v54 = vpop.permute.xlu1 %5065 }
 0x7e2   : > { %5144 = vst.msk [vmem:[#allocation3 + $0x98] sm:$0xff] %vm955_vm2, %v5068_v42  ;;  %5143 = vst.msk [vmem:[#allocation3 + $0x90] sm:$0xff] %vm955_vm2, %v5066_v54 }
 0x7e3   : > { %6228 = vrot.lane.b32.xlu0 %v6141_v11, %s7477_s27  ;;  %6226 = vrot.lane.b32.xlu1 %v6140_v2, %s7477_s27  ;;  %v5953_v11 = vld [vmem:[#allocation2 + $0x2ed] sm:$0xff]  ;;  %v5952_v2 = vld [vmem:[#allocation2 + $0x2e5] sm:$0xff] }
 0x7e5   : > { %v5256_v12 = vpop.permute.xlu0 %5255  ;;  %v5254_v45 = vpop.permute.xlu1 %5253 }
 0x7e6   : > { %5334 = vst.msk [vmem:[#allocation3 + $0x88] sm:$0xff] %vm1148_vm3, %v5256_v12  ;;  %5333 = vst.msk [vmem:[#allocation3 + $0x80] sm:$0xff] %vm1148_vm3, %v5254_v45 }
 0x7e7   : > { %4891 = vrot.lane.b32.xlu0 %v4800_v31, %s7470_s16  ;;  %4889 = vrot.lane.b32.xlu1 %v4799_v47, %s7470_s16  ;;  %v6143_v47 = vld [vmem:[#allocation2 + $0x2d2] sm:$0xff] }
 0x7e9   : > { %v5260_v18 = vpop.permute.xlu0 %5259  ;;  %v5258_v22 = vpop.permute.xlu1 %5257 }
 0x7ea   : > { %5336 = vst.msk [vmem:[#allocation3 + $0x98] sm:$0xff] %vm1148_vm3, %v5260_v18  ;;  %5335 = vst.msk [vmem:[#allocation3 + $0x90] sm:$0xff] %vm1148_vm3, %v5258_v22  ;;  %v6142_v18 = vld [vmem:[#allocation2 + $0x2ca] sm:$0xff] }
 0x7eb   : > { %5079 = vrot.lane.b32.xlu0 %v4990_v39, %s7471_s17  ;;  %5077 = vrot.lane.b32.xlu1 %v4989_v37, %s7471_s17 }
 0x7ed   : > { %v5448_v57 = vpop.permute.xlu0 %5447  ;;  %v5446_v5 = vpop.permute.xlu1 %5445 }
 0x7ee   : > { %5526 = vst.msk [vmem:[#allocation3 + $0x88] sm:$0xff] %vm1341_vm4, %v5448_v57  ;;  %5525 = vst.msk [vmem:[#allocation3 + $0x80] sm:$0xff] %vm1341_vm4, %v5446_v5 }
 0x7ef   : > { %5083 = vrot.lane.b32.xlu0 %v4992_v28, %s7471_s17  ;;  %5081 = vrot.lane.b32.xlu1 %v4991_v38, %s7471_s17  ;;  %v4802_v38 = vld [vmem:[#allocation2 + $0x1cd] sm:$0xff] }
 0x7f1   : > { %v5452_v58 = vpop.permute.xlu0 %5451  ;;  %v5450_v60 = vpop.permute.xlu1 %5449 }
 0x7f2   : > { %5528 = vst.msk [vmem:[#allocation3 + $0x98] sm:$0xff] %vm1341_vm4, %v5452_v58  ;;  %5527 = vst.msk [vmem:[#allocation3 + $0x90] sm:$0xff] %vm1341_vm4, %v5450_v60  ;;  %v4801_v58 = vld [vmem:[#allocation2 + $0x1c5] sm:$0xff] }
 0x7f3   : > { %5271 = vrot.lane.b32.xlu0 %v10488_v20, %s7472_s18  ;;  %5269 = vrot.lane.b32.xlu1 %v10490_v33, %s7472_s18 }
 0x7f5   : > { %v5640_v16 = vpop.permute.xlu0 %5639  ;;  %v5638_v25 = vpop.permute.xlu1 %5637 }
 0x7f6   : > { %5718 = vst.msk [vmem:[#allocation3 + $0x88] sm:$0xff] %vm1534_vm5, %v5640_v16  ;;  %5717 = vst.msk [vmem:[#allocation3 + $0x80] sm:$0xff] %vm1534_vm5, %v5638_v25  ;;  %v6145_v16 = vld [vmem:[#allocation2 + $0x2f2] sm:$0xff]  ;;  %v6144_v25 = vld [vmem:[#allocation2 + $0x2ea] sm:$0xff] }
 0x7f7   : > { %5275 = vrot.lane.b32.xlu0 %v10600_v36, %s7472_s18  ;;  %5273 = vrot.lane.b32.xlu1 %v10602_v13, %s7472_s18 }
 0x7f9   : > { %v5644_v34 = vpop.permute.xlu0 %5643  ;;  %v5642_v61 = vpop.permute.xlu1 %5641 }
 0x7fa   : > { %5720 = vst.msk [vmem:[#allocation3 + $0x98] sm:$0xff] %vm1534_vm5, %v5644_v34  ;;  %5719 = vst.msk [vmem:[#allocation3 + $0x90] sm:$0xff] %vm1534_vm5, %v5642_v61 }
 0x7fb   : > { %5463 = vrot.lane.b32.xlu0 %v10508_v24, %s7473_s19  ;;  %5461 = vrot.lane.b32.xlu1 %v10510_v27, %s7473_s19 }
 0x7fd   : > { %v5833_v20 = vpop.permute.xlu0 %5832  ;;  %v5831_v33 = vpop.permute.xlu1 %5830 }
 0x7fe   : > { %5911 = vst.msk [vmem:[#allocation3 + $0x88] sm:$0xff] %vm1728_vm6, %v5833_v20  ;;  %5910 = vst.msk [vmem:[#allocation3 + $0x80] sm:$0xff] %vm1728_vm6, %v5831_v33 }
 0x7ff   : > { %5467 = vrot.lane.b32.xlu0 %v10620_v48, %s7473_s19  ;;  %5465 = vrot.lane.b32.xlu1 %v10622_v32, %s7473_s19  ;;  %v5759_v48 = vld [vmem:[#allocation2 + $0x2c8] sm:$0xff]  ;;  %v5758_v32 = vld [vmem:[#allocation2 + $0x2c0] sm:$0xff] }
 0x801   : > { %v5837_v36 = vpop.permute.xlu0 %5836  ;;  %v5835_v13 = vpop.permute.xlu1 %5834 }
 0x802   : > { %5913 = vst.msk [vmem:[#allocation3 + $0x98] sm:$0xff] %vm1728_vm6, %v5837_v36  ;;  %5912 = vst.msk [vmem:[#allocation3 + $0x90] sm:$0xff] %vm1728_vm6, %v5835_v13  ;;  %v4804_v36 = vld [vmem:[#allocation2 + $0x1ed] sm:$0xff]  ;;  %v4803_v13 = vld [vmem:[#allocation2 + $0x1e5] sm:$0xff] }
 0x803   : > { %5655 = vrot.lane.b32.xlu0 %v10536_v10, %s7474_s20  ;;  %5653 = vrot.lane.b32.xlu1 %v10538_v1, %s7474_s20  ;;  %v5761_v10 = vld [vmem:[#allocation2 + $0x2e8] sm:$0xff]  ;;  %v5760_v1 = vld [vmem:[#allocation2 + $0x2e0] sm:$0xff] }
 0x805   : > { %v6025_v24 = vpop.permute.xlu0 %6024  ;;  %v6023_v27 = vpop.permute.xlu1 %6022 }
 0x806   : > { %6103 = vst.msk [vmem:[#allocation3 + $0x88] sm:$0xff] %vm1921_vm8, %v6025_v24  ;;  %6102 = vst.msk [vmem:[#allocation3 + $0x80] sm:$0xff] %vm1921_vm8, %v6023_v27 }
 0x807   : > { %5659 = vrot.lane.b32.xlu0 %v10641_v29, %s7474_s20  ;;  %5657 = vrot.lane.b32.xlu1 %v10643_v9, %s7474_s20  ;;  %v5951_v29 = vld [vmem:[#allocation2 + $0x2cd] sm:$0xff]  ;;  %v5950_v9 = vld [vmem:[#allocation2 + $0x2c5] sm:$0xff] }
 0x809   : > { %v6029_v63 = vpop.permute.xlu0 %6028  ;;  %v6027_v14 = vpop.permute.xlu1 %6026 }
 0x80a   : > { %6105 = vst.msk [vmem:[#allocation3 + $0x98] sm:$0xff] %vm1921_vm8, %v6029_v63  ;;  %6104 = vst.msk [vmem:[#allocation3 + $0x90] sm:$0xff] %vm1921_vm8, %v6027_v14 }
 0x80b   : > { %5848 = vrot.lane.b32.xlu0 %v5759_v48, %s7475_s21  ;;  %5846 = vrot.lane.b32.xlu1 %v5758_v32, %s7475_s21  ;;  %v4994_v48 = vld [vmem:[#allocation2 + $0x1d2] sm:$0xff]  ;;  %v4993_v32 = vld [vmem:[#allocation2 + $0x1ca] sm:$0xff] }
 0x80d   : > { %v6217_v23 = vpop.permute.xlu0 %6216  ;;  %v6215_v17 = vpop.permute.xlu1 %6214 }
 0x80e   : > { %6295 = vst.msk [vmem:[#allocation3 + $0x88] sm:$0xff] %vm2114_vm9, %v6217_v23  ;;  %6294 = vst.msk [vmem:[#allocation3 + $0x80] sm:$0xff] %vm2114_vm9, %v6215_v17 }
 0x80f   : > { %5852 = vrot.lane.b32.xlu0 %v5761_v10, %s7475_s21  ;;  %5850 = vrot.lane.b32.xlu1 %v5760_v1, %s7475_s21  ;;  %v4996_v10 = vld [vmem:[#allocation2 + $0x1f2] sm:$0xff]  ;;  %v4995_v1 = vld [vmem:[#allocation2 + $0x1ea] sm:$0xff] }
 0x811   : > { %v4880_v52 = vpop.permute.xlu0 %4879  ;;  %v4878_v30 = vpop.permute.xlu1 %4877 }
 0x812   : > { %4954 = vst.msk [vmem:[#allocation3 + $0xa8] sm:$0xff] %vm762_vm1, %v4880_v52  ;;  %4953 = vst.msk [vmem:[#allocation3 + $0xa0] sm:$0xff] %vm762_vm1, %v4878_v30 }
 0x813   : > { %6040 = vrot.lane.b32.xlu0 %v5951_v29, %s7476_s22  ;;  %6038 = vrot.lane.b32.xlu1 %v5950_v9, %s7476_s22 }
 0x815   : > { %v6221_v42 = vpop.permute.xlu0 %6220  ;;  %v6219_v54 = vpop.permute.xlu1 %6218  ;;  %v6326_v12 = vld [vmem:[#allocation3 + $0x80] sm:$0xff]  ;;  %v6327_v45 = vld [vmem:[#allocation3 + $0x88] sm:$0xff] }
 0x816   : > { %6297 = vst.msk [vmem:[#allocation3 + $0x98] sm:$0xff] %vm2114_vm9, %v6221_v42  ;;  %6296 = vst.msk [vmem:[#allocation3 + $0x90] sm:$0xff] %vm2114_vm9, %v6219_v54  ;;  %v6350_v31 = vpack.c.bf16 %v6327_v45, %v6326_v12  ;;  %v5764_v54 = vld [vmem:[#allocation2 + $0x320] sm:$0xff] }
 0x817   : > { %6044 = vrot.lane.b32.xlu0 %v5953_v11, %s7476_s22  ;;  %6042 = vrot.lane.b32.xlu1 %v5952_v2, %s7476_s22  ;;  %v10880_v11 = vpop.f32.mrf.mxu0 }
 0x818   : > { %7381 = vmatprep.mubr.msk.bf16.mxu0 %vm2222_vm10, %v6350_v31  ;;  %v5954_v31 = vld [vmem:[#allocation2 + $0x305] sm:$0xff] }
 0x819   : > { %v4884_v22 = vpop.permute.xlu0 %4883  ;;  %v4882_v39 = vpop.permute.xlu1 %4881 }
 0x81a   : > { %4956 = vst.msk [vmem:[#allocation3 + $0xb8] sm:$0xff] %vm762_vm1, %v4884_v22  ;;  %4955 = vst.msk [vmem:[#allocation3 + $0xb0] sm:$0xff] %vm762_vm1, %v4882_v39  ;;  %v6470_v42 = vpop.f32.mrf.mxu0 }
 0x81b   : > { %6232 = vrot.lane.b32.xlu0 %v6143_v47, %s7477_s27  ;;  %6230 = vrot.lane.b32.xlu1 %v6142_v18, %s7477_s27 }
 0x81c   : > { %v10892_v45 = vpop.f32.mrf.mxu0 }
 0x81d   : > { %v5072_v37 = vpop.permute.xlu0 %5071  ;;  %v5070_v57 = vpop.permute.xlu1 %5069  ;;  %v6328_v5 = vld [vmem:[#allocation3 + $0x90] sm:$0xff]  ;;  %v6329_v28 = vld [vmem:[#allocation3 + $0x98] sm:$0xff] }
 0x81e   : > { %5146 = vst.msk [vmem:[#allocation3 + $0xa8] sm:$0xff] %vm955_vm2, %v5072_v37  ;;  %5145 = vst.msk [vmem:[#allocation3 + $0xa0] sm:$0xff] %vm955_vm2, %v5070_v57  ;;  %v6351_v60 = vpack.c.bf16 %v6329_v28, %v6328_v5  ;;  %v6473_v22 = vpop.f32.mrf.mxu0  ;;  %v5957_v37 = vld [vmem:[#allocation2 + $0x32d] sm:$0xff]  ;;  %v5956_v57 = vld [vmem:[#allocation2 + $0x325] sm:$0xff] }
 0x81f   : > { %4895 = vrot.lane.b32.xlu0 %v4802_v38, %s7470_s16  ;;  %4893 = vrot.lane.b32.xlu1 %v4801_v58, %s7470_s16 }
 0x820   : > { %7382 = vmatmul.mubr.msk.bf16.gmra.mxu0 %vm2222_vm10, %v6351_v60  ;;  %v10902_v39 = vpop.f32.mrf.mxu0 }
 0x821   : > { %v5076_v34 = vpop.permute.xlu0 %5075  ;;  %v5074_v61 = vpop.permute.xlu1 %5073 }
 0x822   : > { %5148 = vst.msk [vmem:[#allocation3 + $0xb8] sm:$0xff] %vm955_vm2, %v5076_v34  ;;  %5147 = vst.msk [vmem:[#allocation3 + $0xb0] sm:$0xff] %vm955_vm2, %v5074_v61  ;;  %v6146_v34 = vld [vmem:[#allocation2 + $0x30a] sm:$0xff] }
 0x823   : > { %6236 = vrot.lane.b32.xlu0 %v6145_v16, %s7477_s27  ;;  %6234 = vrot.lane.b32.xlu1 %v6144_v25, %s7477_s27  ;;  %v6486_v16 = vpop.f32.mrf.mxu0  ;;  %v6147_v25 = vld [vmem:[#allocation2 + $0x312] sm:$0xff] }
 0x825   : > { %v5264_v20 = vpop.permute.xlu0 %5263  ;;  %v5262_v33 = vpop.permute.xlu1 %5261 }
 0x826   : > { %5338 = vst.msk [vmem:[#allocation3 + $0xa8] sm:$0xff] %vm1148_vm3, %v5264_v20  ;;  %5337 = vst.msk [vmem:[#allocation3 + $0xa0] sm:$0xff] %vm1148_vm3, %v5262_v33  ;;  %v7372_v33 = vpop.f32.mrf.mxu0 }
 0x827   : > { %4899 = vrot.lane.b32.xlu0 %v4804_v36, %s7470_s16  ;;  %4897 = vrot.lane.b32.xlu1 %v4803_v13, %s7470_s16  ;;  %v6149_v36 = vld [vmem:[#allocation2 + $0x332] sm:$0xff]  ;;  %v6148_v13 = vld [vmem:[#allocation2 + $0x32a] sm:$0xff] }
 0x829   : > { %v5268_v24 = vpop.permute.xlu0 %5267  ;;  %v5266_v27 = vpop.permute.xlu1 %5265 }
 0x82a   : > { %5340 = vst.msk [vmem:[#allocation3 + $0xb8] sm:$0xff] %vm1148_vm3, %v5268_v24  ;;  %5339 = vst.msk [vmem:[#allocation3 + $0xb0] sm:$0xff] %vm1148_vm3, %v5266_v27 }
 0x82b   : > { %5087 = vrot.lane.b32.xlu0 %v4994_v48, %s7471_s17  ;;  %5085 = vrot.lane.b32.xlu1 %v4993_v32, %s7471_s17 }
 0x82d   : > { %v5456_v63 = vpop.permute.xlu0 %5455  ;;  %v5454_v14 = vpop.permute.xlu1 %5453 }
 0x82e   : > { %5530 = vst.msk [vmem:[#allocation3 + $0xa8] sm:$0xff] %vm1341_vm4, %v5456_v63  ;;  %5529 = vst.msk [vmem:[#allocation3 + $0xa0] sm:$0xff] %vm1341_vm4, %v5454_v14  ;;  %v10920_v14 = vld [vmem:[%s11259_s6] ss:$0 sm:$0xff] }
 0x82f   : > { %5091 = vrot.lane.b32.xlu0 %v4996_v10, %s7471_s17  ;;  %5089 = vrot.lane.b32.xlu1 %v4995_v1, %s7471_s17  ;;  %v6489_v10 = vpop.f32.mrf.mxu0  ;;  %v6471_v1 = vadd.f32 %v10920_v14, %v6470_v42 }
 0x831   : > { %v5460_v23 = vpop.permute.xlu0 %5459  ;;  %v5458_v17 = vpop.permute.xlu1 %5457 }
 0x832   : > { %5532 = vst.msk [vmem:[#allocation3 + $0xb8] sm:$0xff] %vm1341_vm4, %v5460_v23  ;;  %5531 = vst.msk [vmem:[#allocation3 + $0xb0] sm:$0xff] %vm1341_vm4, %v5458_v17  ;;  %v6474_v23 = vadd.f32 %v10920_v14, %v6473_v22 }
 0x833   : > { %5279 = vrot.lane.b32.xlu0 %v10610_v3, %s7472_s18  ;;  %5277 = vrot.lane.b32.xlu1 %v10612_v26, %s7472_s18 }
 0x835   : > { %v5648_v29 = vpop.permute.xlu0 %5647  ;;  %v5646_v9 = vpop.permute.xlu1 %5645 }
 0x836   : > { %5722 = vst.msk [vmem:[#allocation3 + $0xa8] sm:$0xff] %vm1534_vm5, %v5648_v29  ;;  %5721 = vst.msk [vmem:[#allocation3 + $0xa0] sm:$0xff] %vm1534_vm5, %v5646_v9  ;;  %v7460_v9 = vld [vmem:[%s11260_s7] sm:$0xff]  }
 0x837   : > { %5283 = vrot.lane.b32.xlu0 %v10714_v55, %s7472_s18  ;;  %5281 = vrot.lane.b32.xlu1 %v10716_v40, %s7472_s18 }
 0x838   : > { %7397 = vmatprep.subr.bf16.mxu1 %v7460_v9 }
 0x839   : > { %v5652_v52 = vpop.permute.xlu0 %5651  ;;  %v5650_v30 = vpop.permute.xlu1 %5649  ;;  %7398 = vmatpush3.bf16.msra.mxu1 %v7460_v9 }
 0x83a   : > { %5724 = vst.msk [vmem:[#allocation3 + $0xb8] sm:$0xff] %vm1534_vm5, %v5652_v52  ;;  %5723 = vst.msk [vmem:[#allocation3 + $0xb0] sm:$0xff] %vm1534_vm5, %v5650_v30  ;;  %v6479_v30 = vadd.f32 %v10880_v11, %v10920_v14 }
 0x83b   : > { %5471 = vrot.lane.b32.xlu0 %v10630_v46, %s7473_s19  ;;  %5469 = vrot.lane.b32.xlu1 %v10632_v56, %s7473_s19 }
 0x83d   : > { %v5841_v3 = vpop.permute.xlu0 %5840  ;;  %v5839_v26 = vpop.permute.xlu1 %5838 }
 0x83e   : > { %5915 = vst.msk [vmem:[#allocation3 + $0xa8] sm:$0xff] %vm1728_vm6, %v5841_v3  ;;  %5914 = vst.msk [vmem:[#allocation3 + $0xa0] sm:$0xff] %vm1728_vm6, %v5839_v26  ;;  %v6482_v3 = vadd.f32 %v10892_v45, %v10920_v14 }
 0x83f   : > { %5475 = vrot.lane.b32.xlu0 %v10728_v4, %s7473_s19  ;;  %5473 = vrot.lane.b32.xlu1 %v10730_v41, %s7473_s19  ;;  %v5763_v4 = vld [vmem:[#allocation2 + $0x308] sm:$0xff]  ;;  %v5762_v41 = vld [vmem:[#allocation2 + $0x300] sm:$0xff] }
 0x841   : > { %v5845_v55 = vpop.permute.xlu0 %5844  ;;  %v5843_v40 = vpop.permute.xlu1 %5842 }
 0x842   : > { %5917 = vst.msk [vmem:[#allocation3 + $0xb8] sm:$0xff] %vm1728_vm6, %v5845_v55  ;;  %5916 = vst.msk [vmem:[#allocation3 + $0xb0] sm:$0xff] %vm1728_vm6, %v5843_v40 }
 0x843   : > { %5663 = vrot.lane.b32.xlu0 %v10656_v8, %s7474_s20  ;;  %5661 = vrot.lane.b32.xlu1 %v10658_v6, %s7474_s20  ;;  %v5765_v6 = vld [vmem:[#allocation2 + $0x328] sm:$0xff] }
 0x845   : > { %v6033_v46 = vpop.permute.xlu0 %6032  ;;  %v6031_v56 = vpop.permute.xlu1 %6030 }
 0x846   : > { %6107 = vst.msk [vmem:[#allocation3 + $0xa8] sm:$0xff] %vm1921_vm8, %v6033_v46  ;;  %6106 = vst.msk [vmem:[#allocation3 + $0xa0] sm:$0xff] %vm1921_vm8, %v6031_v56  ;;  %v6487_v46 = vadd.f32 %v10920_v14, %v6486_v16  ;;  %v6490_v56 = vadd.f32 %v10920_v14, %v6489_v10 }
 0x847   : > { %5667 = vrot.lane.b32.xlu0 %v10743_v50, %s7474_s20  ;;  %5665 = vrot.lane.b32.xlu1 %v10745_v43, %s7474_s20  ;;  %v5955_v43 = vld [vmem:[#allocation2 + $0x30d] sm:$0xff] }
 0x849   : > { %v6037_v8 = vpop.permute.xlu0 %6036  ;;  %v6035_v2 = vpop.permute.xlu1 %6034 }
 0x84a   : > { %6109 = vst.msk [vmem:[#allocation3 + $0xb8] sm:$0xff] %vm1921_vm8, %v6037_v8  ;;  %6108 = vst.msk [vmem:[#allocation3 + $0xb0] sm:$0xff] %vm1921_vm8, %v6035_v2  ;;  %v6495_v8 = vadd.f32 %v10902_v39, %v10920_v14  ;;  %v6498_v2 = vadd.f32 %v7372_v33, %v10920_v14 }
 0x84b   : > { %5856 = vrot.lane.b32.xlu0 %v5763_v4, %s7475_s21  ;;  %5854 = vrot.lane.b32.xlu1 %v5762_v41, %s7475_s21 }
 0x84d   : > { %v6225_v12 = vpop.permute.xlu0 %6224  ;;  %v6223_v50 = vpop.permute.xlu1 %6222 }
 0x84e   : > { %6299 = vst.msk [vmem:[#allocation3 + $0xa8] sm:$0xff] %vm2114_vm9, %v6225_v12  ;;  %6298 = vst.msk [vmem:[#allocation3 + $0xa0] sm:$0xff] %vm2114_vm9, %v6223_v50 }
 0x84f   : > { %5860 = vrot.lane.b32.xlu0 %v5765_v6, %s7475_s21  ;;  %5858 = vrot.lane.b32.xlu1 %v5764_v54, %s7475_s21 }
 0x851   : > { %v4888_v47 = vpop.permute.xlu0 %4887  ;;  %v4886_v18 = vpop.permute.xlu1 %4885 }
 0x852   : > { %4958 = vst.msk [vmem:[#allocation3 + $0xc8] sm:$0xff] %vm762_vm1, %v4888_v47  ;;  %4957 = vst.msk [vmem:[#allocation3 + $0xc0] sm:$0xff] %vm762_vm1, %v4886_v18 }
 0x853   : > { %6048 = vrot.lane.b32.xlu0 %v5955_v43, %s7476_s22  ;;  %6046 = vrot.lane.b32.xlu1 %v5954_v31, %s7476_s22 }
 0x855   : > { %v6229_v5 = vpop.permute.xlu0 %6228  ;;  %v6227_v28 = vpop.permute.xlu1 %6226  ;;  %v6330_v38 = vld [vmem:[#allocation3 + $0xa0] sm:$0xff]  ;;  %v6331_v58 = vld [vmem:[#allocation3 + $0xa8] sm:$0xff] }
 0x856   : > { %6301 = vst.msk [vmem:[#allocation3 + $0xb8] sm:$0xff] %vm2114_vm9, %v6229_v5  ;;  %6300 = vst.msk [vmem:[#allocation3 + $0xb0] sm:$0xff] %vm2114_vm9, %v6227_v28  ;;  %v6352_v60 = vpack.c.bf16 %v6331_v58, %v6330_v38 }
 0x857   : > { %6052 = vrot.lane.b32.xlu0 %v5957_v37, %s7476_s22  ;;  %6050 = vrot.lane.b32.xlu1 %v5956_v57, %s7476_s22 }
 0x858   : > { %7385 = vmatprep.mubr.msk.bf16.mxu0 %vm2222_vm10, %v6352_v60 }
 0x859   : > { %v4892_v61 = vpop.permute.xlu0 %4891  ;;  %v4890_v20 = vpop.permute.xlu1 %4889 }
 0x85a   : > { %4960 = vst.msk [vmem:[#allocation3 + $0xd8] sm:$0xff] %vm762_vm1, %v4892_v61  ;;  %4959 = vst.msk [vmem:[#allocation3 + $0xd0] sm:$0xff] %vm762_vm1, %v4890_v20 }
 0x85b   : > { %6240 = vrot.lane.b32.xlu0 %v6147_v25, %s7477_s27  ;;  %6238 = vrot.lane.b32.xlu1 %v6146_v34, %s7477_s27 }
 0x85d   : > { %v5080_v24 = vpop.permute.xlu0 %5079  ;;  %v5078_v27 = vpop.permute.xlu1 %5077  ;;  %v6332_v48 = vld [vmem:[#allocation3 + $0xb0] sm:$0xff]  ;;  %v6333_v32 = vld [vmem:[#allocation3 + $0xb8] sm:$0xff] }
 0x85e   : > { %5150 = vst.msk [vmem:[#allocation3 + $0xc8] sm:$0xff] %vm955_vm2, %v5080_v24  ;;  %5149 = vst.msk [vmem:[#allocation3 + $0xc0] sm:$0xff] %vm955_vm2, %v5078_v27  ;;  %v6353_v63 = vpack.c.bf16 %v6333_v32, %v6332_v48 }
 0x85f   : > { %6244 = vrot.lane.b32.xlu0 %v6149_v36, %s7477_s27  ;;  %6242 = vrot.lane.b32.xlu1 %v6148_v13, %s7477_s27 }
 0x860   : > { %7386 = vmatmul.mubr.msk.bf16.gmra.mxu0 %vm2222_vm10, %v6353_v63  ;;  %v7375_v52 = vpop.f32.mrf.mxu0 }
 0x861   : > { %v5084_v17 = vpop.permute.xlu0 %5083  ;;  %v5082_v29 = vpop.permute.xlu1 %5081  ;;  %v6511_v31 = vadd.f32 %v7375_v52, %v10920_v14 }
 0x862   : > { %5152 = vst.msk [vmem:[#allocation3 + $0xd8] sm:$0xff] %vm955_vm2, %v5084_v17  ;;  %5151 = vst.msk [vmem:[#allocation3 + $0xd0] sm:$0xff] %vm955_vm2, %v5082_v29  ;;  %v6502_v40 = vpop.f32.mrf.mxu0 }
 0x863   : > { %6631 = vrot.lane.b32.xlu0 %v6474_v23, %s7472_s18  ;;  %6629 = vrot.lane.b32.xlu1 %v6471_v1, %s7472_s18  ;;  %v6503_v12 = vadd.f32 %v10920_v14, %v6502_v40 }
 0x864   : > { %v7376_v41 = vpop.f32.mrf.mxu0 }
 0x865   : > { %v5272_v26 = vpop.permute.xlu0 %5271  ;;  %v5270_v55 = vpop.permute.xlu1 %5269  ;;  %v6514_v47 = vadd.f32 %v7376_v41, %v10920_v14 }
 0x866   : > { %5342 = vst.msk [vmem:[#allocation3 + $0xc8] sm:$0xff] %vm1148_vm3, %v5272_v26  ;;  %5341 = vst.msk [vmem:[#allocation3 + $0xc0] sm:$0xff] %vm1148_vm3, %v5270_v55  ;;  %v6505_v54 = vpop.f32.mrf.mxu0 }
 0x867   : > { %6635 = vrot.lane.b32.xlu0 %v6482_v3, %s7472_s18  ;;  %6633 = vrot.lane.b32.xlu1 %v6479_v30, %s7472_s18  ;;  %v6506_v50 = vadd.f32 %v10920_v14, %v6505_v54 }
 0x869   : > { %v5276_v11 = vpop.permute.xlu0 %5275  ;;  %v5274_v4 = vpop.permute.xlu1 %5273 }
 0x86a   : > { %5344 = vst.msk [vmem:[#allocation3 + $0xd8] sm:$0xff] %vm1148_vm3, %v5276_v11  ;;  %5343 = vst.msk [vmem:[#allocation3 + $0xd0] sm:$0xff] %vm1148_vm3, %v5274_v4 }
 0x86b   : > { %6639 = vrot.lane.b32.xlu0 %v6490_v56, %s7472_s18  ;;  %6637 = vrot.lane.b32.xlu1 %v6487_v46, %s7472_s18 }
 0x86d   : > { %v5464_v42 = vpop.permute.xlu0 %5463  ;;  %v5462_v6 = vpop.permute.xlu1 %5461 }
 0x86e   : > { %5534 = vst.msk [vmem:[#allocation3 + $0xc8] sm:$0xff] %vm1341_vm4, %v5464_v42  ;;  %5533 = vst.msk [vmem:[#allocation3 + $0xc0] sm:$0xff] %vm1341_vm4, %v5462_v6 }
 0x86f   : > { %6643 = vrot.lane.b32.xlu0 %v6498_v2, %s7472_s18  ;;  %6641 = vrot.lane.b32.xlu1 %v6495_v8, %s7472_s18 }
 0x871   : > { %v5468_v45 = vpop.permute.xlu0 %5467  ;;  %v5466_v43 = vpop.permute.xlu1 %5465 }
 0x872   : > { %5536 = vst.msk [vmem:[#allocation3 + $0xd8] sm:$0xff] %vm1341_vm4, %v5468_v45  ;;  %5535 = vst.msk [vmem:[#allocation3 + $0xd0] sm:$0xff] %vm1341_vm4, %v5466_v43 }
 0x873   : > { %6647 = vrot.lane.b32.xlu0 %v6506_v50, %s7472_s18  ;;  %6645 = vrot.lane.b32.xlu1 %v6503_v12, %s7472_s18 }
 0x875   : > { %v5656_v18 = vpop.permute.xlu0 %5655  ;;  %v5654_v22 = vpop.permute.xlu1 %5653 }
 0x876   : > { %5726 = vst.msk [vmem:[#allocation3 + $0xc8] sm:$0xff] %vm1534_vm5, %v5656_v18  ;;  %5725 = vst.msk [vmem:[#allocation3 + $0xc0] sm:$0xff] %vm1534_vm5, %v5654_v22 }
 0x877   : > { %6651 = vrot.lane.b32.xlu0 %v6514_v47, %s7472_s18  ;;  %6649 = vrot.lane.b32.xlu1 %v6511_v31, %s7472_s18 }
 0x879   : > { %v5660_v39 = vpop.permute.xlu0 %5659  ;;  %v5658_v37 = vpop.permute.xlu1 %5657 }
 0x87a   : > { %5728 = vst.msk [vmem:[#allocation3 + $0xd8] sm:$0xff] %vm1534_vm5, %v5660_v39  ;;  %5727 = vst.msk [vmem:[#allocation3 + $0xd0] sm:$0xff] %vm1534_vm5, %v5658_v37 }
 0x87d   : > { %v5849_v57 = vpop.permute.xlu0 %5848  ;;  %v5847_v5 = vpop.permute.xlu1 %5846 }
 0x87e   : > { %5919 = vst.msk [vmem:[#allocation3 + $0xc8] sm:$0xff] %vm1728_vm6, %v5849_v57  ;;  %5918 = vst.msk [vmem:[#allocation3 + $0xc0] sm:$0xff] %vm1728_vm6, %v5847_v5 }
 0x881   : > { %v5853_v28 = vpop.permute.xlu0 %5852  ;;  %v5851_v38 = vpop.permute.xlu1 %5850 }
 0x882   : > { %5921 = vst.msk [vmem:[#allocation3 + $0xd8] sm:$0xff] %vm1728_vm6, %v5853_v28  ;;  %5920 = vst.msk [vmem:[#allocation3 + $0xd0] sm:$0xff] %vm1728_vm6, %v5851_v38 }
 0x885   : > { %v6041_v58 = vpop.permute.xlu0 %6040  ;;  %v6039_v60 = vpop.permute.xlu1 %6038 }
 0x886   : > { %6111 = vst.msk [vmem:[#allocation3 + $0xc8] sm:$0xff] %vm1921_vm8, %v6041_v58  ;;  %6110 = vst.msk [vmem:[#allocation3 + $0xc0] sm:$0xff] %vm1921_vm8, %v6039_v60 }
 0x889   : > { %v6045_v16 = vpop.permute.xlu0 %6044  ;;  %v6043_v25 = vpop.permute.xlu1 %6042 }
 0x88a   : > { %6113 = vst.msk [vmem:[#allocation3 + $0xd8] sm:$0xff] %vm1921_vm8, %v6045_v16  ;;  %6112 = vst.msk [vmem:[#allocation3 + $0xd0] sm:$0xff] %vm1921_vm8, %v6043_v25 }
 0x88d   : > { %v6233_v34 = vpop.permute.xlu0 %6232  ;;  %v6231_v61 = vpop.permute.xlu1 %6230 }
 0x88e   : > { %6303 = vst.msk [vmem:[#allocation3 + $0xc8] sm:$0xff] %vm2114_vm9, %v6233_v34  ;;  %6302 = vst.msk [vmem:[#allocation3 + $0xc0] sm:$0xff] %vm2114_vm9, %v6231_v61 }
 0x891   : > { %v4896_v20 = vpop.permute.xlu0 %4895  ;;  %v4894_v33 = vpop.permute.xlu1 %4893 }
 0x892   : > { %4962 = vst.msk [vmem:[#allocation3 + $0xe8] sm:$0xff] %vm762_vm1, %v4896_v20  ;;  %4961 = vst.msk [vmem:[#allocation3 + $0xe0] sm:$0xff] %vm762_vm1, %v4894_v33 }
 0x895   : > { %v6237_v36 = vpop.permute.xlu0 %6236  ;;  %v6235_v13 = vpop.permute.xlu1 %6234  ;;  %v6334_v24 = vld [vmem:[#allocation3 + $0xc0] sm:$0xff]  ;;  %v6335_v27 = vld [vmem:[#allocation3 + $0xc8] sm:$0xff] }
 0x896   : > { %6305 = vst.msk [vmem:[#allocation3 + $0xd8] sm:$0xff] %vm2114_vm9, %v6237_v36  ;;  %6304 = vst.msk [vmem:[#allocation3 + $0xd0] sm:$0xff] %vm2114_vm9, %v6235_v13  ;;  %v6354_v48 = vpack.c.bf16 %v6335_v27, %v6334_v24 }
 0x898   : > { %7389 = vmatprep.mubr.msk.bf16.mxu0 %vm2222_vm10, %v6354_v48 }
 0x899   : > { %v4900_v32 = vpop.permute.xlu0 %4899  ;;  %v4898_v63 = vpop.permute.xlu1 %4897 }
 0x89a   : > { %4964 = vst.msk [vmem:[#allocation3 + $0xf8] sm:$0xff] %vm762_vm1, %v4900_v32  ;;  %4963 = vst.msk [vmem:[#allocation3 + $0xf0] sm:$0xff] %vm762_vm1, %v4898_v63 }
 0x89d   : > { %v5088_v10 = vpop.permute.xlu0 %5087  ;;  %v5086_v1 = vpop.permute.xlu1 %5085  ;;  %v6336_v23 = vld [vmem:[#allocation3 + $0xd0] sm:$0xff]  ;;  %v6337_v17 = vld [vmem:[#allocation3 + $0xd8] sm:$0xff] }
 0x89e   : > { %5154 = vst.msk [vmem:[#allocation3 + $0xe8] sm:$0xff] %vm955_vm2, %v5088_v10  ;;  %5153 = vst.msk [vmem:[#allocation3 + $0xe0] sm:$0xff] %vm955_vm2, %v5086_v1  ;;  %v6355_v29 = vpack.c.bf16 %v6337_v17, %v6336_v23 }
 0x8a0   : > { %v7379_v9 = vpop.f32.mrf.mxu0  ;;  %7390 = vmatmul.mubr.msk.bf16.gmra.mxu0 %vm2222_vm10, %v6355_v29 }
 0x8a1   : > { %v5092_v52 = vpop.permute.xlu0 %5091  ;;  %v5090_v30 = vpop.permute.xlu1 %5089  ;;  %v6527_v11 = vadd.f32 %v7379_v9, %v10920_v14 }
 0x8a2   : > { %5156 = vst.msk [vmem:[#allocation3 + $0xf8] sm:$0xff] %vm955_vm2, %v5092_v52  ;;  %5155 = vst.msk [vmem:[#allocation3 + $0xf0] sm:$0xff] %vm955_vm2, %v5090_v30  ;;  %v6518_v3 = vpop.f32.mrf.mxu0 }
 0x8a3   : > { %v6519_v26 = vadd.f32 %v10920_v14, %v6518_v3 }
 0x8a4   : > { %v7380_v55 = vpop.f32.mrf.mxu0 }
 0x8a5   : > { %v5280_v40 = vpop.permute.xlu0 %5279  ;;  %v5278_v46 = vpop.permute.xlu1 %5277  ;;  %6653 = vrot.lane.b32.xlu1 %v6519_v26, %s7472_s18  ;;  %v6530_v2 = vadd.f32 %v7380_v55, %v10920_v14 }
 0x8a6   : > { %5346 = vst.msk [vmem:[#allocation3 + $0xe8] sm:$0xff] %vm1148_vm3, %v5280_v40  ;;  %5345 = vst.msk [vmem:[#allocation3 + $0xe0] sm:$0xff] %vm1148_vm3, %v5278_v46  ;;  %v6521_v56 = vpop.f32.mrf.mxu0 }
 0x8a7   : > { %v6522_v4 = vadd.f32 %v10920_v14, %v6521_v56 }
 0x8a9   : > { %v5284_v41 = vpop.permute.xlu0 %5283  ;;  %v5282_v8 = vpop.permute.xlu1 %5281  ;;  %6655 = vrot.lane.b32.xlu0 %v6522_v4, %s7472_s18  ;;  %6657 = vrot.lane.b32.xlu1 %v6527_v11, %s7472_s18 }
 0x8aa   : > { %5348 = vst.msk [vmem:[#allocation3 + $0xf8] sm:$0xff] %vm1148_vm3, %v5284_v41  ;;  %5347 = vst.msk [vmem:[#allocation3 + $0xf0] sm:$0xff] %vm1148_vm3, %v5282_v8 }
 0x8ad   : > { %v5472_v42 = vpop.permute.xlu0 %5471  ;;  %v5470_v6 = vpop.permute.xlu1 %5469  ;;  %6659 = vrot.lane.b32.xlu0 %v6530_v2, %s7472_s18  ;;  %4587 = vrot.lane.b32.xlu1 %v9992_v59, %s7471_s17 }
 0x8ae   : > { %5538 = vst.msk [vmem:[#allocation3 + $0xe8] sm:$0xff] %vm1341_vm4, %v5472_v42  ;;  %5537 = vst.msk [vmem:[#allocation3 + $0xe0] sm:$0xff] %vm1341_vm4, %v5470_v6 }
 0x8b1   : > { %v5476_v54 = vpop.permute.xlu0 %5475  ;;  %v5474_v12 = vpop.permute.xlu1 %5473 }
 0x8b2   : > { %5540 = vst.msk [vmem:[#allocation3 + $0xf8] sm:$0xff] %vm1341_vm4, %v5476_v54  ;;  %5539 = vst.msk [vmem:[#allocation3 + $0xf0] sm:$0xff] %vm1341_vm4, %v5474_v12 }
 0x8b5   : > { %v5664_v50 = vpop.permute.xlu0 %5663  ;;  %v5662_v45 = vpop.permute.xlu1 %5661 }
 0x8b6   : > { %5730 = vst.msk [vmem:[#allocation3 + $0xe8] sm:$0xff] %vm1534_vm5, %v5664_v50  ;;  %5729 = vst.msk [vmem:[#allocation3 + $0xe0] sm:$0xff] %vm1534_vm5, %v5662_v45 }
 0x8b9   : > { %v5668_v43 = vpop.permute.xlu0 %5667  ;;  %v5666_v31 = vpop.permute.xlu1 %5665 }
 0x8ba   : > { %5732 = vst.msk [vmem:[#allocation3 + $0xf8] sm:$0xff] %vm1534_vm5, %v5668_v43  ;;  %5731 = vst.msk [vmem:[#allocation3 + $0xf0] sm:$0xff] %vm1534_vm5, %v5666_v31 }
 0x8bd   : > { %v5857_v59 = vpop.permute.xlu0 %5856  ;;  %v5855_v47 = vpop.permute.xlu1 %5854 }
 0x8be   : > { %5923 = vst.msk [vmem:[#allocation3 + $0xe8] sm:$0xff] %vm1728_vm6, %v5857_v59  ;;  %5922 = vst.msk [vmem:[#allocation3 + $0xe0] sm:$0xff] %vm1728_vm6, %v5855_v47 }
 0x8c1   : > { %v5861_v18 = vpop.permute.xlu0 %5860  ;;  %v5859_v22 = vpop.permute.xlu1 %5858 }
 0x8c2   : > { %5925 = vst.msk [vmem:[#allocation3 + $0xf8] sm:$0xff] %vm1728_vm6, %v5861_v18  ;;  %5924 = vst.msk [vmem:[#allocation3 + $0xf0] sm:$0xff] %vm1728_vm6, %v5859_v22 }
 0x8c5   : > { %v6049_v39 = vpop.permute.xlu0 %6048  ;;  %v6047_v37 = vpop.permute.xlu1 %6046 }
 0x8c6   : > { %6115 = vst.msk [vmem:[#allocation3 + $0xe8] sm:$0xff] %vm1921_vm8, %v6049_v39  ;;  %6114 = vst.msk [vmem:[#allocation3 + $0xe0] sm:$0xff] %vm1921_vm8, %v6047_v37 }
 0x8c9   : > { %v6053_v57 = vpop.permute.xlu0 %6052  ;;  %v6051_v5 = vpop.permute.xlu1 %6050 }
 0x8ca   : > { %6117 = vst.msk [vmem:[#allocation3 + $0xf8] sm:$0xff] %vm1921_vm8, %v6053_v57  ;;  %6116 = vst.msk [vmem:[#allocation3 + $0xf0] sm:$0xff] %vm1921_vm8, %v6051_v5 }
 0x8cd   : > { %v6241_v28 = vpop.permute.xlu0 %6240  ;;  %v6239_v38 = vpop.permute.xlu1 %6238 }
 0x8ce   : > { %6307 = vst.msk [vmem:[#allocation3 + $0xe8] sm:$0xff] %vm2114_vm9, %v6241_v28  ;;  %6306 = vst.msk [vmem:[#allocation3 + $0xe0] sm:$0xff] %vm2114_vm9, %v6239_v38 }
 0x8d1   : > { %v6245_v58 = vpop.permute.xlu0 %6244  ;;  %v6243_v60 = vpop.permute.xlu1 %6242 }
 0x8d2   : > { %6309 = vst.msk [vmem:[#allocation3 + $0xf8] sm:$0xff] %vm2114_vm9, %v6245_v58  ;;  %6308 = vst.msk [vmem:[#allocation3 + $0xf0] sm:$0xff] %vm2114_vm9, %v6243_v60 }
 0x8d5   : > { %v6632_v16 = vpop.permute.xlu0 %6631  ;;  %v6630_v25 = vpop.permute.xlu1 %6629  ;;  %v6338_v34 = vld [vmem:[#allocation3 + $0xe0] sm:$0xff]  ;;  %v6339_v61 = vld [vmem:[#allocation3 + $0xe8] sm:$0xff] }
 0x8d6   : > { %6726 = vst.msk [vmem:[#allocation4 + $0x8] sm:$0xff] %vm1148_vm3, %v6632_v16  ;;  %6725 = vst.msk [vmem:[#allocation4] sm:$0xff] %vm1148_vm3, %v6630_v25  ;;  %v6356_v20 = vpack.c.bf16 %v6339_v61, %v6338_v34 }
 0x8d8   : > { %7393 = vmatprep.mubr.msk.bf16.mxu0 %vm2222_vm10, %v6356_v20 }
 0x8d9   : > { %v6636_v33 = vpop.permute.xlu0 %6635  ;;  %v6634_v36 = vpop.permute.xlu1 %6633  ;;  %v6340_v13 = vld [vmem:[#allocation3 + $0xf0] sm:$0xff]  ;;  %v6341_v24 = vld [vmem:[#allocation3 + $0xf8] sm:$0xff] }
 0x8da   : > { %6728 = vst.msk [vmem:[#allocation4 + $0x18] sm:$0xff] %vm1148_vm3, %v6636_v33  ;;  %6727 = vst.msk [vmem:[#allocation4 + $0x10] sm:$0xff] %vm1148_vm3, %v6634_v36  ;;  %v6357_v27 = vpack.c.bf16 %v6341_v24, %v6340_v13 }
 0x8dc   : > { %7394 = vmatmul.mubr.msk.bf16.gmra.mxu0 %vm2222_vm10, %v6357_v27 }
 0x8dd   : > { %v6640_v48 = vpop.permute.xlu0 %6639  ;;  %v6638_v32 = vpop.permute.xlu1 %6637  ;;  %v6757_v63 = vld [vmem:[#allocation4] sm:$0xff]  ;;  %v6758_v10 = vld [vmem:[#allocation4 + $0x8] sm:$0xff] }
 0x8de   : > { %6730 = vst.msk [vmem:[#allocation4 + $0x28] sm:$0xff] %vm1148_vm3, %v6640_v48  ;;  %6729 = vst.msk [vmem:[#allocation4 + $0x20] sm:$0xff] %vm1148_vm3, %v6638_v32  ;;  %v6789_v1 = vpack.c.bf16 %v6758_v10, %v6757_v63 }
 0x8e0   : > { %v7383_v23 = vpop.f32.mrf.mxu0  ;;  %7399 = vmatprep.mubr.msk.bf16.mxu1 %vm6820_vm12, %v6789_v1 }
 0x8e1   : > { %v6644_v17 = vpop.permute.xlu0 %6643  ;;  %v6642_v29 = vpop.permute.xlu1 %6641  ;;  %v6759_v9 = vld [vmem:[#allocation4 + $0x10] sm:$0xff]  ;;  %v6760_v52 = vld [vmem:[#allocation4 + $0x18] sm:$0xff]  ;;  %v6543_v8 = vadd.f32 %v7383_v23, %v10920_v14 }
 0x8e2   : > { %6732 = vst.msk [vmem:[#allocation4 + $0x38] sm:$0xff] %vm1148_vm3, %v6644_v17  ;;  %6731 = vst.msk [vmem:[#allocation4 + $0x30] sm:$0xff] %vm1148_vm3, %v6642_v29  ;;  %v6534_v30 = vpop.f32.mrf.mxu0  ;;  %v6790_v3 = vpack.c.bf16 %v6760_v52, %v6759_v9 }
 0x8e3   : > { %v6535_v26 = vadd.f32 %v10920_v14, %v6534_v30 }
 0x8e4   : > { %v7384_v55 = vpop.f32.mrf.mxu0  ;;  %7400 = vmatmul.mubr.msk.bf16.vlgmr.msra.gmra.mxu1 %vm6820_vm12, %v6790_v3 }
 0x8e5   : > { %v6648_v40 = vpop.permute.xlu0 %6647  ;;  %v6646_v46 = vpop.permute.xlu1 %6645  ;;  %6661 = vrot.lane.b32.xlu0 %v6535_v26, %s7472_s18  ;;  %v6761_v56 = vld [vmem:[#allocation4 + $0x20] sm:$0xff]  ;;  %v6762_v11 = vld [vmem:[#allocation4 + $0x28] sm:$0xff]  ;;  %v6546_v45 = vadd.f32 %v7384_v55, %v10920_v14 }
 0x8e6   : > { %6734 = vst.msk [vmem:[#allocation4 + $0x48] sm:$0xff] %vm1148_vm3, %v6648_v40  ;;  %6733 = vst.msk [vmem:[#allocation4 + $0x40] sm:$0xff] %vm1148_vm3, %v6646_v46  ;;  %v6537_v4 = vpop.f32.mrf.mxu0  ;;  %v6791_v41 = vpack.c.bf16 %v6762_v11, %v6761_v56  ;;  %v11395_v46 = vld [vmem:[#allocation15_spill] sm:$0xff] }
 0x8e7   : > { %v6538_v2 = vadd.f32 %v10920_v14, %v6537_v4 }
 0x8e8   : > { %7403 = vmatprep.mubr.msk.bf16.mxu1 %vm6820_vm12, %v6791_v41 }
 0x8e9   : > { %v6652_v42 = vpop.permute.xlu0 %6651  ;;  %v6650_v6 = vpop.permute.xlu1 %6649  ;;  %6665 = vrot.lane.b32.xlu0 %v6543_v8, %s7472_s18  ;;  %6663 = vrot.lane.b32.xlu1 %v6538_v2, %s7472_s18  ;;  %v6763_v54 = vld [vmem:[#allocation4 + $0x30] sm:$0xff]  ;;  %v6764_v12 = vld [vmem:[#allocation4 + $0x38] sm:$0xff] }
 0x8ea   : > { %6736 = vst.msk [vmem:[#allocation4 + $0x58] sm:$0xff] %vm1148_vm3, %v6652_v42  ;;  %6735 = vst.msk [vmem:[#allocation4 + $0x50] sm:$0xff] %vm1148_vm3, %v6650_v6  ;;  %v6792_v50 = vpack.c.bf16 %v6764_v12, %v6763_v54  ;;  %v11118_v6 = vld [vmem:[%s11261_s8] ss:$0 sm:$0xff] }
 0x8ec   : > { %7404 = vmatmul.mubr.msk.bf16.gmra.mxu1 %vm6820_vm12, %v6792_v50 }
 0x8ed   : > { %4589 = vrot.lane.b32.xlu0 %v10030_v44, %s7471_s17  ;;  %6667 = vrot.lane.b32.xlu1 %v6546_v45, %s7472_s18  ;;  %v6765_v43 = vld [vmem:[#allocation4 + $0x40] sm:$0xff]  ;;  %v6766_v31 = vld [vmem:[#allocation4 + $0x48] sm:$0xff] }
 0x8ee   : > { %v6793_v59 = vpack.c.bf16 %v6766_v31, %v6765_v43 }
 0x8f0   : > { %7407 = vmatprep.mubr.msk.bf16.mxu1 %vm6820_vm12, %v6793_v59 }
 0x8f1   : > { %4593 = vrot.lane.b32.xlu0 %v10023_v53, %s7471_s17  ;;  %4591 = vrot.lane.b32.xlu1 %v10048_v0, %s7471_s17  ;;  %v6767_v47 = vld [vmem:[#allocation4 + $0x50] sm:$0xff]  ;;  %v6768_v18 = vld [vmem:[#allocation4 + $0x58] sm:$0xff] }
 0x8f2   : > { %v6794_v22 = vpack.c.bf16 %v6768_v18, %v6767_v47 }
 0x8f4   : > { %7408 = vmatmul.mubr.msk.bf16.gmra.mxu1 %vm6820_vm12, %v6794_v22 }
 0x8f5   : > { %4595 = vrot.lane.b32.xlu1 %v10039_v7, %s7471_s17 }
 0x917   : > { %v6654_v44 = vpop.permute.xlu1 %6653 }
 0x918   : > { %6737 = vst.msk [vmem:[#allocation4 + $0x60] sm:$0xff] %vm1148_vm3, %v6654_v44 }
 0x91b   : > { %v6656_v39 = vpop.permute.xlu0 %6655  ;;  %v6658_v37 = vpop.permute.xlu1 %6657 }
 0x91c   : > { %6738 = vst.msk [vmem:[#allocation4 + $0x68] sm:$0xff] %vm1148_vm3, %v6656_v39  ;;  %6739 = vst.msk [vmem:[#allocation4 + $0x70] sm:$0xff] %vm1148_vm3, %v6658_v37 }
 0x91f   : > { %v6660_v53 = vpop.permute.xlu0 %6659  ;;  %v4588_v57 = vpop.permute.xlu1 %4587  ;;  %v6769_v7 = vld [vmem:[#allocation4 + $0x60] sm:$0xff] }
 0x920   : > { %6740 = vst.msk [vmem:[#allocation4 + $0x78] sm:$0xff] %vm1148_vm3, %v6660_v53  ;;  %v7387_v0 = vpop.f32.mrf.mxu0 }
 0x921   : > { %4664 = vst.msk [vmem:[#allocation4 + $0x98] sm:$0xff] %vm955_vm2, %v4588_v57  ;;  %v6559_v25 = vadd.f32 %v7387_v0, %v10920_v14 }
 0x922   : > { %v6550_v5 = vpop.f32.mrf.mxu0 }
 0x923   : > { %v6551_v28 = vadd.f32 %v10920_v14, %v6550_v5  ;;  %v6770_v38 = vld [vmem:[#allocation4 + $0x68] sm:$0xff]  ;;  %v6771_v61 = vld [vmem:[#allocation4 + $0x70] sm:$0xff] }
 0x924   : > { %v7388_v58 = vpop.f32.mrf.mxu0  ;;  %v6795_v60 = vpack.c.bf16 %v6770_v38, %v6769_v7 }
 0x925   : > { %6669 = vrot.lane.b32.xlu0 %v6551_v28, %s7472_s18  ;;  %v6562_v36 = vadd.f32 %v7388_v58, %v10920_v14 }
 0x926   : > { %v6553_v16 = vpop.f32.mrf.mxu0  ;;  %7411 = vmatprep.mubr.msk.bf16.mxu1 %vm6820_vm12, %v6795_v60 }
 0x927   : > { %v6554_v34 = vadd.f32 %v10920_v14, %v6553_v16  ;;  %v6772_v20 = vld [vmem:[#allocation4 + $0x78] sm:$0xff] }
 0x928   : > { %v6796_v33 = vpack.c.bf16 %v6772_v20, %v6771_v61 }
 0x929   : > { %6673 = vrot.lane.b32.xlu0 %v6559_v25, %s7472_s18  ;;  %6671 = vrot.lane.b32.xlu1 %v6554_v34, %s7472_s18 }
 0x92a   : > { %7412 = vmatmul.mubr.msk.bf16.gmra.mxu1 %vm6820_vm12, %v6796_v33 }
 0x92d   : > { %4597 = vrot.lane.b32.xlu0 %v10183_v49, %s7471_s17  ;;  %6675 = vrot.lane.b32.xlu1 %v6562_v36, %s7472_s18 }
 0x931   : > { %4601 = vrot.lane.b32.xlu0 %v10174_v15, %s7471_s17  ;;  %4599 = vrot.lane.b32.xlu1 %v10201_v51, %s7471_s17 }
 0x935   : > { %4603 = vrot.lane.b32.xlu1 %v10192_v19, %s7471_s17 }
 0x957   : > { %v6662_v13 = vpop.permute.xlu0 %6661 }
 0x958   : > { %6741 = vst.msk [vmem:[#allocation4 + $0x80] sm:$0xff] %vm1148_vm3, %v6662_v13 }
 0x95b   : > { %v6666_v24 = vpop.permute.xlu0 %6665  ;;  %v6664_v27 = vpop.permute.xlu1 %6663 }
 0x95c   : > { %6743 = vst.msk [vmem:[#allocation4 + $0x90] sm:$0xff] %vm1148_vm3, %v6666_v24  ;;  %6742 = vst.msk [vmem:[#allocation4 + $0x88] sm:$0xff] %vm1148_vm3, %v6664_v27 }
 0x95f   : > { %v4590_v49 = vpop.permute.xlu0 %4589  ;;  %v6668_v48 = vpop.permute.xlu1 %6667  ;;  %v6773_v10 = vld [vmem:[#allocation4 + $0x80] sm:$0xff] }
 0x960   : > { %4665 = vst.msk [vmem:[#allocation4 + $0xa0] sm:$0xff] %vm955_vm2, %v4590_v49  ;;  %v7391_v15 = vpop.f32.mrf.mxu0 }
 0x961   : > { %6744 = vst.msk [vmem:[#allocation4 + $0x98] sm:$0xff] %vm1148_vm3, %v6668_v48  ;;  %v6575_v9 = vadd.f32 %v7391_v15, %v10920_v14 }
 0x962   : > { %v6566_v51 = vpop.f32.mrf.mxu0 }
 0x963   : > { %v6567_v32 = vadd.f32 %v10920_v14, %v6566_v51  ;;  %v4594_v19 = vpop.permute.xlu0 %4593  ;;  %v4592_v63 = vpop.permute.xlu1 %4591  ;;  %v6774_v1 = vld [vmem:[#allocation4 + $0x88] sm:$0xff]  ;;  %v6775_v3 = vld [vmem:[#allocation4 + $0x90] sm:$0xff] }
 0x964   : > { %4667 = vst.msk [vmem:[#allocation4 + $0xb0] sm:$0xff] %vm955_vm2, %v4594_v19  ;;  %4666 = vst.msk [vmem:[#allocation4 + $0xa8] sm:$0xff] %vm955_vm2, %v4592_v63  ;;  %v7392_v23 = vpop.f32.mrf.mxu0  ;;  %v6797_v17 = vpack.c.bf16 %v6774_v1, %v6773_v10 }
 0x965   : > { %6677 = vrot.lane.b32.xlu0 %v6567_v32, %s7472_s18  ;;  %v6578_v40 = vadd.f32 %v7392_v23, %v10920_v14 }
 0x966   : > { %v6569_v29 = vpop.f32.mrf.mxu0  ;;  %7415 = vmatprep.mubr.msk.bf16.mxu1 %vm6820_vm12, %v6797_v17 }
 0x967   : > { %v6570_v52 = vadd.f32 %v10920_v14, %v6569_v29  ;;  %v4596_v30 = vpop.permute.xlu1 %4595 }
 0x968   : > { %v6776_v26 = vld [vmem:[#allocation4 + $0x98] sm:$0xff]  ;;  %4668 = vst.msk [vmem:[#allocation4 + $0xb8] sm:$0xff] %vm955_vm2, %v4596_v30 }
 0x969   : > { %v6798_v55 = vpack.c.bf16 %v6776_v26, %v6775_v3  ;;  %6681 = vrot.lane.b32.xlu0 %v6575_v9, %s7472_s18  ;;  %6679 = vrot.lane.b32.xlu1 %v6570_v52, %s7472_s18 }
 0x96b   : > { %7416 = vmatmul.mubr.msk.bf16.gmra.mxu1 %vm6820_vm12, %v6798_v55 }
 0x96d   : > { %4605 = vrot.lane.b32.xlu0 %v10302_v35, %s7471_s17  ;;  %6683 = vrot.lane.b32.xlu1 %v6578_v40, %s7472_s18 }
 0x971   : > { %4609 = vrot.lane.b32.xlu0 %v10293_v21, %s7471_s17  ;;  %4607 = vrot.lane.b32.xlu1 %v10318_v62, %s7471_s17 }
 0x975   : > { %4611 = vrot.lane.b32.xlu1 %v11395_v46, %s7471_s17 }
 0x997   : > { %v6670_v56 = vpop.permute.xlu0 %6669 }
 0x998   : > { %6745 = vst.msk [vmem:[#allocation4 + $0xa0] sm:$0xff] %vm1148_vm3, %v6670_v56 }
 0x99b   : > { %v6674_v11 = vpop.permute.xlu0 %6673  ;;  %v6672_v4 = vpop.permute.xlu1 %6671 }
 0x99c   : > { %6747 = vst.msk [vmem:[#allocation4 + $0xb0] sm:$0xff] %vm1148_vm3, %v6674_v11  ;;  %6746 = vst.msk [vmem:[#allocation4 + $0xa8] sm:$0xff] %vm1148_vm3, %v6672_v4  ;;  %v7395_v35 = vpop.f32.mrf.mxu0 }
 0x99d   : > { %v6591_v54 = vadd.f32 %v7395_v35, %v10920_v14 }
 0x99e   : > { %v6582_v41 = vpop.f32.mrf.mxu0 }
 0x99f   : > { %v6583_v8 = vadd.f32 %v10920_v14, %v6582_v41  ;;  %v4598_v21 = vpop.permute.xlu0 %4597  ;;  %v6676_v2 = vpop.permute.xlu1 %6675  ;;  %v6777_v43 = vld [vmem:[#allocation4 + $0xa0] sm:$0xff] }
 0x9a0   : > { %4669 = vst.msk [vmem:[#allocation4 + $0xc0] sm:$0xff] %vm955_vm2, %v4598_v21  ;;  %v7396_v62 = vpop.f32.mrf.mxu0 }
 0x9a1   : > { %6748 = vst.msk [vmem:[#allocation4 + $0xb8] sm:$0xff] %vm1148_vm3, %v6676_v2  ;;  %6685 = vrot.lane.b32.xlu0 %v6583_v8, %s7472_s18  ;;  %v6594_v44 = vadd.f32 %v7396_v62, %v10920_v14 }
 0x9a2   : > { %v6585_v42 = vpop.f32.mrf.mxu0 }
 0x9a3   : > { %v6586_v12 = vadd.f32 %v10920_v14, %v6585_v42  ;;  %v4602_v50 = vpop.permute.xlu0 %4601  ;;  %v4600_v45 = vpop.permute.xlu1 %4599  ;;  %v6778_v31 = vld [vmem:[#allocation4 + $0xa8] sm:$0xff]  ;;  %v6779_v53 = vld [vmem:[#allocation4 + $0xb0] sm:$0xff] }
 0x9a4   : > { %4671 = vst.msk [vmem:[#allocation4 + $0xd0] sm:$0xff] %vm955_vm2, %v4602_v50  ;;  %4670 = vst.msk [vmem:[#allocation4 + $0xc8] sm:$0xff] %vm955_vm2, %v4600_v45  ;;  %v7401_v59 = vpop.f32.mrf.mxu1  ;;  %v6799_v47 = vpack.c.bf16 %v6778_v31, %v6777_v43 }
 0x9a5   : > { %v6912_v18 = vadd.f32 %v7401_v59, %v11118_v6  ;;  %6689 = vrot.lane.b32.xlu0 %v6591_v54, %s7472_s18  ;;  %6687 = vrot.lane.b32.xlu1 %v6586_v12, %s7472_s18 }
 0x9a6   : > { %v6903_v22 = vpop.f32.mrf.mxu1  ;;  %7419 = vmatprep.mubr.msk.bf16.mxu1 %vm6820_vm12, %v6799_v47 }
 0x9a7   : > { %7033 = vst.msk [vmem:[%s11129_s26 + $0x10] sm:$0xff] %vm7030_vm13, %v6912_v18  ;;  %v6904_v39 = vadd.f32 %v11118_v6, %v6903_v22  ;;  %v4604_v37 = vpop.permute.xlu1 %4603 }
 0x9a8   : > { %v6780_v57 = vld [vmem:[#allocation4 + $0xb8] sm:$0xff]  ;;  %4672 = vst.msk [vmem:[#allocation4 + $0xd8] sm:$0xff] %vm955_vm2, %v4604_v37  ;;  %v7402_v0 = vpop.f32.mrf.mxu1 }
 0x9a9   : > { %v6800_v5 = vpack.c.bf16 %v6780_v57, %v6779_v53  ;;  %7031 = vst.msk [vmem:[%s11129_s26] sm:$0xff] %vm7030_vm13, %v6904_v39  ;;  %v6915_v28 = vadd.f32 %v7402_v0, %v11118_v6  ;;  %6691 = vrot.lane.b32.xlu1 %v6594_v44, %s7472_s18 }
 0x9aa   : > { %v6906_v14 = vpop.f32.mrf.mxu1 }
 0x9ab   : > { %7420 = vmatmul.mubr.msk.bf16.gmra.mxu1 %vm6820_vm12, %v6800_v5  ;;  %7034 = vst.msk [vmem:[%s11129_s26 + $0x18] sm:$0xff] %vm7030_vm13, %v6915_v28  ;;  %v6907_v7 = vadd.f32 %v11118_v6, %v6906_v14 }
 0x9ac   : > { %v7405_v38 = vpop.f32.mrf.mxu1 }
 0x9ad   : > { %7032 = vst.msk [vmem:[%s11129_s26 + $0x8] sm:$0xff] %vm7030_vm13, %v6907_v7  ;;  %v6928_v58 = vadd.f32 %v7405_v38, %v11118_v6 }
 0x9ae   : > { %v6919_v60 = vpop.f32.mrf.mxu1 }
 0x9af   : > { %7037 = vst.msk [vmem:[%s11129_s26 + $0x30] sm:$0xff] %vm7030_vm13, %v6928_v58  ;;  %v6920_v16 = vadd.f32 %v11118_v6, %v6919_v60 }
 0x9b0   : > { %v7406_v25 = vpop.f32.mrf.mxu1 }
 0x9b1   : > { %7035 = vst.msk [vmem:[%s11129_s26 + $0x20] sm:$0xff] %vm7030_vm13, %v6920_v16  ;;  %v6931_v34 = vadd.f32 %v7406_v25, %v11118_v6 }
 0x9b2   : > { %v6922_v61 = vpop.f32.mrf.mxu1 }
 0x9b3   : > { %7038 = vst.msk [vmem:[%s11129_s26 + $0x38] sm:$0xff] %vm7030_vm13, %v6931_v34  ;;  %v6923_v20 = vadd.f32 %v11118_v6, %v6922_v61 }
 0x9b4   : > { %v7409_v33 = vpop.f32.mrf.mxu1 }
 0x9b5   : > { %7036 = vst.msk [vmem:[%s11129_s26 + $0x28] sm:$0xff] %vm7030_vm13, %v6923_v20  ;;  %v6944_v36 = vadd.f32 %v7409_v33, %v11118_v6 }
 0x9b6   : > { %v6935_v13 = vpop.f32.mrf.mxu1 }
 0x9b7   : > { %7041 = vst.msk [vmem:[%s11129_s26 + $0x50] sm:$0xff] %vm7030_vm13, %v6944_v36  ;;  %v6936_v24 = vadd.f32 %v11118_v6, %v6935_v13 }
 0x9b8   : > { %v7410_v27 = vpop.f32.mrf.mxu1 }
 0x9b9   : > { %7039 = vst.msk [vmem:[%s11129_s26 + $0x40] sm:$0xff] %vm7030_vm13, %v6936_v24  ;;  %v6947_v49 = vadd.f32 %v7410_v27, %v11118_v6 }
 0x9ba   : > { %v6938_v48 = vpop.f32.mrf.mxu1 }
 0x9bb   : > { %7042 = vst.msk [vmem:[%s11129_s26 + $0x58] sm:$0xff] %vm7030_vm13, %v6947_v49  ;;  %v6939_v15 = vadd.f32 %v11118_v6, %v6938_v48 }
 0x9bd   : > { %7040 = vst.msk [vmem:[%s11129_s26 + $0x48] sm:$0xff] %vm7030_vm13, %v6939_v15 }
 0x9d7   : > { %v6678_v51 = vpop.permute.xlu0 %6677 }
 0x9d8   : > { %6749 = vst.msk [vmem:[#allocation4 + $0xc0] sm:$0xff] %vm1148_vm3, %v6678_v51 }
 0x9db   : > { %v6682_v32 = vpop.permute.xlu0 %6681  ;;  %v6680_v19 = vpop.permute.xlu1 %6679 }
 0x9dc   : > { %6751 = vst.msk [vmem:[#allocation4 + $0xd0] sm:$0xff] %vm1148_vm3, %v6682_v32  ;;  %6750 = vst.msk [vmem:[#allocation4 + $0xc8] sm:$0xff] %vm1148_vm3, %v6680_v19 }
 0x9df   : > { %v4606_v63 = vpop.permute.xlu0 %4605  ;;  %v6684_v10 = vpop.permute.xlu1 %6683  ;;  %v6781_v17 = vld [vmem:[#allocation4 + $0xc0] sm:$0xff] }
 0x9e0   : > { %4673 = vst.msk [vmem:[#allocation4 + $0xe0] sm:$0xff] %vm955_vm2, %v4606_v63 }
 0x9e1   : > { %6752 = vst.msk [vmem:[#allocation4 + $0xd8] sm:$0xff] %vm1148_vm3, %v6684_v10 }
 0x9e3   : > { %v4610_v1 = vpop.permute.xlu0 %4609  ;;  %v4608_v23 = vpop.permute.xlu1 %4607  ;;  %v6782_v29 = vld [vmem:[#allocation4 + $0xc8] sm:$0xff]  ;;  %v6783_v30 = vld [vmem:[#allocation4 + $0xd0] sm:$0xff] }
 0x9e4   : > { %4675 = vst.msk [vmem:[#allocation4 + $0xf0] sm:$0xff] %vm955_vm2, %v4610_v1  ;;  %4674 = vst.msk [vmem:[#allocation4 + $0xe8] sm:$0xff] %vm955_vm2, %v4608_v23  ;;  %v6801_v9 = vpack.c.bf16 %v6782_v29, %v6781_v17 }
 0x9e6   : > { %7423 = vmatprep.mubr.msk.bf16.mxu1 %vm6820_vm12, %v6801_v9 }
 0x9e7   : > { %v4612_v52 = vpop.permute.xlu1 %4611 }
 0x9e8   : > { %v6784_v3 = vld [vmem:[#allocation4 + $0xd8] sm:$0xff]  ;;  %4676 = vst.msk [vmem:[#allocation4 + $0xf8] sm:$0xff] %vm955_vm2, %v4612_v52 }
 0x9e9   : > { %v6802_v26 = vpack.c.bf16 %v6784_v3, %v6783_v30 }
 0x9ea   : > { %v7413_v55 = vpop.f32.mrf.mxu1 }
 0x9eb   : > { %7424 = vmatmul.mubr.msk.bf16.gmra.mxu1 %vm6820_vm12, %v6802_v26  ;;  %v6960_v40 = vadd.f32 %v7413_v55, %v11118_v6 }
 0x9ec   : > { %v6951_v46 = vpop.f32.mrf.mxu1 }
 0x9ed   : > { %7045 = vst.msk [vmem:[%s11129_s26 + $0x70] sm:$0xff] %vm7030_vm13, %v6960_v40  ;;  %v6952_v56 = vadd.f32 %v11118_v6, %v6951_v46 }
 0x9ee   : > { %v7414_v11 = vpop.f32.mrf.mxu1 }
 0x9ef   : > { %7043 = vst.msk [vmem:[%s11129_s26 + $0x60] sm:$0xff] %vm7030_vm13, %v6952_v56  ;;  %v6963_v4 = vadd.f32 %v7414_v11, %v11118_v6 }
 0x9f0   : > { %v6954_v35 = vpop.f32.mrf.mxu1 }
 0x9f1   : > { %7046 = vst.msk [vmem:[%s11129_s26 + $0x78] sm:$0xff] %vm7030_vm13, %v6963_v4  ;;  %v6955_v41 = vadd.f32 %v11118_v6, %v6954_v35 }
 0x9f3   : > { %7044 = vst.msk [vmem:[%s11129_s26 + $0x68] sm:$0xff] %vm7030_vm13, %v6955_v41 }
 0xa13   : > { %v6686_v8 = vpop.permute.xlu0 %6685 }
 0xa14   : > { %6753 = vst.msk [vmem:[#allocation4 + $0xe0] sm:$0xff] %vm1148_vm3, %v6686_v8 }
 0xa17   : > { %v6690_v21 = vpop.permute.xlu0 %6689  ;;  %v6688_v2 = vpop.permute.xlu1 %6687 }
 0xa18   : > { %6755 = vst.msk [vmem:[#allocation4 + $0xf0] sm:$0xff] %vm1148_vm3, %v6690_v21  ;;  %6754 = vst.msk [vmem:[#allocation4 + $0xe8] sm:$0xff] %vm1148_vm3, %v6688_v2 }
 0xa1b   : > { %v6692_v62 = vpop.permute.xlu1 %6691  ;;  %v6785_v42 = vld [vmem:[#allocation4 + $0xe0] sm:$0xff] }
 0xa1c   : > { %6756 = vst.msk [vmem:[#allocation4 + $0xf8] sm:$0xff] %vm1148_vm3, %v6692_v62 }
 0xa1f   : > { %v6786_v54 = vld [vmem:[#allocation4 + $0xe8] sm:$0xff]  ;;  %v6787_v50 = vld [vmem:[#allocation4 + $0xf0] sm:$0xff] }
 0xa20   : > { %v6803_v12 = vpack.c.bf16 %v6786_v54, %v6785_v42 }
 0xa22   : > { %7427 = vmatprep.mubr.msk.bf16.mxu1 %vm6820_vm12, %v6803_v12 }
 0xa23   : > { %v6788_v45 = vld [vmem:[#allocation4 + $0xf8] sm:$0xff] }
 0xa24   : > { %v6804_v43 = vpack.c.bf16 %v6788_v45, %v6787_v50 }
 0xa26   : > { %7428 = vmatmul.mubr.msk.bf16.gmra.mxu1 %vm6820_vm12, %v6804_v43 }
 0xa2b   : > { %v7417_v31 = vpop.f32.mrf.mxu1 }
 0xa2c   : > { %v6976_v59 = vadd.f32 %v7417_v31, %v11118_v6 }
 0xa2d   : > { %v6967_v47 = vpop.f32.mrf.mxu1 }
 0xa2e   : > { %7049 = vst.msk [vmem:[%s11129_s26 + $0x90] sm:$0xff] %vm7030_vm13, %v6976_v59  ;;  %v6968_v18 = vadd.f32 %v11118_v6, %v6967_v47 }
 0xa2f   : > { %v7418_v22 = vpop.f32.mrf.mxu1 }
 0xa30   : > { %7047 = vst.msk [vmem:[%s11129_s26 + $0x80] sm:$0xff] %vm7030_vm13, %v6968_v18  ;;  %v6979_v44 = vadd.f32 %v7418_v22, %v11118_v6 }
 0xa31   : > { %v6970_v39 = vpop.f32.mrf.mxu1 }
 0xa32   : > { %7050 = vst.msk [vmem:[%s11129_s26 + $0x98] sm:$0xff] %vm7030_vm13, %v6979_v44  ;;  %v6971_v37 = vadd.f32 %v11118_v6, %v6970_v39 }
 0xa34   : > { %7048 = vst.msk [vmem:[%s11129_s26 + $0x88] sm:$0xff] %vm7030_vm13, %v6971_v37 }
 0xa6b   : > { %v7421_v53 = vpop.f32.mrf.mxu1 }
 0xa6c   : > { %v6992_v57 = vadd.f32 %v7421_v53, %v11118_v6 }
 0xa6d   : > { %v6983_v0 = vpop.f32.mrf.mxu1 }
 0xa6e   : > { %7053 = vst.msk [vmem:[%s11129_s26 + $0xb0] sm:$0xff] %vm7030_vm13, %v6992_v57  ;;  %v6984_v5 = vadd.f32 %v11118_v6, %v6983_v0 }
 0xa6f   : > { %v7422_v28 = vpop.f32.mrf.mxu1 }
 0xa70   : > { %7051 = vst.msk [vmem:[%s11129_s26 + $0xa0] sm:$0xff] %vm7030_vm13, %v6984_v5  ;;  %v6995_v14 = vadd.f32 %v7422_v28, %v11118_v6 }
 0xa71   : > { %v6986_v7 = vpop.f32.mrf.mxu1 }
 0xa72   : > { %7054 = vst.msk [vmem:[%s11129_s26 + $0xb8] sm:$0xff] %vm7030_vm13, %v6995_v14  ;;  %v6987_v38 = vadd.f32 %v11118_v6, %v6986_v7 }
 0xa74   : > { %7052 = vst.msk [vmem:[%s11129_s26 + $0xa8] sm:$0xff] %vm7030_vm13, %v6987_v38 }
 0xaab   : > { %v7425_v58 = vpop.f32.mrf.mxu1 }
 0xaac   : > { %v7008_v60 = vadd.f32 %v7425_v58, %v11118_v6 }
 0xaad   : > { %v6999_v16 = vpop.f32.mrf.mxu1 }
 0xaae   : > { %7057 = vst.msk [vmem:[%s11129_s26 + $0xd0] sm:$0xff] %vm7030_vm13, %v7008_v60  ;;  %v7000_v25 = vadd.f32 %v11118_v6, %v6999_v16 }
 0xaaf   : > { %v7426_v34 = vpop.f32.mrf.mxu1 }
 0xab0   : > { %7055 = vst.msk [vmem:[%s11129_s26 + $0xc0] sm:$0xff] %vm7030_vm13, %v7000_v25  ;;  %v7011_v61 = vadd.f32 %v7426_v34, %v11118_v6 }
 0xab1   : > { %v7002_v20 = vpop.f32.mrf.mxu1 }
 0xab2   : > { %7058 = vst.msk [vmem:[%s11129_s26 + $0xd8] sm:$0xff] %vm7030_vm13, %v7011_v61  ;;  %v7003_v33 = vadd.f32 %v11118_v6, %v7002_v20 }
 0xab4   : > { %7056 = vst.msk [vmem:[%s11129_s26 + $0xc8] sm:$0xff] %vm7030_vm13, %v7003_v33 }
 0xae6   : > { %v7429_v36 = vpop.f32.mrf.mxu1 }
 0xae7   : > { %v7024_v13 = vadd.f32 %v7429_v36, %v11118_v6 }
 0xae8   : > { %v7015_v24 = vpop.f32.mrf.mxu1 }
 0xae9   : > { %7061 = vst.msk [vmem:[%s11129_s26 + $0xf0] sm:$0xff] %vm7030_vm13, %v7024_v13  ;;  %v7016_v27 = vadd.f32 %v11118_v6, %v7015_v24 }
 0xaea   : > { %v7430_v49 = vpop.f32.mrf.mxu1 }
 0xaeb   : > { %7059 = vst.msk [vmem:[%s11129_s26 + $0xe0] sm:$0xff] %vm7030_vm13, %v7016_v27  ;;  %v7027_v48 = vadd.f32 %v7430_v49, %v11118_v6 }
 0xaec   : > { %v7018_v15 = vpop.f32.mrf.mxu1 }
 0xaed   : > { %7062 = vst.msk [vmem:[%s11129_s26 + $0xf8] sm:$0xff] %vm7030_vm13, %v7027_v48  ;;  %v7019_v51 = vadd.f32 %v11118_v6, %v7018_v15 }
 0xaef   : > { %7060 = vst.msk [vmem:[%s11129_s26 + $0xe8] sm:$0xff] %vm7030_vm13, %v7019_v51 }
 0xaf0 PF: > { %s19_s30 = sadd.s32 1, %s7467_s30  }
 0xaf1   : > { %p16_p4 = scmp.ge.s32.totalorder %s19_s30, 4  }
 0xaf3   :  { %18 = sbr.rel (!%p16_p4) target bundleno = 1 (0x1), region = 92 }

</bundles_post_ra>
